<compile_context>
chip_gen: v7x
topology: tpu7x:2x2x1
jax: 0.10.0
libtpu: 0.0.40
codegen_flags: <defaults>
</compile_context>

<pallas_src>
import jax
import jax.numpy as jnp
from jax.experimental import pallas as pl
from jax.experimental.pallas import tpu as pltpu

_BN_EPS = 1e-5


# --------------------------------------------------------------------------- kernels
def _matmul_bn_relu_kernel(x_ref, w_ref, s_ref, o_ref):
    # out = relu(x @ w + shift), single MXU matmul, f32 accumulation.
    o_ref[...] = jnp.maximum(
        jnp.dot(x_ref[...], w_ref[...], preferred_element_type=jnp.float32)
        + s_ref[...], 0.0).astype(o_ref.dtype)


def _heads_pool_kernel(xh_ref, w_ref, s_ref, xp_ref, oh_ref, op_ref):
    # Fused 1x1 heads (Conv_3_1 + Conv_2_1, 512-lane padded output) ...
    oh_ref[...] = jnp.maximum(
        jnp.dot(xh_ref[...], w_ref[...], preferred_element_type=jnp.float32)
        + s_ref[...], 0.0).astype(oh_ref.dtype)
    # ... plus MaxPool2d(3, stride=2, padding=1): max over the 9 window taps,
    # exact f32 path (-inf padded taps).
    op_ref[...] = jnp.max(xp_ref[...], axis=0).astype(op_ref.dtype)


def _dual_matmul_bn_relu_kernel(x2_ref, w2_ref, s2_ref,
                                x3_ref, w3_ref, s3_ref,
                                o2_ref, o3_ref):
    # Two independent branch-tail convs (3x3 stride-2) in one call.
    o2_ref[...] = jnp.maximum(
        jnp.dot(x2_ref[...], w2_ref[...], preferred_element_type=jnp.float32)
        + s2_ref[...], 0.0).astype(o2_ref.dtype)
    o3_ref[...] = jnp.maximum(
        jnp.dot(x3_ref[...], w3_ref[...], preferred_element_type=jnp.float32)
        + s3_ref[...], 0.0).astype(o3_ref.dtype)


# --------------------------------------------------------------------------- helpers
def _fold_conv_bn(p):
    """Fold eval-mode BN into the conv: scale into bf16 weights, f32 additive shift."""
    cout, cin, kh, kw = p["w"].shape
    s = p["gamma"] * jax.lax.rsqrt(p["var"] + _BN_EPS)
    shift = (p["b"] - p["mean"]) * s + p["beta"]
    # (cout, cin, kh, kw) -> (kh*kw*cin, cout); K ordered (ky, kx, cin) to match im2col.
    w = jnp.transpose(p["w"], (2, 3, 1, 0)).reshape(kh * kw * cin, cout)
    w = (w * s[None, :]).astype(jnp.bfloat16)
    return w, shift.reshape(1, cout).astype(jnp.float32)


def _im2col(x_nhwc, kh, kw, ph, pw, stride):
    """im2col with taps folded into K: returns [N*Ho*Wo, kh*kw*C] (columns ordered ky,kx,c)."""
    N, H, W, C = x_nhwc.shape
    Ho = (H + 2 * ph - kh) // stride + 1
    Wo = (W + 2 * pw - kw) // stride + 1
    xp = jnp.pad(x_nhwc, ((0, 0), (ph, ph), (pw, pw), (0, 0)))
    cols = []
    for ky in range(kh):
        for kx in range(kw):
            tap = jax.lax.slice(
                xp,
                (0, ky, kx, 0),
                (N, ky + (Ho - 1) * stride + 1, kx + (Wo - 1) * stride + 1, C),
                (1, stride, stride, 1))
            cols.append(tap.reshape(N * Ho * Wo, C))
    return jnp.concatenate(cols, axis=-1), (N, Ho, Wo)


def _pool_taps_3x3_s2_p1(x_nhwc):
    """9 shifted strided taps of MaxPool2d(3, stride=2, padding=1), -inf padded (f32)."""
    N, H, W, C = x_nhwc.shape
    Ho = (H + 2 - 3) // 2 + 1
    Wo = (W + 2 - 3) // 2 + 1
    xp = jnp.pad(x_nhwc, ((0, 0), (1, 1), (1, 1), (0, 0)), constant_values=-jnp.inf)
    taps = []
    for ky in range(3):
        for kx in range(3):
            tap = jax.lax.slice(
                xp, (0, ky, kx, 0),
                (N, ky + (Ho - 1) * 2 + 1, kx + (Wo - 1) * 2 + 1, C),
                (1, 2, 2, 1))
            taps.append(tap.reshape(N * Ho * Wo, C))
    return jnp.stack(taps, axis=0), (N, Ho, Wo)


def _arbitrary():
    return pltpu.CompilerParams(dimension_semantics=("arbitrary",))


# --------------------------------------------------------------------------- pallas wrappers
def matmul_bn_relu(x_cols, w, shift, out_dtype):
    """relu(x_cols @ w + shift) as a single-grid-step Pallas matmul."""
    M, K = x_cols.shape
    _, Cout = w.shape
    return pl.pallas_call(
        _matmul_bn_relu_kernel,
        out_shape=jax.ShapeDtypeStruct((M, Cout), out_dtype),
        grid=(1,),
        in_specs=[pl.BlockSpec((M, K), lambda i: (0, 0)),
                  pl.BlockSpec((K, Cout), lambda i: (0, 0)),
                  pl.BlockSpec((1, Cout), lambda i: (0, 0))],
        out_specs=pl.BlockSpec((M, Cout), lambda i: (0, 0)),
        compiler_params=_arbitrary(),
    )(x_cols, w, shift)


def conv_bn_relu(x_nhwc, p, kh, kw, ph, pw, stride=1, out_dtype=jnp.bfloat16):
    w, shift = _fold_conv_bn(p)
    x_cols, (N, Ho, Wo) = _im2col(x_nhwc.astype(jnp.bfloat16), kh, kw, ph, pw, stride)
    y = matmul_bn_relu(x_cols, w, shift, out_dtype)
    return y.reshape(N, Ho, Wo, -1)


def heads_and_maxpool(x_nhwc, p3_1, p2_1):
    """One pallas_call: fused 1x1 heads (Conv_3_1 ++ Conv_2_1, padded to 512) + maxpool."""
    N, H, W, C = x_nhwc.shape
    w3, s3 = _fold_conv_bn(p3_1)                          # (1024, 256)
    w2, s2 = _fold_conv_bn(p2_1)                          # (1024, 192)
    pad = 512 - (w3.shape[1] + w2.shape[1])               # 64 -> lane-dense output
    w_heads = jnp.concatenate([w3, w2, jnp.zeros((C, pad), jnp.bfloat16)], axis=-1)
    s_heads = jnp.concatenate([s3, s2, jnp.zeros((1, pad), jnp.float32)], axis=-1)
    xh = x_nhwc.astype(jnp.bfloat16).reshape(N * H * W, C)

    xp, (_, Ho, Wo) = _pool_taps_3x3_s2_p1(x_nhwc)        # (9, N*Ho*Wo, C) f32
    Mh = N * H * W
    Mp = N * Ho * Wo

    y_heads, y_pool = pl.pallas_call(
        _heads_pool_kernel,
        out_shape=(jax.ShapeDtypeStruct((Mh, 512), jnp.bfloat16),
                   jax.ShapeDtypeStruct((Mp, C), jnp.float32)),
        grid=(1,),
        in_specs=[pl.BlockSpec((Mh, C), lambda i: (0, 0)),
                  pl.BlockSpec((C, 512), lambda i: (0, 0)),
                  pl.BlockSpec((1, 512), lambda i: (0, 0)),
                  pl.BlockSpec((9, Mp, C), lambda i: (0, 0, 0))],
        out_specs=(pl.BlockSpec((Mh, 512), lambda i: (0, 0)),
                   pl.BlockSpec((Mp, C), lambda i: (0, 0))),
        compiler_params=_arbitrary(),
    )(xh, w_heads, s_heads, xp)

    x3 = y_heads[:, :256].reshape(N, H, W, 256)
    x2 = y_heads[:, 256:448].reshape(N, H, W, 192)
    x1 = y_pool.reshape(N, Ho, Wo, C)
    return x1, x2, x3


def dual_conv3x3_s2_bn_relu(x2_nhwc, p2, x3_nhwc, p3):
    """Both branch-tail 3x3 stride-2 convs (independent) fused into one pallas_call."""
    w2, s2 = _fold_conv_bn(p2)
    w3, s3 = _fold_conv_bn(p3)
    x2_cols, (N, Ho, Wo) = _im2col(x2_nhwc.astype(jnp.bfloat16), 3, 3, 1, 1, 2)
    x3_cols, _ = _im2col(x3_nhwc.astype(jnp.bfloat16), 3, 3, 1, 1, 2)
    M = N * Ho * Wo
    K2, C2 = w2.shape
    K3, C3 = w3.shape
    y2, y3 = pl.pallas_call(
        _dual_matmul_bn_relu_kernel,
        out_shape=(jax.ShapeDtypeStruct((M, C2), jnp.float32),
                   jax.ShapeDtypeStruct((M, C3), jnp.float32)),
        grid=(1,),
        in_specs=[pl.BlockSpec((M, K2), lambda i: (0, 0)),
                  pl.BlockSpec((K2, C2), lambda i: (0, 0)),
                  pl.BlockSpec((1, C2), lambda i: (0, 0)),
                  pl.BlockSpec((M, K3), lambda i: (0, 0)),
                  pl.BlockSpec((K3, C3), lambda i: (0, 0)),
                  pl.BlockSpec((1, C3), lambda i: (0, 0))],
        out_specs=(pl.BlockSpec((M, C2), lambda i: (0, 0)),
                   pl.BlockSpec((M, C3), lambda i: (0, 0))),
        compiler_params=_arbitrary(),
    )(x2_cols, w2, s2, x3_cols, w3, s3)
    return y2.reshape(N, Ho, Wo, C2), y3.reshape(N, Ho, Wo, C3)


# --------------------------------------------------------------------------- parameters
def make_conv_params(key, cin, cout, kh, kw):
    k1, k2, k3, k4, k5, k6 = jax.random.split(key, 6)
    fan_in = cin * kh * kw
    bound = 1.0 / jnp.sqrt(jnp.float32(fan_in))
    return dict(
        w=jax.random.uniform(k1, (cout, cin, kh, kw), jnp.float32, -bound, bound),
        b=jax.random.uniform(k2, (cout,), jnp.float32, -bound, bound),
        gamma=jax.random.uniform(k3, (cout,), jnp.float32, 0.5, 1.5),
        beta=jax.random.uniform(k4, (cout,), jnp.float32, -0.1, 0.1),
        mean=jax.random.uniform(k5, (cout,), jnp.float32, -0.1, 0.1),
        var=jax.random.uniform(k6, (cout,), jnp.float32, 0.5, 1.5),
    )


def make_reduction_b_params(key):
    keys = jax.random.split(key, 6)
    return {
        "c2_1": make_conv_params(keys[0], 1024, 192, 1, 1),
        "c2_2": make_conv_params(keys[1], 192, 192, 3, 3),
        "c3_1": make_conv_params(keys[2], 1024, 256, 1, 1),
        "c3_2": make_conv_params(keys[3], 256, 256, 1, 7),
        "c3_3": make_conv_params(keys[4], 256, 320, 7, 1),
        "c3_4": make_conv_params(keys[5], 320, 320, 3, 3),
    }


# --------------------------------------------------------------------------- forward
@jax.jit
def reduction_b_forward(x_nchw, params):
    x = jnp.transpose(x_nchw, (0, 2, 3, 1))               # NCHW -> NHWC, f32

    # call 1: maxpool branch + both fused 1x1 heads
    x1, x2, x3 = heads_and_maxpool(x, params["c3_1"], params["c2_1"])

    # call 2/3: branch-3 middle convs (1x7 then 7x1), stride 1
    x3 = conv_bn_relu(x3, params["c3_2"], 1, 7, 0, 3)
    x3 = conv_bn_relu(x3, params["c3_3"], 7, 1, 3, 0)

    # call 4: both branch tails (3x3 stride-2), fused, f32 outputs
    x2, x3 = dual_conv3x3_s2_bn_relu(x2, params["c2_2"], x3, params["c3_4"])

    out = jnp.concatenate([x1, x2, x3], axis=-1)          # [N, Ho, Wo, 1024+192+320]
    return jnp.transpose(out, (0, 3, 1, 2))               # NHWC -> NCHW


# --------------------------------------------------------------------------- main
if __name__ == "__main__":
    key = jax.random.PRNGKey(0)
    kx, kp = jax.random.split(key)

    # Reduction_B requires 1024 input channels; keep spatial small (8x8), batch=2.
    x = jax.random.normal(kx, (2, 1024, 8, 8), jnp.float32)
    params = make_reduction_b_params(kp)

    out = jax.block_until_ready(reduction_b_forward(x, params))

    assert out.shape == (2, 1536, 4, 4), out.shape
    assert out.dtype == jnp.float32
    assert bool(jnp.all(jnp.isfinite(out)))
    # conv branches are ReLU'd
    assert bool(jnp.all(out[:, 1024:] >= 0.0))
    # max-pool branch is an exact f32 path -> must match XLA reduce_window reference
    ref_pool = jax.lax.reduce_window(
        jnp.transpose(x, (0, 2, 3, 1)), -jnp.inf, jax.lax.max,
        (1, 3, 3, 1), (1, 2, 2, 1), ((0, 0), (1, 1), (1, 1), (0, 0)))
    ref_pool = jnp.transpose(ref_pool, (0, 3, 1, 2))
    assert bool(jnp.allclose(out[:, :1024], ref_pool))
    print("KERNEL_OK")
</pallas_src>

<mosaic_0001>
module attributes {stable_mosaic.version = 11 : i64} {
  func.func @_heads_pool_kernel(%arg0: i32, %arg1: memref<128x1024xbf16, #tpu.memory_space<vmem>>, %arg2: memref<1024x512xbf16, #tpu.memory_space<vmem>>, %arg3: memref<1x512xf32, #tpu.memory_space<vmem>>, %arg4: memref<9x32x1024xf32, #tpu.memory_space<vmem>>, %arg5: memref<128x512xbf16, #tpu.memory_space<vmem>>, %arg6: memref<32x1024xf32, #tpu.memory_space<vmem>>) attributes {dimension_semantics = [#tpu.dimension_semantics<arbitrary>], iteration_bounds = array<i64: 1>, scalar_prefetch = 0 : i64, scratch_operands = 0 : i64, tpu.core_type = #tpu.core_type<tc>, window_params = [{pipeline_mode = #tpu.pipeline_mode<synchronous>, transform_indices = @transform_0, window_bounds = array<i64: 128, 1024>}, {pipeline_mode = #tpu.pipeline_mode<synchronous>, transform_indices = @transform_1, window_bounds = array<i64: 1024, 512>}, {pipeline_mode = #tpu.pipeline_mode<synchronous>, transform_indices = @transform_2, window_bounds = array<i64: 1, 512>}, {pipeline_mode = #tpu.pipeline_mode<synchronous>, transform_indices = @transform_3, window_bounds = array<i64: 9, 32, 1024>}, {pipeline_mode = #tpu.pipeline_mode<synchronous>, transform_indices = @transform_4, window_bounds = array<i64: 128, 512>}, {pipeline_mode = #tpu.pipeline_mode<synchronous>, transform_indices = @transform_5, window_bounds = array<i64: 32, 1024>}]} {
    %c0 = arith.constant 0 : index
    %c0_0 = arith.constant 0 : index
    %0 = vector.load %arg1[%c0, %c0_0] : memref<128x1024xbf16, #tpu.memory_space<vmem>>, vector<128x1024xbf16>
    %c0_1 = arith.constant 0 : index
    %c0_2 = arith.constant 0 : index
    %1 = vector.load %arg2[%c0_1, %c0_2] : memref<1024x512xbf16, #tpu.memory_space<vmem>>, vector<1024x512xbf16>
    %cst = arith.constant dense<0.000000e+00> : vector<128x512xf32>
    %2 = tpu.matmul %0, %1, %cst {dimension_numbers = #tpu.dot_dimension_numbers<[1], [0], [0], [1], [0, 0, 1, 1], [], []>} : vector<128x1024xbf16>, vector<1024x512xbf16>, vector<128x512xf32> -> vector<128x512xf32>
    %c0_3 = arith.constant 0 : index
    %c0_4 = arith.constant 0 : index
    %3 = vector.load %arg3[%c0_3, %c0_4] : memref<1x512xf32, #tpu.memory_space<vmem>>, vector<1x512xf32>
    %4 = vector.broadcast %3 : vector<1x512xf32> to vector<128x512xf32>
    %5 = arith.addf %2, %4 : vector<128x512xf32>
    %cst_5 = arith.constant 0.000000e+00 : f32
    %6 = vector.broadcast %cst_5 : f32 to vector<128x512xf32>
    %7 = arith.maximumf %5, %6 : vector<128x512xf32>
    %8 = arith.truncf %7 : vector<128x512xf32> to vector<128x512xbf16>
    %c0_6 = arith.constant 0 : index
    %c0_7 = arith.constant 0 : index
    %9 = vector.load %arg5[%c0_6, %c0_7] : memref<128x512xbf16, #tpu.memory_space<vmem>>, vector<128x512xbf16>
    tpu.vector_store %arg5[%c0_6, %c0_7], %8 {strides = array<i32>} : memref<128x512xbf16, #tpu.memory_space<vmem>>, vector<128x512xbf16>,
    %c0_8 = arith.constant 0 : index
    %c0_9 = arith.constant 0 : index
    %c0_10 = arith.constant 0 : index
    %10 = vector.load %arg4[%c0_8, %c0_9, %c0_10] : memref<9x32x1024xf32, #tpu.memory_space<vmem>>, vector<9x32x1024xf32>
    %cst_11 = arith.constant dense<0xFF800000> : vector<32x1024xf32>
    %11 = vector.multi_reduction <maximumf>, %10, %cst_11 [0] : vector<9x32x1024xf32> to vector<32x1024xf32>
    %c0_12 = arith.constant 0 : index
    %c0_13 = arith.constant 0 : index
    %12 = vector.load %arg6[%c0_12, %c0_13] : memref<32x1024xf32, #tpu.memory_space<vmem>>, vector<32x1024xf32>
    tpu.vector_store %arg6[%c0_12, %c0_13], %11 {strides = array<i32>} : memref<32x1024xf32, #tpu.memory_space<vmem>>, vector<32x1024xf32>,
    return
  }
  func.func @transform_0(%arg0: i32) -> (i32, i32) {
    %c0_i32 = arith.constant 0 : i32
    %c0_i32_0 = arith.constant 0 : i32
    %c0_i32_1 = arith.constant 0 : i32
    return %c0_i32, %c0_i32_0 : i32, i32
  }
  func.func @transform_1(%arg0: i32) -> (i32, i32) {
    %c0_i32 = arith.constant 0 : i32
    %c0_i32_0 = arith.constant 0 : i32
    %c0_i32_1 = arith.constant 0 : i32
    return %c0_i32, %c0_i32_0 : i32, i32
  }
  func.func @transform_2(%arg0: i32) -> (i32, i32) {
    %c0_i32 = arith.constant 0 : i32
    %c0_i32_0 = arith.constant 0 : i32
    %c0_i32_1 = arith.constant 0 : i32
    return %c0_i32, %c0_i32_0 : i32, i32
  }
  func.func @transform_3(%arg0: i32) -> (i32, i32, i32) {
    %c0_i32 = arith.constant 0 : i32
    %c0_i32_0 = arith.constant 0 : i32
    %c0_i32_1 = arith.constant 0 : i32
    %c0_i32_2 = arith.constant 0 : i32
    return %c0_i32, %c0_i32_0, %c0_i32_1 : i32, i32, i32
  }
  func.func @transform_4(%arg0: i32) -> (i32, i32) {
    %c0_i32 = arith.constant 0 : i32
    %c0_i32_0 = arith.constant 0 : i32
    %c0_i32_1 = arith.constant 0 : i32
    return %c0_i32, %c0_i32_0 : i32, i32
  }
  func.func @transform_5(%arg0: i32) -> (i32, i32) {
    %c0_i32 = arith.constant 0 : i32
    %c0_i32_0 = arith.constant 0 : i32
    %c0_i32_1 = arith.constant 0 : i32
    return %c0_i32, %c0_i32_0 : i32, i32
  }
}

module attributes {stable_mosaic.version = 11 : i64} {
  func.func @_matmul_bn_relu_kernel(%arg0: i32, %arg1: memref<128x1792xbf16, #tpu.memory_space<vmem>>, %arg2: memref<1792x256xbf16, #tpu.memory_space<vmem>>, %arg3: memref<1x256xf32, #tpu.memory_space<vmem>>, %arg4: memref<128x256xbf16, #tpu.memory_space<vmem>>) attributes {dimension_semantics = [#tpu.dimension_semantics<arbitrary>], iteration_bounds = array<i64: 1>, scalar_prefetch = 0 : i64, scratch_operands = 0 : i64, tpu.core_type = #tpu.core_type<tc>, window_params = [{pipeline_mode = #tpu.pipeline_mode<synchronous>, transform_indices = @transform_0, window_bounds = array<i64: 128, 1792>}, {pipeline_mode = #tpu.pipeline_mode<synchronous>, transform_indices = @transform_1, window_bounds = array<i64: 1792, 256>}, {pipeline_mode = #tpu.pipeline_mode<synchronous>, transform_indices = @transform_2, window_bounds = array<i64: 1, 256>}, {pipeline_mode = #tpu.pipeline_mode<synchronous>, transform_indices = @transform_3, window_bounds = array<i64: 128, 256>}]} {
    %c0 = arith.constant 0 : index
    %c0_0 = arith.constant 0 : index
    %0 = vector.load %arg1[%c0, %c0_0] : memref<128x1792xbf16, #tpu.memory_space<vmem>>, vector<128x1792xbf16>
    %c0_1 = arith.constant 0 : index
    %c0_2 = arith.constant 0 : index
    %1 = vector.load %arg2[%c0_1, %c0_2] : memref<1792x256xbf16, #tpu.memory_space<vmem>>, vector<1792x256xbf16>
    %cst = arith.constant dense<0.000000e+00> : vector<128x256xf32>
    %2 = tpu.matmul %0, %1, %cst {dimension_numbers = #tpu.dot_dimension_numbers<[1], [0], [0], [1], [0, 0, 1, 1], [], []>} : vector<128x1792xbf16>, vector<1792x256xbf16>, vector<128x256xf32> -> vector<128x256xf32>
    %c0_3 = arith.constant 0 : index
    %c0_4 = arith.constant 0 : index
    %3 = vector.load %arg3[%c0_3, %c0_4] : memref<1x256xf32, #tpu.memory_space<vmem>>, vector<1x256xf32>
    %4 = vector.broadcast %3 : vector<1x256xf32> to vector<128x256xf32>
    %5 = arith.addf %2, %4 : vector<128x256xf32>
    %cst_5 = arith.constant 0.000000e+00 : f32
    %6 = vector.broadcast %cst_5 : f32 to vector<128x256xf32>
    %7 = arith.maximumf %5, %6 : vector<128x256xf32>
    %8 = arith.truncf %7 : vector<128x256xf32> to vector<128x256xbf16>
    %c0_6 = arith.constant 0 : index
    %c0_7 = arith.constant 0 : index
    %9 = vector.load %arg4[%c0_6, %c0_7] : memref<128x256xbf16, #tpu.memory_space<vmem>>, vector<128x256xbf16>
    tpu.vector_store %arg4[%c0_6, %c0_7], %8 {strides = array<i32>} : memref<128x256xbf16, #tpu.memory_space<vmem>>, vector<128x256xbf16>,
    return
  }
  func.func @transform_0(%arg0: i32) -> (i32, i32) {
    %c0_i32 = arith.constant 0 : i32
    %c0_i32_0 = arith.constant 0 : i32
    %c0_i32_1 = arith.constant 0 : i32
    return %c0_i32, %c0_i32_0 : i32, i32
  }
  func.func @transform_1(%arg0: i32) -> (i32, i32) {
    %c0_i32 = arith.constant 0 : i32
    %c0_i32_0 = arith.constant 0 : i32
    %c0_i32_1 = arith.constant 0 : i32
    return %c0_i32, %c0_i32_0 : i32, i32
  }
  func.func @transform_2(%arg0: i32) -> (i32, i32) {
    %c0_i32 = arith.constant 0 : i32
    %c0_i32_0 = arith.constant 0 : i32
    %c0_i32_1 = arith.constant 0 : i32
    return %c0_i32, %c0_i32_0 : i32, i32
  }
  func.func @transform_3(%arg0: i32) -> (i32, i32) {
    %c0_i32 = arith.constant 0 : i32
    %c0_i32_0 = arith.constant 0 : i32
    %c0_i32_1 = arith.constant 0 : i32
    return %c0_i32, %c0_i32_0 : i32, i32
  }
}

module attributes {stable_mosaic.version = 11 : i64} {
  func.func @_matmul_bn_relu_kernel(%arg0: i32, %arg1: memref<128x1792xbf16, #tpu.memory_space<vmem>>, %arg2: memref<1792x320xbf16, #tpu.memory_space<vmem>>, %arg3: memref<1x320xf32, #tpu.memory_space<vmem>>, %arg4: memref<128x320xbf16, #tpu.memory_space<vmem>>) attributes {dimension_semantics = [#tpu.dimension_semantics<arbitrary>], iteration_bounds = array<i64: 1>, scalar_prefetch = 0 : i64, scratch_operands = 0 : i64, tpu.core_type = #tpu.core_type<tc>, window_params = [{pipeline_mode = #tpu.pipeline_mode<synchronous>, transform_indices = @transform_0, window_bounds = array<i64: 128, 1792>}, {pipeline_mode = #tpu.pipeline_mode<synchronous>, transform_indices = @transform_1, window_bounds = array<i64: 1792, 320>}, {pipeline_mode = #tpu.pipeline_mode<synchronous>, transform_indices = @transform_2, window_bounds = array<i64: 1, 320>}, {pipeline_mode = #tpu.pipeline_mode<synchronous>, transform_indices = @transform_3, window_bounds = array<i64: 128, 320>}]} {
    %c0 = arith.constant 0 : index
    %c0_0 = arith.constant 0 : index
    %0 = vector.load %arg1[%c0, %c0_0] : memref<128x1792xbf16, #tpu.memory_space<vmem>>, vector<128x1792xbf16>
    %c0_1 = arith.constant 0 : index
    %c0_2 = arith.constant 0 : index
    %1 = vector.load %arg2[%c0_1, %c0_2] : memref<1792x320xbf16, #tpu.memory_space<vmem>>, vector<1792x320xbf16>
    %cst = arith.constant dense<0.000000e+00> : vector<128x320xf32>
    %2 = tpu.matmul %0, %1, %cst {dimension_numbers = #tpu.dot_dimension_numbers<[1], [0], [0], [1], [0, 0, 1, 1], [], []>} : vector<128x1792xbf16>, vector<1792x320xbf16>, vector<128x320xf32> -> vector<128x320xf32>
    %c0_3 = arith.constant 0 : index
    %c0_4 = arith.constant 0 : index
    %3 = vector.load %arg3[%c0_3, %c0_4] : memref<1x320xf32, #tpu.memory_space<vmem>>, vector<1x320xf32>
    %4 = vector.broadcast %3 : vector<1x320xf32> to vector<128x320xf32>
    %5 = arith.addf %2, %4 : vector<128x320xf32>
    %cst_5 = arith.constant 0.000000e+00 : f32
    %6 = vector.broadcast %cst_5 : f32 to vector<128x320xf32>
    %7 = arith.maximumf %5, %6 : vector<128x320xf32>
    %8 = arith.truncf %7 : vector<128x320xf32> to vector<128x320xbf16>
    %c0_6 = arith.constant 0 : index
    %c0_7 = arith.constant 0 : index
    %9 = vector.load %arg4[%c0_6, %c0_7] : memref<128x320xbf16, #tpu.memory_space<vmem>>, vector<128x320xbf16>
    tpu.vector_store %arg4[%c0_6, %c0_7], %8 {strides = array<i32>} : memref<128x320xbf16, #tpu.memory_space<vmem>>, vector<128x320xbf16>,
    return
  }
  func.func @transform_0(%arg0: i32) -> (i32, i32) {
    %c0_i32 = arith.constant 0 : i32
    %c0_i32_0 = arith.constant 0 : i32
    %c0_i32_1 = arith.constant 0 : i32
    return %c0_i32, %c0_i32_0 : i32, i32
  }
  func.func @transform_1(%arg0: i32) -> (i32, i32) {
    %c0_i32 = arith.constant 0 : i32
    %c0_i32_0 = arith.constant 0 : i32
    %c0_i32_1 = arith.constant 0 : i32
    return %c0_i32, %c0_i32_0 : i32, i32
  }
  func.func @transform_2(%arg0: i32) -> (i32, i32) {
    %c0_i32 = arith.constant 0 : i32
    %c0_i32_0 = arith.constant 0 : i32
    %c0_i32_1 = arith.constant 0 : i32
    return %c0_i32, %c0_i32_0 : i32, i32
  }
  func.func @transform_3(%arg0: i32) -> (i32, i32) {
    %c0_i32 = arith.constant 0 : i32
    %c0_i32_0 = arith.constant 0 : i32
    %c0_i32_1 = arith.constant 0 : i32
    return %c0_i32, %c0_i32_0 : i32, i32
  }
}

module attributes {stable_mosaic.version = 11 : i64} {
  func.func @_dual_matmul_bn_relu_kernel(%arg0: i32, %arg1: memref<32x1728xbf16, #tpu.memory_space<vmem>>, %arg2: memref<1728x192xbf16, #tpu.memory_space<vmem>>, %arg3: memref<1x192xf32, #tpu.memory_space<vmem>>, %arg4: memref<32x2880xbf16, #tpu.memory_space<vmem>>, %arg5: memref<2880x320xbf16, #tpu.memory_space<vmem>>, %arg6: memref<1x320xf32, #tpu.memory_space<vmem>>, %arg7: memref<32x192xf32, #tpu.memory_space<vmem>>, %arg8: memref<32x320xf32, #tpu.memory_space<vmem>>) attributes {dimension_semantics = [#tpu.dimension_semantics<arbitrary>], iteration_bounds = array<i64: 1>, scalar_prefetch = 0 : i64, scratch_operands = 0 : i64, tpu.core_type = #tpu.core_type<tc>, window_params = [{pipeline_mode = #tpu.pipeline_mode<synchronous>, transform_indices = @transform_0, window_bounds = array<i64: 32, 1728>}, {pipeline_mode = #tpu.pipeline_mode<synchronous>, transform_indices = @transform_1, window_bounds = array<i64: 1728, 192>}, {pipeline_mode = #tpu.pipeline_mode<synchronous>, transform_indices = @transform_2, window_bounds = array<i64: 1, 192>}, {pipeline_mode = #tpu.pipeline_mode<synchronous>, transform_indices = @transform_3, window_bounds = array<i64: 32, 2880>}, {pipeline_mode = #tpu.pipeline_mode<synchronous>, transform_indices = @transform_4, window_bounds = array<i64: 2880, 320>}, {pipeline_mode = #tpu.pipeline_mode<synchronous>, transform_indices = @transform_5, window_bounds = array<i64: 1, 320>}, {pipeline_mode = #tpu.pipeline_mode<synchronous>, transform_indices = @transform_6, window_bounds = array<i64: 32, 192>}, {pipeline_mode = #tpu.pipeline_mode<synchronous>, transform_indices = @transform_7, window_bounds = array<i64: 32, 320>}]} {
    %c0 = arith.constant 0 : index
    %c0_0 = arith.constant 0 : index
    %0 = vector.load %arg1[%c0, %c0_0] : memref<32x1728xbf16, #tpu.memory_space<vmem>>, vector<32x1728xbf16>
    %c0_1 = arith.constant 0 : index
    %c0_2 = arith.constant 0 : index
    %1 = vector.load %arg2[%c0_1, %c0_2] : memref<1728x192xbf16, #tpu.memory_space<vmem>>, vector<1728x192xbf16>
    %cst = arith.constant dense<0.000000e+00> : vector<32x192xf32>
    %2 = tpu.matmul %0, %1, %cst {dimension_numbers = #tpu.dot_dimension_numbers<[1], [0], [0], [1], [0, 0, 1, 1], [], []>} : vector<32x1728xbf16>, vector<1728x192xbf16>, vector<32x192xf32> -> vector<32x192xf32>
    %c0_3 = arith.constant 0 : index
    %c0_4 = arith.constant 0 : index
    %3 = vector.load %arg3[%c0_3, %c0_4] : memref<1x192xf32, #tpu.memory_space<vmem>>, vector<1x192xf32>
    %4 = vector.broadcast %3 : vector<1x192xf32> to vector<32x192xf32>
    %5 = arith.addf %2, %4 : vector<32x192xf32>
    %cst_5 = arith.constant 0.000000e+00 : f32
    %6 = vector.broadcast %cst_5 : f32 to vector<32x192xf32>
    %7 = arith.maximumf %5, %6 : vector<32x192xf32>
    %c0_6 = arith.constant 0 : index
    %c0_7 = arith.constant 0 : index
    %8 = vector.load %arg7[%c0_6, %c0_7] : memref<32x192xf32, #tpu.memory_space<vmem>>, vector<32x192xf32>
    tpu.vector_store %arg7[%c0_6, %c0_7], %7 {strides = array<i32>} : memref<32x192xf32, #tpu.memory_space<vmem>>, vector<32x192xf32>,
    %c0_8 = arith.constant 0 : index
    %c0_9 = arith.constant 0 : index
    %9 = vector.load %arg4[%c0_8, %c0_9] : memref<32x2880xbf16, #tpu.memory_space<vmem>>, vector<32x2880xbf16>
    %c0_10 = arith.constant 0 : index
    %c0_11 = arith.constant 0 : index
    %10 = vector.load %arg5[%c0_10, %c0_11] : memref<2880x320xbf16, #tpu.memory_space<vmem>>, vector<2880x320xbf16>
    %cst_12 = arith.constant dense<0.000000e+00> : vector<32x320xf32>
    %11 = tpu.matmul %9, %10, %cst_12 {dimension_numbers = #tpu.dot_dimension_numbers<[1], [0], [0], [1], [0, 0, 1, 1], [], []>} : vector<32x2880xbf16>, vector<2880x320xbf16>, vector<32x320xf32> -> vector<32x320xf32>
    %c0_13 = arith.constant 0 : index
    %c0_14 = arith.constant 0 : index
    %12 = vector.load %arg6[%c0_13, %c0_14] : memref<1x320xf32, #tpu.memory_space<vmem>>, vector<1x320xf32>
    %13 = vector.broadcast %12 : vector<1x320xf32> to vector<32x320xf32>
    %14 = arith.addf %11, %13 : vector<32x320xf32>
    %cst_15 = arith.constant 0.000000e+00 : f32
    %15 = vector.broadcast %cst_15 : f32 to vector<32x320xf32>
    %16 = arith.maximumf %14, %15 : vector<32x320xf32>
    %c0_16 = arith.constant 0 : index
    %c0_17 = arith.constant 0 : index
    %17 = vector.load %arg8[%c0_16, %c0_17] : memref<32x320xf32, #tpu.memory_space<vmem>>, vector<32x320xf32>
    tpu.vector_store %arg8[%c0_16, %c0_17], %16 {strides = array<i32>} : memref<32x320xf32, #tpu.memory_space<vmem>>, vector<32x320xf32>,
    return
  }
  func.func @transform_0(%arg0: i32) -> (i32, i32) {
    %c0_i32 = arith.constant 0 : i32
    %c0_i32_0 = arith.constant 0 : i32
    %c0_i32_1 = arith.constant 0 : i32
    return %c0_i32, %c0_i32_0 : i32, i32
  }
  func.func @transform_1(%arg0: i32) -> (i32, i32) {
    %c0_i32 = arith.constant 0 : i32
    %c0_i32_0 = arith.constant 0 : i32
    %c0_i32_1 = arith.constant 0 : i32
    return %c0_i32, %c0_i32_0 : i32, i32
  }
  func.func @transform_2(%arg0: i32) -> (i32, i32) {
    %c0_i32 = arith.constant 0 : i32
    %c0_i32_0 = arith.constant 0 : i32
    %c0_i32_1 = arith.constant 0 : i32
    return %c0_i32, %c0_i32_0 : i32, i32
  }
  func.func @transform_3(%arg0: i32) -> (i32, i32) {
    %c0_i32 = arith.constant 0 : i32
    %c0_i32_0 = arith.constant 0 : i32
    %c0_i32_1 = arith.constant 0 : i32
    return %c0_i32, %c0_i32_0 : i32, i32
  }
  func.func @transform_4(%arg0: i32) -> (i32, i32) {
    %c0_i32 = arith.constant 0 : i32
    %c0_i32_0 = arith.constant 0 : i32
    %c0_i32_1 = arith.constant 0 : i32
    return %c0_i32, %c0_i32_0 : i32, i32
  }
  func.func @transform_5(%arg0: i32) -> (i32, i32) {
    %c0_i32 = arith.constant 0 : i32
    %c0_i32_0 = arith.constant 0 : i32
    %c0_i32_1 = arith.constant 0 : i32
    return %c0_i32, %c0_i32_0 : i32, i32
  }
  func.func @transform_6(%arg0: i32) -> (i32, i32) {
    %c0_i32 = arith.constant 0 : i32
    %c0_i32_0 = arith.constant 0 : i32
    %c0_i32_1 = arith.constant 0 : i32
    return %c0_i32, %c0_i32_0 : i32, i32
  }
  func.func @transform_7(%arg0: i32) -> (i32, i32) {
    %c0_i32 = arith.constant 0 : i32
    %c0_i32_0 = arith.constant 0 : i32
    %c0_i32_1 = arith.constant 0 : i32
    return %c0_i32, %c0_i32_0 : i32, i32
  }
}

</mosaic_0001>

<bundles_post_ra>
// kernel: reduction_b_forward.4
= control target key start
LH: loop header
LB: loop body
LE: loop exit
PB: predicated region body
PF: predicated region fallthrough
CT: control target
= control target key end

     0   :  { %s7881_s1 = inlined_call_operand.vmem [shape: bf16[1024,512], index: 1, kind: input, shape index: {}]   ;;  %s7882_s0 = inlined_call_operand.vmem [shape: bf16[128,1024], index: 0, kind: input, shape index: {}]   ;;  %s7883_s3 = inlined_call_operand.vmem [shape: f32[9,32,1024], index: 3, kind: input, shape index: {}]   ;;  %s7884_s2 = inlined_call_operand.vmem [shape: f32[1,512], index: 2, kind: input, shape index: {}]   ;;  %s7885_s4 = inlined_call_operand.vmem [shape: bf16[128,512], index: 4, kind: output, shape index: {0}]   ;;  %s7886_s5 = inlined_call_operand.vmem [shape: f32[32,1024], index: 5, kind: output, shape index: {1}]  }
   0x1   :  { %v4377_v0 = vld [vmem:[%s7881_s1 + $0x4] ss:$16 sps:$4 sm:$0xff]   ;;  %v4379_v1 = vld [vmem:[%s7881_s1 + $0xc] ss:$16 sps:$4 sm:$0xff]   ;;  %v4381_v2 = vld [vmem:[%s7881_s1] ss:$16 sps:$4 sm:$0xff]  }
   0x2   :  { %1961 = vmatprep.subr.bf16.mxu0 %v4377_v0  ;;  %v4382_v3 = vld [vmem:[%s7881_s1 + $0x8] ss:$16 sps:$4 sm:$0xff]   ;;  %2413 = vmatprep.subr.bf16.mxu1 %v4379_v1  ;;  %v4383_v4 = vld [vmem:[%s7881_s1 + $0x24] ss:$16 sps:$4 sm:$0xff]   ;;  %v4385_v5 = vld [vmem:[%s7881_s1 + $0x2c] ss:$16 sps:$4 sm:$0xff]  }
   0x3   :  { %1962 = vmatpush1.bf16.msra.mxu0 %v4381_v2  ;;  %2414 = vmatpush1.bf16.msra.mxu1 %v4382_v3  ;;  %v4387_v6 = vld [vmem:[%s7881_s1 + $0x20] ss:$16 sps:$4 sm:$0xff]   ;;  %v4388_v7 = vld [vmem:[%s7881_s1 + $0x28] ss:$16 sps:$4 sm:$0xff]   ;;  %v4389_v8 = vld [vmem:[%s7881_s1 + $0x44] ss:$16 sps:$4 sm:$0xff]  }
   0x4   :  { %1963 = vmatprep.subr.bf16.mxu0 %v4383_v4  ;;  %2415 = vmatprep.subr.bf16.mxu1 %v4385_v5  ;;  %v4391_v9 = vld [vmem:[%s7881_s1 + $0x4c] ss:$16 sps:$4 sm:$0xff]   ;;  %v4393_v10 = vld [vmem:[%s7881_s1 + $0x40] ss:$16 sps:$4 sm:$0xff]   ;;  %v4394_v11 = vld [vmem:[%s7881_s1 + $0x48] ss:$16 sps:$4 sm:$0xff]  }
   0x5   :  { %v4395_v12 = vld [vmem:[%s7881_s1 + $0x64] ss:$16 sps:$4 sm:$0xff]   ;;  %v4397_v13 = vld [vmem:[%s7881_s1 + $0x6c] ss:$16 sps:$4 sm:$0xff]   ;;  %v4399_v14 = vld [vmem:[%s7881_s1 + $0x60] ss:$16 sps:$4 sm:$0xff]  }
   0x6   :  { %v4400_v15 = vld [vmem:[%s7881_s1 + $0x68] ss:$16 sps:$4 sm:$0xff]   ;;  %v4401_v16 = vld [vmem:[%s7881_s1 + $0x84] ss:$16 sps:$4 sm:$0xff]   ;;  %v4403_v17 = vld [vmem:[%s7881_s1 + $0x8c] ss:$16 sps:$4 sm:$0xff]  }
   0x7   :  { %1964 = vmatpush1.bf16.msra.mxu0 %v4387_v6  ;;  %2416 = vmatpush1.bf16.msra.mxu1 %v4388_v7  ;;  %v4405_v18 = vld [vmem:[%s7881_s1 + $0x80] ss:$16 sps:$4 sm:$0xff]   ;;  %v4406_v19 = vld [vmem:[%s7881_s1 + $0x88] ss:$16 sps:$4 sm:$0xff]   ;;  %v4407_v20 = vld [vmem:[%s7881_s1 + $0xa4] ss:$16 sps:$4 sm:$0xff]  }
   0x8   :  { %1965 = vmatprep.subr.bf16.mxu0 %v4389_v8  ;;  %2417 = vmatprep.subr.bf16.mxu1 %v4391_v9  ;;  %v4409_v21 = vld [vmem:[%s7881_s1 + $0xac] ss:$16 sps:$4 sm:$0xff]   ;;  %v4411_v22 = vld [vmem:[%s7881_s1 + $0xa0] ss:$16 sps:$4 sm:$0xff]   ;;  %v4412_v23 = vld [vmem:[%s7881_s1 + $0xa8] ss:$16 sps:$4 sm:$0xff]  }
   0x9   :  { %v4413_v24 = vld [vmem:[%s7881_s1 + $0xc4] ss:$16 sps:$4 sm:$0xff]   ;;  %v4415_v25 = vld [vmem:[%s7881_s1 + $0xcc] ss:$16 sps:$4 sm:$0xff]   ;;  %v4417_v26 = vld [vmem:[%s7881_s1 + $0xc0] ss:$16 sps:$4 sm:$0xff]  }
   0xa   :  { %v4418_v27 = vld [vmem:[%s7881_s1 + $0xc8] ss:$16 sps:$4 sm:$0xff]   ;;  %v4419_v28 = vld [vmem:[%s7881_s1 + $0xe4] ss:$16 sps:$4 sm:$0xff]   ;;  %v4421_v29 = vld [vmem:[%s7881_s1 + $0xec] ss:$16 sps:$4 sm:$0xff]  }
   0xb   :  { %1966 = vmatpush1.bf16.msra.mxu0 %v4393_v10  ;;  %2418 = vmatpush1.bf16.msra.mxu1 %v4394_v11  ;;  %v4423_v30 = vld [vmem:[%s7881_s1 + $0xe0] ss:$16 sps:$4 sm:$0xff]   ;;  %v4424_v31 = vld [vmem:[%s7881_s1 + $0xe8] ss:$16 sps:$4 sm:$0xff]   ;;  %v4425_v32 = vld [vmem:[%s7881_s1 + $0x104] ss:$16 sps:$4 sm:$0xff]  }
   0xc   :  { %1967 = vmatprep.subr.bf16.mxu0 %v4395_v12  ;;  %2419 = vmatprep.subr.bf16.mxu1 %v4397_v13  ;;  %v4427_v33 = vld [vmem:[%s7881_s1 + $0x10c] ss:$16 sps:$4 sm:$0xff]   ;;  %v4429_v34 = vld [vmem:[%s7881_s1 + $0x100] ss:$16 sps:$4 sm:$0xff]   ;;  %v4430_v35 = vld [vmem:[%s7881_s1 + $0x108] ss:$16 sps:$4 sm:$0xff]  }
   0xd   :  { %v4431_v36 = vld [vmem:[%s7881_s1 + $0x124] ss:$16 sps:$4 sm:$0xff]   ;;  %v4433_v37 = vld [vmem:[%s7881_s1 + $0x12c] ss:$16 sps:$4 sm:$0xff]   ;;  %v4435_v38 = vld [vmem:[%s7881_s1 + $0x120] ss:$16 sps:$4 sm:$0xff]  }
   0xe   :  { %v4436_v39 = vld [vmem:[%s7881_s1 + $0x128] ss:$16 sps:$4 sm:$0xff]   ;;  %v4437_v40 = vld [vmem:[%s7881_s1 + $0x144] ss:$16 sps:$4 sm:$0xff]   ;;  %v4439_v41 = vld [vmem:[%s7881_s1 + $0x14c] ss:$16 sps:$4 sm:$0xff]  }
   0xf   :  { %1968 = vmatpush1.bf16.msra.mxu0 %v4399_v14  ;;  %2420 = vmatpush1.bf16.msra.mxu1 %v4400_v15  ;;  %v4441_v42 = vld [vmem:[%s7881_s1 + $0x140] ss:$16 sps:$4 sm:$0xff]   ;;  %v4442_v43 = vld [vmem:[%s7881_s1 + $0x148] ss:$16 sps:$4 sm:$0xff]   ;;  %v4443_v44 = vld [vmem:[%s7881_s1 + $0x164] ss:$16 sps:$4 sm:$0xff]  }
  0x10   :  { %1969 = vmatprep.subr.bf16.mxu0 %v4401_v16  ;;  %2421 = vmatprep.subr.bf16.mxu1 %v4403_v17  ;;  %v4445_v45 = vld [vmem:[%s7881_s1 + $0x16c] ss:$16 sps:$4 sm:$0xff]   ;;  %v19_v46 = vld [vmem:[%s7882_s0] sm:$0xff]  ;;  %v4448_v49 = vld [vmem:[%s7881_s1 + $0x168] ss:$16 sps:$4 sm:$0xff]  }
  0x11   :  { %v23_v47 = vld [vmem:[%s7882_s0 + $0x20] sm:$0xff]  ;;  %v4451_v52 = vld [vmem:[%s7881_s1 + $0x18c] ss:$16 sps:$4 sm:$0xff]   ;;  %v4454_v54 = vld [vmem:[%s7881_s1 + $0x188] ss:$16 sps:$4 sm:$0xff]  }
  0x12   :  { %v4447_v48 = vld [vmem:[%s7881_s1 + $0x160] ss:$16 sps:$4 sm:$0xff]   ;;  %v3738_v50 = vcombine.high %v19_v46, %v23_v47  ;;  %v4449_v51 = vld [vmem:[%s7881_s1 + $0x184] ss:$16 sps:$4 sm:$0xff]   ;;  %v4457_v56 = vld [vmem:[%s7881_s1 + $0x1ac] ss:$16 sps:$4 sm:$0xff]   ;;  %v3737_v7 = vcombine.low %v19_v46, %v23_v47 }
  0x13   :  { %1970 = vmatpush1.bf16.msra.mxu0 %v4405_v18  ;;  %2422 = vmatpush1.bf16.msra.mxu1 %v4406_v19  ;;  %v4453_v53 = vld [vmem:[%s7881_s1 + $0x180] ss:$16 sps:$4 sm:$0xff]   ;;  %v4455_v55 = vld [vmem:[%s7881_s1 + $0x1a4] ss:$16 sps:$4 sm:$0xff]   ;;  %v4460_v58 = vld [vmem:[%s7881_s1 + $0x1a8] ss:$16 sps:$4 sm:$0xff]  }
  0x14   :  { %1971 = vmatprep.subr.bf16.mxu0 %v4407_v20  ;;  %2423 = vmatprep.subr.bf16.mxu1 %v4409_v21  ;;  %v4459_v57 = vld [vmem:[%s7881_s1 + $0x1a0] ss:$16 sps:$4 sm:$0xff]   ;;  %v4461_v59 = vld [vmem:[%s7881_s1 + $0x1c4] ss:$16 sps:$4 sm:$0xff]   ;;  %v4463_v60 = vld [vmem:[%s7881_s1 + $0x1cc] ss:$16 sps:$4 sm:$0xff]  }
  0x15   :  { %1993 = vmatprep.mubr.bf16.mxu0 %v3738_v50  ;;  %2445 = vmatprep.mubr.bf16.mxu1 %v3738_v50  ;;  %v4465_v61 = vld [vmem:[%s7881_s1 + $0x1c0] ss:$16 sps:$4 sm:$0xff]   ;;  %v4466_v62 = vld [vmem:[%s7881_s1 + $0x1c8] ss:$16 sps:$4 sm:$0xff]   ;;  %v4467_v63 = vld [vmem:[%s7881_s1 + $0x1e4] ss:$16 sps:$4 sm:$0xff]  }
  0x16   :  { %v4469_v0 = vld [vmem:[%s7881_s1 + $0x1ec] ss:$16 sps:$4 sm:$0xff]   ;;  %v4471_v1 = vld [vmem:[%s7881_s1 + $0x1e0] ss:$16 sps:$4 sm:$0xff]   ;;  %v4472_v2 = vld [vmem:[%s7881_s1 + $0x1e8] ss:$16 sps:$4 sm:$0xff]  }
  0x17   :  { %1972 = vmatpush1.bf16.msra.mxu0 %v4411_v22  ;;  %2424 = vmatpush1.bf16.msra.mxu1 %v4412_v23  ;;  %v4475_v3 = vld [vmem:[%s7881_s1 + $0x204] ss:$16 sps:$4 sm:$0xff]   ;;  %v4478_v4 = vld [vmem:[%s7881_s1 + $0x20c] ss:$16 sps:$4 sm:$0xff]   ;;  %v4473_v5 = vld [vmem:[%s7881_s1 + $0x200] ss:$16 sps:$4 sm:$0xff]  }
  0x18   :  { %1973 = vmatprep.subr.bf16.mxu0 %v4413_v24  ;;  %2425 = vmatprep.subr.bf16.mxu1 %v4415_v25  ;;  %v4476_v6 = vld [vmem:[%s7881_s1 + $0x208] ss:$16 sps:$4 sm:$0xff]   ;;  %v27_v8 = vld [vmem:[%s7882_s0 + $0x40] sm:$0xff]  ;;  %v4484_v11 = vld [vmem:[%s7881_s1 + $0x22c] ss:$16 sps:$4 sm:$0xff]  }
  0x19   :  { %v31_v9 = vld [vmem:[%s7882_s0 + $0x60] sm:$0xff]  ;;  %v4482_v14 = vld [vmem:[%s7881_s1 + $0x228] ss:$16 sps:$4 sm:$0xff]   ;;  %v4490_v16 = vld [vmem:[%s7881_s1 + $0x24c] ss:$16 sps:$4 sm:$0xff]  }
  0x1a   :  { %v4481_v10 = vld [vmem:[%s7881_s1 + $0x224] ss:$16 sps:$4 sm:$0xff]   ;;  %v3746_v12 = vcombine.high %v27_v8, %v31_v9  ;;  %v4479_v13 = vld [vmem:[%s7881_s1 + $0x220] ss:$16 sps:$4 sm:$0xff]   ;;  %v3745_v18 = vcombine.low %v27_v8, %v31_v9  ;;  %v4488_v21 = vld [vmem:[%s7881_s1 + $0x248] ss:$16 sps:$4 sm:$0xff]  }
  0x1b   :  { %1974 = vmatpush1.bf16.msra.mxu0 %v4417_v26  ;;  %2426 = vmatpush1.bf16.msra.mxu1 %v4418_v27  ;;  %v4487_v15 = vld [vmem:[%s7881_s1 + $0x244] ss:$16 sps:$4 sm:$0xff]   ;;  %v4485_v20 = vld [vmem:[%s7881_s1 + $0x240] ss:$16 sps:$4 sm:$0xff]   ;;  %v4496_v23 = vld [vmem:[%s7881_s1 + $0x26c] ss:$16 sps:$4 sm:$0xff]  }
  0x1c   :  { %1975 = vmatprep.subr.bf16.mxu0 %v4419_v28  ;;  %2427 = vmatprep.subr.bf16.mxu1 %v4421_v29  ;;  %v35_v17 = vld [vmem:[%s7882_s0 + $0x80] sm:$0xff]  ;;  %v4494_v26 = vld [vmem:[%s7881_s1 + $0x268] ss:$16 sps:$4 sm:$0xff]   ;;  %v4502_v28 = vld [vmem:[%s7881_s1 + $0x28c] ss:$16 sps:$4 sm:$0xff]  }
  0x1d   :  { %v39_v19 = vld [vmem:[%s7882_s0 + $0xa0] sm:$0xff]  ;;  %v4520_v47 = vld [vmem:[%s7881_s1 + $0x2ec] ss:$16 sps:$4 sm:$0xff]   ;;  %v4518_v50 = vld [vmem:[%s7881_s1 + $0x2e8] ss:$16 sps:$4 sm:$0xff]  }
  0x1e   :  { %v4493_v22 = vld [vmem:[%s7881_s1 + $0x264] ss:$16 sps:$4 sm:$0xff]   ;;  %v3754_v24 = vcombine.high %v35_v17, %v39_v19  ;;  %v4491_v25 = vld [vmem:[%s7881_s1 + $0x260] ss:$16 sps:$4 sm:$0xff]  }
  0x1f   :  { %1976 = vmatpush1.bf16.msra.mxu0 %v4423_v30  ;;  %2428 = vmatpush1.bf16.msra.mxu1 %v4424_v31  ;;  %v4499_v27 = vld [vmem:[%s7881_s1 + $0x284] ss:$16 sps:$4 sm:$0xff]   ;;  %v3753_v30 = vcombine.low %v35_v17, %v39_v19  ;;  %v4539_v9 = vld [vmem:[%s7881_s1 + $0x360] ss:$16 sps:$4 sm:$0xff]   ;;  %v4556_v19 = vld [vmem:[%s7881_s1 + $0x3ac] ss:$16 sps:$4 sm:$0xff]  }
  0x20   :  { %1977 = vmatprep.subr.bf16.mxu0 %v4425_v32  ;;  %2429 = vmatprep.subr.bf16.mxu1 %v4427_v33  ;;  %v43_v29 = vld [vmem:[%s7882_s0 + $0xc0] sm:$0xff]  ;;  %v4500_v33 = vld [vmem:[%s7881_s1 + $0x288] ss:$16 sps:$4 sm:$0xff]  }
  0x21   :  { %v47_v31 = vld [vmem:[%s7882_s0 + $0xe0] sm:$0xff] }
  0x22   :  { %v4497_v32 = vld [vmem:[%s7881_s1 + $0x280] ss:$16 sps:$4 sm:$0xff]   ;;  %v4517_v46 = vld [vmem:[%s7881_s1 + $0x2e4] ss:$16 sps:$4 sm:$0xff]  }
  0x23   :  { %1978 = vmatpush1.bf16.msra.mxu0 %v4429_v34  ;;  %2430 = vmatpush1.bf16.msra.mxu1 %v4430_v35  ;;  %v4505_v34 = vld [vmem:[%s7881_s1 + $0x2a4] ss:$16 sps:$4 sm:$0xff]   ;;  %v4508_v35 = vld [vmem:[%s7881_s1 + $0x2ac] ss:$16 sps:$4 sm:$0xff]  }
  0x24   :  { %1979 = vmatprep.subr.bf16.mxu0 %v4431_v36  ;;  %2431 = vmatprep.subr.bf16.mxu1 %v4433_v37  ;;  %v3762_v36 = vcombine.high %v43_v29, %v47_v31  ;;  %v4503_v37 = vld [vmem:[%s7881_s1 + $0x2a0] ss:$16 sps:$4 sm:$0xff]  }
  0x25   :  { %v79_v17 = vld [vmem:[%s7882_s0 + $0x1e0] sm:$0xff] }
  0x27   :  { %1980 = vmatpush1.bf16.msra.mxu0 %v4435_v38  ;;  %2432 = vmatpush1.bf16.msra.mxu1 %v4436_v39  ;;  %v4506_v38 = vld [vmem:[%s7881_s1 + $0x2a8] ss:$16 sps:$4 sm:$0xff]   ;;  %v4511_v39 = vld [vmem:[%s7881_s1 + $0x2c4] ss:$16 sps:$4 sm:$0xff]  }
  0x28   :  { %1981 = vmatprep.subr.bf16.mxu0 %v4437_v40  ;;  %2433 = vmatprep.subr.bf16.mxu1 %v4439_v41  ;;  %v4514_v40 = vld [vmem:[%s7881_s1 + $0x2cc] ss:$16 sps:$4 sm:$0xff]   ;;  %v4509_v41 = vld [vmem:[%s7881_s1 + $0x2c0] ss:$16 sps:$4 sm:$0xff]  }
  0x2b   :  { %1982 = vmatpush1.bf16.msra.mxu0 %v4441_v42  ;;  %2434 = vmatpush1.bf16.msra.mxu1 %v4442_v43  ;;  %v4512_v42 = vld [vmem:[%s7881_s1 + $0x2c8] ss:$16 sps:$4 sm:$0xff]   ;;  %v3761_v43 = vcombine.low %v43_v29, %v47_v31  ;;  %v4568_v31 = vld [vmem:[%s7881_s1 + $0x3ec] ss:$16 sps:$4 sm:$0xff]  }
  0x2c   :  { %1983 = vmatprep.subr.bf16.mxu0 %v4443_v44  ;;  %2435 = vmatprep.subr.bf16.mxu1 %v4445_v45  ;;  %v51_v44 = vld [vmem:[%s7882_s0 + $0x100] sm:$0xff]  ;;  %v4560_v29 = vld [vmem:[%s7881_s1 + $0x3c8] ss:$16 sps:$4 sm:$0xff]  }
  0x2d   :  { %v55_v45 = vld [vmem:[%s7882_s0 + $0x120] sm:$0xff] }
  0x2f   :  { %1984 = vmatpush1.bf16.msra.mxu0 %v4447_v48  ;;  %2436 = vmatpush1.bf16.msra.mxu1 %v4448_v49  ;;  %v3770_v48 = vcombine.high %v51_v44, %v55_v45  ;;  %v4515_v49 = vld [vmem:[%s7881_s1 + $0x2e0] ss:$16 sps:$4 sm:$0xff]  }
  0x30   :  { %1985 = vmatprep.subr.bf16.mxu0 %v4449_v51  ;;  %2437 = vmatprep.subr.bf16.mxu1 %v4451_v52  ;;  %v4523_v51 = vld [vmem:[%s7881_s1 + $0x304] ss:$16 sps:$4 sm:$0xff]   ;;  %v4526_v52 = vld [vmem:[%s7881_s1 + $0x30c] ss:$16 sps:$4 sm:$0xff]  }
  0x33   :  { %1986 = vmatpush1.bf16.msra.mxu0 %v4453_v53  ;;  %2438 = vmatpush1.bf16.msra.mxu1 %v4454_v54  ;;  %v59_v53 = vld [vmem:[%s7882_s0 + $0x140] sm:$0xff]  ;;  %v3769_v54 = vcombine.low %v51_v44, %v55_v45 }
  0x34   :  { %1987 = vmatprep.subr.bf16.mxu0 %v4455_v55  ;;  %2439 = vmatprep.subr.bf16.mxu1 %v4457_v56  ;;  %v63_v55 = vld [vmem:[%s7882_s0 + $0x160] sm:$0xff] }
  0x35   :  { %v4521_v56 = vld [vmem:[%s7881_s1 + $0x300] ss:$16 sps:$4 sm:$0xff]  }
  0x36   :  { %v4575_v45 = vld [vmem:[%s7881_s1 + $0x420] ss:$16 sps:$4 sm:$0xff]  }
  0x37   :  { %1988 = vmatpush1.bf16.msra.mxu0 %v4459_v57  ;;  %2440 = vmatpush1.bf16.msra.mxu1 %v4460_v58  ;;  %v4524_v57 = vld [vmem:[%s7881_s1 + $0x308] ss:$16 sps:$4 sm:$0xff]   ;;  %v4529_v58 = vld [vmem:[%s7881_s1 + $0x324] ss:$16 sps:$4 sm:$0xff]  }
  0x38   :  { %1989 = vmatprep.subr.bf16.mxu0 %v4461_v59  ;;  %2441 = vmatprep.subr.bf16.mxu1 %v4463_v60  ;;  %v4532_v59 = vld [vmem:[%s7881_s1 + $0x32c] ss:$16 sps:$4 sm:$0xff]   ;;  %v3778_v60 = vcombine.high %v59_v53, %v63_v55 }
  0x3b   :  { %1990 = vmatpush1.bf16.msra.mxu0 %v4465_v61  ;;  %2442 = vmatpush1.bf16.msra.mxu1 %v4466_v62  ;;  %v4527_v61 = vld [vmem:[%s7881_s1 + $0x320] ss:$16 sps:$4 sm:$0xff]   ;;  %v4530_v62 = vld [vmem:[%s7881_s1 + $0x328] ss:$16 sps:$4 sm:$0xff]  }
  0x3c   :  { %1991 = vmatprep.subr.bf16.mxu0 %v4467_v63  ;;  %2443 = vmatprep.subr.bf16.mxu1 %v4469_v0  ;;  %v4535_v63 = vld [vmem:[%s7881_s1 + $0x344] ss:$16 sps:$4 sm:$0xff]   ;;  %v4538_v0 = vld [vmem:[%s7881_s1 + $0x34c] ss:$16 sps:$4 sm:$0xff]  }
  0x3f   :  { %1992 = vmatpush1.bf16.msra.mxu0 %v4471_v1  ;;  %2444 = vmatpush1.bf16.msra.mxu1 %v4472_v2  ;;  %v67_v1 = vld [vmem:[%s7882_s0 + $0x180] sm:$0xff]  ;;  %v3777_v2 = vcombine.low %v59_v53, %v63_v55  ;;  %v40_v53 = vld [vmem:[%s7882_s0 + $0xa8] sm:$0xff] }
  0x40   :  { %2074 = vmatprep.subr.bf16.mxu0 %v4475_v3  ;;  %2526 = vmatprep.subr.bf16.mxu1 %v4478_v4  ;;  %v71_v3 = vld [vmem:[%s7882_s0 + $0x1a0] sm:$0xff]  ;;  %v4592_v55 = vld [vmem:[%s7881_s1 + $0x46c] ss:$16 sps:$4 sm:$0xff]  }
  0x41   :  { %v4533_v4 = vld [vmem:[%s7881_s1 + $0x340] ss:$16 sps:$4 sm:$0xff]   ;;  %v3786_v8 = vcombine.high %v67_v1, %v71_v3 }
  0x42   :  { %1994 = vmatmul.mubr.bf16.vlgmr.msra.gmra.mrb[0].mxu0 %v3737_v7  ;;  %2446 = vmatmul.mubr.bf16.vlgmr.msra.gmra.mrb[0].mxu1 %v3737_v7  ;;  %v4544_v7 = vld [vmem:[%s7881_s1 + $0x36c] ss:$16 sps:$4 sm:$0xff]  }
  0x43   :  { %2075 = vmatpush1.bf16.msra.mxu0 %v4473_v5  ;;  %2527 = vmatpush1.bf16.msra.mxu1 %v4476_v6  ;;  %v4536_v5 = vld [vmem:[%s7881_s1 + $0x348] ss:$16 sps:$4 sm:$0xff]   ;;  %v4541_v6 = vld [vmem:[%s7881_s1 + $0x364] ss:$16 sps:$4 sm:$0xff]  }
  0x44   :  { %2076 = vmatprep.subr.bf16.mxu0 %v4481_v10  ;;  %2528 = vmatprep.subr.bf16.mxu1 %v4484_v11  ;;  %v4542_v10 = vld [vmem:[%s7881_s1 + $0x368] ss:$16 sps:$4 sm:$0xff]   ;;  %v4547_v11 = vld [vmem:[%s7881_s1 + $0x384] ss:$16 sps:$4 sm:$0xff]  }
  0x45   :  { %2003 = vmatprep.mubr.bf16.mxu0 %v3746_v12  ;;  %2455 = vmatprep.mubr.bf16.mxu1 %v3746_v12  ;;  %v4550_v12 = vld [vmem:[%s7881_s1 + $0x38c] ss:$16 sps:$4 sm:$0xff]  }
  0x47   :  { %2077 = vmatpush1.bf16.msra.mxu0 %v4479_v13  ;;  %2529 = vmatpush1.bf16.msra.mxu1 %v4482_v14  ;;  %v4545_v13 = vld [vmem:[%s7881_s1 + $0x380] ss:$16 sps:$4 sm:$0xff]   ;;  %v4548_v14 = vld [vmem:[%s7881_s1 + $0x388] ss:$16 sps:$4 sm:$0xff]  }
  0x48   :  { %2078 = vmatprep.subr.bf16.mxu0 %v4487_v15  ;;  %2530 = vmatprep.subr.bf16.mxu1 %v4490_v16  ;;  %v3785_v15 = vcombine.low %v67_v1, %v71_v3  ;;  %v75_v16 = vld [vmem:[%s7882_s0 + $0x1c0] sm:$0xff]  ;;  %v4596_v1 = vld [vmem:[%s7881_s1 + $0x488] ss:$16 sps:$4 sm:$0xff]   ;;  %v4604_v3 = vld [vmem:[%s7881_s1 + $0x4ac] ss:$16 sps:$4 sm:$0xff]  }
  0x4a   :  { %2004 = vmatmul.mubr.bf16.gmra.mrb[4].mxu0 %v3745_v18  ;;  %2456 = vmatmul.mubr.bf16.gmra.mrb[4].mxu1 %v3745_v18  ;;  %v4553_v18 = vld [vmem:[%s7881_s1 + $0x3a4] ss:$16 sps:$4 sm:$0xff]  }
  0x4b   :  { %2079 = vmatpush1.bf16.msra.mxu0 %v4485_v20  ;;  %2531 = vmatpush1.bf16.msra.mxu1 %v4488_v21  ;;  %v3794_v20 = vcombine.high %v75_v16, %v79_v17  ;;  %v4551_v21 = vld [vmem:[%s7881_s1 + $0x3a0] ss:$16 sps:$4 sm:$0xff]  }
  0x4c   :  { %2080 = vmatprep.subr.bf16.mxu0 %v4493_v22  ;;  %2532 = vmatprep.subr.bf16.mxu1 %v4496_v23  ;;  %v4554_v22 = vld [vmem:[%s7881_s1 + $0x3a8] ss:$16 sps:$4 sm:$0xff]   ;;  %v4559_v23 = vld [vmem:[%s7881_s1 + $0x3c4] ss:$16 sps:$4 sm:$0xff]  }
  0x4d   :  { %2013 = vmatprep.mubr.bf16.mxu0 %v3754_v24  ;;  %2465 = vmatprep.mubr.bf16.mxu1 %v3754_v24  ;;  %v4562_v24 = vld [vmem:[%s7881_s1 + $0x3cc] ss:$16 sps:$4 sm:$0xff]  }
  0x4f   :  { %2081 = vmatpush1.bf16.msra.mxu0 %v4491_v25  ;;  %2533 = vmatpush1.bf16.msra.mxu1 %v4494_v26  ;;  %v20_v25 = vld [vmem:[%s7882_s0 + $0x8] sm:$0xff]  ;;  %v3793_v26 = vcombine.low %v75_v16, %v79_v17  ;;  %v4611_v17 = vld [vmem:[%s7881_s1 + $0x4e0] ss:$16 sps:$4 sm:$0xff]  }
  0x50   :  { %2082 = vmatprep.subr.bf16.mxu0 %v4499_v27  ;;  %2534 = vmatprep.subr.bf16.mxu1 %v4502_v28  ;;  %v24_v27 = vld [vmem:[%s7882_s0 + $0x28] sm:$0xff]  ;;  %v4557_v28 = vld [vmem:[%s7881_s1 + $0x3c0] ss:$16 sps:$4 sm:$0xff]  }
  0x52   :  { %2014 = vmatmul.mubr.bf16.gmra.mrb[8].mxu0 %v3753_v30  ;;  %2466 = vmatmul.mubr.bf16.gmra.mrb[8].mxu1 %v3753_v30  ;;  %v4565_v30 = vld [vmem:[%s7881_s1 + $0x3e4] ss:$16 sps:$4 sm:$0xff]  }
  0x53   :  { %2083 = vmatpush1.bf16.msra.mxu0 %v4497_v32  ;;  %2535 = vmatpush1.bf16.msra.mxu1 %v4500_v33  ;;  %v3740_v32 = vcombine.high %v20_v25, %v24_v27  ;;  %v4563_v33 = vld [vmem:[%s7881_s1 + $0x3e0] ss:$16 sps:$4 sm:$0xff]  }
  0x54   :  { %2084 = vmatprep.subr.bf16.mxu0 %v4505_v34  ;;  %2536 = vmatprep.subr.bf16.mxu1 %v4508_v35  ;;  %v4566_v34 = vld [vmem:[%s7881_s1 + $0x3e8] ss:$16 sps:$4 sm:$0xff]   ;;  %v4571_v35 = vld [vmem:[%s7881_s1 + $0x404] ss:$16 sps:$4 sm:$0xff]  }
  0x55   :  { %2023 = vmatprep.mubr.bf16.mxu0 %v3762_v36  ;;  %2475 = vmatprep.mubr.bf16.mxu1 %v3762_v36  ;;  %v4574_v36 = vld [vmem:[%s7881_s1 + $0x40c] ss:$16 sps:$4 sm:$0xff]  }
  0x57   :  { %2085 = vmatpush1.bf16.msra.mxu0 %v4503_v37  ;;  %2537 = vmatpush1.bf16.msra.mxu1 %v4506_v38  ;;  %v28_v37 = vld [vmem:[%s7882_s0 + $0x48] sm:$0xff]  ;;  %v3739_v38 = vcombine.low %v20_v25, %v24_v27 }
  0x58   :  { %2086 = vmatprep.subr.bf16.mxu0 %v4511_v39  ;;  %2538 = vmatprep.subr.bf16.mxu1 %v4514_v40  ;;  %v32_v39 = vld [vmem:[%s7882_s0 + $0x68] sm:$0xff]  ;;  %v4569_v40 = vld [vmem:[%s7881_s1 + $0x400] ss:$16 sps:$4 sm:$0xff]  }
  0x59   :  { %v3748_v44 = vcombine.high %v28_v37, %v32_v39  ;;  %v64_v25 = vld [vmem:[%s7882_s0 + $0x168] sm:$0xff] }
  0x5a   :  { %2024 = vmatmul.mubr.bf16.gmra.mrb[12].mxu0 %v3761_v43  ;;  %2476 = vmatmul.mubr.bf16.gmra.mrb[12].mxu1 %v3761_v43  ;;  %v4580_v43 = vld [vmem:[%s7881_s1 + $0x42c] ss:$16 sps:$4 sm:$0xff]  }
  0x5b   :  { %2087 = vmatpush1.bf16.msra.mxu0 %v4509_v41  ;;  %2539 = vmatpush1.bf16.msra.mxu1 %v4512_v42  ;;  %v4572_v41 = vld [vmem:[%s7881_s1 + $0x408] ss:$16 sps:$4 sm:$0xff]   ;;  %v4577_v42 = vld [vmem:[%s7881_s1 + $0x424] ss:$16 sps:$4 sm:$0xff]   ;;  %v4628_v27 = vld [vmem:[%s7881_s1 + $0x52c] ss:$16 sps:$4 sm:$0xff]  }
  0x5c   :  { %2088 = vmatprep.subr.bf16.mxu0 %v4517_v46  ;;  %2540 = vmatprep.subr.bf16.mxu1 %v4520_v47  ;;  %v4578_v46 = vld [vmem:[%s7881_s1 + $0x428] ss:$16 sps:$4 sm:$0xff]   ;;  %v4583_v47 = vld [vmem:[%s7881_s1 + $0x444] ss:$16 sps:$4 sm:$0xff]  }
  0x5d   :  { %2033 = vmatprep.mubr.bf16.mxu0 %v3770_v48  ;;  %2485 = vmatprep.mubr.bf16.mxu1 %v3770_v48  ;;  %v4586_v48 = vld [vmem:[%s7881_s1 + $0x44c] ss:$16 sps:$4 sm:$0xff]  }
  0x5f   :  { %2089 = vmatpush1.bf16.msra.mxu0 %v4515_v49  ;;  %2541 = vmatpush1.bf16.msra.mxu1 %v4518_v50  ;;  %v4581_v49 = vld [vmem:[%s7881_s1 + $0x440] ss:$16 sps:$4 sm:$0xff]   ;;  %v4584_v50 = vld [vmem:[%s7881_s1 + $0x448] ss:$16 sps:$4 sm:$0xff]  }
  0x60   :  { %2090 = vmatprep.subr.bf16.mxu0 %v4523_v51  ;;  %2542 = vmatprep.subr.bf16.mxu1 %v4526_v52  ;;  %v3747_v51 = vcombine.low %v28_v37, %v32_v39  ;;  %v36_v52 = vld [vmem:[%s7882_s0 + $0x88] sm:$0xff] }
  0x61   :  { %v4632_v37 = vld [vmem:[%s7881_s1 + $0x548] ss:$16 sps:$4 sm:$0xff]   ;;  %v4640_v39 = vld [vmem:[%s7881_s1 + $0x56c] ss:$16 sps:$4 sm:$0xff]  }
  0x62   :  { %2034 = vmatmul.mubr.bf16.gmra.mrb[16].mxu0 %v3769_v54  ;;  %2486 = vmatmul.mubr.bf16.gmra.mrb[16].mxu1 %v3769_v54  ;;  %v4589_v54 = vld [vmem:[%s7881_s1 + $0x464] ss:$16 sps:$4 sm:$0xff]  }
  0x63   :  { %2091 = vmatpush1.bf16.msra.mxu0 %v4521_v56  ;;  %2543 = vmatpush1.bf16.msra.mxu1 %v4524_v57  ;;  %v3756_v56 = vcombine.high %v36_v52, %v40_v53  ;;  %v4587_v57 = vld [vmem:[%s7881_s1 + $0x460] ss:$16 sps:$4 sm:$0xff]  }
  0x64   :  { %2092 = vmatprep.subr.bf16.mxu0 %v4529_v58  ;;  %2544 = vmatprep.subr.bf16.mxu1 %v4532_v59  ;;  %v4590_v58 = vld [vmem:[%s7881_s1 + $0x468] ss:$16 sps:$4 sm:$0xff]   ;;  %v4595_v59 = vld [vmem:[%s7881_s1 + $0x484] ss:$16 sps:$4 sm:$0xff]  }
  0x65   :  { %2043 = vmatprep.mubr.bf16.mxu0 %v3778_v60  ;;  %2495 = vmatprep.mubr.bf16.mxu1 %v3778_v60  ;;  %v4598_v60 = vld [vmem:[%s7881_s1 + $0x48c] ss:$16 sps:$4 sm:$0xff]  }
  0x67   :  { %2093 = vmatpush1.bf16.msra.mxu0 %v4527_v61  ;;  %2545 = vmatpush1.bf16.msra.mxu1 %v4530_v62  ;;  %v44_v61 = vld [vmem:[%s7882_s0 + $0xc8] sm:$0xff]  ;;  %v3755_v62 = vcombine.low %v36_v52, %v40_v53  ;;  %v4647_v53 = vld [vmem:[%s7881_s1 + $0x5a0] ss:$16 sps:$4 sm:$0xff]  }
  0x68   :  { %2094 = vmatprep.subr.bf16.mxu0 %v4535_v63  ;;  %2546 = vmatprep.subr.bf16.mxu1 %v4538_v0  ;;  %v48_v63 = vld [vmem:[%s7882_s0 + $0xe8] sm:$0xff]  ;;  %v4593_v0 = vld [vmem:[%s7881_s1 + $0x480] ss:$16 sps:$4 sm:$0xff]  }
  0x6a   :  { %2044 = vmatmul.mubr.bf16.gmra.mrb[20].mxu0 %v3777_v2  ;;  %2496 = vmatmul.mubr.bf16.gmra.mrb[20].mxu1 %v3777_v2  ;;  %v4601_v2 = vld [vmem:[%s7881_s1 + $0x4a4] ss:$16 sps:$4 sm:$0xff]  }
  0x6b   :  { %2095 = vmatpush1.bf16.msra.mxu0 %v4533_v4  ;;  %2547 = vmatpush1.bf16.msra.mxu1 %v4536_v5  ;;  %v3764_v4 = vcombine.high %v44_v61, %v48_v63  ;;  %v4599_v5 = vld [vmem:[%s7881_s1 + $0x4a0] ss:$16 sps:$4 sm:$0xff]  }
  0x6c   :  { %2096 = vmatprep.subr.bf16.mxu0 %v4541_v6  ;;  %2548 = vmatprep.subr.bf16.mxu1 %v4544_v7  ;;  %v4602_v6 = vld [vmem:[%s7881_s1 + $0x4a8] ss:$16 sps:$4 sm:$0xff]   ;;  %v4607_v7 = vld [vmem:[%s7881_s1 + $0x4c4] ss:$16 sps:$4 sm:$0xff]  }
  0x6d   :  { %2053 = vmatprep.mubr.bf16.mxu0 %v3786_v8  ;;  %2505 = vmatprep.mubr.bf16.mxu1 %v3786_v8  ;;  %v4610_v8 = vld [vmem:[%s7881_s1 + $0x4cc] ss:$16 sps:$4 sm:$0xff]  }
  0x6f   :  { %2097 = vmatpush1.bf16.msra.mxu0 %v4539_v9  ;;  %2549 = vmatpush1.bf16.msra.mxu1 %v4542_v10  ;;  %v52_v9 = vld [vmem:[%s7882_s0 + $0x108] sm:$0xff]  ;;  %v3763_v10 = vcombine.low %v44_v61, %v48_v63  ;;  %v25_v61 = vld [vmem:[%s7882_s0 + $0x30] sm:$0xff] }
  0x70   :  { %2098 = vmatprep.subr.bf16.mxu0 %v4547_v11  ;;  %2550 = vmatprep.subr.bf16.mxu1 %v4550_v12  ;;  %v56_v11 = vld [vmem:[%s7882_s0 + $0x128] sm:$0xff]  ;;  %v4605_v12 = vld [vmem:[%s7881_s1 + $0x4c0] ss:$16 sps:$4 sm:$0xff]  }
  0x71   :  { %v3772_v16 = vcombine.high %v52_v9, %v56_v11  ;;  %v4664_v63 = vld [vmem:[%s7881_s1 + $0x5ec] ss:$16 sps:$4 sm:$0xff]  }
  0x72   :  { %2054 = vmatmul.mubr.bf16.gmra.mrb[24].mxu0 %v3785_v15  ;;  %2506 = vmatmul.mubr.bf16.gmra.mrb[24].mxu1 %v3785_v15  ;;  %v4616_v15 = vld [vmem:[%s7881_s1 + $0x4ec] ss:$16 sps:$4 sm:$0xff]  }
  0x73   :  { %2099 = vmatpush1.bf16.msra.mxu0 %v4545_v13  ;;  %2551 = vmatpush1.bf16.msra.mxu1 %v4548_v14  ;;  %v4608_v13 = vld [vmem:[%s7881_s1 + $0x4c8] ss:$16 sps:$4 sm:$0xff]   ;;  %v4613_v14 = vld [vmem:[%s7881_s1 + $0x4e4] ss:$16 sps:$4 sm:$0xff]  }
  0x74   :  { %2100 = vmatprep.subr.bf16.mxu0 %v4553_v18  ;;  %2552 = vmatprep.subr.bf16.mxu1 %v4556_v19  ;;  %v4614_v18 = vld [vmem:[%s7881_s1 + $0x4e8] ss:$16 sps:$4 sm:$0xff]   ;;  %v4619_v19 = vld [vmem:[%s7881_s1 + $0x504] ss:$16 sps:$4 sm:$0xff]  }
  0x75   :  { %2063 = vmatprep.mubr.bf16.mxu0 %v3794_v20  ;;  %2515 = vmatprep.mubr.bf16.mxu1 %v3794_v20  ;;  %v4622_v20 = vld [vmem:[%s7881_s1 + $0x50c] ss:$16 sps:$4 sm:$0xff]  }
  0x77   :  { %2101 = vmatpush1.bf16.msra.mxu0 %v4551_v21  ;;  %2553 = vmatpush1.bf16.msra.mxu1 %v4554_v22  ;;  %v4617_v21 = vld [vmem:[%s7881_s1 + $0x500] ss:$16 sps:$4 sm:$0xff]   ;;  %v4620_v22 = vld [vmem:[%s7881_s1 + $0x508] ss:$16 sps:$4 sm:$0xff]  }
  0x78   :  { %2102 = vmatprep.subr.bf16.mxu0 %v4559_v23  ;;  %2554 = vmatprep.subr.bf16.mxu1 %v4562_v24  ;;  %v3771_v23 = vcombine.low %v52_v9, %v56_v11  ;;  %v60_v24 = vld [vmem:[%s7882_s0 + $0x148] sm:$0xff] }
  0x79   :  { %v4668_v9 = vld [vmem:[%s7881_s1 + $0x608] ss:$16 sps:$4 sm:$0xff]   ;;  %v4676_v11 = vld [vmem:[%s7881_s1 + $0x62c] ss:$16 sps:$4 sm:$0xff]  }
  0x7a   :  { %2064 = vmatmul.mubr.bf16.gmra.mrb[28].mxu0 %v3793_v26  ;;  %2516 = vmatmul.mubr.bf16.gmra.mrb[28].mxu1 %v3793_v26  ;;  %v4625_v26 = vld [vmem:[%s7881_s1 + $0x524] ss:$16 sps:$4 sm:$0xff]  }
  0x7b   :  { %2103 = vmatpush1.bf16.msra.mxu0 %v4557_v28  ;;  %2555 = vmatpush1.bf16.msra.mxu1 %v4560_v29  ;;  %v3780_v28 = vcombine.high %v60_v24, %v64_v25  ;;  %v4623_v29 = vld [vmem:[%s7881_s1 + $0x520] ss:$16 sps:$4 sm:$0xff]  }
  0x7c   :  { %2104 = vmatprep.subr.bf16.mxu0 %v4565_v30  ;;  %2556 = vmatprep.subr.bf16.mxu1 %v4568_v31  ;;  %v4626_v30 = vld [vmem:[%s7881_s1 + $0x528] ss:$16 sps:$4 sm:$0xff]   ;;  %v4631_v31 = vld [vmem:[%s7881_s1 + $0x544] ss:$16 sps:$4 sm:$0xff]  }
  0x7d   :  { %2106 = vmatprep.mubr.bf16.mxu0 %v3740_v32  ;;  %2558 = vmatprep.mubr.bf16.mxu1 %v3740_v32  ;;  %v4634_v32 = vld [vmem:[%s7881_s1 + $0x54c] ss:$16 sps:$4 sm:$0xff]  }
  0x7f   :  { %2105 = vmatpush1.bf16.msra.mxu0 %v4563_v33  ;;  %2557 = vmatpush1.bf16.msra.mxu1 %v4566_v34  ;;  %v68_v33 = vld [vmem:[%s7882_s0 + $0x188] sm:$0xff]  ;;  %v3779_v34 = vcombine.low %v60_v24, %v64_v25  ;;  %v4683_v25 = vld [vmem:[%s7881_s1 + $0x660] ss:$16 sps:$4 sm:$0xff]  }
  0x80   :  { %2187 = vmatprep.subr.bf16.mxu0 %v4571_v35  ;;  %2639 = vmatprep.subr.bf16.mxu1 %v4574_v36  ;;  %v72_v35 = vld [vmem:[%s7882_s0 + $0x1a8] sm:$0xff]  ;;  %v4629_v36 = vld [vmem:[%s7881_s1 + $0x540] ss:$16 sps:$4 sm:$0xff]  }
  0x82   :  { %2107 = vmatmul.mubr.bf16.vlgmr.msra.gmra.mrb[0].mxu0 %v3739_v38  ;;  %2559 = vmatmul.mubr.bf16.vlgmr.msra.gmra.mrb[0].mxu1 %v3739_v38  ;;  %v4637_v38 = vld [vmem:[%s7881_s1 + $0x564] ss:$16 sps:$4 sm:$0xff]  }
  0x83   :  { %2188 = vmatpush1.bf16.msra.mxu0 %v4569_v40  ;;  %2640 = vmatpush1.bf16.msra.mxu1 %v4572_v41  ;;  %v3788_v40 = vcombine.high %v68_v33, %v72_v35  ;;  %v4635_v41 = vld [vmem:[%s7881_s1 + $0x560] ss:$16 sps:$4 sm:$0xff]  }
  0x84   :  { %2189 = vmatprep.subr.bf16.mxu0 %v4577_v42  ;;  %2641 = vmatprep.subr.bf16.mxu1 %v4580_v43  ;;  %v4638_v42 = vld [vmem:[%s7881_s1 + $0x568] ss:$16 sps:$4 sm:$0xff]   ;;  %v4643_v43 = vld [vmem:[%s7881_s1 + $0x584] ss:$16 sps:$4 sm:$0xff]  }
  0x85   :  { %2116 = vmatprep.mubr.bf16.mxu0 %v3748_v44  ;;  %2568 = vmatprep.mubr.bf16.mxu1 %v3748_v44  ;;  %v4646_v44 = vld [vmem:[%s7881_s1 + $0x58c] ss:$16 sps:$4 sm:$0xff]  }
  0x87   :  { %2190 = vmatpush1.bf16.msra.mxu0 %v4575_v45  ;;  %2642 = vmatpush1.bf16.msra.mxu1 %v4578_v46  ;;  %v76_v45 = vld [vmem:[%s7882_s0 + $0x1c8] sm:$0xff]  ;;  %v3787_v46 = vcombine.low %v68_v33, %v72_v35 }
  0x88   :  { %2191 = vmatprep.subr.bf16.mxu0 %v4583_v47  ;;  %2643 = vmatprep.subr.bf16.mxu1 %v4586_v48  ;;  %v80_v47 = vld [vmem:[%s7882_s0 + $0x1e8] sm:$0xff]  ;;  %v4641_v48 = vld [vmem:[%s7881_s1 + $0x580] ss:$16 sps:$4 sm:$0xff]  }
  0x89   :  { %v3796_v52 = vcombine.high %v76_v45, %v80_v47  ;;  %v4692_v33 = vld [vmem:[%s7881_s1 + $0x688] ss:$16 sps:$4 sm:$0xff]   ;;  %v4700_v35 = vld [vmem:[%s7881_s1 + $0x6ac] ss:$16 sps:$4 sm:$0xff]  }
  0x8a   :  { %2117 = vmatmul.mubr.bf16.gmra.mrb[4].mxu0 %v3747_v51  ;;  %2569 = vmatmul.mubr.bf16.gmra.mrb[4].mxu1 %v3747_v51  ;;  %v4652_v51 = vld [vmem:[%s7881_s1 + $0x5ac] ss:$16 sps:$4 sm:$0xff]  }
  0x8b   :  { %2192 = vmatpush1.bf16.msra.mxu0 %v4581_v49  ;;  %2644 = vmatpush1.bf16.msra.mxu1 %v4584_v50  ;;  %v4644_v49 = vld [vmem:[%s7881_s1 + $0x588] ss:$16 sps:$4 sm:$0xff]   ;;  %v4649_v50 = vld [vmem:[%s7881_s1 + $0x5a4] ss:$16 sps:$4 sm:$0xff]  }
  0x8c   :  { %2193 = vmatprep.subr.bf16.mxu0 %v4589_v54  ;;  %2645 = vmatprep.subr.bf16.mxu1 %v4592_v55  ;;  %v4650_v54 = vld [vmem:[%s7881_s1 + $0x5a8] ss:$16 sps:$4 sm:$0xff]   ;;  %v4655_v55 = vld [vmem:[%s7881_s1 + $0x5c4] ss:$16 sps:$4 sm:$0xff]  }
  0x8d   :  { %2126 = vmatprep.mubr.bf16.mxu0 %v3756_v56  ;;  %2578 = vmatprep.mubr.bf16.mxu1 %v3756_v56  ;;  %v4658_v56 = vld [vmem:[%s7881_s1 + $0x5cc] ss:$16 sps:$4 sm:$0xff]  }
  0x8f   :  { %2194 = vmatpush1.bf16.msra.mxu0 %v4587_v57  ;;  %2646 = vmatpush1.bf16.msra.mxu1 %v4590_v58  ;;  %v4653_v57 = vld [vmem:[%s7881_s1 + $0x5c0] ss:$16 sps:$4 sm:$0xff]   ;;  %v4656_v58 = vld [vmem:[%s7881_s1 + $0x5c8] ss:$16 sps:$4 sm:$0xff]  }
  0x90   :  { %2195 = vmatprep.subr.bf16.mxu0 %v4595_v59  ;;  %2647 = vmatprep.subr.bf16.mxu1 %v4598_v60  ;;  %v3795_v59 = vcombine.low %v76_v45, %v80_v47  ;;  %v21_v60 = vld [vmem:[%s7882_s0 + $0x10] sm:$0xff]  ;;  %v4704_v45 = vld [vmem:[%s7881_s1 + $0x6c8] ss:$16 sps:$4 sm:$0xff]   ;;  %v4712_v47 = vld [vmem:[%s7881_s1 + $0x6ec] ss:$16 sps:$4 sm:$0xff]  }
  0x92   :  { %2127 = vmatmul.mubr.bf16.gmra.mrb[8].mxu0 %v3755_v62  ;;  %2579 = vmatmul.mubr.bf16.gmra.mrb[8].mxu1 %v3755_v62  ;;  %v4661_v62 = vld [vmem:[%s7881_s1 + $0x5e4] ss:$16 sps:$4 sm:$0xff]  }
  0x93   :  { %2196 = vmatpush1.bf16.msra.mxu0 %v4593_v0  ;;  %2648 = vmatpush1.bf16.msra.mxu1 %v4596_v1  ;;  %v3742_v0 = vcombine.high %v21_v60, %v25_v61  ;;  %v4659_v1 = vld [vmem:[%s7881_s1 + $0x5e0] ss:$16 sps:$4 sm:$0xff]  }
  0x94   :  { %2197 = vmatprep.subr.bf16.mxu0 %v4601_v2  ;;  %2649 = vmatprep.subr.bf16.mxu1 %v4604_v3  ;;  %v4662_v2 = vld [vmem:[%s7881_s1 + $0x5e8] ss:$16 sps:$4 sm:$0xff]   ;;  %v4667_v3 = vld [vmem:[%s7881_s1 + $0x604] ss:$16 sps:$4 sm:$0xff]  }
  0x95   :  { %2136 = vmatprep.mubr.bf16.mxu0 %v3764_v4  ;;  %2588 = vmatprep.mubr.bf16.mxu1 %v3764_v4  ;;  %v4670_v4 = vld [vmem:[%s7881_s1 + $0x60c] ss:$16 sps:$4 sm:$0xff]  }
  0x97   :  { %2198 = vmatpush1.bf16.msra.mxu0 %v4599_v5  ;;  %2650 = vmatpush1.bf16.msra.mxu1 %v4602_v6  ;;  %v3741_v5 = vcombine.low %v21_v60, %v25_v61  ;;  %v29_v6 = vld [vmem:[%s7882_s0 + $0x50] sm:$0xff] }
  0x98   :  { %2199 = vmatprep.subr.bf16.mxu0 %v4607_v7  ;;  %2651 = vmatprep.subr.bf16.mxu1 %v4610_v8  ;;  %v33_v7 = vld [vmem:[%s7882_s0 + $0x70] sm:$0xff] }
  0x99   :  { %v4665_v8 = vld [vmem:[%s7881_s1 + $0x600] ss:$16 sps:$4 sm:$0xff]  }
  0x9a   :  { %2137 = vmatmul.mubr.bf16.gmra.mrb[12].mxu0 %v3763_v10  ;;  %2589 = vmatmul.mubr.bf16.gmra.mrb[12].mxu1 %v3763_v10  ;;  %v4673_v10 = vld [vmem:[%s7881_s1 + $0x624] ss:$16 sps:$4 sm:$0xff]   ;;  %v4719_v61 = vld [vmem:[%s7881_s1 + $0x720] ss:$16 sps:$4 sm:$0xff]  }
  0x9b   :  { %2200 = vmatpush1.bf16.msra.mxu0 %v4605_v12  ;;  %2652 = vmatpush1.bf16.msra.mxu1 %v4608_v13  ;;  %v3750_v12 = vcombine.high %v29_v6, %v33_v7  ;;  %v4671_v13 = vld [vmem:[%s7881_s1 + $0x620] ss:$16 sps:$4 sm:$0xff]  }
  0x9c   :  { %2201 = vmatprep.subr.bf16.mxu0 %v4613_v14  ;;  %2653 = vmatprep.subr.bf16.mxu1 %v4616_v15  ;;  %v4674_v14 = vld [vmem:[%s7881_s1 + $0x628] ss:$16 sps:$4 sm:$0xff]   ;;  %v4679_v15 = vld [vmem:[%s7881_s1 + $0x644] ss:$16 sps:$4 sm:$0xff]  }
  0x9d   :  { %2146 = vmatprep.mubr.bf16.mxu0 %v3772_v16  ;;  %2598 = vmatprep.mubr.bf16.mxu1 %v3772_v16  ;;  %v4682_v16 = vld [vmem:[%s7881_s1 + $0x64c] ss:$16 sps:$4 sm:$0xff]  }
  0x9f   :  { %2202 = vmatpush1.bf16.msra.mxu0 %v4611_v17  ;;  %2654 = vmatpush1.bf16.msra.mxu1 %v4614_v18  ;;  %v3749_v17 = vcombine.low %v29_v6, %v33_v7  ;;  %v37_v18 = vld [vmem:[%s7882_s0 + $0x90] sm:$0xff]  ;;  %v4736_v7 = vld [vmem:[%s7881_s1 + $0x76c] ss:$16 sps:$4 sm:$0xff]  }
  0xa0   :  { %2203 = vmatprep.subr.bf16.mxu0 %v4619_v19  ;;  %2655 = vmatprep.subr.bf16.mxu1 %v4622_v20  ;;  %v41_v19 = vld [vmem:[%s7882_s0 + $0xb0] sm:$0xff] }
  0xa1   :  { %v4677_v20 = vld [vmem:[%s7881_s1 + $0x640] ss:$16 sps:$4 sm:$0xff]   ;;  %v3758_v24 = vcombine.high %v37_v18, %v41_v19  ;;  %v4733_v6 = vld [vmem:[%s7881_s1 + $0x764] ss:$16 sps:$4 sm:$0xff]  }
  0xa2   :  { %2147 = vmatmul.mubr.bf16.gmra.mrb[16].mxu0 %v3771_v23  ;;  %2599 = vmatmul.mubr.bf16.gmra.mrb[16].mxu1 %v3771_v23  ;;  %v4688_v23 = vld [vmem:[%s7881_s1 + $0x66c] ss:$16 sps:$4 sm:$0xff]  }
  0xa3   :  { %2204 = vmatpush1.bf16.msra.mxu0 %v4617_v21  ;;  %2656 = vmatpush1.bf16.msra.mxu1 %v4620_v22  ;;  %v4680_v21 = vld [vmem:[%s7881_s1 + $0x648] ss:$16 sps:$4 sm:$0xff]   ;;  %v4685_v22 = vld [vmem:[%s7881_s1 + $0x664] ss:$16 sps:$4 sm:$0xff]  }
  0xa4   :  { %2205 = vmatprep.subr.bf16.mxu0 %v4625_v26  ;;  %2657 = vmatprep.subr.bf16.mxu1 %v4628_v27  ;;  %v4686_v26 = vld [vmem:[%s7881_s1 + $0x668] ss:$16 sps:$4 sm:$0xff]   ;;  %v4691_v27 = vld [vmem:[%s7881_s1 + $0x684] ss:$16 sps:$4 sm:$0xff]  }
  0xa5   :  { %2156 = vmatprep.mubr.bf16.mxu0 %v3780_v28  ;;  %2608 = vmatprep.mubr.bf16.mxu1 %v3780_v28  ;;  %v4694_v28 = vld [vmem:[%s7881_s1 + $0x68c] ss:$16 sps:$4 sm:$0xff]  }
  0xa7   :  { %2206 = vmatpush1.bf16.msra.mxu0 %v4623_v29  ;;  %2658 = vmatpush1.bf16.msra.mxu1 %v4626_v30  ;;  %v3757_v29 = vcombine.low %v37_v18, %v41_v19  ;;  %v45_v30 = vld [vmem:[%s7882_s0 + $0xd0] sm:$0xff]  ;;  %v4748_v19 = vld [vmem:[%s7881_s1 + $0x7ac] ss:$16 sps:$4 sm:$0xff]  }
  0xa8   :  { %2207 = vmatprep.subr.bf16.mxu0 %v4631_v31  ;;  %2659 = vmatprep.subr.bf16.mxu1 %v4634_v32  ;;  %v49_v31 = vld [vmem:[%s7882_s0 + $0xf0] sm:$0xff] }
  0xa9   :  { %v4689_v32 = vld [vmem:[%s7881_s1 + $0x680] ss:$16 sps:$4 sm:$0xff]   ;;  %v4745_v18 = vld [vmem:[%s7881_s1 + $0x7a4] ss:$16 sps:$4 sm:$0xff]  }
  0xaa   :  { %2157 = vmatmul.mubr.bf16.gmra.mrb[20].mxu0 %v3779_v34  ;;  %2609 = vmatmul.mubr.bf16.gmra.mrb[20].mxu1 %v3779_v34  ;;  %v4697_v34 = vld [vmem:[%s7881_s1 + $0x6a4] ss:$16 sps:$4 sm:$0xff]  }
  0xab   :  { %2208 = vmatpush1.bf16.msra.mxu0 %v4629_v36  ;;  %2660 = vmatpush1.bf16.msra.mxu1 %v4632_v37  ;;  %v3766_v36 = vcombine.high %v45_v30, %v49_v31  ;;  %v4695_v37 = vld [vmem:[%s7881_s1 + $0x6a0] ss:$16 sps:$4 sm:$0xff]  }
  0xac   :  { %2209 = vmatprep.subr.bf16.mxu0 %v4637_v38  ;;  %2661 = vmatprep.subr.bf16.mxu1 %v4640_v39  ;;  %v4698_v38 = vld [vmem:[%s7881_s1 + $0x6a8] ss:$16 sps:$4 sm:$0xff]   ;;  %v4703_v39 = vld [vmem:[%s7881_s1 + $0x6c4] ss:$16 sps:$4 sm:$0xff]  }
  0xad   :  { %2166 = vmatprep.mubr.bf16.mxu0 %v3788_v40  ;;  %2618 = vmatprep.mubr.bf16.mxu1 %v3788_v40  ;;  %v4706_v40 = vld [vmem:[%s7881_s1 + $0x6cc] ss:$16 sps:$4 sm:$0xff]  }
  0xaf   :  { %2210 = vmatpush1.bf16.msra.mxu0 %v4635_v41  ;;  %2662 = vmatpush1.bf16.msra.mxu1 %v4638_v42  ;;  %v3765_v41 = vcombine.low %v45_v30, %v49_v31  ;;  %v53_v42 = vld [vmem:[%s7882_s0 + $0x110] sm:$0xff]  ;;  %v4760_v31 = vld [vmem:[%s7881_s1 + $0x7ec] ss:$16 sps:$4 sm:$0xff]  }
  0xb0   :  { %2211 = vmatprep.subr.bf16.mxu0 %v4643_v43  ;;  %2663 = vmatprep.subr.bf16.mxu1 %v4646_v44  ;;  %v57_v43 = vld [vmem:[%s7882_s0 + $0x130] sm:$0xff] }
  0xb1   :  { %v4701_v44 = vld [vmem:[%s7881_s1 + $0x6c0] ss:$16 sps:$4 sm:$0xff]   ;;  %v4757_v30 = vld [vmem:[%s7881_s1 + $0x7e4] ss:$16 sps:$4 sm:$0xff]  }
  0xb2   :  { %2167 = vmatmul.mubr.bf16.gmra.mrb[24].mxu0 %v3787_v46  ;;  %2619 = vmatmul.mubr.bf16.gmra.mrb[24].mxu1 %v3787_v46  ;;  %v4709_v46 = vld [vmem:[%s7881_s1 + $0x6e4] ss:$16 sps:$4 sm:$0xff]  }
  0xb3   :  { %2212 = vmatpush1.bf16.msra.mxu0 %v4641_v48  ;;  %2664 = vmatpush1.bf16.msra.mxu1 %v4644_v49  ;;  %v3774_v48 = vcombine.high %v53_v42, %v57_v43  ;;  %v4707_v49 = vld [vmem:[%s7881_s1 + $0x6e0] ss:$16 sps:$4 sm:$0xff]  }
  0xb4   :  { %2213 = vmatprep.subr.bf16.mxu0 %v4649_v50  ;;  %2665 = vmatprep.subr.bf16.mxu1 %v4652_v51  ;;  %v4710_v50 = vld [vmem:[%s7881_s1 + $0x6e8] ss:$16 sps:$4 sm:$0xff]   ;;  %v4715_v51 = vld [vmem:[%s7881_s1 + $0x704] ss:$16 sps:$4 sm:$0xff]  }
  0xb5   :  { %2176 = vmatprep.mubr.bf16.mxu0 %v3796_v52  ;;  %2628 = vmatprep.mubr.bf16.mxu1 %v3796_v52  ;;  %v4718_v52 = vld [vmem:[%s7881_s1 + $0x70c] ss:$16 sps:$4 sm:$0xff]  }
  0xb7   :  { %2214 = vmatpush1.bf16.msra.mxu0 %v4647_v53  ;;  %2666 = vmatpush1.bf16.msra.mxu1 %v4650_v54  ;;  %v3773_v53 = vcombine.low %v53_v42, %v57_v43  ;;  %v61_v54 = vld [vmem:[%s7882_s0 + $0x150] sm:$0xff]  ;;  %v46_v43 = vld [vmem:[%s7882_s0 + $0xd8] sm:$0xff] }
  0xb8   :  { %2215 = vmatprep.subr.bf16.mxu0 %v4655_v55  ;;  %2667 = vmatprep.subr.bf16.mxu1 %v4658_v56  ;;  %v65_v55 = vld [vmem:[%s7882_s0 + $0x170] sm:$0xff] }
  0xb9   :  { %v4713_v56 = vld [vmem:[%s7881_s1 + $0x700] ss:$16 sps:$4 sm:$0xff]   ;;  %v3782_v60 = vcombine.high %v61_v54, %v65_v55 }
  0xba   :  { %2177 = vmatmul.mubr.bf16.gmra.mrb[28].mxu0 %v3795_v59  ;;  %2629 = vmatmul.mubr.bf16.gmra.mrb[28].mxu1 %v3795_v59  ;;  %v4724_v59 = vld [vmem:[%s7881_s1 + $0x72c] ss:$16 sps:$4 sm:$0xff]  }
  0xbb   :  { %2216 = vmatpush1.bf16.msra.mxu0 %v4653_v57  ;;  %2668 = vmatpush1.bf16.msra.mxu1 %v4656_v58  ;;  %v4716_v57 = vld [vmem:[%s7881_s1 + $0x708] ss:$16 sps:$4 sm:$0xff]   ;;  %v4721_v58 = vld [vmem:[%s7881_s1 + $0x724] ss:$16 sps:$4 sm:$0xff]  }
  0xbc   :  { %2217 = vmatprep.subr.bf16.mxu0 %v4661_v62  ;;  %2669 = vmatprep.subr.bf16.mxu1 %v4664_v63  ;;  %v4722_v62 = vld [vmem:[%s7881_s1 + $0x728] ss:$16 sps:$4 sm:$0xff]   ;;  %v4727_v63 = vld [vmem:[%s7881_s1 + $0x744] ss:$16 sps:$4 sm:$0xff]  }
  0xbd   :  { %2219 = vmatprep.mubr.bf16.mxu0 %v3742_v0  ;;  %2671 = vmatprep.mubr.bf16.mxu1 %v3742_v0  ;;  %v4730_v0 = vld [vmem:[%s7881_s1 + $0x74c] ss:$16 sps:$4 sm:$0xff]  }
  0xbf   :  { %2218 = vmatpush1.bf16.msra.mxu0 %v4659_v1  ;;  %2670 = vmatpush1.bf16.msra.mxu1 %v4662_v2  ;;  %v3781_v1 = vcombine.low %v61_v54, %v65_v55  ;;  %v69_v2 = vld [vmem:[%s7882_s0 + $0x190] sm:$0xff]  ;;  %v70_v55 = vld [vmem:[%s7882_s0 + $0x198] sm:$0xff] }
  0xc0   :  { %2300 = vmatprep.subr.bf16.mxu0 %v4667_v3  ;;  %2752 = vmatprep.subr.bf16.mxu1 %v4670_v4  ;;  %v73_v3 = vld [vmem:[%s7882_s0 + $0x1b0] sm:$0xff] }
  0xc1   :  { %v4725_v4 = vld [vmem:[%s7881_s1 + $0x740] ss:$16 sps:$4 sm:$0xff]  }
  0xc2   :  { %2220 = vmatmul.mubr.bf16.vlgmr.msra.gmra.mrb[0].mxu0 %v3741_v5  ;;  %2672 = vmatmul.mubr.bf16.vlgmr.msra.gmra.mrb[0].mxu1 %v3741_v5  ;;  %v4728_v5 = vld [vmem:[%s7881_s1 + $0x748] ss:$16 sps:$4 sm:$0xff]  }
  0xc3   :  { %2301 = vmatpush1.bf16.msra.mxu0 %v4665_v8  ;;  %2753 = vmatpush1.bf16.msra.mxu1 %v4668_v9  ;;  %v3790_v8 = vcombine.high %v69_v2, %v73_v3  ;;  %v4731_v9 = vld [vmem:[%s7881_s1 + $0x760] ss:$16 sps:$4 sm:$0xff]  }
  0xc4   :  { %2302 = vmatprep.subr.bf16.mxu0 %v4673_v10  ;;  %2754 = vmatprep.subr.bf16.mxu1 %v4676_v11  ;;  %v4734_v10 = vld [vmem:[%s7881_s1 + $0x768] ss:$16 sps:$4 sm:$0xff]   ;;  %v4739_v11 = vld [vmem:[%s7881_s1 + $0x784] ss:$16 sps:$4 sm:$0xff]  }
  0xc5   :  { %2229 = vmatprep.mubr.bf16.mxu0 %v3750_v12  ;;  %2681 = vmatprep.mubr.bf16.mxu1 %v3750_v12  ;;  %v4742_v12 = vld [vmem:[%s7881_s1 + $0x78c] ss:$16 sps:$4 sm:$0xff]  }
  0xc7   :  { %2303 = vmatpush1.bf16.msra.mxu0 %v4671_v13  ;;  %2755 = vmatpush1.bf16.msra.mxu1 %v4674_v14  ;;  %v3789_v13 = vcombine.low %v69_v2, %v73_v3  ;;  %v77_v14 = vld [vmem:[%s7882_s0 + $0x1d0] sm:$0xff]  ;;  %v339_v2 = vld [vmem:[%s7884_s2] sm:$0xf] }
  0xc8   :  { %2304 = vmatprep.subr.bf16.mxu0 %v4679_v15  ;;  %2756 = vmatprep.subr.bf16.mxu1 %v4682_v16  ;;  %v81_v15 = vld [vmem:[%s7882_s0 + $0x1f0] sm:$0xff] }
  0xc9   :  { %v4737_v16 = vld [vmem:[%s7881_s1 + $0x780] ss:$16 sps:$4 sm:$0xff]  }
  0xca   :  { %2230 = vmatmul.mubr.bf16.gmra.mrb[4].mxu0 %v3749_v17  ;;  %2682 = vmatmul.mubr.bf16.gmra.mrb[4].mxu1 %v3749_v17  ;;  %v4740_v17 = vld [vmem:[%s7881_s1 + $0x788] ss:$16 sps:$4 sm:$0xff]  }
  0xcb   :  { %2305 = vmatpush1.bf16.msra.mxu0 %v4677_v20  ;;  %2757 = vmatpush1.bf16.msra.mxu1 %v4680_v21  ;;  %v3798_v20 = vcombine.high %v77_v14, %v81_v15  ;;  %v4743_v21 = vld [vmem:[%s7881_s1 + $0x7a0] ss:$16 sps:$4 sm:$0xff]  }
  0xcc   :  { %2306 = vmatprep.subr.bf16.mxu0 %v4685_v22  ;;  %2758 = vmatprep.subr.bf16.mxu1 %v4688_v23  ;;  %v4746_v22 = vld [vmem:[%s7881_s1 + $0x7a8] ss:$16 sps:$4 sm:$0xff]   ;;  %v4751_v23 = vld [vmem:[%s7881_s1 + $0x7c4] ss:$16 sps:$4 sm:$0xff]  }
  0xcd   :  { %2239 = vmatprep.mubr.bf16.mxu0 %v3758_v24  ;;  %2691 = vmatprep.mubr.bf16.mxu1 %v3758_v24  ;;  %v4754_v24 = vld [vmem:[%s7881_s1 + $0x7cc] ss:$16 sps:$4 sm:$0xff]  }
  0xcf   :  { %2307 = vmatpush1.bf16.msra.mxu0 %v4683_v25  ;;  %2759 = vmatpush1.bf16.msra.mxu1 %v4686_v26  ;;  %v3797_v25 = vcombine.low %v77_v14, %v81_v15  ;;  %v22_v26 = vld [vmem:[%s7882_s0 + $0x18] sm:$0xff]  ;;  %v5792_v14 = vld [vmem:[%s7883_s3 + $0x110] sm:$0xff] }
  0xd0   :  { %2308 = vmatprep.subr.bf16.mxu0 %v4691_v27  ;;  %2760 = vmatprep.subr.bf16.mxu1 %v4694_v28  ;;  %v26_v27 = vld [vmem:[%s7882_s0 + $0x38] sm:$0xff]  ;;  %v4749_v28 = vld [vmem:[%s7881_s1 + $0x7c0] ss:$16 sps:$4 sm:$0xff]  }
  0xd1   :  { %v5797_v15 = vld [vmem:[%s7883_s3 + $0x118] sm:$0xff] }
  0xd2   :  { %2240 = vmatmul.mubr.bf16.gmra.mrb[8].mxu0 %v3757_v29  ;;  %2692 = vmatmul.mubr.bf16.gmra.mrb[8].mxu1 %v3757_v29  ;;  %v4752_v29 = vld [vmem:[%s7881_s1 + $0x7c8] ss:$16 sps:$4 sm:$0xff]  }
  0xd3   :  { %2309 = vmatpush1.bf16.msra.mxu0 %v4689_v32  ;;  %2761 = vmatpush1.bf16.msra.mxu1 %v4692_v33  ;;  %v3744_v32 = vcombine.high %v22_v26, %v26_v27  ;;  %v4755_v33 = vld [vmem:[%s7881_s1 + $0x7e0] ss:$16 sps:$4 sm:$0xff]  }
  0xd4   :  { %2310 = vmatprep.subr.bf16.mxu0 %v4697_v34  ;;  %2762 = vmatprep.subr.bf16.mxu1 %v4700_v35  ;;  %v4758_v34 = vld [vmem:[%s7881_s1 + $0x7e8] ss:$16 sps:$4 sm:$0xff]  }
  0xd5   :  { %2249 = vmatprep.mubr.bf16.mxu0 %v3766_v36  ;;  %2701 = vmatprep.mubr.bf16.mxu1 %v3766_v36  ;;  %v30_v35 = vld [vmem:[%s7882_s0 + $0x58] sm:$0xff] }
  0xd6   :  { %v34_v36 = vld [vmem:[%s7882_s0 + $0x78] sm:$0xff] }
  0xd7   :  { %2311 = vmatpush1.bf16.msra.mxu0 %v4695_v37  ;;  %2763 = vmatpush1.bf16.msra.mxu1 %v4698_v38  ;;  %v3743_v37 = vcombine.low %v22_v26, %v26_v27  ;;  %v3752_v38 = vcombine.high %v30_v35, %v34_v36  ;;  %v5852_v26 = vld [vmem:[%s7883_s3 + $0x50] sm:$0xff]  ;;  %v5857_v27 = vld [vmem:[%s7883_s3 + $0x58] sm:$0xff] }
  0xd8   :  { %2312 = vmatprep.subr.bf16.mxu0 %v4703_v39  ;;  %2764 = vmatprep.subr.bf16.mxu1 %v4706_v40  ;;  %v38_v39 = vld [vmem:[%s7882_s0 + $0x98] sm:$0xff]  ;;  %7966 = vst [vmem:[#allocation8_spill] sm:$0xff] %v5857_v27  ;;  %v3222_v27 = vld [vmem:[%s7883_s3 + $0x228] sm:$0xff] }
  0xd9   :  { %v42_v40 = vld [vmem:[%s7882_s0 + $0xb8] sm:$0xff] }
  0xda   :  { %2250 = vmatmul.mubr.bf16.gmra.mrb[12].mxu0 %v3765_v41  ;;  %2702 = vmatmul.mubr.bf16.gmra.mrb[12].mxu1 %v3765_v41  ;;  %v3751_v41 = vcombine.low %v30_v35, %v34_v36  ;;  %v3760_v42 = vcombine.high %v38_v39, %v42_v40  ;;  %v5894_v35 = vld [vmem:[%s7883_s3 + $0x70] sm:$0xff]  ;;  %v5899_v36 = vld [vmem:[%s7883_s3 + $0x78] sm:$0xff] }
  0xdb   :  { %2313 = vmatpush1.bf16.msra.mxu0 %v4701_v44  ;;  %2765 = vmatpush1.bf16.msra.mxu1 %v4704_v45  ;;  %v50_v44 = vld [vmem:[%s7882_s0 + $0xf8] sm:$0xff]  ;;  %v3759_v45 = vcombine.low %v38_v39, %v42_v40  ;;  %7972 = vst [vmem:[#allocation14_spill] sm:$0xff] %v5899_v36  ;;  %v5914_v39 = vld [vmem:[%s7883_s3 + $0x170] sm:$0xff] }
  0xdc   :  { %2314 = vmatprep.subr.bf16.mxu0 %v4709_v46  ;;  %2766 = vmatprep.subr.bf16.mxu1 %v4712_v47  ;;  %v3768_v46 = vcombine.high %v46_v43, %v50_v44  ;;  %v54_v47 = vld [vmem:[%s7882_s0 + $0x118] sm:$0xff]  ;;  %v3227_v36 = vld [vmem:[%s7883_s3 + $0x250] sm:$0xff] }
  0xdd   :  { %2259 = vmatprep.mubr.bf16.mxu0 %v3774_v48  ;;  %2711 = vmatprep.mubr.bf16.mxu1 %v3774_v48  ;;  %v58_v48 = vld [vmem:[%s7882_s0 + $0x138] sm:$0xff] }
  0xde   :  { %v5919_v40 = vld [vmem:[%s7883_s3 + $0x178] sm:$0xff] }
  0xdf   :  { %2315 = vmatpush1.bf16.msra.mxu0 %v4707_v49  ;;  %2767 = vmatpush1.bf16.msra.mxu1 %v4710_v50  ;;  %v3767_v49 = vcombine.low %v46_v43, %v50_v44  ;;  %v3776_v50 = vcombine.high %v54_v47, %v58_v48  ;;  %7974 = vst [vmem:[#allocation16_spill] sm:$0xff] %v5919_v40  ;;  %v3226_v40 = vld [vmem:[%s7883_s3 + $0x248] sm:$0xff] }
  0xe0   :  { %2316 = vmatprep.subr.bf16.mxu0 %v4715_v51  ;;  %2768 = vmatprep.subr.bf16.mxu1 %v4718_v52  ;;  %v62_v51 = vld [vmem:[%s7882_s0 + $0x158] sm:$0xff] }
  0xe1   :  { %v66_v52 = vld [vmem:[%s7882_s0 + $0x178] sm:$0xff] }
  0xe2   :  { %2260 = vmatmul.mubr.bf16.gmra.mrb[16].mxu0 %v3773_v53  ;;  %2712 = vmatmul.mubr.bf16.gmra.mrb[16].mxu1 %v3773_v53  ;;  %v3775_v53 = vcombine.low %v54_v47, %v58_v48  ;;  %v3784_v54 = vcombine.high %v62_v51, %v66_v52  ;;  %v5945_v47 = vld [vmem:[%s7883_s3 + $0x98] sm:$0xff]  ;;  %v5950_v48 = vld [vmem:[%s7883_s3 + $0xa0] sm:$0xff] }
  0xe3   :  { %2317 = vmatpush1.bf16.msra.mxu0 %v4713_v56  ;;  %2769 = vmatpush1.bf16.msra.mxu1 %v4716_v57  ;;  %v74_v56 = vld [vmem:[%s7882_s0 + $0x1b8] sm:$0xff]  ;;  %v3783_v57 = vcombine.low %v62_v51, %v66_v52  ;;  %7979 = vst [vmem:[#allocation21_spill] sm:$0xff] %v5945_v47  ;;  %7980 = vst [vmem:[#allocation22_spill] sm:$0xff] %v5950_v48  ;;  %v5970_v52 = vld [vmem:[%s7883_s3 + $0x1a0] sm:$0xff] }
  0xe4   :  { %2318 = vmatprep.subr.bf16.mxu0 %v4721_v58  ;;  %2770 = vmatprep.subr.bf16.mxu1 %v4724_v59  ;;  %v3792_v58 = vcombine.high %v70_v55, %v74_v56  ;;  %v78_v59 = vld [vmem:[%s7882_s0 + $0x1d8] sm:$0xff]  ;;  %7982 = vst [vmem:[#allocation24_spill] sm:$0xff] %v5970_v52  ;;  %v3231_v47 = vld [vmem:[%s7883_s3 + $0x270] sm:$0xff]  ;;  %v3237_v48 = vld [vmem:[%s7883_s3 + $0x2a0] sm:$0xff] }
  0xe5   :  { %2269 = vmatprep.mubr.bf16.mxu0 %v3782_v60  ;;  %2721 = vmatprep.mubr.bf16.mxu1 %v3782_v60  ;;  %v82_v60 = vld [vmem:[%s7882_s0 + $0x1f8] sm:$0xff] }
  0xe6   :  { %v5965_v51 = vld [vmem:[%s7883_s3 + $0x198] sm:$0xff] }
  0xe7   :  { %2319 = vmatpush1.bf16.msra.mxu0 %v4719_v61  ;;  %2771 = vmatpush1.bf16.msra.mxu1 %v4722_v62  ;;  %v3791_v61 = vcombine.low %v70_v55, %v74_v56  ;;  %v3800_v62 = vcombine.high %v78_v59, %v82_v60  ;;  %7981 = vst [vmem:[#allocation23_spill] sm:$0xff] %v5965_v51  ;;  %v5982_v55 = vld [vmem:[%s7883_s3 + $0xb0] sm:$0xff]  ;;  %v5987_v56 = vld [vmem:[%s7883_s3 + $0xb8] sm:$0xff]  ;;  %v3230_v51 = vld [vmem:[%s7883_s3 + $0x268] sm:$0xff] }
  0xe8   :  { %2320 = vmatprep.subr.bf16.mxu0 %v4727_v63  ;;  %2772 = vmatprep.subr.bf16.mxu1 %v4730_v0  ;;  %v3799_v63 = vcombine.low %v78_v59, %v82_v60  ;;  %v341_v0 = vlaneseq  ;;  %7983 = vst [vmem:[#allocation25_spill] sm:$0xff] %v5987_v56  ;;  %v6002_v59 = vld [vmem:[%s7883_s3 + $0x1b0] sm:$0xff]  ;;  %v6007_v60 = vld [vmem:[%s7883_s3 + $0x1b8] sm:$0xff] }
  0xe9   :  { %7985 = vst [vmem:[#allocation27_spill] sm:$0xff] %v6007_v60  ;;  %v3234_v60 = vld [vmem:[%s7883_s3 + $0x288] sm:$0xff]  ;;  %v3235_v56 = vld [vmem:[%s7883_s3 + $0x290] sm:$0xff]  ;;  %v3236_v52 = vld [vmem:[%s7883_s3 + $0x298] sm:$0xff] }
  0xea   :  { %2270 = vmatmul.mubr.bf16.gmra.mrb[20].mxu0 %v3781_v1  ;;  %2722 = vmatmul.mubr.bf16.gmra.mrb[20].mxu1 %v3781_v1  ;;  %v342_v1 = vshrl.u32 %v341_v0, 7  ;;  %v6055_v0 = vld [vmem:[%s7883_s3 + $0x1d8] sm:$0xff] }
  0xeb   :  { %2321 = vmatpush1.bf16.msra.mxu0 %v4725_v4  ;;  %2773 = vmatpush1.bf16.msra.mxu1 %v4728_v5  ;;  %v5757_v4 = vld [vmem:[%s7883_s3] sm:$0xff]  ;;  %7990 = vst [vmem:[#allocation32_spill] sm:$0xff] %v6055_v0 }
  0xec   :  { %2322 = vmatprep.subr.bf16.mxu0 %v4733_v6  ;;  %2774 = vmatprep.subr.bf16.mxu1 %v4736_v7  ;;  %v343_v3 = vsub.s32 0, %v342_v1  ;;  %v5762_v5 = vld [vmem:[%s7883_s3 + $0x100] sm:$0xff]  ;;  %v351_v6 = vsub.s32 2, %v342_v1  ;;  %v347_v7 = vsub.s32 1, %v342_v1 }
  0xed   :  { %2279 = vmatprep.mubr.bf16.mxu0 %v3790_v8  ;;  %2731 = vmatprep.mubr.bf16.mxu1 %v3790_v8  ;;  %v355_v8 = vsub.s32 3, %v342_v1  ;;  %v6050_v1 = vld [vmem:[%s7883_s3 + $0x1d0] sm:$0xff] }
  0xee   :  { %v5928_v43 = vrot.slane %v339_v2, %v347_v7  ;;  %v6040_v7 = vld [vmem:[%s7883_s3 + $0xe0] sm:$0xff]  ;;  %7989 = vst [vmem:[#allocation31_spill] sm:$0xff] %v6050_v1  ;;  %v3238_v1 = vld [vmem:[%s7883_s3 + $0x2a8] sm:$0xff] }
  0xef   :  { %2323 = vmatpush1.bf16.msra.mxu0 %v4731_v9  ;;  %2775 = vmatpush1.bf16.msra.mxu1 %v4734_v10  ;;  %v5767_v9 = vld [vmem:[%s7883_s3 + $0x8] sm:$0xff]  ;;  %v5772_v10 = vld [vmem:[%s7883_s3 + $0x10] sm:$0xff]  ;;  %v5930_v44 = vrot.slane %v339_v2, %v355_v8  ;;  %7988 = vst [vmem:[#allocation30_spill] sm:$0xff] %v6040_v7 }
  0xf0   :  { %2324 = vmatprep.subr.bf16.mxu0 %v4739_v11  ;;  %2776 = vmatprep.subr.bf16.mxu1 %v4742_v12  ;;  %v5777_v11 = vld [vmem:[%s7883_s3 + $0x18] sm:$0xff]  ;;  %v5782_v12 = vld [vmem:[%s7883_s3 + $0x20] sm:$0xff]  ;;  %7977 = vst [vmem:[#allocation19_spill] sm:$0xff] %v5928_v43  ;;  %v6045_v8 = vld [vmem:[%s7883_s3 + $0x1c8] sm:$0xff] }
  0xf1   :  { %7978 = vst [vmem:[#allocation20_spill] sm:$0xff] %v5930_v44  ;;  %v6088_v44 = vld [vmem:[%s7883_s3 + $0x1f0] sm:$0xff]  ;;  %v3217_v43 = vld [vmem:[%s7883_s3 + $0x200] sm:$0xff] }
  0xf2   :  { %2280 = vmatmul.mubr.bf16.gmra.mrb[24].mxu0 %v3789_v13  ;;  %2732 = vmatmul.mubr.bf16.gmra.mrb[24].mxu1 %v3789_v13  ;;  %v5787_v13 = vld [vmem:[%s7883_s3 + $0x108] sm:$0xff] }
  0xf3   :  { %2325 = vmatpush1.bf16.msra.mxu0 %v4737_v16  ;;  %2777 = vmatpush1.bf16.msra.mxu1 %v4740_v17  ;;  %v5802_v16 = vld [vmem:[%s7883_s3 + $0x120] sm:$0xff]  ;;  %v5807_v17 = vld [vmem:[%s7883_s3 + $0x28] sm:$0xff] }
  0xf4   :  { %2326 = vmatprep.subr.bf16.mxu0 %v4745_v18  ;;  %2778 = vmatprep.subr.bf16.mxu1 %v4748_v19  ;;  %v5812_v18 = vld [vmem:[%s7883_s3 + $0x30] sm:$0xff]  ;;  %v5817_v19 = vld [vmem:[%s7883_s3 + $0x38] sm:$0xff] }
  0xf5   :  { %2289 = vmatprep.mubr.bf16.mxu0 %v3798_v20  ;;  %2741 = vmatprep.mubr.bf16.mxu1 %v3798_v20  ;;  %7960 = vst [vmem:[#allocation2_spill] sm:$0xff] %v5812_v18  ;;  %7961 = vst [vmem:[#allocation3_spill] sm:$0xff] %v5817_v19  ;;  %v5822_v20 = vld [vmem:[%s7883_s3 + $0x40] sm:$0xff]  ;;  %v6112_v18 = vld [vmem:[%s7883_s3 + $0x1f8] sm:$0xff] }
  0xf6   :  { %7962 = vst [vmem:[#allocation4_spill] sm:$0xff] %v5822_v20  ;;  %v3219_v20 = vld [vmem:[%s7883_s3 + $0x210] sm:$0xff]  ;;  %v3221_v19 = vld [vmem:[%s7883_s3 + $0x220] sm:$0xff] }
  0xf7   :  { %2327 = vmatpush1.bf16.msra.mxu0 %v4743_v21  ;;  %2779 = vmatpush1.bf16.msra.mxu1 %v4746_v22  ;;  %v5827_v21 = vld [vmem:[%s7883_s3 + $0x128] sm:$0xff]  ;;  %v5832_v22 = vld [vmem:[%s7883_s3 + $0x130] sm:$0xff] }
  0xf8   :  { %2328 = vmatprep.subr.bf16.mxu0 %v4751_v23  ;;  %2780 = vmatprep.subr.bf16.mxu1 %v4754_v24  ;;  %7963 = vst [vmem:[#allocation5_spill] sm:$0xff] %v5832_v22  ;;  %v5837_v23 = vld [vmem:[%s7883_s3 + $0x138] sm:$0xff]  ;;  %v5842_v24 = vld [vmem:[%s7883_s3 + $0x140] sm:$0xff] }
  0xf9   :  { %7964 = vst [vmem:[#allocation6_spill] sm:$0xff] %v5837_v23  ;;  %7965 = vst [vmem:[#allocation7_spill] sm:$0xff] %v5842_v24  ;;  %v6107_v22 = vld [vmem:[%s7883_s3 + $0xf8] sm:$0xff] }
  0xfa   :  { %2290 = vmatmul.mubr.bf16.gmra.mrb[28].mxu0 %v3797_v25  ;;  %2742 = vmatmul.mubr.bf16.gmra.mrb[28].mxu1 %v3797_v25  ;;  %v5847_v25 = vld [vmem:[%s7883_s3 + $0x48] sm:$0xff]  ;;  %v3220_v23 = vld [vmem:[%s7883_s3 + $0x218] sm:$0xff]  ;;  %v3689_v0 = vmax.f32 %v6107_v22, %v6112_v18 }
  0xfb   :  { %2329 = vmatpush1.bf16.msra.mxu0 %v4749_v28  ;;  %2781 = vmatpush1.bf16.msra.mxu1 %v4752_v29  ;;  %v5862_v28 = vld [vmem:[%s7883_s3 + $0x60] sm:$0xff]  ;;  %v5867_v29 = vld [vmem:[%s7883_s3 + $0x148] sm:$0xff]  ;;  %v3224_v24 = vld [vmem:[%s7883_s3 + $0x238] sm:$0xff] }
  0xfc   :  { %2330 = vmatprep.subr.bf16.mxu0 %v4757_v30  ;;  %2782 = vmatprep.subr.bf16.mxu1 %v4760_v31  ;;  %7967 = vst [vmem:[#allocation9_spill] sm:$0xff] %v5862_v28  ;;  %v5872_v30 = vld [vmem:[%s7883_s3 + $0x150] sm:$0xff]  ;;  %v5877_v31 = vld [vmem:[%s7883_s3 + $0x158] sm:$0xff]  ;;  %v8005_v22 = vld [vmem:[#allocation3_spill] sm:$0xff] }
  0xfd   :  { %2332 = vmatprep.mubr.bf16.mxu0 %v3744_v32  ;;  %2784 = vmatprep.mubr.bf16.mxu1 %v3744_v32  ;;  %7968 = vst [vmem:[#allocation10_spill] sm:$0xff] %v5872_v30  ;;  %7969 = vst [vmem:[#allocation11_spill] sm:$0xff] %v5877_v31  ;;  %v5882_v32 = vld [vmem:[%s7883_s3 + $0x160] sm:$0xff]  ;;  %v3223_v30 = vld [vmem:[%s7883_s3 + $0x230] sm:$0xff] }
  0xfe   :  { %7970 = vst [vmem:[#allocation12_spill] sm:$0xff] %v5882_v32  ;;  %v3225_v32 = vld [vmem:[%s7883_s3 + $0x240] sm:$0xff]  ;;  %v3228_v28 = vld [vmem:[%s7883_s3 + $0x258] sm:$0xff] }
  0xff   :  { %2331 = vmatpush1.bf16.msra.mxu0 %v4755_v33  ;;  %2783 = vmatpush1.bf16.msra.mxu1 %v4758_v34  ;;  %v5884_v33 = vrot.slane %v339_v2, %v343_v3  ;;  %v5889_v34 = vld [vmem:[%s7883_s3 + $0x68] sm:$0xff]  ;;  %v6030_v3 = vld [vmem:[%s7883_s3 + $0xd0] sm:$0xff]  ;;  %v3229_v31 = vld [vmem:[%s7883_s3 + $0x260] sm:$0xff] }
 0x100   :  { %v8003_v18 = vld [vmem:[#allocation5_spill] sm:$0xff] }
 0x101   :  { %7971 = vst [vmem:[#allocation13_spill] sm:$0xff] %v5884_v33  ;;  %v6078_v33 = vld [vmem:[%s7883_s3 + $0xf0] sm:$0xff] }
 0x102   :  { %2333 = vmatmul.mubr.bf16.vlgmr.msra.gmra.mrb[0].mxu0 %v3743_v37  ;;  %2785 = vmatmul.mubr.bf16.vlgmr.msra.gmra.mrb[0].mxu1 %v3743_v37  ;;  %v5904_v37 = vld [vmem:[%s7883_s3 + $0x80] sm:$0xff] }
 0x103   :  { %2342 = vmatprep.mubr.bf16.mxu0 %v3752_v38  ;;  %2794 = vmatprep.mubr.bf16.mxu1 %v3752_v38  ;;  %7973 = vst [vmem:[#allocation15_spill] sm:$0xff] %v5904_v37  ;;  %v5909_v38 = vld [vmem:[%s7883_s3 + $0x168] sm:$0xff]  ;;  %v3233_v37 = vld [vmem:[%s7883_s3 + $0x280] sm:$0xff] }
 0x10a   :  { %2343 = vmatmul.mubr.bf16.gmra.mrb[4].mxu0 %v3751_v41  ;;  %2795 = vmatmul.mubr.bf16.gmra.mrb[4].mxu1 %v3751_v41  ;;  %v5924_v41 = vld [vmem:[%s7883_s3 + $0x180] sm:$0xff] }
 0x10b   :  { %2352 = vmatprep.mubr.bf16.mxu0 %v3760_v42  ;;  %2804 = vmatprep.mubr.bf16.mxu1 %v3760_v42  ;;  %7975 = vst [vmem:[#allocation17_spill] sm:$0xff] %v5924_v41  ;;  %v5926_v42 = vrot.slane %v339_v2, %v351_v6  ;;  %v6025_v2 = vld [vmem:[%s7883_s3 + $0xc8] sm:$0xff]  ;;  %v6035_v6 = vld [vmem:[%s7883_s3 + $0xd8] sm:$0xff] }
 0x10c   :  { %7987 = vst [vmem:[#allocation29_spill] sm:$0xff] %v6035_v6  ;;  %v3232_v41 = vld [vmem:[%s7883_s3 + $0x278] sm:$0xff] }
 0x10d   :  { %7976 = vst [vmem:[#allocation18_spill] sm:$0xff] %v5926_v42  ;;  %v6073_v42 = vld [vmem:[%s7883_s3 + $0xe8] sm:$0xff] }
 0x112   :  { %2353 = vmatmul.mubr.bf16.gmra.mrb[8].mxu0 %v3759_v45  ;;  %2805 = vmatmul.mubr.bf16.gmra.mrb[8].mxu1 %v3759_v45  ;;  %v5935_v45 = vld [vmem:[%s7883_s3 + $0x88] sm:$0xff] }
 0x113   :  { %2362 = vmatprep.mubr.bf16.mxu0 %v3768_v46  ;;  %2814 = vmatprep.mubr.bf16.mxu1 %v3768_v46  ;;  %v5940_v46 = vld [vmem:[%s7883_s3 + $0x90] sm:$0xff] }
 0x11a   :  { %2363 = vmatmul.mubr.bf16.gmra.mrb[12].mxu0 %v3767_v49  ;;  %2815 = vmatmul.mubr.bf16.gmra.mrb[12].mxu1 %v3767_v49  ;;  %v5955_v49 = vld [vmem:[%s7883_s3 + $0x188] sm:$0xff] }
 0x11b   :  { %2372 = vmatprep.mubr.bf16.mxu0 %v3776_v50  ;;  %2824 = vmatprep.mubr.bf16.mxu1 %v3776_v50  ;;  %v5960_v50 = vld [vmem:[%s7883_s3 + $0x190] sm:$0xff] }
 0x122   :  { %2373 = vmatmul.mubr.bf16.gmra.mrb[16].mxu0 %v3775_v53  ;;  %2825 = vmatmul.mubr.bf16.gmra.mrb[16].mxu1 %v3775_v53  ;;  %v6083_v53 = vld [vmem:[%s7883_s3 + $0x1e8] sm:$0xff] }
 0x123   :  { %2382 = vmatprep.mubr.bf16.mxu0 %v3784_v54  ;;  %2834 = vmatprep.mubr.bf16.mxu1 %v3784_v54  ;;  %v5977_v54 = vld [vmem:[%s7883_s3 + $0xa8] sm:$0xff] }
 0x12a   :  { %2383 = vmatmul.mubr.bf16.gmra.mrb[20].mxu0 %v3783_v57  ;;  %2835 = vmatmul.mubr.bf16.gmra.mrb[20].mxu1 %v3783_v57  ;;  %v5992_v57 = vld [vmem:[%s7883_s3 + $0xc0] sm:$0xff] }
 0x12b   :  { %2392 = vmatprep.mubr.bf16.mxu0 %v3792_v58  ;;  %2844 = vmatprep.mubr.bf16.mxu1 %v3792_v58  ;;  %7984 = vst [vmem:[#allocation26_spill] sm:$0xff] %v5992_v57  ;;  %v5997_v58 = vld [vmem:[%s7883_s3 + $0x1a8] sm:$0xff] }
 0x132   :  { %2393 = vmatmul.mubr.bf16.gmra.mrb[24].mxu0 %v3791_v61  ;;  %2845 = vmatmul.mubr.bf16.gmra.mrb[24].mxu1 %v3791_v61  ;;  %v6012_v61 = vld [vmem:[%s7883_s3 + $0x1c0] sm:$0xff] }
 0x133   :  { %2402 = vmatprep.mubr.bf16.mxu0 %v3800_v62  ;;  %2854 = vmatprep.mubr.bf16.mxu1 %v3800_v62  ;;  %7986 = vst [vmem:[#allocation28_spill] sm:$0xff] %v6012_v61  ;;  %v3218_v62 = vld [vmem:[%s7883_s3 + $0x208] sm:$0xff]  ;;  %v7992_v61 = vmax.f32 %v5757_v4, %v5762_v5  ;;  %v3239_v4 = vld [vmem:[%s7883_s3 + $0x2b0] sm:$0xff]  ;;  %v3240_v5 = vld [vmem:[%s7883_s3 + $0x2b8] sm:$0xff] }
 0x135   :  { %v6206_v57 = vmax.f32 %v7992_v61, %v3217_v43  ;;  %v7997_v61 = vmax.f32 %v5777_v11, %v5797_v15  ;;  %v3244_v11 = vld [vmem:[%s7883_s3 + $0x2d8] sm:$0xff] }
 0x13a   :  { %2403 = vmatmul.mubr.bf16.gmra.mrb[28].mxu0 %v3799_v63  ;;  %2855 = vmatmul.mubr.bf16.gmra.mrb[28].mxu1 %v3799_v63  ;;  %v6060_v63 = vld [vmem:[%s7883_s3 + $0x1e0] sm:$0xff] }
 0x13b   :  { %7991 = vst [vmem:[#allocation33_spill] sm:$0xff] %v6060_v63  ;;  %v7993_v63 = vmax.f32 %v5767_v9, %v5787_v13  ;;  %v3241_v9 = vld [vmem:[%s7883_s3 + $0x2c0] sm:$0xff]  ;;  %v7995_v13 = vmax.f32 %v5772_v10, %v5792_v14  ;;  %v3243_v10 = vld [vmem:[%s7883_s3 + $0x2d0] sm:$0xff]  ;;  %v8001_v14 = vmax.f32 %v5807_v17, %v5827_v21  ;;  %v3246_v17 = vld [vmem:[%s7883_s3 + $0x2e8] sm:$0xff] }
 0x13c   :  { %v3247_v21 = vld [vmem:[%s7883_s3 + $0x2f0] sm:$0xff] }
 0x13d   :  { %v6211_v7 = vmax.f32 %v7993_v63, %v3218_v62  ;;  %v6232_v43 = vmax.f32 %v7995_v13, %v3219_v20  ;;  %v6237_v62 = vmax.f32 %v7997_v61, %v3220_v23  ;;  %v7999_v63 = vmax.f32 %v5782_v12, %v5802_v16  ;;  %v3245_v12 = vld [vmem:[%s7883_s3 + $0x2e0] sm:$0xff] }
 0x13e   :  { %v6261_v15 = vmax.f32 %v8001_v14, %v3222_v27  ;;  %v8002_v16 = vld [vmem:[#allocation2_spill] sm:$0xff]  ;;  %v3248_v27 = vld [vmem:[%s7883_s3 + $0x2f8] sm:$0xff] }
 0x13f   :  { %7994 = vst [vmem:[#allocation34_spill] sm:$0xff] %v6211_v7  ;;  %7996 = vst [vmem:[#allocation35_spill] sm:$0xff] %v6232_v43  ;;  %v6242_v6 = vmax.f32 %v7999_v63, %v3221_v19  ;;  %v3242_v7 = vld [vmem:[%s7883_s3 + $0x2c8] sm:$0xff]  ;;  %v8004_v19 = vmax.f32 %v8002_v16, %v8003_v18  ;;  %v8006_v23 = vld [vmem:[#allocation6_spill] sm:$0xff] }
 0x140   :  { %7998 = vst [vmem:[#allocation36_spill] sm:$0xff] %v6237_v62  ;;  %v8007_v13 = vmax.f32 %v8005_v22, %v8006_v23  ;;  %v8009_v63 = vld [vmem:[#allocation4_spill] sm:$0xff]  ;;  %v8017_v18 = vld [vmem:[#allocation11_spill] sm:$0xff]  ;;  %v8020_v23 = vld [vmem:[#allocation9_spill] sm:$0xff] }
 0x141   :  { %8000 = vst [vmem:[#allocation37_spill] sm:$0xff] %v6242_v6  ;;  %v6266_v20 = vmax.f32 %v8004_v19, %v3223_v30  ;;  %v8010_v6 = vld [vmem:[#allocation7_spill] sm:$0xff]  ;;  %v8013_v30 = vmax.f32 %v5847_v25, %v5867_v29  ;;  %v8016_v16 = vld [vmem:[#allocation8_spill] sm:$0xff]  ;;  %v6330_v29 = vld [vmem:[%s7883_s3 + $0x320] sm:$0xff] }
 0x142   :  { %v6271_v61 = vmax.f32 %v8007_v13, %v3224_v24  ;;  %v8011_v62 = vmax.f32 %v8009_v63, %v8010_v6  ;;  %v6290_v24 = vld [vmem:[%s7883_s3 + $0x300] sm:$0xff]  ;;  %v8018_v19 = vmax.f32 %v8016_v16, %v8017_v18  ;;  %v8021_v13 = vld [vmem:[#allocation12_spill] sm:$0xff]  ;;  %v6315_v25 = vld [vmem:[%s7883_s3 + $0x308] sm:$0xff]  ;;  %8024 = vst [vmem:[#allocation4_spill] sm:$0xff] %v6330_v29 }
 0x143   :  { %v8014_v6 = vld [vmem:[#allocation10_spill] sm:$0xff]  ;;  %v8022_v63 = vmax.f32 %v8020_v23, %v8021_v13  ;;  %v8032_v23 = vld [vmem:[#allocation17_spill] sm:$0xff]  ;;  %v6565_v29 = vld [vmem:[%s7883_s3 + $0x3e8] sm:$0xff] }
 0x144   :  { %8008 = vst [vmem:[#allocation2_spill] sm:$0xff] %v6271_v61  ;;  %v6276_v43 = vmax.f32 %v8011_v62, %v3225_v32  ;;  %v6295_v32 = vmax.f32 %v8013_v30, %v3226_v40  ;;  %v8015_v62 = vmax.f32 %v5852_v26, %v8014_v6  ;;  %v6305_v22 = vmax.f32 %v8018_v19, %v3228_v28  ;;  %v6320_v26 = vld [vmem:[%s7883_s3 + $0x310] sm:$0xff]  ;;  %v6325_v28 = vld [vmem:[%s7883_s3 + $0x318] sm:$0xff]  ;;  %v8027_v6 = vld [vmem:[#allocation14_spill] sm:$0xff] }
 0x145   :  { %v8026_v40 = vmax.f32 %v5894_v35, %v5914_v39  ;;  %v8031_v19 = vld [vmem:[#allocation15_spill] sm:$0xff]  ;;  %v6360_v35 = vld [vmem:[%s7883_s3 + $0x330] sm:$0xff]  ;;  %v8037_v39 = vmax.f32 %v5935_v45, %v5955_v49  ;;  %v6405_v49 = vld [vmem:[%s7883_s3 + $0x358] sm:$0xff] }
 0x146   :  { %8012 = vst [vmem:[#allocation5_spill] sm:$0xff] %v6276_v43  ;;  %v6300_v14 = vmax.f32 %v8015_v62, %v3227_v36  ;;  %8019 = vst [vmem:[#allocation3_spill] sm:$0xff] %v6305_v22  ;;  %v6310_v43 = vmax.f32 %v8022_v63, %v3229_v31  ;;  %v8025_v31 = vmax.f32 %v5889_v34, %v5909_v38  ;;  %v8028_v62 = vld [vmem:[#allocation16_spill] sm:$0xff]  ;;  %v6355_v34 = vld [vmem:[%s7883_s3 + $0x328] sm:$0xff] }
 0x147   :  { %v6340_v30 = vmax.f32 %v8026_v40, %v3231_v47  ;;  %v8029_v16 = vmax.f32 %v8027_v6, %v8028_v62  ;;  %v8033_v13 = vmax.f32 %v8031_v19, %v8032_v23  ;;  %v6365_v38 = vld [vmem:[%s7883_s3 + $0x338] sm:$0xff]  ;;  %v8038_v47 = vmax.f32 %v5940_v46, %v5960_v50  ;;  %v8040_v40 = vld [vmem:[#allocation23_spill] sm:$0xff]  ;;  %v8044_v19 = vld [vmem:[#allocation24_spill] sm:$0xff]  ;;  %8047 = vst [vmem:[#allocation14_spill] sm:$0xff] %v6405_v49 }
 0x148   :  { %8023 = vst [vmem:[#allocation6_spill] sm:$0xff] %v6310_v43  ;;  %v6335_v36 = vmax.f32 %v8025_v31, %v3230_v51  ;;  %8035 = vst [vmem:[#allocation8_spill] sm:$0xff] %v6365_v38  ;;  %v8039_v31 = vld [vmem:[#allocation21_spill] sm:$0xff]  ;;  %v6395_v45 = vld [vmem:[%s7883_s3 + $0x348] sm:$0xff]  ;;  %v8049_v50 = vmax.f32 %v5977_v54, %v5997_v58 }
 0x149   :  { %v6345_v18 = vmax.f32 %v8029_v16, %v3232_v41  ;;  %v6350_v63 = vmax.f32 %v8033_v13, %v3233_v37  ;;  %v6370_v37 = vld [vmem:[%s7883_s3 + $0x340] sm:$0xff]  ;;  %v6375_v41 = vmax.f32 %v8037_v39, %v3234_v60  ;;  %v6380_v51 = vmax.f32 %v8038_v47, %v3235_v56  ;;  %v6400_v46 = vld [vmem:[%s7883_s3 + $0x350] sm:$0xff]  ;;  %v8051_v39 = vld [vmem:[#allocation25_spill] sm:$0xff] }
 0x14a   :  { %8036 = vst [vmem:[#allocation11_spill] sm:$0xff] %v6370_v37  ;;  %v8041_v6 = vmax.f32 %v8039_v31, %v8040_v40  ;;  %v8043_v16 = vld [vmem:[#allocation22_spill] sm:$0xff]  ;;  %v8050_v56 = vmax.f32 %v5982_v55, %v6002_v59  ;;  %v8052_v47 = vld [vmem:[#allocation27_spill] sm:$0xff]  ;;  %v6440_v55 = vld [vmem:[%s7883_s3 + $0x370] sm:$0xff] }
 0x14b   :  { %8030 = vst [vmem:[#allocation7_spill] sm:$0xff] %v6345_v18  ;;  %8034 = vst [vmem:[#allocation10_spill] sm:$0xff] %v6350_v63  ;;  %v8045_v23 = vmax.f32 %v8043_v16, %v8044_v19  ;;  %v8053_v31 = vmax.f32 %v8051_v39, %v8052_v47  ;;  %v8056_v16 = vld [vmem:[#allocation28_spill] sm:$0xff]  ;;  %v6435_v54 = vld [vmem:[%s7883_s3 + $0x368] sm:$0xff] }
 0x14c   :  { %v6385_v62 = vmax.f32 %v8041_v6, %v3236_v52  ;;  %v6415_v52 = vmax.f32 %v8049_v50, %v3238_v1  ;;  %v6420_v60 = vmax.f32 %v8050_v56, %v3239_v4  ;;  %v8055_v6 = vld [vmem:[#allocation26_spill] sm:$0xff]  ;;  %v6445_v58 = vld [vmem:[%s7883_s3 + $0x378] sm:$0xff]  ;;  %v8061_v1 = vmax.f32 %v6025_v2, %v6045_v8  ;;  %v8065_v39 = vld [vmem:[#allocation32_spill] sm:$0xff] }
 0x14d   :  { %v6390_v13 = vmax.f32 %v8045_v23, %v3237_v48  ;;  %v6410_v48 = vld [vmem:[%s7883_s3 + $0x360] sm:$0xff]  ;;  %v6425_v40 = vmax.f32 %v8053_v31, %v3240_v5  ;;  %v8057_v19 = vmax.f32 %v8055_v6, %v8056_v16  ;;  %8059 = vst [vmem:[#allocation21_spill] sm:$0xff] %v6445_v58  ;;  %v8062_v5 = vld [vmem:[#allocation31_spill] sm:$0xff]  ;;  %v8064_v56 = vld [vmem:[#allocation29_spill] sm:$0xff] }
 0x14e   :  { %8042 = vst [vmem:[#allocation9_spill] sm:$0xff] %v6385_v62  ;;  %8048 = vst [vmem:[#allocation16_spill] sm:$0xff] %v6410_v48  ;;  %v6450_v59 = vld [vmem:[%s7883_s3 + $0x380] sm:$0xff]  ;;  %v6455_v4 = vmax.f32 %v8061_v1, %v3242_v7  ;;  %v8066_v47 = vmax.f32 %v8064_v56, %v8065_v39  ;;  %v8069_v16 = vld [vmem:[#allocation33_spill] sm:$0xff]  ;;  %v8076_v1 = vmax.f32 %v6078_v33, %v6088_v44 }
 0x14f   :  { %8046 = vst [vmem:[#allocation12_spill] sm:$0xff] %v6390_v13  ;;  %8054 = vst [vmem:[#allocation15_spill] sm:$0xff] %v6425_v40  ;;  %v6430_v23 = vmax.f32 %v8057_v19, %v3241_v9  ;;  %v8063_v9 = vmax.f32 %v6030_v3, %v8062_v5  ;;  %v8068_v6 = vld [vmem:[#allocation30_spill] sm:$0xff]  ;;  %v6475_v2 = vld [vmem:[%s7883_s3 + $0x388] sm:$0xff] }
 0x150   :  { %8060 = vst [vmem:[#allocation23_spill] sm:$0xff] %v6450_v59  ;;  %v6465_v31 = vmax.f32 %v8066_v47, %v3244_v11  ;;  %v8070_v19 = vmax.f32 %v8068_v6, %v8069_v16  ;;  %v6480_v3 = vld [vmem:[%s7883_s3 + $0x390] sm:$0xff]  ;;  %v6485_v7 = vld [vmem:[%s7883_s3 + $0x398] sm:$0xff]  ;;  %v6490_v8 = vld [vmem:[%s7883_s3 + $0x3a0] sm:$0xff]  ;;  %v8075_v11 = vmax.f32 %v6073_v42, %v6083_v53  ;;  %v6502_v5 = vmax.f32 %v8076_v1, %v3247_v21 }
 0x151   :  { %8058 = vst [vmem:[#allocation17_spill] sm:$0xff] %v6430_v23  ;;  %v6460_v50 = vmax.f32 %v8063_v9, %v3243_v10  ;;  %8072 = vst [vmem:[#allocation25_spill] sm:$0xff] %v6480_v3  ;;  %v6504_v9 = vmax.f32 %v3689_v0, %v3248_v27  ;;  %v6509_v56 = vld [vmem:[%s7883_s3 + $0x3a8] sm:$0xff]  ;;  %v6514_v39 = vld [vmem:[%s7883_s3 + $0x3b0] sm:$0xff] }
 0x152   :  { %8067 = vst [vmem:[#allocation22_spill] sm:$0xff] %v6465_v31  ;;  %v6470_v23 = vmax.f32 %v8070_v19, %v3245_v12  ;;  %8073 = vst [vmem:[#allocation27_spill] sm:$0xff] %v6485_v7  ;;  %v6497_v12 = vmax.f32 %v8075_v11, %v3246_v17  ;;  %v6519_v42 = vld [vmem:[%s7883_s3 + $0x3b8] sm:$0xff]  ;;  %v6524_v33 = vld [vmem:[%s7883_s3 + $0x3c0] sm:$0xff] }
 0x153   :  { %8074 = vst [vmem:[#allocation26_spill] sm:$0xff] %v6490_v8  ;;  %8077 = vst [vmem:[#allocation28_spill] sm:$0xff] %v6502_v5  ;;  %v8081_v44 = vld [vmem:[#allocation34_spill] sm:$0xff]  ;;  %v8082_v0 = vld [vmem:[#allocation35_spill] sm:$0xff] }
 0x154   :  { %8071 = vst [vmem:[#allocation24_spill] sm:$0xff] %v6470_v23  ;;  %8078 = vst [vmem:[#allocation31_spill] sm:$0xff] %v6504_v9  ;;  %v8083_v21 = vld [vmem:[#allocation36_spill] sm:$0xff]  ;;  %v6537_v16 = vld [vmem:[%s7883_s3 + $0x3c8] sm:$0xff] }
 0x155   :  { %8079 = vst [vmem:[#allocation29_spill] sm:$0xff] %v6519_v42  ;;  %8080 = vst [vmem:[#allocation32_spill] sm:$0xff] %v6524_v33  ;;  %v6542_v19 = vld [vmem:[%s7883_s3 + $0x3d0] sm:$0xff]  ;;  %v6547_v11 = vld [vmem:[%s7883_s3 + $0x3d8] sm:$0xff]  ;;  %v8093_v33 = vmax.f32 %v6206_v57, %v6290_v24 }
 0x156   :  { %8085 = vst [vmem:[#allocation30_spill] sm:$0xff] %v6542_v19  ;;  %8086 = vst [vmem:[#allocation33_spill] sm:$0xff] %v6547_v11  ;;  %v6552_v1 = vld [vmem:[%s7883_s3 + $0x3e0] sm:$0xff]  ;;  %v6570_v47 = vld [vmem:[%s7883_s3 + $0x3f0] sm:$0xff]  ;;  %v8095_v11 = vmax.f32 %v8082_v0, %v6320_v26 }
 0x157   :  { %8087 = vst [vmem:[#allocation34_spill] sm:$0xff] %v6552_v1  ;;  %8089 = vst [vmem:[#allocation35_spill] sm:$0xff] %v6565_v29  ;;  %v6575_v27 = vld [vmem:[%s7883_s3 + $0x3f8] sm:$0xff]  ;;  %v3281_v17 = vld [vmem:[%s7883_s3 + $0x400] sm:$0xff]  ;;  %v8096_v1 = vmax.f32 %v8083_v21, %v6325_v28 }
 0x158   :  { %8090 = vst [vmem:[#allocation36_spill] sm:$0xff] %v6570_v47  ;;  %8091 = vst [vmem:[#allocation38_spill] sm:$0xff] %v6575_v27  ;;  %v3282_v38 = vld [vmem:[%s7883_s3 + $0x408] sm:$0xff]  ;;  %v3283_v61 = vld [vmem:[%s7883_s3 + $0x410] sm:$0xff]  ;;  %v6683_v13 = vmax.f32 %v8093_v33, %v3281_v17  ;;  %v8094_v33 = vmax.f32 %v8081_v44, %v6315_v25 }
 0x159   :  { %v3284_v10 = vld [vmem:[%s7883_s3 + $0x418] sm:$0xff]  ;;  %v3285_v6 = vld [vmem:[%s7883_s3 + $0x420] sm:$0xff]  ;;  %v3286_v49 = vld [vmem:[%s7883_s3 + $0x428] sm:$0xff]  ;;  %v6711_v23 = vmax.f32 %v8095_v11, %v3283_v61 }
 0x15a   :  { %v3287_v22 = vld [vmem:[%s7883_s3 + $0x430] sm:$0xff]  ;;  %v3288_v37 = vld [vmem:[%s7883_s3 + $0x438] sm:$0xff]  ;;  %v3289_v53 = vld [vmem:[%s7883_s3 + $0x440] sm:$0xff]  ;;  %v6706_v17 = vmax.f32 %v8094_v33, %v3282_v38  ;;  %v6716_v27 = vmax.f32 %v8096_v1, %v3284_v10  ;;  %v8100_v38 = vmax.f32 %v6261_v15, %v6355_v34 }
 0x15b   :  { %v3290_v58 = vld [vmem:[%s7883_s3 + $0x448] sm:$0xff]  ;;  %v3291_v18 = vld [vmem:[%s7883_s3 + $0x450] sm:$0xff]  ;;  %v3292_v48 = vld [vmem:[%s7883_s3 + $0x458] sm:$0xff] }
 0x15c   :  { %v3293_v43 = vld [vmem:[%s7883_s3 + $0x460] sm:$0xff]  ;;  %v3294_v62 = vld [vmem:[%s7883_s3 + $0x468] sm:$0xff]  ;;  %v3295_v3 = vld [vmem:[%s7883_s3 + $0x470] sm:$0xff]  ;;  %v6738_v10 = vmax.f32 %v8100_v38, %v3286_v49  ;;  %v8109_v49 = vmax.f32 %v6300_v14, %v6400_v46 }
 0x15d   :  { %v3296_v59 = vld [vmem:[%s7883_s3 + $0x478] sm:$0xff]  ;;  %v3297_v63 = vld [vmem:[%s7883_s3 + $0x480] sm:$0xff]  ;;  %v3298_v42 = vld [vmem:[%s7883_s3 + $0x488] sm:$0xff] }
 0x15e   :  { %v3299_v40 = vld [vmem:[%s7883_s3 + $0x490] sm:$0xff]  ;;  %v3300_v8 = vld [vmem:[%s7883_s3 + $0x498] sm:$0xff]  ;;  %v3301_v7 = vld [vmem:[%s7883_s3 + $0x4a0] sm:$0xff] }
 0x15f   :  { %v3302_v31 = vld [vmem:[%s7883_s3 + $0x4a8] sm:$0xff]  ;;  %v3303_v19 = vld [vmem:[%s7883_s3 + $0x4b0] sm:$0xff]  ;;  %v3304_v57 = vld [vmem:[%s7883_s3 + $0x4b8] sm:$0xff] }
 0x160   :  { %v3305_v24 = vld [vmem:[%s7883_s3 + $0x4c0] sm:$0xff]  ;;  %v8097_v9 = vld [vmem:[#allocation37_spill] sm:$0xff]  ;;  %v8098_v47 = vld [vmem:[#allocation4_spill] sm:$0xff] }
 0x161   :  { %v8099_v5 = vmax.f32 %v8097_v9, %v8098_v47  ;;  %v3306_v25 = vld [vmem:[%s7883_s3 + $0x4c8] sm:$0xff]  ;;  %v3307_v26 = vld [vmem:[%s7883_s3 + $0x4d0] sm:$0xff]  ;;  %v3308_v61 = vld [vmem:[%s7883_s3 + $0x4d8] sm:$0xff] }
 0x162   :  { %v3309_v28 = vld [vmem:[%s7883_s3 + $0x4e0] sm:$0xff]  ;;  %v8103_v0 = vld [vmem:[#allocation8_spill] sm:$0xff]  ;;  %v8106_v11 = vld [vmem:[#allocation11_spill] sm:$0xff] }
 0x163   :  { %v6721_v29 = vmax.f32 %v8099_v5, %v3285_v6  ;;  %v8101_v5 = vmax.f32 %v6266_v20, %v6360_v35  ;;  %v8102_v44 = vld [vmem:[#allocation2_spill] sm:$0xff]  ;;  %v8105_v6 = vld [vmem:[#allocation5_spill] sm:$0xff]  ;;  %v3310_v15 = vld [vmem:[%s7883_s3 + $0x4e8] sm:$0xff]  ;;  %v8108_v35 = vmax.f32 %v6295_v32, %v6395_v45 }
 0x164   :  { %v8104_v21 = vmax.f32 %v8102_v44, %v8103_v0  ;;  %v8107_v1 = vmax.f32 %v8105_v6, %v8106_v11  ;;  %v3311_v20 = vld [vmem:[%s7883_s3 + $0x4f0] sm:$0xff]  ;;  %v6769_v34 = vld [vmem:[%s7883_s3 + $0x508] sm:$0xff]  ;;  %v3312_v32 = vld [vmem:[%s7883_s3 + $0x4f8] sm:$0xff] }
 0x165   :  { %v6743_v9 = vmax.f32 %v8101_v5, %v3287_v22  ;;  %v6764_v22 = vld [vmem:[%s7883_s3 + $0x500] sm:$0xff]  ;;  %v8110_v38 = vld [vmem:[#allocation3_spill] sm:$0xff]  ;;  %v8114_v6 = vld [vmem:[#allocation16_spill] sm:$0xff] }
 0x166   :  { %v6748_v47 = vmax.f32 %v8104_v21, %v3288_v37  ;;  %v6753_v33 = vmax.f32 %v8107_v1, %v3289_v53  ;;  %v6774_v37 = vmax.f32 %v8108_v35, %v3290_v58  ;;  %v6779_v53 = vmax.f32 %v8109_v49, %v3291_v18  ;;  %v8111_v5 = vld [vmem:[#allocation14_spill] sm:$0xff]  ;;  %v6797_v14 = vld [vmem:[%s7883_s3 + $0x510] sm:$0xff]  ;;  %v6802_v18 = vld [vmem:[%s7883_s3 + $0x518] sm:$0xff] }
 0x167   :  { %v8112_v44 = vmax.f32 %v8110_v38, %v8111_v5  ;;  %v8113_v21 = vld [vmem:[#allocation6_spill] sm:$0xff]  ;;  %v8118_v35 = vld [vmem:[#allocation7_spill] sm:$0xff]  ;;  %v8119_v49 = vld [vmem:[#allocation21_spill] sm:$0xff] }
 0x168   :  { %v8115_v11 = vmax.f32 %v8113_v21, %v8114_v6  ;;  %v6807_v45 = vld [vmem:[%s7883_s3 + $0x520] sm:$0xff]  ;;  %v8120_v38 = vmax.f32 %v8118_v35, %v8119_v49  ;;  %v8122_v21 = vld [vmem:[#allocation23_spill] sm:$0xff] }
 0x169   :  { %v6784_v0 = vmax.f32 %v8112_v44, %v3292_v48  ;;  %v8117_v48 = vmax.f32 %v6340_v30, %v6440_v55  ;;  %v8121_v44 = vld [vmem:[#allocation10_spill] sm:$0xff]  ;;  %v6837_v30 = vld [vmem:[%s7883_s3 + $0x530] sm:$0xff]  ;;  %v8129_v35 = vld [vmem:[#allocation27_spill] sm:$0xff] }
 0x16a   :  { %v6789_v1 = vmax.f32 %v8115_v11, %v3293_v43  ;;  %v8116_v43 = vmax.f32 %v6335_v36, %v6435_v54  ;;  %v6822_v5 = vmax.f32 %v8120_v38, %v3296_v59  ;;  %v8123_v6 = vmax.f32 %v8121_v44, %v8122_v21  ;;  %v6832_v36 = vld [vmem:[%s7883_s3 + $0x528] sm:$0xff]  ;;  %v8126_v59 = vld [vmem:[#allocation25_spill] sm:$0xff]  ;;  %v8131_v44 = vld [vmem:[#allocation12_spill] sm:$0xff] }
 0x16b   :  { %v6817_v58 = vmax.f32 %v8117_v48, %v3295_v3  ;;  %v8125_v54 = vmax.f32 %v6375_v41, %v6475_v2  ;;  %v8127_v3 = vmax.f32 %v6380_v51, %v8126_v59  ;;  %v8128_v48 = vld [vmem:[#allocation9_spill] sm:$0xff]  ;;  %v8132_v21 = vld [vmem:[#allocation26_spill] sm:$0xff]  ;;  %v6872_v41 = vld [vmem:[%s7883_s3 + $0x548] sm:$0xff] }
 0x16c   :  { %v6812_v46 = vmax.f32 %v8116_v43, %v3294_v62  ;;  %v6827_v11 = vmax.f32 %v8123_v6, %v3297_v63  ;;  %v6842_v62 = vld [vmem:[%s7883_s3 + $0x538] sm:$0xff]  ;;  %v6847_v63 = vld [vmem:[%s7883_s3 + $0x540] sm:$0xff]  ;;  %v8130_v49 = vmax.f32 %v8128_v48, %v8129_v35  ;;  %v8133_v6 = vmax.f32 %v8131_v44, %v8132_v21  ;;  %v6877_v51 = vld [vmem:[%s7883_s3 + $0x550] sm:$0xff] }
 0x16d   :  { %v6852_v55 = vmax.f32 %v8125_v54, %v3298_v42  ;;  %v6857_v43 = vmax.f32 %v8127_v3, %v3299_v40  ;;  %v6882_v40 = vld [vmem:[%s7883_s3 + $0x558] sm:$0xff]  ;;  %v6887_v2 = vld [vmem:[%s7883_s3 + $0x560] sm:$0xff]  ;;  %v8135_v42 = vmax.f32 %v6420_v60, %v6514_v39  ;;  %v8136_v59 = vld [vmem:[#allocation15_spill] sm:$0xff]  ;;  %v8143_v39 = vmax.f32 %v6455_v4, %v6537_v16 }
 0x16e   :  { %8124 = vst [vmem:[#allocation37_spill] sm:$0xff] %v6827_v11  ;;  %v6862_v38 = vmax.f32 %v8130_v49, %v3300_v8  ;;  %v6867_v11 = vmax.f32 %v8133_v6, %v3301_v7  ;;  %v8134_v7 = vmax.f32 %v6415_v52, %v6509_v56  ;;  %v8137_v3 = vld [vmem:[#allocation29_spill] sm:$0xff]  ;;  %v8140_v44 = vld [vmem:[#allocation32_spill] sm:$0xff]  ;;  %v6912_v52 = vld [vmem:[%s7883_s3 + $0x568] sm:$0xff] }
 0x16f   :  { %v6897_v54 = vmax.f32 %v8135_v42, %v3303_v19  ;;  %v8138_v48 = vmax.f32 %v8136_v59, %v8137_v3  ;;  %v8139_v49 = vld [vmem:[#allocation17_spill] sm:$0xff]  ;;  %v6917_v60 = vld [vmem:[%s7883_s3 + $0x570] sm:$0xff]  ;;  %v6927_v56 = vld [vmem:[%s7883_s3 + $0x580] sm:$0xff]  ;;  %v6932_v19 = vmax.f32 %v8143_v39, %v3306_v25 }
 0x170   :  { %v6892_v8 = vmax.f32 %v8134_v7, %v3302_v31  ;;  %v8141_v21 = vmax.f32 %v8139_v49, %v8140_v44  ;;  %v6922_v31 = vld [vmem:[%s7883_s3 + $0x578] sm:$0xff]  ;;  %v8146_v42 = vld [vmem:[#allocation22_spill] sm:$0xff]  ;;  %v8149_v49 = vld [vmem:[#allocation24_spill] sm:$0xff] }
 0x171   :  { %v6902_v35 = vmax.f32 %v8138_v48, %v3304_v57  ;;  %v8144_v57 = vld [vmem:[#allocation30_spill] sm:$0xff]  ;;  %v8147_v59 = vld [vmem:[#allocation33_spill] sm:$0xff]  ;;  %v6952_v4 = vld [vmem:[%s7883_s3 + $0x588] sm:$0xff] }
 0x172   :  { %v6907_v6 = vmax.f32 %v8141_v21, %v3305_v24  ;;  %v8145_v24 = vmax.f32 %v6460_v50, %v8144_v57  ;;  %v8148_v3 = vmax.f32 %v8146_v42, %v8147_v59  ;;  %v8150_v44 = vld [vmem:[#allocation34_spill] sm:$0xff]  ;;  %v6957_v50 = vld [vmem:[%s7883_s3 + $0x590] sm:$0xff]  ;;  %v6962_v16 = vld [vmem:[%s7883_s3 + $0x598] sm:$0xff] }
 0x173   :  { %v8151_v21 = vmax.f32 %v8149_v49, %v8150_v44  ;;  %v6967_v25 = vld [vmem:[%s7883_s3 + $0x5a0] sm:$0xff]  ;;  %v8155_v42 = vld [vmem:[#allocation36_spill] sm:$0xff]  ;;  %v6986_v49 = vld [vmem:[%s7883_s3 + $0x5a8] sm:$0xff]  ;;  %v3477_v44 = vmax.f32 %v6721_v29, %v6807_v45  ;;  %v3509_v45 = vmax.f32 %v6753_v33, %v6847_v63  ;;  %v3533_v33 = vmax.f32 %v6784_v0, %v6882_v40 }
 0x174   :  { %8142 = vst [vmem:[#allocation4_spill] sm:$0xff] %v6907_v6  ;;  %v6937_v7 = vmax.f32 %v8145_v24, %v3307_v26  ;;  %v6942_v48 = vmax.f32 %v8148_v3, %v3308_v61  ;;  %v3445_v26 = vmax.f32 %v6683_v13, %v6764_v22  ;;  %v3453_v61 = vmax.f32 %v6706_v17, %v6769_v34  ;;  %v8154_v24 = vld [vmem:[#allocation28_spill] sm:$0xff]  ;;  %v7032_v29 = vld [vmem:[%s7883_s3 + $0x5e0] sm:$0xff] }
 0x175   :  { %v6947_v6 = vmax.f32 %v8151_v21, %v3309_v28  ;;  %v8152_v28 = vld [vmem:[#allocation35_spill] sm:$0xff]  ;;  %v8156_v59 = vmax.f32 %v8154_v24, %v8155_v42  ;;  %v6991_v13 = vld [vmem:[%s7883_s3 + $0x5b0] sm:$0xff]  ;;  %v3469_v22 = vmax.f32 %v6716_v27, %v6802_v18  ;;  %v7027_v27 = vld [vmem:[%s7883_s3 + $0x5d8] sm:$0xff]  ;;  %v3501_v18 = vmax.f32 %v6748_v47, %v6842_v62 }
 0x176   :  { %v8153_v39 = vmax.f32 %v6497_v12, %v8152_v28  ;;  %v6996_v12 = vld [vmem:[%s7883_s3 + $0x5b8] sm:$0xff]  ;;  %v8157_v21 = vld [vmem:[#allocation31_spill] sm:$0xff]  ;;  %v8158_v28 = vld [vmem:[#allocation38_spill] sm:$0xff]  ;;  %v3525_v47 = vmax.f32 %v6779_v53, %v6877_v51  ;;  %v3549_v53 = vmax.f32 %v6812_v46, %v6912_v52  ;;  %v3557_v0 = vmax.f32 %v6817_v58, %v6917_v60 }
 0x177   :  { %v6981_v3 = vmax.f32 %v8156_v59, %v3311_v20  ;;  %v3461_v20 = vmax.f32 %v6711_v23, %v6797_v14  ;;  %v7017_v42 = vld [vmem:[%s7883_s3 + $0x5c8] sm:$0xff]  ;;  %v7022_v23 = vld [vmem:[%s7883_s3 + $0x5d0] sm:$0xff]  ;;  %v3493_v14 = vmax.f32 %v6743_v9, %v6837_v30  ;;  %v3517_v9 = vmax.f32 %v6774_v37, %v6872_v41  ;;  %v3345_v30 = vld [vmem:[%s7883_s3 + $0x600] sm:$0xff] }
 0x178   :  { %v6976_v57 = vmax.f32 %v8153_v39, %v3310_v15  ;;  %v7001_v15 = vld [vmem:[%s7883_s3 + $0x5c0] sm:$0xff]  ;;  %v8159_v39 = vmax.f32 %v8157_v21, %v8158_v28  ;;  %v7045_v59 = vld [vmem:[%s7883_s3 + $0x5e8] sm:$0xff]  ;;  %v7050_v21 = vld [vmem:[%s7883_s3 + $0x5f0] sm:$0xff]  ;;  %v3581_v58 = vmax.f32 %v6852_v55, %v6952_v4  ;;  %v3605_v52 = vmax.f32 %v6867_v11, %v6967_v25 }
 0x179   :  { %v3346_v62 = vld [vmem:[%s7883_s3 + $0x608] sm:$0xff]  ;;  %v3347_v37 = vld [vmem:[%s7883_s3 + $0x610] sm:$0xff]  ;;  %v8160_v63 = vld [vmem:[#allocation37_spill] sm:$0xff]  ;;  %v3629_v11 = vmax.f32 %v6902_v35, %v6996_v12  ;;  %v3653_v35 = vmax.f32 %v6937_v7, %v7022_v23  ;;  %v3661_v25 = vmax.f32 %v6942_v48, %v7027_v27 }
 0x17a   :  { %v7012_v24 = vmax.f32 %v8159_v39, %v3312_v32  ;;  %v3485_v32 = vmax.f32 %v6738_v10, %v6832_v36  ;;  %v7055_v10 = vld [vmem:[%s7883_s3 + $0x5f8] sm:$0xff]  ;;  %v3541_v36 = vmax.f32 %v6789_v1, %v6887_v2  ;;  %v3565_v1 = vmax.f32 %v6822_v5, %v6922_v31  ;;  %v3349_v40 = vld [vmem:[%s7883_s3 + $0x620] sm:$0xff]  ;;  %v3350_v46 = vld [vmem:[%s7883_s3 + $0x628] sm:$0xff] }
 0x17b   :  { %v3573_v41 = vmax.f32 %v8160_v63, %v6927_v56  ;;  %v3348_v51 = vld [vmem:[%s7883_s3 + $0x618] sm:$0xff]  ;;  %v3589_v5 = vmax.f32 %v6857_v43, %v6957_v50  ;;  %v3597_v2 = vmax.f32 %v6862_v38, %v6962_v16  ;;  %v3351_v60 = vld [vmem:[%s7883_s3 + $0x630] sm:$0xff]  ;;  %v3353_v55 = vld [vmem:[%s7883_s3 + $0x640] sm:$0xff]  ;;  %v3613_v43 = vmax.f32 %v6892_v8, %v6986_v49 }
 0x17c   :  { %v3352_v31 = vld [vmem:[%s7883_s3 + $0x638] sm:$0xff]  ;;  %v3621_v38 = vmax.f32 %v6897_v54, %v6991_v13  ;;  %v8161_v56 = vld [vmem:[#allocation4_spill] sm:$0xff]  ;;  %v3354_v50 = vld [vmem:[%s7883_s3 + $0x648] sm:$0xff]  ;;  %v3645_v54 = vmax.f32 %v6932_v19, %v7017_v42  ;;  %v3669_v49 = vmax.f32 %v6947_v6, %v7032_v29  ;;  %v3677_v7 = vmax.f32 %v6976_v57, %v7045_v59 }
 0x17d   :  { %v3637_v4 = vmax.f32 %v8161_v56, %v7001_v15  ;;  %v3355_v16 = vld [vmem:[%s7883_s3 + $0x650] sm:$0xff]  ;;  %v3356_v8 = vld [vmem:[%s7883_s3 + $0x658] sm:$0xff]  ;;  %v3357_v13 = vld [vmem:[%s7883_s3 + $0x660] sm:$0xff]  ;;  %v7142_v15 = vmax.f32 %v3445_v26, %v3345_v30  ;;  %v3685_v6 = vmax.f32 %v6981_v3, %v7050_v21  ;;  %v3693_v48 = vmax.f32 %v7012_v24, %v7055_v10 }
 0x17e   :  { %v3358_v12 = vld [vmem:[%s7883_s3 + $0x668] sm:$0xff]  ;;  %v3359_v19 = vld [vmem:[%s7883_s3 + $0x670] sm:$0xff]  ;;  %v3360_v28 = vld [vmem:[%s7883_s3 + $0x678] sm:$0xff]  ;;  %v7162_v57 = vmax.f32 %v3453_v61, %v3346_v62  ;;  %v7164_v3 = vmax.f32 %v3461_v20, %v3347_v37  ;;  %v7166_v24 = vmax.f32 %v3469_v22, %v3348_v51  ;;  %v7168_v42 = vmax.f32 %v3477_v44, %v3349_v40 }
 0x17f   :  { %v3361_v39 = vld [vmem:[%s7883_s3 + $0x680] sm:$0xff]  ;;  %v3362_v26 = vld [vmem:[%s7883_s3 + $0x688] sm:$0xff]  ;;  %v3363_v23 = vld [vmem:[%s7883_s3 + $0x690] sm:$0xff]  ;;  %v7179_v34 = vmax.f32 %v3485_v32, %v3350_v46  ;;  %v7181_v61 = vmax.f32 %v3493_v14, %v3351_v60  ;;  %v7183_v20 = vmax.f32 %v3501_v18, %v3352_v31  ;;  %v7185_v22 = vmax.f32 %v3509_v45, %v3353_v55 }
 0x180   :  { %v3364_v27 = vld [vmem:[%s7883_s3 + $0x698] sm:$0xff]  ;;  %v3365_v17 = vld [vmem:[%s7883_s3 + $0x6a0] sm:$0xff]  ;;  %v3366_v44 = vld [vmem:[%s7883_s3 + $0x6a8] sm:$0xff]  ;;  %v7196_v32 = vmax.f32 %v3517_v9, %v3354_v50  ;;  %v7198_v14 = vmax.f32 %v3525_v47, %v3355_v16  ;;  %v7200_v18 = vmax.f32 %v3533_v33, %v3356_v8  ;;  %v7202_v45 = vmax.f32 %v3541_v36, %v3357_v13 }
 0x181   :  { %v3367_v29 = vld [vmem:[%s7883_s3 + $0x6b0] sm:$0xff]  ;;  %v3368_v59 = vld [vmem:[%s7883_s3 + $0x6b8] sm:$0xff]  ;;  %v3369_v21 = vld [vmem:[%s7883_s3 + $0x6c0] sm:$0xff]  ;;  %v7213_v9 = vmax.f32 %v3549_v53, %v3358_v12  ;;  %v7215_v47 = vmax.f32 %v3557_v0, %v3359_v19  ;;  %v7217_v33 = vmax.f32 %v3565_v1, %v3360_v28  ;;  %v7219_v36 = vmax.f32 %v3573_v41, %v3361_v39 }
 0x182   :  { %v3370_v10 = vld [vmem:[%s7883_s3 + $0x6c8] sm:$0xff]  ;;  %v3371_v30 = vld [vmem:[%s7883_s3 + $0x6d0] sm:$0xff]  ;;  %v3372_v62 = vld [vmem:[%s7883_s3 + $0x6d8] sm:$0xff]  ;;  %v7230_v53 = vmax.f32 %v3581_v58, %v3362_v26  ;;  %v7232_v0 = vmax.f32 %v3589_v5, %v3363_v23  ;;  %v7234_v1 = vmax.f32 %v3597_v2, %v3364_v27  ;;  %v7236_v41 = vmax.f32 %v3605_v52, %v3365_v17 }
 0x183   :  { %8162 = vst [vmem:[#allocation2_spill] sm:$0xff] %v7219_v36  ;;  %v3373_v37 = vld [vmem:[%s7883_s3 + $0x6e0] sm:$0xff]  ;;  %v3374_v63 = vld [vmem:[%s7883_s3 + $0x6e8] sm:$0xff]  ;;  %v3375_v51 = vld [vmem:[%s7883_s3 + $0x6f0] sm:$0xff]  ;;  %v7249_v58 = vmax.f32 %v3613_v43, %v3366_v44  ;;  %v7251_v5 = vmax.f32 %v3621_v38, %v3367_v29  ;;  %v7253_v2 = vmax.f32 %v3629_v11, %v3368_v59  ;;  %v7255_v52 = vmax.f32 %v3637_v4, %v3369_v21 }
 0x184   :  { %v3376_v40 = vld [vmem:[%s7883_s3 + $0x6f8] sm:$0xff]  ;;  %v7247_v46 = vld [vmem:[%s7883_s3 + $0x700] sm:$0xff]  ;;  %v7260_v60 = vld [vmem:[%s7883_s3 + $0x708] sm:$0xff]  ;;  %v7272_v43 = vmax.f32 %v3645_v54, %v3370_v10  ;;  %v7274_v38 = vmax.f32 %v3653_v35, %v3371_v30  ;;  %v7276_v11 = vmax.f32 %v3661_v25, %v3372_v62  ;;  %v7278_v56 = vmax.f32 %v3669_v49, %v3373_v37 }
 0x185   :  { %8163 = vst [vmem:[#allocation8_spill] sm:$0xff] %v7249_v58  ;;  %8164 = vst [vmem:[#allocation5_spill] sm:$0xff] %v7251_v5  ;;  %v7265_v31 = vld [vmem:[%s7883_s3 + $0x710] sm:$0xff]  ;;  %v7270_v55 = vld [vmem:[%s7883_s3 + $0x718] sm:$0xff]  ;;  %v7297_v54 = vmax.f32 %v3677_v7, %v3374_v63  ;;  %v7299_v35 = vmax.f32 %v3685_v6, %v3375_v51  ;;  %v7301_v25 = vmax.f32 %v3693_v48, %v3376_v40 }
 0x186   :  { %8165 = vst [vmem:[#allocation11_spill] sm:$0xff] %v7253_v2  ;;  %8166 = vst [vmem:[#allocation3_spill] sm:$0xff] %v7255_v52  ;;  %v7283_v4 = vld [vmem:[%s7883_s3 + $0x720] sm:$0xff]  ;;  %v7288_v50 = vld [vmem:[%s7883_s3 + $0x728] sm:$0xff] }
 0x187   :  { %8167 = vst [vmem:[#allocation14_spill] sm:$0xff] %v7272_v43  ;;  %8168 = vst [vmem:[#allocation6_spill] sm:$0xff] %v7274_v38  ;;  %v7293_v16 = vld [vmem:[%s7883_s3 + $0x730] sm:$0xff]  ;;  %v7306_v49 = vld [vmem:[%s7883_s3 + $0x738] sm:$0xff]  ;;  %v8185_v58 = vmax.f32 %v7168_v42, %v7283_v4 }
 0x188   :  { %8169 = vst [vmem:[#allocation16_spill] sm:$0xff] %v7276_v11  ;;  %8170 = vst [vmem:[#allocation7_spill] sm:$0xff] %v7278_v56  ;;  %v7311_v13 = vld [vmem:[%s7883_s3 + $0x740] sm:$0xff]  ;;  %v7316_v12 = vld [vmem:[%s7883_s3 + $0x748] sm:$0xff] }
 0x189   :  { %8171 = vst [vmem:[#allocation21_spill] sm:$0xff] %v7297_v54  ;;  %8172 = vst [vmem:[#allocation10_spill] sm:$0xff] %v7299_v35  ;;  %v7329_v28 = vld [vmem:[%s7883_s3 + $0x750] sm:$0xff]  ;;  %v7334_v39 = vld [vmem:[%s7883_s3 + $0x758] sm:$0xff] }
 0x18a   :  { %8173 = vst [vmem:[#allocation23_spill] sm:$0xff] %v7301_v25  ;;  %v7339_v26 = vld [vmem:[%s7883_s3 + $0x760] sm:$0xff]  ;;  %v7352_v21 = vld [vmem:[%s7883_s3 + $0x768] sm:$0xff]  ;;  %v7357_v10 = vld [vmem:[%s7883_s3 + $0x770] sm:$0xff] }
 0x18b   :  { %v7362_v30 = vld [vmem:[%s7883_s3 + $0x778] sm:$0xff]  ;;  %v8175_v17 = vld [vmem:[#allocation18_spill] sm:$0xff]  ;;  %v8177_v62 = vld [vmem:[#allocation19_spill] sm:$0xff] }
 0x18c   :  { %v8174_v40 = vld [vmem:[#allocation13_spill] sm:$0xff]  ;;  %v7377_v6 = vld [vmem:[%s7883_s3 + $0x780] sm:$0xff]  ;;  %v8178_v51 = vld [vmem:[#allocation20_spill] sm:$0xff] }
 0x18d   :  { %8176 = vst [vmem:[#allocation25_spill] sm:$0xff] %v7377_v6  ;;  %v7393_v25 = vld [vmem:[%s7883_s3 + $0x790] sm:$0xff]  ;;  %v7406_v37 = vld [vmem:[%s7883_s3 + $0x798] sm:$0xff]  ;;  %v3409_v6 = vld [vmem:[%s7883_s3 + $0x800] sm:$0xff] }
 0x18e   :  { %v3410_v36 = vld [vmem:[%s7883_s3 + $0x808] sm:$0xff]  ;;  %v3416_v42 = vld [vmem:[%s7883_s3 + $0x838] sm:$0xff] }
 0x1d5   :  { %v2334_v29 = vpop.f32.mrb[0].mxu0  ;;  %v2786_v59 = vpop.f32.mrb[0].mxu1 }
 0x1d6   :  { %v4121_v44 = vadd.f32 %v2334_v29, %v8174_v40  ;;  %v4153_v27 = vadd.f32 %v2786_v59, %v8175_v17  ;;  %v2336_v23 = vpop.f32.mrb[1].mxu0  ;;  %v2788_v48 = vpop.f32.mrb[1].mxu1  ;;  %v7388_v59 = vld [vmem:[%s7883_s3 + $0x788] sm:$0xff] }
 0x1d7   :  { %v4122_v7 = vadd.f32 %v2336_v23, %v8177_v62  ;;  %v4154_v19 = vadd.f32 %v2788_v48, %v8178_v51  ;;  %v2338_v29 = vpop.f32.mrb[2].mxu0  ;;  %v2790_v8 = vpop.f32.mrb[2].mxu1 }
 0x1d8   :  { %v2865_v63 = vmax.f32 %v4121_v44, 0.0  ;;  %v2867_v48 = vmax.f32 %v4153_v27, 0.0  ;;  %v4123_v35 = vadd.f32 %v2338_v29, %v8174_v40  ;;  %v4155_v54 = vadd.f32 %v2790_v8, %v8175_v17  ;;  %v2340_v56 = vpop.f32.mrb[3].mxu0  ;;  %v2792_v11 = vpop.f32.mrb[3].mxu1  ;;  %v7411_v27 = vld [vmem:[%s7883_s3 + $0x7a0] sm:$0xff]  ;;  %v7416_v8 = vld [vmem:[%s7883_s3 + $0x7a8] sm:$0xff] }
 0x1d9   :  { %v2866_v38 = vmax.f32 %v4122_v7, 0.0  ;;  %v2868_v43 = vmax.f32 %v4154_v19, 0.0  ;;  %v4124_v52 = vadd.f32 %v2340_v56, %v8177_v62  ;;  %v4156_v2 = vadd.f32 %v2792_v11, %v8178_v51  ;;  %8179 = vst [vmem:[#allocation9_spill] sm:$0xff] %v7411_v27  ;;  %8180 = vst [vmem:[#allocation27_spill] sm:$0xff] %v7416_v8 }
 0x1da   :  { %v2869_v19 = vmax.f32 %v4123_v35, 0.0  ;;  %v2871_v7 = vmax.f32 %v4155_v54, 0.0  ;;  %v3411_v54 = vld [vmem:[%s7883_s3 + $0x810] sm:$0xff]  ;;  %v3412_v35 = vld [vmem:[%s7883_s3 + $0x818] sm:$0xff]  ;;  %v8184_v11 = vmax.f32 %v7166_v24, %v7270_v55  ;;  %v8187_v55 = vmax.f32 %v7181_v61, %v7293_v16  ;;  %v3418_v61 = vld [vmem:[%s7883_s3 + $0x848] sm:$0xff] }
 0x1db   :  { %v4089_v44 = vpack.c.bf16 %v2866_v38, %v2865_v63  ;;  %v4090_v29 = vpack.c.bf16 %v2868_v43, %v2867_v48  ;;  %v2870_v23 = vmax.f32 %v4124_v52, 0.0  ;;  %v2872_v5 = vmax.f32 %v4156_v2, 0.0  ;;  %v3414_v63 = vld [vmem:[%s7883_s3 + $0x828] sm:$0xff] }
 0x1dc   :  { %v8181_v52 = vmax.f32 %v7142_v15, %v7247_v46  ;;  %v8182_v38 = vmax.f32 %v7162_v57, %v7260_v60  ;;  %v3472_v8 = vmax.f32 %v8184_v11, %v3412_v35  ;;  %v8186_v60 = vmax.f32 %v7179_v34, %v7288_v50 }
 0x1dd   :  { %3121 = vst [vmem:[%s7885_s4] sm:$0xff] %v4089_v44  ;;  %3122 = vst [vmem:[%s7885_s4 + $0x8] sm:$0xff] %v4090_v29  ;;  %v4091_v48 = vpack.c.bf16 %v2870_v23, %v2869_v19  ;;  %v4092_v15 = vpack.c.bf16 %v2872_v5, %v2871_v7  ;;  %v2344_v46 = vpop.f32.mrb[4].mxu0  ;;  %v3415_v44 = vld [vmem:[%s7883_s3 + $0x830] sm:$0xff]  ;;  %v8183_v5 = vmax.f32 %v7164_v3, %v7265_v31 }
 0x1de   :  { %v3448_v2 = vmax.f32 %v8181_v52, %v3409_v6  ;;  %v2796_v6 = vpop.f32.mrb[4].mxu1  ;;  %v3413_v52 = vld [vmem:[%s7883_s3 + $0x820] sm:$0xff]  ;;  %v3456_v29 = vmax.f32 %v8182_v38, %v3410_v36  ;;  %v4125_v19 = vadd.f32 %v2344_v46, %v8174_v40  ;;  %v2346_v43 = vpop.f32.mrb[5].mxu0  ;;  %v3488_v31 = vmax.f32 %v8186_v60, %v3414_v63  ;;  %3700 = vst [vmem:[%s7886_s5 + $0x18] sm:$0xff] %v3472_v8  ;;  %v3419_v63 = vld [vmem:[%s7883_s3 + $0x850] sm:$0xff]  ;;  %v3422_v46 = vld [vmem:[%s7883_s3 + $0x868] sm:$0xff] }
 0x1df   :  { %v3464_v23 = vmax.f32 %v8183_v5, %v3411_v54  ;;  %v4157_v7 = vadd.f32 %v2796_v6, %v8175_v17  ;;  %v2798_v56 = vpop.f32.mrb[5].mxu1  ;;  %v3480_v27 = vmax.f32 %v8185_v58, %v3413_v52  ;;  %3123 = vst [vmem:[%s7885_s4 + $0x10] sm:$0xff] %v4091_v48  ;;  %3124 = vst [vmem:[%s7885_s4 + $0x18] sm:$0xff] %v4092_v15  ;;  %v2348_v24 = vpop.f32.mrb[6].mxu0  ;;  %v3417_v58 = vld [vmem:[%s7883_s3 + $0x840] sm:$0xff]  ;;  %v3420_v48 = vld [vmem:[%s7883_s3 + $0x858] sm:$0xff] }
 0x1e0   :  { %3697 = vst [vmem:[%s7886_s5] sm:$0xff] %v3448_v2  ;;  %v4126_v57 = vadd.f32 %v2346_v43, %v8177_v62  ;;  %v4158_v3 = vadd.f32 %v2798_v56, %v8178_v51  ;;  %v2800_v36 = vpop.f32.mrb[6].mxu1  ;;  %v3496_v4 = vmax.f32 %v8187_v55, %v3415_v44  ;;  %3698 = vst [vmem:[%s7886_s5 + $0x8] sm:$0xff] %v3456_v29  ;;  %v2873_v11 = vmax.f32 %v4125_v19, 0.0  ;;  %v2350_v34 = vpop.f32.mrb[7].mxu0  ;;  %v3421_v8 = vld [vmem:[%s7883_s3 + $0x860] sm:$0xff]  ;;  %v3423_v6 = vld [vmem:[%s7883_s3 + $0x870] sm:$0xff] }
 0x1e1   :  { %3699 = vst [vmem:[%s7886_s5 + $0x10] sm:$0xff] %v3464_v23  ;;  %v2875_v56 = vmax.f32 %v4157_v7, 0.0  ;;  %v4127_v54 = vadd.f32 %v2348_v24, %v8174_v40  ;;  %v4159_v35 = vadd.f32 %v2800_v36, %v8175_v17  ;;  %v2802_v50 = vpop.f32.mrb[7].mxu1  ;;  %3701 = vst [vmem:[%s7886_s5 + $0x20] sm:$0xff] %v3480_v27  ;;  %v4128_v43 = vadd.f32 %v2350_v34, %v8177_v62  ;;  %v3425_v24 = vld [vmem:[%s7883_s3 + $0x880] sm:$0xff] }
 0x1e2   :  { %v2874_v16 = vmax.f32 %v4126_v57, 0.0  ;;  %v2876_v2 = vmax.f32 %v4158_v3, 0.0  ;;  %v4160_v38 = vadd.f32 %v2802_v50, %v8178_v51  ;;  %3702 = vst [vmem:[%s7886_s5 + $0x28] sm:$0xff] %v3488_v31  ;;  %3703 = vst [vmem:[%s7886_s5 + $0x30] sm:$0xff] %v3496_v4  ;;  %v8188_v52 = vmax.f32 %v7183_v20, %v7306_v49  ;;  %v3424_v3 = vld [vmem:[%s7883_s3 + $0x878] sm:$0xff]  ;;  %v3426_v20 = vld [vmem:[%s7883_s3 + $0x888] sm:$0xff] }
 0x1e3   :  { %v2877_v27 = vmax.f32 %v4127_v54, 0.0  ;;  %v2879_v15 = vmax.f32 %v4159_v35, 0.0  ;;  %v8189_v29 = vmax.f32 %v7185_v22, %v7311_v13  ;;  %v2878_v7 = vmax.f32 %v4128_v43, 0.0  ;;  %v3427_v22 = vld [vmem:[%s7883_s3 + $0x890] sm:$0xff]  ;;  %v8197_v50 = vld [vmem:[#allocation2_spill] sm:$0xff] }
 0x1e4   :  { %v3504_v44 = vmax.f32 %v8188_v52, %v3416_v42  ;;  %v4093_v23 = vpack.c.bf16 %v2874_v16, %v2873_v11  ;;  %v4094_v19 = vpack.c.bf16 %v2876_v2, %v2875_v56  ;;  %v2880_v57 = vmax.f32 %v4160_v38, 0.0 }
 0x1e5   :  { %v3512_v5 = vmax.f32 %v8189_v29, %v3417_v58  ;;  %v8190_v49 = vmax.f32 %v7196_v32, %v7316_v12  ;;  %v8191_v36 = vmax.f32 %v7198_v14, %v7329_v28  ;;  %v8192_v58 = vmax.f32 %v7200_v18, %v7334_v39  ;;  %v2354_v18 = vpop.f32.mrb[8].mxu0  ;;  %v3400_v29 = vld [vmem:[%s7883_s3 + $0x7b8] sm:$0xff] }
 0x1e6   :  { %v8193_v31 = vmax.f32 %v7202_v45, %v7339_v26  ;;  %3704 = vst [vmem:[%s7886_s5 + $0x38] sm:$0xff] %v3504_v44  ;;  %3125 = vst [vmem:[%s7885_s4 + $0x20] sm:$0xff] %v4093_v23  ;;  %v4095_v32 = vpack.c.bf16 %v2878_v7, %v2877_v27  ;;  %v4096_v14 = vpack.c.bf16 %v2880_v57, %v2879_v15  ;;  %v2806_v45 = vpop.f32.mrb[8].mxu1  ;;  %v2356_v56 = vpop.f32.mrb[9].mxu0  ;;  %v3430_v23 = vld [vmem:[%s7883_s3 + $0x8a8] sm:$0xff] }
 0x1e7   :  { %v3520_v13 = vmax.f32 %v8190_v49, %v3418_v61  ;;  %v3528_v42 = vmax.f32 %v8191_v36, %v3419_v63  ;;  %v3536_v60 = vmax.f32 %v8192_v58, %v3420_v48  ;;  %3705 = vst [vmem:[%s7886_s5 + $0x40] sm:$0xff] %v3512_v5  ;;  %3126 = vst [vmem:[%s7885_s4 + $0x28] sm:$0xff] %v4094_v19  ;;  %v2808_v54 = vpop.f32.mrb[9].mxu1  ;;  %v8198_v61 = vld [vmem:[#allocation25_spill] sm:$0xff]  ;;  %v3401_v5 = vld [vmem:[%s7883_s3 + $0x7c0] sm:$0xff] }
 0x1e8   :  { %v3544_v55 = vmax.f32 %v8193_v31, %v3421_v8  ;;  %v8194_v12 = vmax.f32 %v7213_v9, %v7352_v21  ;;  %v8195_v39 = vmax.f32 %v7215_v47, %v7357_v10  ;;  %v4129_v4 = vadd.f32 %v2354_v18, %v8174_v40  ;;  %3127 = vst [vmem:[%s7885_s4 + $0x30] sm:$0xff] %v4095_v32  ;;  %v2810_v21 = vpop.f32.mrb[10].mxu1  ;;  %v3428_v10 = vld [vmem:[%s7883_s3 + $0x898] sm:$0xff]  ;;  %v3402_v57 = vld [vmem:[%s7883_s3 + $0x7c8] sm:$0xff]  ;;  %v3431_v31 = vld [vmem:[%s7883_s3 + $0x8b0] sm:$0xff] }
 0x1e9   :  { %v4161_v11 = vadd.f32 %v2806_v45, %v8175_v17  ;;  %v8196_v35 = vmax.f32 %v7217_v33, %v7362_v30  ;;  %v8199_v16 = vmax.f32 %v8197_v50, %v8198_v61  ;;  %3706 = vst [vmem:[%s7886_s5 + $0x48] sm:$0xff] %v3520_v13  ;;  %3707 = vst [vmem:[%s7886_s5 + $0x50] sm:$0xff] %v3528_v42  ;;  %v2358_v33 = vpop.f32.mrb[10].mxu0  ;;  %v3429_v30 = vld [vmem:[%s7883_s3 + $0x8a0] sm:$0xff]  ;;  %v8206_v32 = vld [vmem:[#allocation27_spill] sm:$0xff] }
 0x1ea   :  { %v3552_v28 = vmax.f32 %v8194_v12, %v3422_v46  ;;  %v3560_v26 = vmax.f32 %v8195_v39, %v3423_v6  ;;  %3708 = vst [vmem:[%s7886_s5 + $0x58] sm:$0xff] %v3536_v60  ;;  %3709 = vst [vmem:[%s7886_s5 + $0x60] sm:$0xff] %v3544_v55  ;;  %v4130_v9 = vadd.f32 %v2356_v56, %v8177_v62  ;;  %v2881_v8 = vmax.f32 %v4129_v4, 0.0  ;;  %v3432_v55 = vld [vmem:[%s7883_s3 + $0x8b8] sm:$0xff]  ;;  %v8212_v61 = vld [vmem:[#allocation6_spill] sm:$0xff] }
 0x1eb   :  { %v3568_v34 = vmax.f32 %v8196_v35, %v3424_v3  ;;  %v3576_v2 = vmax.f32 %v8199_v16, %v3425_v24  ;;  %3128 = vst [vmem:[%s7885_s4 + $0x38] sm:$0xff] %v4096_v14  ;;  %v4162_v47 = vadd.f32 %v2808_v54, %v8178_v51  ;;  %v8200_v43 = vmax.f32 %v7230_v53, %v7388_v59  ;;  %v2360_v53 = vpop.f32.mrb[11].mxu0  ;;  %v2812_v59 = vpop.f32.mrb[11].mxu1  ;;  %v7663_v3 = vld [vmem:[%s7883_s3 + $0x7d0] sm:$0xff]  ;;  %v8208_v45 = vld [vmem:[#allocation5_spill] sm:$0xff] }
 0x1ec   :  { %v8201_v63 = vmax.f32 %v7232_v0, %v7393_v25  ;;  %3710 = vst [vmem:[%s7886_s5 + $0x68] sm:$0xff] %v3552_v28  ;;  %3711 = vst [vmem:[%s7886_s5 + $0x70] sm:$0xff] %v3560_v26  ;;  %v2883_v27 = vmax.f32 %v4161_v11, 0.0  ;;  %v4131_v15 = vadd.f32 %v2358_v33, %v8174_v40  ;;  %v4163_v46 = vadd.f32 %v2810_v21, %v8175_v17  ;;  %v3399_v0 = vld [vmem:[%s7883_s3 + $0x7b0] sm:$0xff]  ;;  %v8209_v28 = vld [vmem:[#allocation11_spill] sm:$0xff] }
 0x1ed   :  { %v3584_v38 = vmax.f32 %v8200_v43, %v3426_v20  ;;  %3712 = vst [vmem:[%s7886_s5 + $0x78] sm:$0xff] %v3568_v34  ;;  %3713 = vst [vmem:[%s7886_s5 + $0x80] sm:$0xff] %v3576_v2  ;;  %v2882_v25 = vmax.f32 %v4130_v9, 0.0  ;;  %v2884_v6 = vmax.f32 %v4162_v47, 0.0  ;;  %v4132_v52 = vadd.f32 %v2360_v53, %v8177_v62  ;;  %v8210_v26 = vld [vmem:[#allocation3_spill] sm:$0xff]  ;;  %v2364_v54 = vpop.f32.mrb[12].mxu0 }
 0x1ee   :  { %v3592_v48 = vmax.f32 %v8201_v63, %v3427_v22  ;;  %v4164_v44 = vadd.f32 %v2812_v59, %v8178_v51  ;;  %v2885_v19 = vmax.f32 %v4131_v15, 0.0  ;;  %v2887_v7 = vmax.f32 %v4163_v46, 0.0  ;;  %v8203_v22 = vld [vmem:[#allocation9_spill] sm:$0xff]  ;;  %v2816_v35 = vpop.f32.mrb[12].mxu1  ;;  %v8211_v34 = vld [vmem:[#allocation14_spill] sm:$0xff]  ;;  %v2366_v47 = vpop.f32.mrb[13].mxu0 }
 0x1ef   :  { %3714 = vst [vmem:[%s7886_s5 + $0x88] sm:$0xff] %v3584_v38  ;;  %v8202_v24 = vmax.f32 %v7234_v1, %v7406_v37  ;;  %v8204_v49 = vmax.f32 %v7236_v41, %v8203_v22  ;;  %v4097_v36 = vpack.c.bf16 %v2882_v25, %v2881_v8  ;;  %v4098_v42 = vpack.c.bf16 %v2884_v6, %v2883_v27  ;;  %v3433_v1 = vld [vmem:[%s7883_s3 + $0x8c0] sm:$0xff]  ;;  %v3434_v41 = vld [vmem:[%s7883_s3 + $0x8c8] sm:$0xff]  ;;  %v8205_v37 = vld [vmem:[#allocation8_spill] sm:$0xff]  ;;  %v2818_v33 = vpop.f32.mrb[13].mxu1  ;;  %v2368_v38 = vpop.f32.mrb[14].mxu0 }
 0x1f0   :  { %3715 = vst [vmem:[%s7886_s5 + $0x90] sm:$0xff] %v3592_v48  ;;  %v2886_v58 = vmax.f32 %v4132_v52, 0.0  ;;  %v2888_v60 = vmax.f32 %v4164_v44, 0.0  ;;  %v8207_v14 = vmax.f32 %v8205_v37, %v8206_v32  ;;  %v3623_v12 = vmax.f32 %v8208_v45, %v3399_v0  ;;  %v2820_v63 = vpop.f32.mrb[14].mxu1  ;;  %v3404_v48 = vld [vmem:[%s7883_s3 + $0x7d8] sm:$0xff]  ;;  %v3435_v8 = vld [vmem:[%s7883_s3 + $0x8d0] sm:$0xff] }
 0x1f1   :  { %v3600_v20 = vmax.f32 %v8202_v24, %v3428_v10  ;;  %v3608_v13 = vmax.f32 %v8204_v49, %v3429_v30  ;;  %v3631_v39 = vmax.f32 %v8209_v28, %v3400_v29  ;;  %v3639_v4 = vmax.f32 %v8210_v26, %v3401_v5  ;;  %3129 = vst [vmem:[%s7885_s4 + $0x40] sm:$0xff] %v4097_v36  ;;  %v2370_v25 = vpop.f32.mrb[15].mxu0  ;;  %v2822_v6 = vpop.f32.mrb[15].mxu1  ;;  %v3405_v52 = vld [vmem:[%s7883_s3 + $0x7e0] sm:$0xff]  ;;  %v8213_v49 = vld [vmem:[#allocation16_spill] sm:$0xff]  ;;  %v8214_v32 = vld [vmem:[#allocation7_spill] sm:$0xff] }
 0x1f2   :  { %v3616_v18 = vmax.f32 %v8207_v14, %v3430_v23  ;;  %3130 = vst [vmem:[%s7885_s4 + $0x48] sm:$0xff] %v4098_v42  ;;  %v4099_v11 = vpack.c.bf16 %v2886_v58, %v2885_v19  ;;  %v4100_v56 = vpack.c.bf16 %v2888_v60, %v2887_v7  ;;  %v3647_v50 = vmax.f32 %v8211_v34, %v3402_v57  ;;  %v3406_v19 = vld [vmem:[%s7883_s3 + $0x7e8] sm:$0xff]  ;;  %v3407_v7 = vld [vmem:[%s7883_s3 + $0x7f0] sm:$0xff]  ;;  %v3436_v57 = vld [vmem:[%s7883_s3 + $0x8d8] sm:$0xff] }
 0x1f3   :  { %3716 = vst [vmem:[%s7886_s5 + $0x98] sm:$0xff] %v3600_v20  ;;  %3717 = vst [vmem:[%s7886_s5 + $0xa0] sm:$0xff] %v3608_v13  ;;  %v3655_v16 = vmax.f32 %v8212_v61, %v7663_v3  ;;  %v4133_v2 = vadd.f32 %v2364_v54, %v8174_v40  ;;  %v4165_v9 = vadd.f32 %v2816_v35, %v8175_v17  ;;  %v3408_v20 = vld [vmem:[%s7883_s3 + $0x7f8] sm:$0xff] }
 0x1f4   :  { %v3624_v21 = vmax.f32 %v3623_v12, %v3431_v31  ;;  %v3632_v10 = vmax.f32 %v3631_v39, %v3432_v55  ;;  %3718 = vst [vmem:[%s7886_s5 + $0xa8] sm:$0xff] %v3616_v18  ;;  %3131 = vst [vmem:[%s7885_s4 + $0x50] sm:$0xff] %v4099_v11  ;;  %v4134_v30 = vadd.f32 %v2366_v47, %v8177_v62  ;;  %v3437_v31 = vld [vmem:[%s7883_s3 + $0x8e0] sm:$0xff]  ;;  %v3438_v55 = vld [vmem:[%s7883_s3 + $0x8e8] sm:$0xff] }
 0x1f5   :  { %3132 = vst [vmem:[%s7885_s4 + $0x58] sm:$0xff] %v4100_v56  ;;  %v4166_v43 = vadd.f32 %v2818_v33, %v8178_v51  ;;  %v3640_v27 = vmax.f32 %v3639_v4, %v3433_v1  ;;  %v3648_v15 = vmax.f32 %v3647_v50, %v3434_v41  ;;  %v2889_v46 = vmax.f32 %v4133_v2, 0.0  ;;  %v3439_v1 = vld [vmem:[%s7883_s3 + $0x8f0] sm:$0xff]  ;;  %v3440_v41 = vld [vmem:[%s7883_s3 + $0x8f8] sm:$0xff]  ;;  %v8216_v12 = vld [vmem:[#allocation10_spill] sm:$0xff]  ;;  %v2374_v4 = vpop.f32.mrb[16].mxu0 }
 0x1f6   :  { %v2891_v53 = vmax.f32 %v4165_v9, 0.0  ;;  %v4135_v59 = vadd.f32 %v2368_v38, %v8174_v40  ;;  %v4167_v0 = vadd.f32 %v2820_v63, %v8175_v17  ;;  %3719 = vst [vmem:[%s7886_s5 + $0xb0] sm:$0xff] %v3624_v21  ;;  %3720 = vst [vmem:[%s7886_s5 + $0xb8] sm:$0xff] %v3632_v10  ;;  %v2890_v44 = vmax.f32 %v4134_v30, 0.0  ;;  %v8215_v18 = vld [vmem:[#allocation21_spill] sm:$0xff]  ;;  %v2826_v11 = vpop.f32.mrb[16].mxu1 }
 0x1f7   :  { %v2892_v29 = vmax.f32 %v4166_v43, 0.0  ;;  %v4136_v5 = vadd.f32 %v2370_v25, %v8177_v62  ;;  %v4168_v23 = vadd.f32 %v2822_v6, %v8178_v51  ;;  %3721 = vst [vmem:[%s7886_s5 + $0xc0] sm:$0xff] %v3640_v27  ;;  %3722 = vst [vmem:[%s7886_s5 + $0xc8] sm:$0xff] %v3648_v15  ;;  %v3656_v22 = vmax.f32 %v3655_v16, %v3435_v8  ;;  %v8217_v56 = vld [vmem:[#allocation23_spill] sm:$0xff]  ;;  %v2376_v50 = vpop.f32.mrb[17].mxu0  ;;  %v2828_v61 = vpop.f32.mrb[17].mxu1 }
 0x1f8   :  { %v2893_v3 = vmax.f32 %v4135_v59, 0.0  ;;  %v2895_v24 = vmax.f32 %v4167_v0, 0.0  ;;  %v3663_v13 = vmax.f32 %v8213_v49, %v3404_v48  ;;  %v4101_v36 = vpack.c.bf16 %v2890_v44, %v2889_v46  ;;  %v2378_v33 = vpop.f32.mrb[18].mxu0  ;;  %v2830_v21 = vpop.f32.mrb[18].mxu1 }
 0x1f9   :  { %v4102_v42 = vpack.c.bf16 %v2892_v29, %v2891_v53  ;;  %v2894_v58 = vmax.f32 %v4136_v5, 0.0  ;;  %v2896_v60 = vmax.f32 %v4168_v23, 0.0  ;;  %v3671_v14 = vmax.f32 %v8214_v32, %v3405_v52  ;;  %3723 = vst [vmem:[%s7886_s5 + $0xd0] sm:$0xff] %v3656_v22  ;;  %v2380_v8 = vpop.f32.mrb[19].mxu0  ;;  %v2832_v27 = vpop.f32.mrb[19].mxu1 }
 0x1fa   :  { %v3664_v37 = vmax.f32 %v3663_v13, %v3436_v57  ;;  %v3679_v45 = vmax.f32 %v8215_v18, %v3406_v19  ;;  %v3687_v28 = vmax.f32 %v8216_v12, %v3407_v7  ;;  %3133 = vst [vmem:[%s7885_s4 + $0x60] sm:$0xff] %v4101_v36  ;;  %v3695_v54 = vmax.f32 %v8217_v56, %v3408_v20 }
 0x1fb   :  { %3134 = vst [vmem:[%s7885_s4 + $0x68] sm:$0xff] %v4102_v42  ;;  %v4103_v39 = vpack.c.bf16 %v2894_v58, %v2893_v3  ;;  %v4104_v26 = vpack.c.bf16 %v2896_v60, %v2895_v24  ;;  %v4137_v35 = vadd.f32 %v2374_v4, %v8174_v40  ;;  %v4169_v34 = vadd.f32 %v2826_v11, %v8175_v17 }
 0x1fc   :  { %v3672_v16 = vmax.f32 %v3671_v14, %v3437_v31  ;;  %v3680_v2 = vmax.f32 %v3679_v45, %v3438_v55  ;;  %3724 = vst [vmem:[%s7886_s5 + $0xd8] sm:$0xff] %v3664_v37  ;;  %v4138_v9 = vadd.f32 %v2376_v50, %v8177_v62  ;;  %v4170_v47 = vadd.f32 %v2828_v61, %v8178_v51 }
 0x1fd   :  { %3135 = vst [vmem:[%s7885_s4 + $0x70] sm:$0xff] %v4103_v39  ;;  %3136 = vst [vmem:[%s7885_s4 + $0x78] sm:$0xff] %v4104_v26  ;;  %v3688_v10 = vmax.f32 %v3687_v28, %v3439_v1  ;;  %v3696_v30 = vmax.f32 %v3695_v54, %v3440_v41  ;;  %v2897_v43 = vmax.f32 %v4137_v35, 0.0  ;;  %v2899_v38 = vmax.f32 %v4169_v34, 0.0  ;;  %v2384_v19 = vpop.f32.mrb[20].mxu0  ;;  %v2836_v7 = vpop.f32.mrb[20].mxu1 }
 0x1fe   :  { %v4139_v63 = vadd.f32 %v2378_v33, %v8174_v40  ;;  %v4171_v48 = vadd.f32 %v2830_v21, %v8175_v17  ;;  %3725 = vst [vmem:[%s7886_s5 + $0xe0] sm:$0xff] %v3672_v16  ;;  %3726 = vst [vmem:[%s7886_s5 + $0xe8] sm:$0xff] %v3680_v2  ;;  %v2898_v15 = vmax.f32 %v4138_v9, 0.0  ;;  %v2900_v46 = vmax.f32 %v4170_v47, 0.0  ;;  %v2386_v24 = vpop.f32.mrb[21].mxu0  ;;  %v2838_v20 = vpop.f32.mrb[21].mxu1 }
 0x1ff   :  { %v4140_v53 = vadd.f32 %v2380_v8, %v8177_v62  ;;  %v4172_v59 = vadd.f32 %v2832_v27, %v8178_v51  ;;  %3727 = vst [vmem:[%s7886_s5 + $0xf0] sm:$0xff] %v3688_v10  ;;  %3728 = vst [vmem:[%s7886_s5 + $0xf8] sm:$0xff] %v3696_v30  ;;  %v4141_v57 = vadd.f32 %v2384_v19, %v8174_v40  ;;  %v2388_v13 = vpop.f32.mrb[22].mxu0  ;;  %v2840_v36 = vpop.f32.mrb[22].mxu1 }
 0x200   :  { %v2901_v0 = vmax.f32 %v4139_v63, 0.0  ;;  %v2903_v25 = vmax.f32 %v4171_v48, 0.0  ;;  %v4105_v6 = vpack.c.bf16 %v2898_v15, %v2897_v43  ;;  %v4106_v52 = vpack.c.bf16 %v2900_v46, %v2899_v38  ;;  %v2390_v55 = vpop.f32.mrb[23].mxu0  ;;  %v2842_v1 = vpop.f32.mrb[23].mxu1 }
 0x201   :  { %v2902_v44 = vmax.f32 %v4140_v53, 0.0  ;;  %v2904_v29 = vmax.f32 %v4172_v59, 0.0  ;;  %v4173_v3 = vadd.f32 %v2836_v7, %v8175_v17  ;;  %v4142_v22 = vadd.f32 %v2386_v24, %v8177_v62 }
 0x202   :  { %3137 = vst [vmem:[%s7885_s4 + $0x80] sm:$0xff] %v4105_v6  ;;  %3138 = vst [vmem:[%s7885_s4 + $0x88] sm:$0xff] %v4106_v52  ;;  %v4174_v49 = vadd.f32 %v2838_v20, %v8178_v51  ;;  %v2905_v42 = vmax.f32 %v4141_v57, 0.0  ;;  %v4143_v60 = vadd.f32 %v2388_v13, %v8174_v40  ;;  %v4175_v31 = vadd.f32 %v2840_v36, %v8175_v17 }
 0x203   :  { %v4107_v5 = vpack.c.bf16 %v2902_v44, %v2901_v0  ;;  %v4108_v23 = vpack.c.bf16 %v2904_v29, %v2903_v25  ;;  %v2907_v58 = vmax.f32 %v4173_v3, 0.0  ;;  %v2906_v41 = vmax.f32 %v4142_v22, 0.0 }
 0x204   :  { %v2908_v37 = vmax.f32 %v4174_v49, 0.0  ;;  %v4144_v32 = vadd.f32 %v2390_v55, %v8177_v62  ;;  %v4176_v14 = vadd.f32 %v2842_v1, %v8178_v51  ;;  %v2909_v18 = vmax.f32 %v4143_v60, 0.0 }
 0x205   :  { %3139 = vst [vmem:[%s7885_s4 + $0x90] sm:$0xff] %v4107_v5  ;;  %3140 = vst [vmem:[%s7885_s4 + $0x98] sm:$0xff] %v4108_v23  ;;  %v2911_v45 = vmax.f32 %v4175_v31, 0.0  ;;  %v4109_v12 = vpack.c.bf16 %v2906_v41, %v2905_v42  ;;  %v2394_v56 = vpop.f32.mrb[24].mxu0  ;;  %v2846_v54 = vpop.f32.mrb[24].mxu1 }
 0x206   :  { %v4110_v28 = vpack.c.bf16 %v2908_v37, %v2907_v58  ;;  %v2910_v39 = vmax.f32 %v4144_v32, 0.0  ;;  %v2912_v26 = vmax.f32 %v4176_v14, 0.0  ;;  %v4145_v35 = vadd.f32 %v2394_v56, %v8174_v40  ;;  %v2396_v50 = vpop.f32.mrb[25].mxu0  ;;  %v2848_v61 = vpop.f32.mrb[25].mxu1 }
 0x207   :  { %3141 = vst [vmem:[%s7885_s4 + $0xa0] sm:$0xff] %v4109_v12  ;;  %v4177_v34 = vadd.f32 %v2846_v54, %v8175_v17  ;;  %v4146_v16 = vadd.f32 %v2396_v50, %v8177_v62  ;;  %v4178_v2 = vadd.f32 %v2848_v61, %v8178_v51  ;;  %v2398_v9 = vpop.f32.mrb[26].mxu0  ;;  %v2850_v47 = vpop.f32.mrb[26].mxu1 }
 0x208   :  { %3142 = vst [vmem:[%s7885_s4 + $0xa8] sm:$0xff] %v4110_v28  ;;  %v4111_v4 = vpack.c.bf16 %v2910_v39, %v2909_v18  ;;  %v4112_v11 = vpack.c.bf16 %v2912_v26, %v2911_v45  ;;  %v2913_v33 = vmax.f32 %v4145_v35, 0.0  ;;  %v4147_v10 = vadd.f32 %v2398_v9, %v8174_v40  ;;  %v2400_v43 = vpop.f32.mrb[27].mxu0  ;;  %v2852_v38 = vpop.f32.mrb[27].mxu1 }
 0x209   :  { %v2915_v21 = vmax.f32 %v4177_v34, 0.0  ;;  %v4179_v30 = vadd.f32 %v2850_v47, %v8175_v17  ;;  %v2914_v63 = vmax.f32 %v4146_v16, 0.0  ;;  %v2916_v48 = vmax.f32 %v4178_v2, 0.0 }
 0x20a   :  { %3143 = vst [vmem:[%s7885_s4 + $0xb0] sm:$0xff] %v4111_v4  ;;  %3144 = vst [vmem:[%s7885_s4 + $0xb8] sm:$0xff] %v4112_v11  ;;  %v4148_v8 = vadd.f32 %v2400_v43, %v8177_v62  ;;  %v4180_v27 = vadd.f32 %v2852_v38, %v8178_v51  ;;  %v2917_v15 = vmax.f32 %v4147_v10, 0.0 }
 0x20b   :  { %v2919_v46 = vmax.f32 %v4179_v30, 0.0  ;;  %v4113_v53 = vpack.c.bf16 %v2914_v63, %v2913_v33  ;;  %v4114_v59 = vpack.c.bf16 %v2916_v48, %v2915_v21 }
 0x20c   :  { %v2918_v0 = vmax.f32 %v4148_v8, 0.0  ;;  %v2920_v25 = vmax.f32 %v4180_v27, 0.0 }
 0x20d   :  { %3145 = vst [vmem:[%s7885_s4 + $0xc0] sm:$0xff] %v4113_v53  ;;  %3146 = vst [vmem:[%s7885_s4 + $0xc8] sm:$0xff] %v4114_v59  ;;  %v2404_v44 = vpop.f32.mrb[28].mxu0  ;;  %v2856_v29 = vpop.f32.mrb[28].mxu1 }
 0x20e   :  { %v4115_v6 = vpack.c.bf16 %v2918_v0, %v2917_v15  ;;  %v4116_v52 = vpack.c.bf16 %v2920_v25, %v2919_v46  ;;  %v4149_v5 = vadd.f32 %v2404_v44, %v8174_v40  ;;  %v4181_v23 = vadd.f32 %v2856_v29, %v8175_v17  ;;  %v2406_v19 = vpop.f32.mrb[29].mxu0  ;;  %v2858_v7 = vpop.f32.mrb[29].mxu1 }
 0x20f   :  { %v4150_v57 = vadd.f32 %v2406_v19, %v8177_v62  ;;  %v4182_v3 = vadd.f32 %v2858_v7, %v8178_v51  ;;  %v2408_v24 = vpop.f32.mrb[30].mxu0  ;;  %v2860_v20 = vpop.f32.mrb[30].mxu1 }
 0x210   :  { %3147 = vst [vmem:[%s7885_s4 + $0xd0] sm:$0xff] %v4115_v6  ;;  %3148 = vst [vmem:[%s7885_s4 + $0xd8] sm:$0xff] %v4116_v52  ;;  %v2921_v22 = vmax.f32 %v4149_v5, 0.0  ;;  %v2923_v49 = vmax.f32 %v4181_v23, 0.0  ;;  %v4151_v13 = vadd.f32 %v2408_v24, %v8174_v40  ;;  %v4183_v36 = vadd.f32 %v2860_v20, %v8175_v17  ;;  %v2410_v42 = vpop.f32.mrb[31].mxu0  ;;  %v2862_v58 = vpop.f32.mrb[31].mxu1 }
 0x211   :  { %v2922_v60 = vmax.f32 %v4150_v57, 0.0  ;;  %v2924_v31 = vmax.f32 %v4182_v3, 0.0  ;;  %v4152_v55 = vadd.f32 %v2410_v42, %v8177_v62  ;;  %v4184_v1 = vadd.f32 %v2862_v58, %v8178_v51 }
 0x212   :  { %v2925_v41 = vmax.f32 %v4151_v13, 0.0  ;;  %v2927_v37 = vmax.f32 %v4183_v36, 0.0 }
 0x213   :  { %v4117_v32 = vpack.c.bf16 %v2922_v60, %v2921_v22  ;;  %v4118_v14 = vpack.c.bf16 %v2924_v31, %v2923_v49  ;;  %v2926_v18 = vmax.f32 %v4152_v55, 0.0  ;;  %v2928_v45 = vmax.f32 %v4184_v1, 0.0 }
 0x215   :  { %3149 = vst [vmem:[%s7885_s4 + $0xe0] sm:$0xff] %v4117_v32  ;;  %3150 = vst [vmem:[%s7885_s4 + $0xe8] sm:$0xff] %v4118_v14  ;;  %v4119_v17 = vpack.c.bf16 %v2926_v18, %v2925_v41  ;;  %v4120_v40 = vpack.c.bf16 %v2928_v45, %v2927_v37 }
 0x217   :  { %3151 = vst [vmem:[%s7885_s4 + $0xf0] sm:$0xff] %v4119_v17  ;;  %3152 = vst [vmem:[%s7885_s4 + $0xf8] sm:$0xff] %v4120_v40 }

// kernel: reduction_b_forward.5
= control target key start
LH: loop header
LB: loop body
LE: loop exit
PB: predicated region body
PF: predicated region fallthrough
CT: control target
= control target key end

     0   :  { %s5317_s1 = inlined_call_operand.vmem [shape: bf16[1792,256], index: 1, kind: input, shape index: {}]   ;;  %s5318_s0 = inlined_call_operand.vmem [shape: bf16[128,1792], index: 0, kind: input, shape index: {}]   ;;  %s5319_s2 = inlined_call_operand.vmem [shape: f32[1,256], index: 2, kind: input, shape index: {}]   ;;  %s5320_s3 = inlined_call_operand.vmem [shape: bf16[128,256], index: 3, kind: output, shape index: {}]  }
   0x1   :  { %v3605_v0 = vld [vmem:[%s5317_s1 + $0x4] ss:$8 sps:$4 sm:$0xff]   ;;  %v3609_v2 = vld [vmem:[%s5317_s1] ss:$8 sps:$4 sm:$0xff]   ;;  %v3611_v4 = vld [vmem:[%s5317_s1 + $0x14] ss:$8 sps:$4 sm:$0xff]  }
   0x2   :  { %v3607_v1 = vld [vmem:[%s5317_s1 + $0x304] ss:$8 sps:$4 sm:$0xff]   ;;  %2042 = vmatprep.subr.bf16.mxu1 %v3605_v0  ;;  %v3610_v3 = vld [vmem:[%s5317_s1 + $0x300] ss:$8 sps:$4 sm:$0xff]   ;;  %v3613_v5 = vld [vmem:[%s5317_s1 + $0x314] ss:$8 sps:$4 sm:$0xff]  }
   0x3   :  { %2381 = vmatprep.subr.bf16.mxu0 %v3607_v1  ;;  %2043 = vmatpush1.bf16.msra.mxu1 %v3609_v2  ;;  %v3615_v6 = vld [vmem:[%s5317_s1 + $0x10] ss:$8 sps:$4 sm:$0xff]   ;;  %v3617_v8 = vld [vmem:[%s5317_s1 + $0x24] ss:$8 sps:$4 sm:$0xff]   ;;  %v3621_v10 = vld [vmem:[%s5317_s1 + $0x20] ss:$8 sps:$4 sm:$0xff]  }
   0x4   :  { %2382 = vmatpush1.bf16.msra.mxu0 %v3610_v3  ;;  %2044 = vmatprep.subr.bf16.mxu1 %v3611_v4  ;;  %v3616_v7 = vld [vmem:[%s5317_s1 + $0x310] ss:$8 sps:$4 sm:$0xff]   ;;  %v3619_v9 = vld [vmem:[%s5317_s1 + $0x324] ss:$8 sps:$4 sm:$0xff]   ;;  %v3622_v11 = vld [vmem:[%s5317_s1 + $0x320] ss:$8 sps:$4 sm:$0xff]  }
   0x5   :  { %2383 = vmatprep.subr.bf16.mxu0 %v3613_v5  ;;  %v3623_v12 = vld [vmem:[%s5317_s1 + $0x34] ss:$8 sps:$4 sm:$0xff]   ;;  %v3627_v14 = vld [vmem:[%s5317_s1 + $0x30] ss:$8 sps:$4 sm:$0xff]   ;;  %v3629_v16 = vld [vmem:[%s5317_s1 + $0x44] ss:$8 sps:$4 sm:$0xff]  }
   0x6   :  { %v3625_v13 = vld [vmem:[%s5317_s1 + $0x334] ss:$8 sps:$4 sm:$0xff]   ;;  %v3628_v15 = vld [vmem:[%s5317_s1 + $0x330] ss:$8 sps:$4 sm:$0xff]   ;;  %v3631_v17 = vld [vmem:[%s5317_s1 + $0x344] ss:$8 sps:$4 sm:$0xff]  }
   0x7   :  { %2045 = vmatpush1.bf16.msra.mxu1 %v3615_v6  ;;  %v3633_v18 = vld [vmem:[%s5317_s1 + $0x40] ss:$8 sps:$4 sm:$0xff]   ;;  %v3635_v20 = vld [vmem:[%s5317_s1 + $0x54] ss:$8 sps:$4 sm:$0xff]   ;;  %v3639_v22 = vld [vmem:[%s5317_s1 + $0x50] ss:$8 sps:$4 sm:$0xff]  }
   0x8   :  { %2384 = vmatpush1.bf16.msra.mxu0 %v3616_v7  ;;  %2046 = vmatprep.subr.bf16.mxu1 %v3617_v8  ;;  %v3634_v19 = vld [vmem:[%s5317_s1 + $0x340] ss:$8 sps:$4 sm:$0xff]   ;;  %v3637_v21 = vld [vmem:[%s5317_s1 + $0x354] ss:$8 sps:$4 sm:$0xff]   ;;  %v3640_v23 = vld [vmem:[%s5317_s1 + $0x350] ss:$8 sps:$4 sm:$0xff]  }
   0x9   :  { %2385 = vmatprep.subr.bf16.mxu0 %v3619_v9  ;;  %v3641_v24 = vld [vmem:[%s5317_s1 + $0x64] ss:$8 sps:$4 sm:$0xff]   ;;  %v3645_v26 = vld [vmem:[%s5317_s1 + $0x60] ss:$8 sps:$4 sm:$0xff]   ;;  %v3647_v28 = vld [vmem:[%s5317_s1 + $0x74] ss:$8 sps:$4 sm:$0xff]  }
   0xa   :  { %v3643_v25 = vld [vmem:[%s5317_s1 + $0x364] ss:$8 sps:$4 sm:$0xff]   ;;  %v3646_v27 = vld [vmem:[%s5317_s1 + $0x360] ss:$8 sps:$4 sm:$0xff]   ;;  %v3649_v29 = vld [vmem:[%s5317_s1 + $0x374] ss:$8 sps:$4 sm:$0xff]  }
   0xb   :  { %2047 = vmatpush1.bf16.msra.mxu1 %v3621_v10  ;;  %v3651_v30 = vld [vmem:[%s5317_s1 + $0x70] ss:$8 sps:$4 sm:$0xff]   ;;  %v3653_v32 = vld [vmem:[%s5317_s1 + $0x84] ss:$8 sps:$4 sm:$0xff]   ;;  %v3657_v34 = vld [vmem:[%s5317_s1 + $0x80] ss:$8 sps:$4 sm:$0xff]  }
   0xc   :  { %2386 = vmatpush1.bf16.msra.mxu0 %v3622_v11  ;;  %2048 = vmatprep.subr.bf16.mxu1 %v3623_v12  ;;  %v3652_v31 = vld [vmem:[%s5317_s1 + $0x370] ss:$8 sps:$4 sm:$0xff]   ;;  %v3655_v33 = vld [vmem:[%s5317_s1 + $0x384] ss:$8 sps:$4 sm:$0xff]   ;;  %v3658_v35 = vld [vmem:[%s5317_s1 + $0x380] ss:$8 sps:$4 sm:$0xff]  }
   0xd   :  { %2387 = vmatprep.subr.bf16.mxu0 %v3625_v13  ;;  %v3659_v36 = vld [vmem:[%s5317_s1 + $0x94] ss:$8 sps:$4 sm:$0xff]   ;;  %v3663_v38 = vld [vmem:[%s5317_s1 + $0x90] ss:$8 sps:$4 sm:$0xff]   ;;  %v3665_v40 = vld [vmem:[%s5317_s1 + $0xa4] ss:$8 sps:$4 sm:$0xff]  }
   0xe   :  { %v3661_v37 = vld [vmem:[%s5317_s1 + $0x394] ss:$8 sps:$4 sm:$0xff]   ;;  %v3664_v39 = vld [vmem:[%s5317_s1 + $0x390] ss:$8 sps:$4 sm:$0xff]   ;;  %v3667_v41 = vld [vmem:[%s5317_s1 + $0x3a4] ss:$8 sps:$4 sm:$0xff]  }
   0xf   :  { %2049 = vmatpush1.bf16.msra.mxu1 %v3627_v14  ;;  %v3669_v42 = vld [vmem:[%s5317_s1 + $0xa0] ss:$8 sps:$4 sm:$0xff]   ;;  %v3671_v44 = vld [vmem:[%s5317_s1 + $0xb4] ss:$8 sps:$4 sm:$0xff]   ;;  %v3675_v46 = vld [vmem:[%s5317_s1 + $0xb0] ss:$8 sps:$4 sm:$0xff]  }
  0x10   :  { %2388 = vmatpush1.bf16.msra.mxu0 %v3628_v15  ;;  %2050 = vmatprep.subr.bf16.mxu1 %v3629_v16  ;;  %v3670_v43 = vld [vmem:[%s5317_s1 + $0x3a0] ss:$8 sps:$4 sm:$0xff]   ;;  %v3673_v45 = vld [vmem:[%s5317_s1 + $0x3b4] ss:$8 sps:$4 sm:$0xff]   ;;  %v3676_v47 = vld [vmem:[%s5317_s1 + $0x3b0] ss:$8 sps:$4 sm:$0xff]  }
  0x11   :  { %2389 = vmatprep.subr.bf16.mxu0 %v3631_v17  ;;  %v3677_v48 = vld [vmem:[%s5317_s1 + $0xc4] ss:$8 sps:$4 sm:$0xff]   ;;  %v3706_v51 = vld [vmem:[%s5318_s0 + $0x1c] ss:$56 sps:$4 sm:$0xff]   ;;  %v3681_v52 = vld [vmem:[%s5317_s1 + $0xc0] ss:$8 sps:$4 sm:$0xff]  }
  0x12   :  { %v3703_v49 = vld [vmem:[%s5318_s0 + $0x4] ss:$56 sps:$4 sm:$0xff]   ;;  %v3682_v53 = vld [vmem:[%s5317_s1 + $0x3c0] ss:$8 sps:$4 sm:$0xff]   ;;  %2413 = vmatprep.mubr.bf16.mxu0 %v3706_v51  ;;  %v3687_v56 = vld [vmem:[%s5317_s1 + $0xd0] ss:$8 sps:$4 sm:$0xff]  }
  0x13   :  { %2051 = vmatpush1.bf16.msra.mxu1 %v3633_v18  ;;  %v3679_v50 = vld [vmem:[%s5317_s1 + $0x3c4] ss:$8 sps:$4 sm:$0xff]   ;;  %2074 = vmatprep.mubr.bf16.mxu1 %v3703_v49  ;;  %v3683_v54 = vld [vmem:[%s5317_s1 + $0xd4] ss:$8 sps:$4 sm:$0xff]   ;;  %v3688_v57 = vld [vmem:[%s5317_s1 + $0x3d0] ss:$8 sps:$4 sm:$0xff]  }
  0x14   :  { %2390 = vmatpush1.bf16.msra.mxu0 %v3634_v19  ;;  %2052 = vmatprep.subr.bf16.mxu1 %v3635_v20  ;;  %v3685_v55 = vld [vmem:[%s5317_s1 + $0x3d4] ss:$8 sps:$4 sm:$0xff]   ;;  %v3689_v58 = vld [vmem:[%s5317_s1 + $0xe4] ss:$8 sps:$4 sm:$0xff]   ;;  %v3693_v60 = vld [vmem:[%s5317_s1 + $0xe0] ss:$8 sps:$4 sm:$0xff]  }
  0x15   :  { %2391 = vmatprep.subr.bf16.mxu0 %v3637_v21  ;;  %v3691_v59 = vld [vmem:[%s5317_s1 + $0x3e4] ss:$8 sps:$4 sm:$0xff]   ;;  %v3694_v61 = vld [vmem:[%s5317_s1 + $0x3e0] ss:$8 sps:$4 sm:$0xff]   ;;  %v3695_v62 = vld [vmem:[%s5317_s1 + $0xf4] ss:$8 sps:$4 sm:$0xff]  }
  0x16   :  { %v3697_v63 = vld [vmem:[%s5317_s1 + $0x3f4] ss:$8 sps:$4 sm:$0xff]   ;;  %v3699_v0 = vld [vmem:[%s5317_s1 + $0xf0] ss:$8 sps:$4 sm:$0xff]   ;;  %v3709_v2 = vld [vmem:[%s5317_s1 + $0x104] ss:$8 sps:$4 sm:$0xff]  }
  0x17   :  { %2053 = vmatpush1.bf16.msra.mxu1 %v3639_v22  ;;  %v3700_v1 = vld [vmem:[%s5317_s1 + $0x3f0] ss:$8 sps:$4 sm:$0xff]   ;;  %v3712_v3 = vld [vmem:[%s5317_s1 + $0x404] ss:$8 sps:$4 sm:$0xff]   ;;  %v3707_v6 = vld [vmem:[%s5317_s1 + $0x100] ss:$8 sps:$4 sm:$0xff]  }
  0x18   :  { %2392 = vmatpush1.bf16.msra.mxu0 %v3640_v23  ;;  %2054 = vmatprep.subr.bf16.mxu1 %v3641_v24  ;;  %v3701_v4 = vld [vmem:[%s5318_s0] ss:$56 sps:$4 sm:$0xff]   ;;  %v3715_v8 = vld [vmem:[%s5317_s1 + $0x114] ss:$8 sps:$4 sm:$0xff]   ;;  %v3721_v11 = vld [vmem:[%s5318_s0 + $0x8c] ss:$56 sps:$4 sm:$0xff]  }
  0x19   :  { %2393 = vmatprep.subr.bf16.mxu0 %v3643_v25  ;;  %v3704_v5 = vld [vmem:[%s5318_s0 + $0x18] ss:$56 sps:$4 sm:$0xff]   ;;  %v3710_v7 = vld [vmem:[%s5317_s1 + $0x400] ss:$8 sps:$4 sm:$0xff]   ;;  %v3718_v9 = vld [vmem:[%s5317_s1 + $0x414] ss:$8 sps:$4 sm:$0xff]  }
  0x1a   :  { %v3719_v10 = vld [vmem:[%s5318_s0 + $0x74] ss:$56 sps:$4 sm:$0xff]   ;;  %v3713_v12 = vld [vmem:[%s5317_s1 + $0x110] ss:$8 sps:$4 sm:$0xff]   ;;  %v3724_v17 = vld [vmem:[%s5317_s1 + $0x120] ss:$8 sps:$4 sm:$0xff]  }
  0x1b   :  { %2055 = vmatpush1.bf16.msra.mxu1 %v3645_v26  ;;  %v3716_v13 = vld [vmem:[%s5317_s1 + $0x410] ss:$8 sps:$4 sm:$0xff]   ;;  %v3726_v14 = vld [vmem:[%s5317_s1 + $0x124] ss:$8 sps:$4 sm:$0xff]   ;;  %v3727_v18 = vld [vmem:[%s5318_s0 + $0x88] ss:$56 sps:$4 sm:$0xff]  }
  0x1c   :  { %2394 = vmatpush1.bf16.msra.mxu0 %v3646_v27  ;;  %2056 = vmatprep.subr.bf16.mxu1 %v3647_v28  ;;  %v3730_v15 = vld [vmem:[%s5317_s1 + $0x424] ss:$8 sps:$4 sm:$0xff]   ;;  %v3723_v16 = vld [vmem:[%s5318_s0 + $0x70] ss:$56 sps:$4 sm:$0xff]   ;;  %v3733_v20 = vld [vmem:[%s5317_s1 + $0x134] ss:$8 sps:$4 sm:$0xff]  }
  0x1d   :  { %2395 = vmatprep.subr.bf16.mxu0 %v3649_v29  ;;  %v3728_v19 = vld [vmem:[%s5317_s1 + $0x420] ss:$8 sps:$4 sm:$0xff]   ;;  %v3736_v21 = vld [vmem:[%s5317_s1 + $0x434] ss:$8 sps:$4 sm:$0xff]   ;;  %v3731_v24 = vld [vmem:[%s5317_s1 + $0x130] ss:$8 sps:$4 sm:$0xff]  }
  0x1e   :  { %v3737_v22 = vld [vmem:[%s5318_s0 + $0xe4] ss:$56 sps:$4 sm:$0xff]   ;;  %v3734_v25 = vld [vmem:[%s5317_s1 + $0x430] ss:$8 sps:$4 sm:$0xff]   ;;  %v3742_v29 = vld [vmem:[%s5317_s1 + $0x140] ss:$8 sps:$4 sm:$0xff]  }
  0x1f   :  { %2057 = vmatpush1.bf16.msra.mxu1 %v3651_v30  ;;  %v3739_v23 = vld [vmem:[%s5318_s0 + $0xfc] ss:$56 sps:$4 sm:$0xff]   ;;  %v3744_v26 = vld [vmem:[%s5317_s1 + $0x144] ss:$8 sps:$4 sm:$0xff]   ;;  %v3741_v28 = vld [vmem:[%s5318_s0 + $0xe0] ss:$56 sps:$4 sm:$0xff]  }
  0x20   :  { %2396 = vmatpush1.bf16.msra.mxu0 %v3652_v31  ;;  %2058 = vmatprep.subr.bf16.mxu1 %v3653_v32  ;;  %v3748_v27 = vld [vmem:[%s5317_s1 + $0x444] ss:$8 sps:$4 sm:$0xff]   ;;  %v3745_v30 = vld [vmem:[%s5318_s0 + $0xf8] ss:$56 sps:$4 sm:$0xff]   ;;  %v3746_v31 = vld [vmem:[%s5317_s1 + $0x440] ss:$8 sps:$4 sm:$0xff]  }
  0x21   :  { %2397 = vmatprep.subr.bf16.mxu0 %v3655_v33  ;;  %v3751_v32 = vld [vmem:[%s5317_s1 + $0x154] ss:$8 sps:$4 sm:$0xff]   ;;  %v3770_v49 = vld [vmem:[%s5317_s1 + $0x470] ss:$8 sps:$4 sm:$0xff]   ;;  %v3784_v51 = vld [vmem:[%s5317_s1 + $0x484] ss:$8 sps:$4 sm:$0xff]  }
  0x22   :  { %v3754_v33 = vld [vmem:[%s5317_s1 + $0x454] ss:$8 sps:$4 sm:$0xff]  }
  0x23   :  { %2059 = vmatpush1.bf16.msra.mxu1 %v3657_v34  ;;  %v3755_v34 = vld [vmem:[%s5318_s0 + $0x154] ss:$56 sps:$4 sm:$0xff]  }
  0x24   :  { %2398 = vmatpush1.bf16.msra.mxu0 %v3658_v35  ;;  %2060 = vmatprep.subr.bf16.mxu1 %v3659_v36  ;;  %v3757_v35 = vld [vmem:[%s5318_s0 + $0x16c] ss:$56 sps:$4 sm:$0xff]   ;;  %v3749_v36 = vld [vmem:[%s5317_s1 + $0x150] ss:$8 sps:$4 sm:$0xff]  }
  0x25   :  { %2399 = vmatprep.subr.bf16.mxu0 %v3661_v37  ;;  %v3752_v37 = vld [vmem:[%s5317_s1 + $0x450] ss:$8 sps:$4 sm:$0xff]  }
  0x27   :  { %2061 = vmatpush1.bf16.msra.mxu1 %v3663_v38  ;;  %v3762_v38 = vld [vmem:[%s5317_s1 + $0x164] ss:$8 sps:$4 sm:$0xff]  }
  0x28   :  { %2400 = vmatpush1.bf16.msra.mxu0 %v3664_v39  ;;  %2062 = vmatprep.subr.bf16.mxu1 %v3665_v40  ;;  %v3766_v39 = vld [vmem:[%s5317_s1 + $0x464] ss:$8 sps:$4 sm:$0xff]   ;;  %v3759_v40 = vld [vmem:[%s5318_s0 + $0x150] ss:$56 sps:$4 sm:$0xff]  }
  0x29   :  { %2401 = vmatprep.subr.bf16.mxu0 %v3667_v41  ;;  %v3760_v41 = vld [vmem:[%s5317_s1 + $0x160] ss:$8 sps:$4 sm:$0xff]  }
  0x2b   :  { %2063 = vmatpush1.bf16.msra.mxu1 %v3669_v42  ;;  %v3763_v42 = vld [vmem:[%s5318_s0 + $0x168] ss:$56 sps:$4 sm:$0xff]  }
  0x2c   :  { %2402 = vmatpush1.bf16.msra.mxu0 %v3670_v43  ;;  %2064 = vmatprep.subr.bf16.mxu1 %v3671_v44  ;;  %v3764_v43 = vld [vmem:[%s5317_s1 + $0x460] ss:$8 sps:$4 sm:$0xff]   ;;  %v3769_v44 = vld [vmem:[%s5317_s1 + $0x174] ss:$8 sps:$4 sm:$0xff]  }
  0x2d   :  { %2403 = vmatprep.subr.bf16.mxu0 %v3673_v45  ;;  %v3772_v45 = vld [vmem:[%s5317_s1 + $0x474] ss:$8 sps:$4 sm:$0xff]  }
  0x2f   :  { %2065 = vmatpush1.bf16.msra.mxu1 %v3675_v46  ;;  %v3773_v46 = vld [vmem:[%s5318_s0 + $0x1c4] ss:$56 sps:$4 sm:$0xff]  }
  0x30   :  { %2404 = vmatpush1.bf16.msra.mxu0 %v3676_v47  ;;  %2066 = vmatprep.subr.bf16.mxu1 %v3677_v48  ;;  %v3775_v47 = vld [vmem:[%s5318_s0 + $0x1dc] ss:$56 sps:$4 sm:$0xff]   ;;  %v3767_v48 = vld [vmem:[%s5317_s1 + $0x170] ss:$8 sps:$4 sm:$0xff]  }
  0x31   :  { %2405 = vmatprep.subr.bf16.mxu0 %v3679_v50  ;;  %v3780_v50 = vld [vmem:[%s5317_s1 + $0x184] ss:$8 sps:$4 sm:$0xff]  }
  0x33   :  { %2067 = vmatpush1.bf16.msra.mxu1 %v3681_v52  ;;  %v3777_v52 = vld [vmem:[%s5318_s0 + $0x1c0] ss:$56 sps:$4 sm:$0xff]  }
  0x34   :  { %2406 = vmatpush1.bf16.msra.mxu0 %v3682_v53  ;;  %2068 = vmatprep.subr.bf16.mxu1 %v3683_v54  ;;  %v3778_v53 = vld [vmem:[%s5317_s1 + $0x180] ss:$8 sps:$4 sm:$0xff]   ;;  %v3781_v54 = vld [vmem:[%s5318_s0 + $0x1d8] ss:$56 sps:$4 sm:$0xff]  }
  0x35   :  { %2407 = vmatprep.subr.bf16.mxu0 %v3685_v55  ;;  %v3782_v55 = vld [vmem:[%s5317_s1 + $0x480] ss:$8 sps:$4 sm:$0xff]  }
  0x37   :  { %2069 = vmatpush1.bf16.msra.mxu1 %v3687_v56  ;;  %v3787_v56 = vld [vmem:[%s5317_s1 + $0x194] ss:$8 sps:$4 sm:$0xff]  }
  0x38   :  { %2408 = vmatpush1.bf16.msra.mxu0 %v3688_v57  ;;  %2070 = vmatprep.subr.bf16.mxu1 %v3689_v58  ;;  %v3790_v57 = vld [vmem:[%s5317_s1 + $0x494] ss:$8 sps:$4 sm:$0xff]  }
  0x39   :  { %2409 = vmatprep.subr.bf16.mxu0 %v3691_v59  ;;  %v3791_v58 = vld [vmem:[%s5318_s0 + $0x234] ss:$56 sps:$4 sm:$0xff]  }
  0x3a   :  { %v3793_v59 = vld [vmem:[%s5318_s0 + $0x24c] ss:$56 sps:$4 sm:$0xff]  }
  0x3b   :  { %2071 = vmatpush1.bf16.msra.mxu1 %v3693_v60  ;;  %v3785_v60 = vld [vmem:[%s5317_s1 + $0x190] ss:$8 sps:$4 sm:$0xff]  }
  0x3c   :  { %2410 = vmatpush1.bf16.msra.mxu0 %v3694_v61  ;;  %2072 = vmatprep.subr.bf16.mxu1 %v3695_v62  ;;  %v3788_v61 = vld [vmem:[%s5317_s1 + $0x490] ss:$8 sps:$4 sm:$0xff]   ;;  %v3798_v62 = vld [vmem:[%s5317_s1 + $0x1a4] ss:$8 sps:$4 sm:$0xff]  }
  0x3d   :  { %2411 = vmatprep.subr.bf16.mxu0 %v3697_v63  ;;  %v3802_v63 = vld [vmem:[%s5317_s1 + $0x4a4] ss:$8 sps:$4 sm:$0xff]  }
  0x3f   :  { %2073 = vmatpush1.bf16.msra.mxu1 %v3699_v0  ;;  %v3795_v0 = vld [vmem:[%s5318_s0 + $0x230] ss:$56 sps:$4 sm:$0xff]  }
  0x40   :  { %2412 = vmatpush1.bf16.msra.mxu0 %v3700_v1  ;;  %2155 = vmatprep.subr.bf16.mxu1 %v3709_v2  ;;  %v3796_v1 = vld [vmem:[%s5317_s1 + $0x1a0] ss:$8 sps:$4 sm:$0xff]  }
  0x41   :  { %2494 = vmatprep.subr.bf16.mxu0 %v3712_v3  ;;  %v3799_v2 = vld [vmem:[%s5318_s0 + $0x248] ss:$56 sps:$4 sm:$0xff]  }
  0x42   :  { %2075 = vmatmul.mubr.bf16.vlgmr.msra.gmra.mrb[0].mxu1 %v3701_v4  ;;  %v3800_v3 = vld [vmem:[%s5317_s1 + $0x4a0] ss:$8 sps:$4 sm:$0xff]   ;;  %v3805_v4 = vld [vmem:[%s5317_s1 + $0x1b4] ss:$8 sps:$4 sm:$0xff]  }
  0x43   :  { %2414 = vmatmul.mubr.bf16.vlgmr.msra.gmra.mrb[0].mxu0 %v3704_v5  ;;  %2156 = vmatpush1.bf16.msra.mxu1 %v3707_v6  ;;  %v3808_v5 = vld [vmem:[%s5317_s1 + $0x4b4] ss:$8 sps:$4 sm:$0xff]  }
  0x44   :  { %2495 = vmatpush1.bf16.msra.mxu0 %v3710_v7  ;;  %2157 = vmatprep.subr.bf16.mxu1 %v3715_v8  ;;  %v3809_v6 = vld [vmem:[%s5318_s0 + $0x2a4] ss:$56 sps:$4 sm:$0xff]   ;;  %v3803_v8 = vld [vmem:[%s5317_s1 + $0x1b0] ss:$8 sps:$4 sm:$0xff]  }
  0x45   :  { %2496 = vmatprep.subr.bf16.mxu0 %v3718_v9  ;;  %2084 = vmatprep.mubr.bf16.mxu1 %v3719_v10  ;;  %v3811_v7 = vld [vmem:[%s5318_s0 + $0x2bc] ss:$56 sps:$4 sm:$0xff]   ;;  %v3806_v9 = vld [vmem:[%s5317_s1 + $0x4b0] ss:$8 sps:$4 sm:$0xff]   ;;  %v3816_v10 = vld [vmem:[%s5317_s1 + $0x1c4] ss:$8 sps:$4 sm:$0xff]  }
  0x46   :  { %2423 = vmatprep.mubr.bf16.mxu0 %v3721_v11  ;;  %v3820_v11 = vld [vmem:[%s5317_s1 + $0x4c4] ss:$8 sps:$4 sm:$0xff]  }
  0x47   :  { %2158 = vmatpush1.bf16.msra.mxu1 %v3713_v12  ;;  %v3813_v12 = vld [vmem:[%s5318_s0 + $0x2a0] ss:$56 sps:$4 sm:$0xff]  }
  0x48   :  { %2497 = vmatpush1.bf16.msra.mxu0 %v3716_v13  ;;  %2159 = vmatprep.subr.bf16.mxu1 %v3726_v14  ;;  %v3814_v13 = vld [vmem:[%s5317_s1 + $0x1c0] ss:$8 sps:$4 sm:$0xff]   ;;  %v3817_v14 = vld [vmem:[%s5318_s0 + $0x2b8] ss:$56 sps:$4 sm:$0xff]  }
  0x49   :  { %2498 = vmatprep.subr.bf16.mxu0 %v3730_v15  ;;  %v3818_v15 = vld [vmem:[%s5317_s1 + $0x4c0] ss:$8 sps:$4 sm:$0xff]  }
  0x4a   :  { %2085 = vmatmul.mubr.bf16.gmra.mrb[4].mxu1 %v3723_v16  ;;  %v3823_v16 = vld [vmem:[%s5317_s1 + $0x1d4] ss:$8 sps:$4 sm:$0xff]  }
  0x4b   :  { %2424 = vmatmul.mubr.bf16.gmra.mrb[4].mxu0 %v3727_v18  ;;  %2160 = vmatpush1.bf16.msra.mxu1 %v3724_v17  ;;  %v3826_v17 = vld [vmem:[%s5317_s1 + $0x4d4] ss:$8 sps:$4 sm:$0xff]  }
  0x4c   :  { %2499 = vmatpush1.bf16.msra.mxu0 %v3728_v19  ;;  %2161 = vmatprep.subr.bf16.mxu1 %v3733_v20  ;;  %v3827_v18 = vld [vmem:[%s5318_s0 + $0x314] ss:$56 sps:$4 sm:$0xff]   ;;  %v3821_v20 = vld [vmem:[%s5317_s1 + $0x1d0] ss:$8 sps:$4 sm:$0xff]  }
  0x4d   :  { %2500 = vmatprep.subr.bf16.mxu0 %v3736_v21  ;;  %2094 = vmatprep.mubr.bf16.mxu1 %v3737_v22  ;;  %v3829_v19 = vld [vmem:[%s5318_s0 + $0x32c] ss:$56 sps:$4 sm:$0xff]   ;;  %v3824_v21 = vld [vmem:[%s5317_s1 + $0x4d0] ss:$8 sps:$4 sm:$0xff]  }
  0x4e   :  { %2433 = vmatprep.mubr.bf16.mxu0 %v3739_v23  ;;  %v3834_v22 = vld [vmem:[%s5317_s1 + $0x1e4] ss:$8 sps:$4 sm:$0xff]  }
  0x4f   :  { %2162 = vmatpush1.bf16.msra.mxu1 %v3731_v24  ;;  %v3838_v23 = vld [vmem:[%s5317_s1 + $0x4e4] ss:$8 sps:$4 sm:$0xff]   ;;  %v3831_v24 = vld [vmem:[%s5318_s0 + $0x310] ss:$56 sps:$4 sm:$0xff]  }
  0x50   :  { %2501 = vmatpush1.bf16.msra.mxu0 %v3734_v25  ;;  %2163 = vmatprep.subr.bf16.mxu1 %v3744_v26  ;;  %v3832_v25 = vld [vmem:[%s5317_s1 + $0x1e0] ss:$8 sps:$4 sm:$0xff]  }
  0x51   :  { %2502 = vmatprep.subr.bf16.mxu0 %v3748_v27  ;;  %v3835_v26 = vld [vmem:[%s5318_s0 + $0x328] ss:$56 sps:$4 sm:$0xff]  }
  0x52   :  { %2095 = vmatmul.mubr.bf16.gmra.mrb[8].mxu1 %v3741_v28  ;;  %v3836_v27 = vld [vmem:[%s5317_s1 + $0x4e0] ss:$8 sps:$4 sm:$0xff]   ;;  %v3841_v28 = vld [vmem:[%s5317_s1 + $0x1f4] ss:$8 sps:$4 sm:$0xff]  }
  0x53   :  { %2434 = vmatmul.mubr.bf16.gmra.mrb[8].mxu0 %v3745_v30  ;;  %2164 = vmatpush1.bf16.msra.mxu1 %v3742_v29  ;;  %v3844_v29 = vld [vmem:[%s5317_s1 + $0x4f4] ss:$8 sps:$4 sm:$0xff]   ;;  %v3847_v30 = vld [vmem:[%s5318_s0 + $0xc] ss:$56 sps:$4 sm:$0xff]  }
  0x54   :  { %2503 = vmatpush1.bf16.msra.mxu0 %v3746_v31  ;;  %2165 = vmatprep.subr.bf16.mxu1 %v3751_v32  ;;  %v3850_v31 = vld [vmem:[%s5318_s0 + $0x24] ss:$56 sps:$4 sm:$0xff]   ;;  %v3839_v32 = vld [vmem:[%s5317_s1 + $0x1f0] ss:$8 sps:$4 sm:$0xff]  }
  0x55   :  { %2504 = vmatprep.subr.bf16.mxu0 %v3754_v33  ;;  %2104 = vmatprep.mubr.bf16.mxu1 %v3755_v34  ;;  %v3842_v33 = vld [vmem:[%s5317_s1 + $0x4f0] ss:$8 sps:$4 sm:$0xff]   ;;  %v3853_v34 = vld [vmem:[%s5317_s1 + $0x204] ss:$8 sps:$4 sm:$0xff]  }
  0x56   :  { %2443 = vmatprep.mubr.bf16.mxu0 %v3757_v35  ;;  %v3856_v35 = vld [vmem:[%s5317_s1 + $0x504] ss:$8 sps:$4 sm:$0xff]  }
  0x57   :  { %2166 = vmatpush1.bf16.msra.mxu1 %v3749_v36  ;;  %v3845_v36 = vld [vmem:[%s5318_s0 + $0x8] ss:$56 sps:$4 sm:$0xff]  }
  0x58   :  { %2505 = vmatpush1.bf16.msra.mxu0 %v3752_v37  ;;  %2167 = vmatprep.subr.bf16.mxu1 %v3762_v38  ;;  %v3848_v37 = vld [vmem:[%s5318_s0 + $0x20] ss:$56 sps:$4 sm:$0xff]  }
  0x59   :  { %2506 = vmatprep.subr.bf16.mxu0 %v3766_v39  ;;  %v3851_v38 = vld [vmem:[%s5317_s1 + $0x200] ss:$8 sps:$4 sm:$0xff]  }
  0x5a   :  { %2105 = vmatmul.mubr.bf16.gmra.mrb[12].mxu1 %v3759_v40  ;;  %v3854_v39 = vld [vmem:[%s5317_s1 + $0x500] ss:$8 sps:$4 sm:$0xff]   ;;  %v3859_v40 = vld [vmem:[%s5317_s1 + $0x214] ss:$8 sps:$4 sm:$0xff]  }
  0x5b   :  { %2444 = vmatmul.mubr.bf16.gmra.mrb[12].mxu0 %v3763_v42  ;;  %2168 = vmatpush1.bf16.msra.mxu1 %v3760_v41  ;;  %v3862_v41 = vld [vmem:[%s5317_s1 + $0x514] ss:$8 sps:$4 sm:$0xff]  }
  0x5c   :  { %2507 = vmatpush1.bf16.msra.mxu0 %v3764_v43  ;;  %2169 = vmatprep.subr.bf16.mxu1 %v3769_v44  ;;  %v3863_v42 = vld [vmem:[%s5318_s0 + $0x7c] ss:$56 sps:$4 sm:$0xff]   ;;  %v3857_v44 = vld [vmem:[%s5317_s1 + $0x210] ss:$8 sps:$4 sm:$0xff]  }
  0x5d   :  { %2508 = vmatprep.subr.bf16.mxu0 %v3772_v45  ;;  %2114 = vmatprep.mubr.bf16.mxu1 %v3773_v46  ;;  %v3865_v43 = vld [vmem:[%s5318_s0 + $0x94] ss:$56 sps:$4 sm:$0xff]   ;;  %v3860_v45 = vld [vmem:[%s5317_s1 + $0x510] ss:$8 sps:$4 sm:$0xff]  }
  0x5e   :  { %2453 = vmatprep.mubr.bf16.mxu0 %v3775_v47  ;;  %v3870_v46 = vld [vmem:[%s5317_s1 + $0x224] ss:$8 sps:$4 sm:$0xff]  }
  0x5f   :  { %2170 = vmatpush1.bf16.msra.mxu1 %v3767_v48  ;;  %v3874_v47 = vld [vmem:[%s5317_s1 + $0x524] ss:$8 sps:$4 sm:$0xff]   ;;  %v3867_v48 = vld [vmem:[%s5318_s0 + $0x78] ss:$56 sps:$4 sm:$0xff]  }
  0x60   :  { %2509 = vmatpush1.bf16.msra.mxu0 %v3770_v49  ;;  %2171 = vmatprep.subr.bf16.mxu1 %v3780_v50  ;;  %v3868_v49 = vld [vmem:[%s5317_s1 + $0x220] ss:$8 sps:$4 sm:$0xff]  }
  0x61   :  { %2510 = vmatprep.subr.bf16.mxu0 %v3784_v51  ;;  %v3871_v50 = vld [vmem:[%s5318_s0 + $0x90] ss:$56 sps:$4 sm:$0xff]  }
  0x62   :  { %2115 = vmatmul.mubr.bf16.gmra.mrb[16].mxu1 %v3777_v52  ;;  %v3872_v51 = vld [vmem:[%s5317_s1 + $0x520] ss:$8 sps:$4 sm:$0xff]   ;;  %v3877_v52 = vld [vmem:[%s5317_s1 + $0x234] ss:$8 sps:$4 sm:$0xff]  }
  0x63   :  { %2454 = vmatmul.mubr.bf16.gmra.mrb[16].mxu0 %v3781_v54  ;;  %2172 = vmatpush1.bf16.msra.mxu1 %v3778_v53  ;;  %v3880_v53 = vld [vmem:[%s5317_s1 + $0x534] ss:$8 sps:$4 sm:$0xff]   ;;  %v3881_v54 = vld [vmem:[%s5318_s0 + $0xec] ss:$56 sps:$4 sm:$0xff]  }
  0x64   :  { %2511 = vmatpush1.bf16.msra.mxu0 %v3782_v55  ;;  %2173 = vmatprep.subr.bf16.mxu1 %v3787_v56  ;;  %v3883_v55 = vld [vmem:[%s5318_s0 + $0x104] ss:$56 sps:$4 sm:$0xff]   ;;  %v3875_v56 = vld [vmem:[%s5317_s1 + $0x230] ss:$8 sps:$4 sm:$0xff]  }
  0x65   :  { %2512 = vmatprep.subr.bf16.mxu0 %v3790_v57  ;;  %2124 = vmatprep.mubr.bf16.mxu1 %v3791_v58  ;;  %v3878_v57 = vld [vmem:[%s5317_s1 + $0x530] ss:$8 sps:$4 sm:$0xff]   ;;  %v3888_v58 = vld [vmem:[%s5317_s1 + $0x244] ss:$8 sps:$4 sm:$0xff]  }
  0x66   :  { %2463 = vmatprep.mubr.bf16.mxu0 %v3793_v59  ;;  %v3892_v59 = vld [vmem:[%s5317_s1 + $0x544] ss:$8 sps:$4 sm:$0xff]  }
  0x67   :  { %2174 = vmatpush1.bf16.msra.mxu1 %v3785_v60  ;;  %v3885_v60 = vld [vmem:[%s5318_s0 + $0xe8] ss:$56 sps:$4 sm:$0xff]  }
  0x68   :  { %2513 = vmatpush1.bf16.msra.mxu0 %v3788_v61  ;;  %2175 = vmatprep.subr.bf16.mxu1 %v3798_v62  ;;  %v3886_v61 = vld [vmem:[%s5317_s1 + $0x240] ss:$8 sps:$4 sm:$0xff]  }
  0x69   :  { %2514 = vmatprep.subr.bf16.mxu0 %v3802_v63  ;;  %v3889_v62 = vld [vmem:[%s5318_s0 + $0x100] ss:$56 sps:$4 sm:$0xff]  }
  0x6a   :  { %2125 = vmatmul.mubr.bf16.gmra.mrb[20].mxu1 %v3795_v0  ;;  %v3890_v63 = vld [vmem:[%s5317_s1 + $0x540] ss:$8 sps:$4 sm:$0xff]   ;;  %v3895_v0 = vld [vmem:[%s5317_s1 + $0x254] ss:$8 sps:$4 sm:$0xff]  }
  0x6b   :  { %2464 = vmatmul.mubr.bf16.gmra.mrb[20].mxu0 %v3799_v2  ;;  %2176 = vmatpush1.bf16.msra.mxu1 %v3796_v1  ;;  %v3898_v1 = vld [vmem:[%s5317_s1 + $0x554] ss:$8 sps:$4 sm:$0xff]  }
  0x6c   :  { %2515 = vmatpush1.bf16.msra.mxu0 %v3800_v3  ;;  %2177 = vmatprep.subr.bf16.mxu1 %v3805_v4  ;;  %v3899_v2 = vld [vmem:[%s5318_s0 + $0x15c] ss:$56 sps:$4 sm:$0xff]   ;;  %v3893_v4 = vld [vmem:[%s5317_s1 + $0x250] ss:$8 sps:$4 sm:$0xff]  }
  0x6d   :  { %2516 = vmatprep.subr.bf16.mxu0 %v3808_v5  ;;  %2134 = vmatprep.mubr.bf16.mxu1 %v3809_v6  ;;  %v3901_v3 = vld [vmem:[%s5318_s0 + $0x174] ss:$56 sps:$4 sm:$0xff]   ;;  %v3896_v5 = vld [vmem:[%s5317_s1 + $0x550] ss:$8 sps:$4 sm:$0xff]  }
  0x6e   :  { %2473 = vmatprep.mubr.bf16.mxu0 %v3811_v7  ;;  %v3906_v6 = vld [vmem:[%s5317_s1 + $0x264] ss:$8 sps:$4 sm:$0xff]  }
  0x6f   :  { %2178 = vmatpush1.bf16.msra.mxu1 %v3803_v8  ;;  %v3910_v7 = vld [vmem:[%s5317_s1 + $0x564] ss:$8 sps:$4 sm:$0xff]   ;;  %v3903_v8 = vld [vmem:[%s5318_s0 + $0x158] ss:$56 sps:$4 sm:$0xff]  }
  0x70   :  { %2517 = vmatpush1.bf16.msra.mxu0 %v3806_v9  ;;  %2179 = vmatprep.subr.bf16.mxu1 %v3816_v10  ;;  %v3904_v9 = vld [vmem:[%s5317_s1 + $0x260] ss:$8 sps:$4 sm:$0xff]  }
  0x71   :  { %2518 = vmatprep.subr.bf16.mxu0 %v3820_v11  ;;  %v3907_v10 = vld [vmem:[%s5318_s0 + $0x170] ss:$56 sps:$4 sm:$0xff]  }
  0x72   :  { %2135 = vmatmul.mubr.bf16.gmra.mrb[24].mxu1 %v3813_v12  ;;  %v3908_v11 = vld [vmem:[%s5317_s1 + $0x560] ss:$8 sps:$4 sm:$0xff]   ;;  %v3913_v12 = vld [vmem:[%s5317_s1 + $0x274] ss:$8 sps:$4 sm:$0xff]  }
  0x73   :  { %2474 = vmatmul.mubr.bf16.gmra.mrb[24].mxu0 %v3817_v14  ;;  %2180 = vmatpush1.bf16.msra.mxu1 %v3814_v13  ;;  %v3916_v13 = vld [vmem:[%s5317_s1 + $0x574] ss:$8 sps:$4 sm:$0xff]   ;;  %v3917_v14 = vld [vmem:[%s5318_s0 + $0x1cc] ss:$56 sps:$4 sm:$0xff]  }
  0x74   :  { %2519 = vmatpush1.bf16.msra.mxu0 %v3818_v15  ;;  %2181 = vmatprep.subr.bf16.mxu1 %v3823_v16  ;;  %v3919_v15 = vld [vmem:[%s5318_s0 + $0x1e4] ss:$56 sps:$4 sm:$0xff]   ;;  %v3911_v16 = vld [vmem:[%s5317_s1 + $0x270] ss:$8 sps:$4 sm:$0xff]  }
  0x75   :  { %2520 = vmatprep.subr.bf16.mxu0 %v3826_v17  ;;  %2144 = vmatprep.mubr.bf16.mxu1 %v3827_v18  ;;  %v3914_v17 = vld [vmem:[%s5317_s1 + $0x570] ss:$8 sps:$4 sm:$0xff]   ;;  %v3924_v18 = vld [vmem:[%s5317_s1 + $0x284] ss:$8 sps:$4 sm:$0xff]  }
  0x76   :  { %2483 = vmatprep.mubr.bf16.mxu0 %v3829_v19  ;;  %v3928_v19 = vld [vmem:[%s5317_s1 + $0x584] ss:$8 sps:$4 sm:$0xff]  }
  0x77   :  { %2182 = vmatpush1.bf16.msra.mxu1 %v3821_v20  ;;  %v3921_v20 = vld [vmem:[%s5318_s0 + $0x1c8] ss:$56 sps:$4 sm:$0xff]  }
  0x78   :  { %2521 = vmatpush1.bf16.msra.mxu0 %v3824_v21  ;;  %2183 = vmatprep.subr.bf16.mxu1 %v3834_v22  ;;  %v3922_v21 = vld [vmem:[%s5317_s1 + $0x280] ss:$8 sps:$4 sm:$0xff]  }
  0x79   :  { %2522 = vmatprep.subr.bf16.mxu0 %v3838_v23  ;;  %v3925_v22 = vld [vmem:[%s5318_s0 + $0x1e0] ss:$56 sps:$4 sm:$0xff]  }
  0x7a   :  { %2145 = vmatmul.mubr.bf16.gmra.mrb[28].mxu1 %v3831_v24  ;;  %v3926_v23 = vld [vmem:[%s5317_s1 + $0x580] ss:$8 sps:$4 sm:$0xff]   ;;  %v3931_v24 = vld [vmem:[%s5317_s1 + $0x294] ss:$8 sps:$4 sm:$0xff]  }
  0x7b   :  { %2484 = vmatmul.mubr.bf16.gmra.mrb[28].mxu0 %v3835_v26  ;;  %2184 = vmatpush1.bf16.msra.mxu1 %v3832_v25  ;;  %v3934_v25 = vld [vmem:[%s5317_s1 + $0x594] ss:$8 sps:$4 sm:$0xff]  }
  0x7c   :  { %2523 = vmatpush1.bf16.msra.mxu0 %v3836_v27  ;;  %2185 = vmatprep.subr.bf16.mxu1 %v3841_v28  ;;  %v3935_v26 = vld [vmem:[%s5318_s0 + $0x23c] ss:$56 sps:$4 sm:$0xff]   ;;  %v3929_v28 = vld [vmem:[%s5317_s1 + $0x290] ss:$8 sps:$4 sm:$0xff]  }
  0x7d   :  { %2524 = vmatprep.subr.bf16.mxu0 %v3844_v29  ;;  %2187 = vmatprep.mubr.bf16.mxu1 %v3847_v30  ;;  %v3937_v27 = vld [vmem:[%s5318_s0 + $0x254] ss:$56 sps:$4 sm:$0xff]   ;;  %v3932_v29 = vld [vmem:[%s5317_s1 + $0x590] ss:$8 sps:$4 sm:$0xff]  }
  0x7e   :  { %2526 = vmatprep.mubr.bf16.mxu0 %v3850_v31  ;;  %v3942_v30 = vld [vmem:[%s5317_s1 + $0x2a4] ss:$8 sps:$4 sm:$0xff]  }
  0x7f   :  { %2186 = vmatpush1.bf16.msra.mxu1 %v3839_v32  ;;  %v3946_v31 = vld [vmem:[%s5317_s1 + $0x5a4] ss:$8 sps:$4 sm:$0xff]   ;;  %v3939_v32 = vld [vmem:[%s5318_s0 + $0x238] ss:$56 sps:$4 sm:$0xff]  }
  0x80   :  { %2525 = vmatpush1.bf16.msra.mxu0 %v3842_v33  ;;  %2268 = vmatprep.subr.bf16.mxu1 %v3853_v34  ;;  %v3940_v33 = vld [vmem:[%s5317_s1 + $0x2a0] ss:$8 sps:$4 sm:$0xff]  }
  0x81   :  { %2607 = vmatprep.subr.bf16.mxu0 %v3856_v35  ;;  %v3943_v34 = vld [vmem:[%s5318_s0 + $0x250] ss:$56 sps:$4 sm:$0xff]  }
  0x82   :  { %2188 = vmatmul.mubr.bf16.vlgmr.msra.gmra.mrb[0].mxu1 %v3845_v36  ;;  %v3944_v35 = vld [vmem:[%s5317_s1 + $0x5a0] ss:$8 sps:$4 sm:$0xff]   ;;  %v3949_v36 = vld [vmem:[%s5317_s1 + $0x2b4] ss:$8 sps:$4 sm:$0xff]  }
  0x83   :  { %2527 = vmatmul.mubr.bf16.vlgmr.msra.gmra.mrb[0].mxu0 %v3848_v37  ;;  %2269 = vmatpush1.bf16.msra.mxu1 %v3851_v38  ;;  %v3952_v37 = vld [vmem:[%s5317_s1 + $0x5b4] ss:$8 sps:$4 sm:$0xff]   ;;  %v3953_v38 = vld [vmem:[%s5318_s0 + $0x2ac] ss:$56 sps:$4 sm:$0xff]  }
  0x84   :  { %2608 = vmatpush1.bf16.msra.mxu0 %v3854_v39  ;;  %2270 = vmatprep.subr.bf16.mxu1 %v3859_v40  ;;  %v3955_v39 = vld [vmem:[%s5318_s0 + $0x2c4] ss:$56 sps:$4 sm:$0xff]   ;;  %v3947_v40 = vld [vmem:[%s5317_s1 + $0x2b0] ss:$8 sps:$4 sm:$0xff]  }
  0x85   :  { %2609 = vmatprep.subr.bf16.mxu0 %v3862_v41  ;;  %2197 = vmatprep.mubr.bf16.mxu1 %v3863_v42  ;;  %v3950_v41 = vld [vmem:[%s5317_s1 + $0x5b0] ss:$8 sps:$4 sm:$0xff]   ;;  %v3960_v42 = vld [vmem:[%s5317_s1 + $0x2c4] ss:$8 sps:$4 sm:$0xff]  }
  0x86   :  { %2536 = vmatprep.mubr.bf16.mxu0 %v3865_v43  ;;  %v3964_v43 = vld [vmem:[%s5317_s1 + $0x5c4] ss:$8 sps:$4 sm:$0xff]  }
  0x87   :  { %2271 = vmatpush1.bf16.msra.mxu1 %v3857_v44  ;;  %v3957_v44 = vld [vmem:[%s5318_s0 + $0x2a8] ss:$56 sps:$4 sm:$0xff]  }
  0x88   :  { %2610 = vmatpush1.bf16.msra.mxu0 %v3860_v45  ;;  %2272 = vmatprep.subr.bf16.mxu1 %v3870_v46  ;;  %v3958_v45 = vld [vmem:[%s5317_s1 + $0x2c0] ss:$8 sps:$4 sm:$0xff]  }
  0x89   :  { %2611 = vmatprep.subr.bf16.mxu0 %v3874_v47  ;;  %v3961_v46 = vld [vmem:[%s5318_s0 + $0x2c0] ss:$56 sps:$4 sm:$0xff]  }
  0x8a   :  { %2198 = vmatmul.mubr.bf16.gmra.mrb[4].mxu1 %v3867_v48  ;;  %v3962_v47 = vld [vmem:[%s5317_s1 + $0x5c0] ss:$8 sps:$4 sm:$0xff]   ;;  %v3967_v48 = vld [vmem:[%s5317_s1 + $0x2d4] ss:$8 sps:$4 sm:$0xff]  }
  0x8b   :  { %2537 = vmatmul.mubr.bf16.gmra.mrb[4].mxu0 %v3871_v50  ;;  %2273 = vmatpush1.bf16.msra.mxu1 %v3868_v49  ;;  %v3970_v49 = vld [vmem:[%s5317_s1 + $0x5d4] ss:$8 sps:$4 sm:$0xff]  }
  0x8c   :  { %2612 = vmatpush1.bf16.msra.mxu0 %v3872_v51  ;;  %2274 = vmatprep.subr.bf16.mxu1 %v3877_v52  ;;  %v3971_v50 = vld [vmem:[%s5318_s0 + $0x31c] ss:$56 sps:$4 sm:$0xff]   ;;  %v3965_v52 = vld [vmem:[%s5317_s1 + $0x2d0] ss:$8 sps:$4 sm:$0xff]  }
  0x8d   :  { %2613 = vmatprep.subr.bf16.mxu0 %v3880_v53  ;;  %2207 = vmatprep.mubr.bf16.mxu1 %v3881_v54  ;;  %v3973_v51 = vld [vmem:[%s5318_s0 + $0x334] ss:$56 sps:$4 sm:$0xff]   ;;  %v3968_v53 = vld [vmem:[%s5317_s1 + $0x5d0] ss:$8 sps:$4 sm:$0xff]  }
  0x8e   :  { %2546 = vmatprep.mubr.bf16.mxu0 %v3883_v55  ;;  %v3978_v54 = vld [vmem:[%s5317_s1 + $0x2e4] ss:$8 sps:$4 sm:$0xff]  }
  0x8f   :  { %2275 = vmatpush1.bf16.msra.mxu1 %v3875_v56  ;;  %v3982_v55 = vld [vmem:[%s5317_s1 + $0x5e4] ss:$8 sps:$4 sm:$0xff]   ;;  %v3975_v56 = vld [vmem:[%s5318_s0 + $0x318] ss:$56 sps:$4 sm:$0xff]  }
  0x90   :  { %2614 = vmatpush1.bf16.msra.mxu0 %v3878_v57  ;;  %2276 = vmatprep.subr.bf16.mxu1 %v3888_v58  ;;  %v3976_v57 = vld [vmem:[%s5317_s1 + $0x2e0] ss:$8 sps:$4 sm:$0xff]  }
  0x91   :  { %2615 = vmatprep.subr.bf16.mxu0 %v3892_v59  ;;  %v3979_v58 = vld [vmem:[%s5318_s0 + $0x330] ss:$56 sps:$4 sm:$0xff]  }
  0x92   :  { %2208 = vmatmul.mubr.bf16.gmra.mrb[8].mxu1 %v3885_v60  ;;  %v3980_v59 = vld [vmem:[%s5317_s1 + $0x5e0] ss:$8 sps:$4 sm:$0xff]   ;;  %v3985_v60 = vld [vmem:[%s5317_s1 + $0x2f4] ss:$8 sps:$4 sm:$0xff]  }
  0x93   :  { %2547 = vmatmul.mubr.bf16.gmra.mrb[8].mxu0 %v3889_v62  ;;  %2277 = vmatpush1.bf16.msra.mxu1 %v3886_v61  ;;  %v3988_v61 = vld [vmem:[%s5317_s1 + $0x5f4] ss:$8 sps:$4 sm:$0xff]  }
  0x94   :  { %2616 = vmatpush1.bf16.msra.mxu0 %v3890_v63  ;;  %2278 = vmatprep.subr.bf16.mxu1 %v3895_v0  ;;  %v3991_v62 = vld [vmem:[%s5318_s0 + $0x14] ss:$56 sps:$4 sm:$0xff]   ;;  %v3983_v0 = vld [vmem:[%s5317_s1 + $0x2f0] ss:$8 sps:$4 sm:$0xff]  }
  0x95   :  { %2617 = vmatprep.subr.bf16.mxu0 %v3898_v1  ;;  %2217 = vmatprep.mubr.bf16.mxu1 %v3899_v2  ;;  %v3994_v63 = vld [vmem:[%s5318_s0 + $0x2c] ss:$56 sps:$4 sm:$0xff]   ;;  %v3986_v1 = vld [vmem:[%s5317_s1 + $0x5f0] ss:$8 sps:$4 sm:$0xff]  }
  0x96   :  { %2556 = vmatprep.mubr.bf16.mxu0 %v3901_v3  ;;  %v3997_v2 = vld [vmem:[%s5317_s1 + $0x604] ss:$8 sps:$4 sm:$0xff]   ;;  %v3989_v3 = vld [vmem:[%s5318_s0 + $0x10] ss:$56 sps:$4 sm:$0xff]  }
  0x97   :  { %2279 = vmatpush1.bf16.msra.mxu1 %v3893_v4  ;;  %v3992_v4 = vld [vmem:[%s5318_s0 + $0x28] ss:$56 sps:$4 sm:$0xff]  }
  0x98   :  { %2618 = vmatpush1.bf16.msra.mxu0 %v3896_v5  ;;  %2280 = vmatprep.subr.bf16.mxu1 %v3906_v6  ;;  %v3995_v5 = vld [vmem:[%s5317_s1 + $0x600] ss:$8 sps:$4 sm:$0xff]   ;;  %v4000_v6 = vld [vmem:[%s5317_s1 + $0x614] ss:$8 sps:$4 sm:$0xff]  }
  0x99   :  { %2619 = vmatprep.subr.bf16.mxu0 %v3910_v7  ;;  %v4001_v7 = vld [vmem:[%s5318_s0 + $0x84] ss:$56 sps:$4 sm:$0xff]  }
  0x9a   :  { %2218 = vmatmul.mubr.bf16.gmra.mrb[12].mxu1 %v3903_v8  ;;  %v4003_v8 = vld [vmem:[%s5318_s0 + $0x9c] ss:$56 sps:$4 sm:$0xff]  }
  0x9b   :  { %2557 = vmatmul.mubr.bf16.gmra.mrb[12].mxu0 %v3907_v10  ;;  %2281 = vmatpush1.bf16.msra.mxu1 %v3904_v9  ;;  %v3998_v9 = vld [vmem:[%s5317_s1 + $0x610] ss:$8 sps:$4 sm:$0xff]   ;;  %v4009_v10 = vld [vmem:[%s5317_s1 + $0x624] ss:$8 sps:$4 sm:$0xff]  }
  0x9c   :  { %2620 = vmatpush1.bf16.msra.mxu0 %v3908_v11  ;;  %2282 = vmatprep.subr.bf16.mxu1 %v3913_v12  ;;  %v4005_v11 = vld [vmem:[%s5318_s0 + $0x80] ss:$56 sps:$4 sm:$0xff]  }
  0x9d   :  { %2621 = vmatprep.subr.bf16.mxu0 %v3916_v13  ;;  %2227 = vmatprep.mubr.bf16.mxu1 %v3917_v14  ;;  %v4006_v12 = vld [vmem:[%s5318_s0 + $0x98] ss:$56 sps:$4 sm:$0xff]   ;;  %v4007_v13 = vld [vmem:[%s5317_s1 + $0x620] ss:$8 sps:$4 sm:$0xff]   ;;  %v4012_v14 = vld [vmem:[%s5317_s1 + $0x634] ss:$8 sps:$4 sm:$0xff]  }
  0x9e   :  { %2566 = vmatprep.mubr.bf16.mxu0 %v3919_v15  ;;  %v4013_v15 = vld [vmem:[%s5318_s0 + $0xf4] ss:$56 sps:$4 sm:$0xff]  }
  0x9f   :  { %2283 = vmatpush1.bf16.msra.mxu1 %v3911_v16  ;;  %v4015_v16 = vld [vmem:[%s5318_s0 + $0x10c] ss:$56 sps:$4 sm:$0xff]  }
  0xa0   :  { %2622 = vmatpush1.bf16.msra.mxu0 %v3914_v17  ;;  %2284 = vmatprep.subr.bf16.mxu1 %v3924_v18  ;;  %v4010_v17 = vld [vmem:[%s5317_s1 + $0x630] ss:$8 sps:$4 sm:$0xff]   ;;  %v4021_v18 = vld [vmem:[%s5317_s1 + $0x644] ss:$8 sps:$4 sm:$0xff]  }
  0xa1   :  { %2623 = vmatprep.subr.bf16.mxu0 %v3928_v19  ;;  %v4017_v19 = vld [vmem:[%s5318_s0 + $0xf0] ss:$56 sps:$4 sm:$0xff]  }
  0xa2   :  { %2228 = vmatmul.mubr.bf16.gmra.mrb[16].mxu1 %v3921_v20  ;;  %v4018_v20 = vld [vmem:[%s5318_s0 + $0x108] ss:$56 sps:$4 sm:$0xff]  }
  0xa3   :  { %2567 = vmatmul.mubr.bf16.gmra.mrb[16].mxu0 %v3925_v22  ;;  %2285 = vmatpush1.bf16.msra.mxu1 %v3922_v21  ;;  %v4019_v21 = vld [vmem:[%s5317_s1 + $0x640] ss:$8 sps:$4 sm:$0xff]   ;;  %v4024_v22 = vld [vmem:[%s5317_s1 + $0x654] ss:$8 sps:$4 sm:$0xff]  }
  0xa4   :  { %2624 = vmatpush1.bf16.msra.mxu0 %v3926_v23  ;;  %2286 = vmatprep.subr.bf16.mxu1 %v3931_v24  ;;  %v4025_v23 = vld [vmem:[%s5318_s0 + $0x164] ss:$56 sps:$4 sm:$0xff]  }
  0xa5   :  { %2625 = vmatprep.subr.bf16.mxu0 %v3934_v25  ;;  %2237 = vmatprep.mubr.bf16.mxu1 %v3935_v26  ;;  %v4027_v24 = vld [vmem:[%s5318_s0 + $0x17c] ss:$56 sps:$4 sm:$0xff]   ;;  %v4022_v25 = vld [vmem:[%s5317_s1 + $0x650] ss:$8 sps:$4 sm:$0xff]   ;;  %v4033_v26 = vld [vmem:[%s5317_s1 + $0x664] ss:$8 sps:$4 sm:$0xff]  }
  0xa6   :  { %2576 = vmatprep.mubr.bf16.mxu0 %v3937_v27  ;;  %v4029_v27 = vld [vmem:[%s5318_s0 + $0x160] ss:$56 sps:$4 sm:$0xff]  }
  0xa7   :  { %2287 = vmatpush1.bf16.msra.mxu1 %v3929_v28  ;;  %v4030_v28 = vld [vmem:[%s5318_s0 + $0x178] ss:$56 sps:$4 sm:$0xff]  }
  0xa8   :  { %2626 = vmatpush1.bf16.msra.mxu0 %v3932_v29  ;;  %2288 = vmatprep.subr.bf16.mxu1 %v3942_v30  ;;  %v4031_v29 = vld [vmem:[%s5317_s1 + $0x660] ss:$8 sps:$4 sm:$0xff]   ;;  %v4036_v30 = vld [vmem:[%s5317_s1 + $0x674] ss:$8 sps:$4 sm:$0xff]  }
  0xa9   :  { %2627 = vmatprep.subr.bf16.mxu0 %v3946_v31  ;;  %v4037_v31 = vld [vmem:[%s5318_s0 + $0x1d4] ss:$56 sps:$4 sm:$0xff]  }
  0xaa   :  { %2238 = vmatmul.mubr.bf16.gmra.mrb[20].mxu1 %v3939_v32  ;;  %v4039_v32 = vld [vmem:[%s5318_s0 + $0x1ec] ss:$56 sps:$4 sm:$0xff]  }
  0xab   :  { %2577 = vmatmul.mubr.bf16.gmra.mrb[20].mxu0 %v3943_v34  ;;  %2289 = vmatpush1.bf16.msra.mxu1 %v3940_v33  ;;  %v4034_v33 = vld [vmem:[%s5317_s1 + $0x670] ss:$8 sps:$4 sm:$0xff]   ;;  %v4045_v34 = vld [vmem:[%s5317_s1 + $0x684] ss:$8 sps:$4 sm:$0xff]  }
  0xac   :  { %2628 = vmatpush1.bf16.msra.mxu0 %v3944_v35  ;;  %2290 = vmatprep.subr.bf16.mxu1 %v3949_v36  ;;  %v4041_v35 = vld [vmem:[%s5318_s0 + $0x1d0] ss:$56 sps:$4 sm:$0xff]  }
  0xad   :  { %2629 = vmatprep.subr.bf16.mxu0 %v3952_v37  ;;  %2247 = vmatprep.mubr.bf16.mxu1 %v3953_v38  ;;  %v4042_v36 = vld [vmem:[%s5318_s0 + $0x1e8] ss:$56 sps:$4 sm:$0xff]   ;;  %v4048_v38 = vld [vmem:[%s5317_s1 + $0x694] ss:$8 sps:$4 sm:$0xff]  }
  0xae   :  { %2586 = vmatprep.mubr.bf16.mxu0 %v3955_v39  ;;  %v4043_v37 = vld [vmem:[%s5317_s1 + $0x680] ss:$8 sps:$4 sm:$0xff]   ;;  %v4049_v39 = vld [vmem:[%s5318_s0 + $0x244] ss:$56 sps:$4 sm:$0xff]  }
  0xaf   :  { %2291 = vmatpush1.bf16.msra.mxu1 %v3947_v40  ;;  %v4051_v40 = vld [vmem:[%s5318_s0 + $0x25c] ss:$56 sps:$4 sm:$0xff]  }
  0xb0   :  { %2630 = vmatpush1.bf16.msra.mxu0 %v3950_v41  ;;  %2292 = vmatprep.subr.bf16.mxu1 %v3960_v42  ;;  %v4046_v41 = vld [vmem:[%s5317_s1 + $0x690] ss:$8 sps:$4 sm:$0xff]   ;;  %v4057_v42 = vld [vmem:[%s5317_s1 + $0x6a4] ss:$8 sps:$4 sm:$0xff]  }
  0xb1   :  { %2631 = vmatprep.subr.bf16.mxu0 %v3964_v43  ;;  %v4053_v43 = vld [vmem:[%s5318_s0 + $0x240] ss:$56 sps:$4 sm:$0xff]  }
  0xb2   :  { %2248 = vmatmul.mubr.bf16.gmra.mrb[24].mxu1 %v3957_v44  ;;  %v4054_v44 = vld [vmem:[%s5318_s0 + $0x258] ss:$56 sps:$4 sm:$0xff]  }
  0xb3   :  { %2587 = vmatmul.mubr.bf16.gmra.mrb[24].mxu0 %v3961_v46  ;;  %2293 = vmatpush1.bf16.msra.mxu1 %v3958_v45  ;;  %v4055_v45 = vld [vmem:[%s5317_s1 + $0x6a0] ss:$8 sps:$4 sm:$0xff]   ;;  %v4060_v46 = vld [vmem:[%s5317_s1 + $0x6b4] ss:$8 sps:$4 sm:$0xff]  }
  0xb4   :  { %2632 = vmatpush1.bf16.msra.mxu0 %v3962_v47  ;;  %2294 = vmatprep.subr.bf16.mxu1 %v3967_v48  ;;  %v4061_v47 = vld [vmem:[%s5318_s0 + $0x2b4] ss:$56 sps:$4 sm:$0xff]  }
  0xb5   :  { %2633 = vmatprep.subr.bf16.mxu0 %v3970_v49  ;;  %2257 = vmatprep.mubr.bf16.mxu1 %v3971_v50  ;;  %v4063_v48 = vld [vmem:[%s5318_s0 + $0x2cc] ss:$56 sps:$4 sm:$0xff]   ;;  %v4058_v49 = vld [vmem:[%s5317_s1 + $0x6b0] ss:$8 sps:$4 sm:$0xff]  }
  0xb6   :  { %2596 = vmatprep.mubr.bf16.mxu0 %v3973_v51  ;;  %v4069_v50 = vld [vmem:[%s5317_s1 + $0x6c4] ss:$8 sps:$4 sm:$0xff]   ;;  %v4065_v51 = vld [vmem:[%s5318_s0 + $0x2b0] ss:$56 sps:$4 sm:$0xff]  }
  0xb7   :  { %2295 = vmatpush1.bf16.msra.mxu1 %v3965_v52  ;;  %v4066_v52 = vld [vmem:[%s5318_s0 + $0x2c8] ss:$56 sps:$4 sm:$0xff]  }
  0xb8   :  { %2634 = vmatpush1.bf16.msra.mxu0 %v3968_v53  ;;  %2296 = vmatprep.subr.bf16.mxu1 %v3978_v54  ;;  %v4067_v53 = vld [vmem:[%s5317_s1 + $0x6c0] ss:$8 sps:$4 sm:$0xff]   ;;  %v4072_v54 = vld [vmem:[%s5317_s1 + $0x6d4] ss:$8 sps:$4 sm:$0xff]  }
  0xb9   :  { %2635 = vmatprep.subr.bf16.mxu0 %v3982_v55  ;;  %v4073_v55 = vld [vmem:[%s5318_s0 + $0x324] ss:$56 sps:$4 sm:$0xff]  }
  0xba   :  { %2258 = vmatmul.mubr.bf16.gmra.mrb[28].mxu1 %v3975_v56  ;;  %v4075_v56 = vld [vmem:[%s5318_s0 + $0x33c] ss:$56 sps:$4 sm:$0xff]  }
  0xbb   :  { %2597 = vmatmul.mubr.bf16.gmra.mrb[28].mxu0 %v3979_v58  ;;  %2297 = vmatpush1.bf16.msra.mxu1 %v3976_v57  ;;  %v4070_v57 = vld [vmem:[%s5317_s1 + $0x6d0] ss:$8 sps:$4 sm:$0xff]   ;;  %v4081_v58 = vld [vmem:[%s5317_s1 + $0x6e4] ss:$8 sps:$4 sm:$0xff]  }
  0xbc   :  { %2636 = vmatpush1.bf16.msra.mxu0 %v3980_v59  ;;  %2298 = vmatprep.subr.bf16.mxu1 %v3985_v60  ;;  %v4077_v59 = vld [vmem:[%s5318_s0 + $0x320] ss:$56 sps:$4 sm:$0xff]  }
  0xbd   :  { %2637 = vmatprep.subr.bf16.mxu0 %v3988_v61  ;;  %2300 = vmatprep.mubr.bf16.mxu1 %v3991_v62  ;;  %v4078_v60 = vld [vmem:[%s5318_s0 + $0x338] ss:$56 sps:$4 sm:$0xff]   ;;  %v4079_v61 = vld [vmem:[%s5317_s1 + $0x6e0] ss:$8 sps:$4 sm:$0xff]   ;;  %v4084_v62 = vld [vmem:[%s5317_s1 + $0x6f4] ss:$8 sps:$4 sm:$0xff]  }
  0xbe   :  { %2639 = vmatprep.mubr.bf16.mxu0 %v3994_v63  ;;  %v4087_v63 = vld [vmem:[%s5318_s0 + $0x34] ss:$56 sps:$4 sm:$0xff]  }
  0xbf   :  { %2299 = vmatpush1.bf16.msra.mxu1 %v3983_v0  ;;  %v4090_v0 = vld [vmem:[%s5318_s0 + $0x1f4] ss:$56 sps:$4 sm:$0xff]  }
  0xc0   :  { %2638 = vmatpush1.bf16.msra.mxu0 %v3986_v1  ;;  %3349 = vmatprep.subr.bf16.mxu1 %v3997_v2  ;;  %v4082_v1 = vld [vmem:[%s5317_s1 + $0x6f0] ss:$8 sps:$4 sm:$0xff]  }
  0xc1   :  { %2720 = vmatprep.subr.bf16.mxu0 %v3997_v2  ;;  %v4085_v2 = vld [vmem:[%s5318_s0 + $0x30] ss:$56 sps:$4 sm:$0xff]  }
  0xc2   :  { %2301 = vmatmul.mubr.bf16.vlgmr.msra.gmra.mrb[0].mxu1 %v3989_v3  ;;  %v4088_v3 = vld [vmem:[%s5318_s0 + $0x1f0] ss:$56 sps:$4 sm:$0xff]  }
  0xc3   :  { %2640 = vmatmul.mubr.bf16.vlgmr.msra.gmra.mrb[0].mxu0 %v3992_v4  ;;  %3365 = vmatpush1.bf16.msra.mxu1 %v3995_v5  ;;  %v4091_v4 = vld [vmem:[%s5318_s0 + $0xa4] ss:$56 sps:$4 sm:$0xff]  }
  0xc4   :  { %2721 = vmatpush1.bf16.msra.mxu0 %v3995_v5  ;;  %3350 = vmatprep.subr.bf16.mxu1 %v4000_v6  ;;  %v4093_v5 = vld [vmem:[%s5318_s0 + $0x264] ss:$56 sps:$4 sm:$0xff]  }
  0xc5   :  { %2722 = vmatprep.subr.bf16.mxu0 %v4000_v6  ;;  %2310 = vmatprep.mubr.bf16.mxu1 %v4001_v7  ;;  %v4095_v6 = vld [vmem:[%s5318_s0 + $0xa0] ss:$56 sps:$4 sm:$0xff]  }
  0xc6   :  { %2649 = vmatprep.mubr.bf16.mxu0 %v4003_v8  ;;  %v4096_v7 = vld [vmem:[%s5318_s0 + $0x260] ss:$56 sps:$4 sm:$0xff]   ;;  %v4097_v8 = vld [vmem:[%s5318_s0 + $0x114] ss:$56 sps:$4 sm:$0xff]  }
  0xc7   :  { %3366 = vmatpush1.bf16.msra.mxu1 %v3998_v9 }
  0xc8   :  { %2723 = vmatpush1.bf16.msra.mxu0 %v3998_v9  ;;  %3351 = vmatprep.subr.bf16.mxu1 %v4009_v10  ;;  %v4099_v9 = vld [vmem:[%s5318_s0 + $0x2d4] ss:$56 sps:$4 sm:$0xff]  }
  0xc9   :  { %2724 = vmatprep.subr.bf16.mxu0 %v4009_v10  ;;  %v4101_v10 = vld [vmem:[%s5318_s0 + $0x110] ss:$56 sps:$4 sm:$0xff]  }
  0xca   :  { %2311 = vmatmul.mubr.bf16.gmra.mrb[4].mxu1 %v4005_v11  ;;  %v4102_v11 = vld [vmem:[%s5318_s0 + $0x2d0] ss:$56 sps:$4 sm:$0xff]  }
  0xcb   :  { %2650 = vmatmul.mubr.bf16.gmra.mrb[4].mxu0 %v4006_v12  ;;  %3367 = vmatpush1.bf16.msra.mxu1 %v4007_v13  ;;  %v4103_v12 = vld [vmem:[%s5318_s0 + $0x184] ss:$56 sps:$4 sm:$0xff]  }
  0xcc   :  { %2725 = vmatpush1.bf16.msra.mxu0 %v4007_v13  ;;  %3352 = vmatprep.subr.bf16.mxu1 %v4012_v14  ;;  %v4105_v13 = vld [vmem:[%s5318_s0 + $0x344] ss:$56 sps:$4 sm:$0xff]  }
  0xcd   :  { %2726 = vmatprep.subr.bf16.mxu0 %v4012_v14  ;;  %2320 = vmatprep.mubr.bf16.mxu1 %v4013_v15  ;;  %v4107_v14 = vld [vmem:[%s5318_s0 + $0x180] ss:$56 sps:$4 sm:$0xff]  }
  0xce   :  { %2659 = vmatprep.mubr.bf16.mxu0 %v4015_v16  ;;  %v4108_v15 = vld [vmem:[%s5318_s0 + $0x340] ss:$56 sps:$4 sm:$0xff]  }
  0xcf   :  { %3368 = vmatpush1.bf16.msra.mxu1 %v4010_v17 }
  0xd0   :  { %2727 = vmatpush1.bf16.msra.mxu0 %v4010_v17  ;;  %3353 = vmatprep.subr.bf16.mxu1 %v4021_v18 }
  0xd1   :  { %2728 = vmatprep.subr.bf16.mxu0 %v4021_v18 }
  0xd2   :  { %2321 = vmatmul.mubr.bf16.gmra.mrb[8].mxu1 %v4017_v19 }
  0xd3   :  { %2660 = vmatmul.mubr.bf16.gmra.mrb[8].mxu0 %v4018_v20  ;;  %3369 = vmatpush1.bf16.msra.mxu1 %v4019_v21 }
  0xd4   :  { %2729 = vmatpush1.bf16.msra.mxu0 %v4019_v21  ;;  %3354 = vmatprep.subr.bf16.mxu1 %v4024_v22 }
  0xd5   :  { %2730 = vmatprep.subr.bf16.mxu0 %v4024_v22  ;;  %2330 = vmatprep.mubr.bf16.mxu1 %v4025_v23 }
  0xd6   :  { %2669 = vmatprep.mubr.bf16.mxu0 %v4027_v24 }
  0xd7   :  { %3370 = vmatpush1.bf16.msra.mxu1 %v4022_v25 }
  0xd8   :  { %2731 = vmatpush1.bf16.msra.mxu0 %v4022_v25  ;;  %3355 = vmatprep.subr.bf16.mxu1 %v4033_v26 }
  0xd9   :  { %2732 = vmatprep.subr.bf16.mxu0 %v4033_v26 }
  0xda   :  { %2331 = vmatmul.mubr.bf16.gmra.mrb[12].mxu1 %v4029_v27  ;;  %v352_v27 = vlaneseq }
  0xdb   :  { %2670 = vmatmul.mubr.bf16.gmra.mrb[12].mxu0 %v4030_v28  ;;  %3371 = vmatpush1.bf16.msra.mxu1 %v4031_v29 }
  0xdc   :  { %2733 = vmatpush1.bf16.msra.mxu0 %v4031_v29  ;;  %3356 = vmatprep.subr.bf16.mxu1 %v4036_v30  ;;  %v353_v29 = vshrl.u32 %v352_v27, 7 }
  0xdd   :  { %2734 = vmatprep.subr.bf16.mxu0 %v4036_v30  ;;  %2340 = vmatprep.mubr.bf16.mxu1 %v4037_v31 }
  0xde   :  { %2679 = vmatprep.mubr.bf16.mxu0 %v4039_v32 }
  0xdf   :  { %3372 = vmatpush1.bf16.msra.mxu1 %v4034_v33 }
  0xe0   :  { %2735 = vmatpush1.bf16.msra.mxu0 %v4034_v33  ;;  %3357 = vmatprep.subr.bf16.mxu1 %v4045_v34  ;;  %v354_v33 = vsub.s32 0, %v353_v29 }
  0xe1   :  { %2736 = vmatprep.subr.bf16.mxu0 %v4045_v34 }
  0xe2   :  { %2341 = vmatmul.mubr.bf16.gmra.mrb[16].mxu1 %v4041_v35  ;;  %v350_v35 = vld [vmem:[%s5319_s2] sm:$0x3] }
  0xe3   :  { %2680 = vmatmul.mubr.bf16.gmra.mrb[16].mxu0 %v4042_v36  ;;  %3373 = vmatpush1.bf16.msra.mxu1 %v4043_v37  ;;  %v358_v36 = vsub.s32 1, %v353_v29 }
  0xe4   :  { %2737 = vmatpush1.bf16.msra.mxu0 %v4043_v37  ;;  %3358 = vmatprep.subr.bf16.mxu1 %v4048_v38  ;;  %v5172_v37 = vrot.slane %v350_v35, %v354_v33 }
  0xe5   :  { %2738 = vmatprep.subr.bf16.mxu0 %v4048_v38  ;;  %2350 = vmatprep.mubr.bf16.mxu1 %v4049_v39  ;;  %v5174_v38 = vrot.slane %v350_v35, %v358_v36 }
  0xe6   :  { %2689 = vmatprep.mubr.bf16.mxu0 %v4051_v40 }
  0xe7   :  { %3374 = vmatpush1.bf16.msra.mxu1 %v4046_v41 }
  0xe8   :  { %2739 = vmatpush1.bf16.msra.mxu0 %v4046_v41  ;;  %3359 = vmatprep.subr.bf16.mxu1 %v4057_v42 }
  0xe9   :  { %2740 = vmatprep.subr.bf16.mxu0 %v4057_v42 }
  0xea   :  { %2351 = vmatmul.mubr.bf16.gmra.mrb[20].mxu1 %v4053_v43 }
  0xeb   :  { %2690 = vmatmul.mubr.bf16.gmra.mrb[20].mxu0 %v4054_v44  ;;  %3375 = vmatpush1.bf16.msra.mxu1 %v4055_v45 }
  0xec   :  { %2741 = vmatpush1.bf16.msra.mxu0 %v4055_v45  ;;  %3360 = vmatprep.subr.bf16.mxu1 %v4060_v46 }
  0xed   :  { %2742 = vmatprep.subr.bf16.mxu0 %v4060_v46  ;;  %2360 = vmatprep.mubr.bf16.mxu1 %v4061_v47 }
  0xee   :  { %2699 = vmatprep.mubr.bf16.mxu0 %v4063_v48 }
  0xef   :  { %3376 = vmatpush1.bf16.msra.mxu1 %v4058_v49 }
  0xf0   :  { %2743 = vmatpush1.bf16.msra.mxu0 %v4058_v49  ;;  %3361 = vmatprep.subr.bf16.mxu1 %v4069_v50 }
  0xf1   :  { %2744 = vmatprep.subr.bf16.mxu0 %v4069_v50 }
  0xf2   :  { %2361 = vmatmul.mubr.bf16.gmra.mrb[24].mxu1 %v4065_v51 }
  0xf3   :  { %2700 = vmatmul.mubr.bf16.gmra.mrb[24].mxu0 %v4066_v52  ;;  %3377 = vmatpush1.bf16.msra.mxu1 %v4067_v53 }
  0xf4   :  { %2745 = vmatpush1.bf16.msra.mxu0 %v4067_v53  ;;  %3362 = vmatprep.subr.bf16.mxu1 %v4072_v54 }
  0xf5   :  { %2746 = vmatprep.subr.bf16.mxu0 %v4072_v54  ;;  %2370 = vmatprep.mubr.bf16.mxu1 %v4073_v55 }
  0xf6   :  { %2709 = vmatprep.mubr.bf16.mxu0 %v4075_v56 }
  0xf7   :  { %3378 = vmatpush1.bf16.msra.mxu1 %v4070_v57 }
  0xf8   :  { %2747 = vmatpush1.bf16.msra.mxu0 %v4070_v57  ;;  %3363 = vmatprep.subr.bf16.mxu1 %v4081_v58 }
  0xf9   :  { %2748 = vmatprep.subr.bf16.mxu0 %v4081_v58 }
  0xfa   :  { %2371 = vmatmul.mubr.bf16.gmra.mrb[28].mxu1 %v4077_v59 }
  0xfb   :  { %2710 = vmatmul.mubr.bf16.gmra.mrb[28].mxu0 %v4078_v60  ;;  %3379 = vmatpush1.bf16.msra.mxu1 %v4079_v61 }
  0xfc   :  { %2749 = vmatpush1.bf16.msra.mxu0 %v4079_v61  ;;  %3364 = vmatprep.subr.bf16.mxu1 %v4084_v62 }
  0xfd   :  { %2750 = vmatprep.subr.bf16.mxu0 %v4084_v62  ;;  %2752 = vmatprep.mubr.bf16.mxu0 %v4087_v63 }
  0xfe   :  { %2792 = vmatprep.mubr.bf16.mxu1 %v4090_v0 }
  0xff   :  { %3380 = vmatpush1.bf16.msra.mxu1 %v4082_v1 }
 0x100   :  { %2751 = vmatpush1.bf16.msra.mxu0 %v4082_v1 }
 0x102   :  { %2793 = vmatmul.mubr.bf16.vlgmr.msra.gmra.mrb[32].mxu1 %v4088_v3 }
 0x103   :  { %2753 = vmatmul.mubr.bf16.vlgmr.msra.gmra.mrb[0].mxu0 %v4085_v2  ;;  %2802 = vmatprep.mubr.bf16.mxu1 %v4093_v5 }
 0x104   :  { %2762 = vmatprep.mubr.bf16.mxu0 %v4091_v4 }
 0x10a   :  { %2803 = vmatmul.mubr.bf16.gmra.mrb[36].mxu1 %v4096_v7 }
 0x10b   :  { %2763 = vmatmul.mubr.bf16.gmra.mrb[4].mxu0 %v4095_v6  ;;  %2812 = vmatprep.mubr.bf16.mxu1 %v4099_v9 }
 0x10c   :  { %2772 = vmatprep.mubr.bf16.mxu0 %v4097_v8 }
 0x112   :  { %2813 = vmatmul.mubr.bf16.gmra.mrb[40].mxu1 %v4102_v11 }
 0x113   :  { %2773 = vmatmul.mubr.bf16.gmra.mrb[8].mxu0 %v4101_v10  ;;  %2822 = vmatprep.mubr.bf16.mxu1 %v4105_v13 }
 0x114   :  { %2782 = vmatprep.mubr.bf16.mxu0 %v4103_v12 }
 0x11a   :  { %2823 = vmatmul.mubr.bf16.gmra.mrb[44].mxu1 %v4108_v15 }
 0x11b   :  { %2783 = vmatmul.mubr.bf16.gmra.mrb[12].mxu0 %v4107_v14 }
 0x195   :  { %v5137_v16 = vpop.f32.mrb[0].mxu1 }
 0x196   :  { %v5139_v17 = vpop.f32.mrb[1].mxu1 }
 0x197   :  { %v5141_v18 = vpop.f32.mrb[2].mxu1 }
 0x198   :  { %v5143_v19 = vpop.f32.mrb[3].mxu1 }
 0x19d   :  { %v5145_v20 = vpop.f32.mrb[4].mxu1 }
 0x19e   :  { %v5147_v21 = vpop.f32.mrb[5].mxu1 }
 0x19f   :  { %v5149_v22 = vpop.f32.mrb[6].mxu1 }
 0x1a0   :  { %v5151_v23 = vpop.f32.mrb[7].mxu1 }
 0x1a5   :  { %v5153_v24 = vpop.f32.mrb[8].mxu1 }
 0x1a6   :  { %v5155_v25 = vpop.f32.mrb[9].mxu1 }
 0x1a7   :  { %v5157_v26 = vpop.f32.mrb[10].mxu1 }
 0x1a8   :  { %v5159_v28 = vpop.f32.mrb[11].mxu1 }
 0x1ad   :  { %v5161_v30 = vpop.f32.mrb[12].mxu1 }
 0x1ae   :  { %v5163_v31 = vpop.f32.mrb[13].mxu1 }
 0x1af   :  { %v5165_v32 = vpop.f32.mrb[14].mxu1 }
 0x1b0   :  { %v5167_v34 = vpop.f32.mrb[15].mxu1 }
 0x1b5   :  { %v2342_v39 = vpop.f32.mrb[16].mxu1 }
 0x1b6   :  { %v2681_v40 = vpop.f32.mrb[16].mxu0  ;;  %v3413_v41 = vadd.f32 %v2342_v39, %v5172_v37  ;;  %v2344_v42 = vpop.f32.mrb[17].mxu1 }
 0x1b7   :  { %v2683_v43 = vpop.f32.mrb[17].mxu0  ;;  %v3416_v44 = vadd.f32 %v2344_v42, %v5174_v38  ;;  %v2346_v45 = vpop.f32.mrb[18].mxu1 }
 0x1b8   :  { %v2685_v46 = vpop.f32.mrb[18].mxu0  ;;  %v3414_v47 = vadd.f32 %v3413_v41, %v2681_v40  ;;  %v3419_v48 = vadd.f32 %v2346_v45, %v5172_v37  ;;  %v2348_v49 = vpop.f32.mrb[19].mxu1 }
 0x1b9   :  { %v2687_v50 = vpop.f32.mrb[19].mxu0  ;;  %v5179_v51 = vadd.f32 %v3416_v44, %v2683_v43  ;;  %v3422_v52 = vadd.f32 %v2348_v49, %v5174_v38 }
 0x1ba   :  { %v5182_v53 = vadd.f32 %v3419_v48, %v2685_v46 }
 0x1bb   :  { %v5184_v54 = vadd.f32 %v3422_v52, %v2687_v50 }
 0x1bd   :  { %v2352_v55 = vpop.f32.mrb[20].mxu1 }
 0x1be   :  { %v2691_v56 = vpop.f32.mrb[20].mxu0  ;;  %v3425_v57 = vadd.f32 %v2352_v55, %v5172_v37  ;;  %v2354_v58 = vpop.f32.mrb[21].mxu1 }
 0x1bf   :  { %v2693_v59 = vpop.f32.mrb[21].mxu0  ;;  %v3428_v60 = vadd.f32 %v2354_v58, %v5174_v38  ;;  %v2356_v61 = vpop.f32.mrb[22].mxu1 }
 0x1c0   :  { %v2695_v62 = vpop.f32.mrb[22].mxu0  ;;  %v5188_v63 = vadd.f32 %v3425_v57, %v2691_v56  ;;  %v3431_v0 = vadd.f32 %v2356_v61, %v5172_v37  ;;  %v2358_v1 = vpop.f32.mrb[23].mxu1  ;;  %v3381_v61 = vadd.f32 %v5137_v16, %v5172_v37 }
 0x1c1   :  { %v2697_v2 = vpop.f32.mrb[23].mxu0  ;;  %v5191_v3 = vadd.f32 %v3428_v60, %v2693_v59  ;;  %v3434_v4 = vadd.f32 %v2358_v1, %v5174_v38 }
 0x1c2   :  { %v5194_v5 = vadd.f32 %v3431_v0, %v2695_v62  ;;  %v3383_v62 = vadd.f32 %v5139_v17, %v5174_v38 }
 0x1c3   :  { %v5196_v6 = vadd.f32 %v3434_v4, %v2697_v2  ;;  %v3385_v2 = vadd.f32 %v5141_v18, %v5172_v37 }
 0x1c5   :  { %v2362_v7 = vpop.f32.mrb[24].mxu1 }
 0x1c6   :  { %v2701_v8 = vpop.f32.mrb[24].mxu0  ;;  %v3437_v9 = vadd.f32 %v2362_v7, %v5172_v37  ;;  %v2364_v10 = vpop.f32.mrb[25].mxu1 }
 0x1c7   :  { %v2703_v11 = vpop.f32.mrb[25].mxu0  ;;  %v3440_v12 = vadd.f32 %v2364_v10, %v5174_v38  ;;  %v2366_v13 = vpop.f32.mrb[26].mxu1  ;;  %v3387_v10 = vadd.f32 %v5143_v19, %v5174_v38 }
 0x1c8   :  { %v2705_v14 = vpop.f32.mrb[26].mxu0  ;;  %v5200_v15 = vadd.f32 %v3437_v9, %v2701_v8  ;;  %v3443_v27 = vadd.f32 %v2366_v13, %v5172_v37  ;;  %v2368_v29 = vpop.f32.mrb[27].mxu1 }
 0x1c9   :  { %v2707_v33 = vpop.f32.mrb[27].mxu0  ;;  %v5203_v35 = vadd.f32 %v3440_v12, %v2703_v11  ;;  %v3446_v36 = vadd.f32 %v2368_v29, %v5174_v38 }
 0x1ca   :  { %v5206_v39 = vadd.f32 %v3443_v27, %v2705_v14 }
 0x1cb   :  { %v5208_v40 = vadd.f32 %v3446_v36, %v2707_v33 }
 0x1cd   :  { %v2372_v41 = vpop.f32.mrb[28].mxu1 }
 0x1ce   :  { %v2711_v42 = vpop.f32.mrb[28].mxu0  ;;  %v3449_v43 = vadd.f32 %v2372_v41, %v5172_v37  ;;  %v2374_v44 = vpop.f32.mrb[29].mxu1 }
 0x1cf   :  { %v2713_v45 = vpop.f32.mrb[29].mxu0  ;;  %v3452_v46 = vadd.f32 %v2374_v44, %v5174_v38  ;;  %v2376_v48 = vpop.f32.mrb[30].mxu1 }
 0x1d0   :  { %v2715_v49 = vpop.f32.mrb[30].mxu0  ;;  %v5212_v50 = vadd.f32 %v3449_v43, %v2711_v42  ;;  %v3455_v52 = vadd.f32 %v2376_v48, %v5172_v37  ;;  %v2378_v55 = vpop.f32.mrb[31].mxu1  ;;  %v3389_v48 = vadd.f32 %v5145_v20, %v5172_v37 }
 0x1d1   :  { %v2717_v56 = vpop.f32.mrb[31].mxu0  ;;  %v5215_v57 = vadd.f32 %v3452_v46, %v2713_v45  ;;  %v3458_v58 = vadd.f32 %v2378_v55, %v5174_v38 }
 0x1d2   :  { %v5218_v59 = vadd.f32 %v3455_v52, %v2715_v49  ;;  %v3391_v49 = vadd.f32 %v5147_v21, %v5174_v38 }
 0x1d3   :  { %v5220_v60 = vadd.f32 %v3458_v58, %v2717_v56  ;;  %v3393_v56 = vadd.f32 %v5149_v22, %v5172_v37 }
 0x1d5   :  { %v2794_v1 = vpop.f32.mrb[32].mxu1 }
 0x1d6   :  { %v2754_v0 = vpop.f32.mrb[0].mxu0  ;;  %v3415_v7 = vadd.f32 %v3414_v47, %v2794_v1  ;;  %v2796_v9 = vpop.f32.mrb[33].mxu1 }
 0x1d7   :  { %v3382_v4 = vadd.f32 %v3381_v61, %v2754_v0  ;;  %v2756_v8 = vpop.f32.mrb[1].mxu0  ;;  %v3418_v12 = vadd.f32 %v5179_v51, %v2796_v9  ;;  %v2798_v16 = vpop.f32.mrb[34].mxu1 }
 0x1d8   :  { %v3384_v11 = vadd.f32 %v3383_v62, %v2756_v8  ;;  %v2758_v13 = vpop.f32.mrb[2].mxu0  ;;  %v2849_v27 = vmax.f32 %v3415_v7, 0.0  ;;  %v3421_v29 = vadd.f32 %v5182_v53, %v2798_v16  ;;  %v2800_v36 = vpop.f32.mrb[35].mxu1  ;;  %v3395_v62 = vadd.f32 %v5151_v23, %v5174_v38 }
 0x1d9   :  { %v2833_v14 = vmax.f32 %v3382_v4, 0.0  ;;  %v3386_v17 = vadd.f32 %v3385_v2, %v2758_v13  ;;  %v2760_v33 = vpop.f32.mrb[3].mxu0  ;;  %v2850_v41 = vmax.f32 %v3418_v12, 0.0  ;;  %v3424_v42 = vadd.f32 %v5184_v54, %v2800_v36 }
 0x1da   :  { %v2834_v18 = vmax.f32 %v3384_v11, 0.0  ;;  %v3388_v47 = vadd.f32 %v3387_v10, %v2760_v33  ;;  %v2851_v44 = vmax.f32 %v3421_v29, 0.0  ;;  %v3397_v33 = vadd.f32 %v5153_v24, %v5172_v37 }
 0x1db   :  { %v2835_v43 = vmax.f32 %v3386_v17, 0.0  ;;  %v3341_v45 = vpack.c.bf16 %v2850_v41, %v2849_v27  ;;  %v2852_v51 = vmax.f32 %v3424_v42, 0.0  ;;  %v3399_v36 = vadd.f32 %v5155_v25, %v5174_v38 }
 0x1dc   :  { %v3333_v19 = vpack.c.bf16 %v2834_v18, %v2833_v14  ;;  %v2836_v46 = vmax.f32 %v3388_v47, 0.0  ;;  %v3401_v47 = vadd.f32 %v5157_v26, %v5172_v37 }
 0x1dd   :  { %2969 = vst [vmem:[%s5320_s3 + $0x40] sm:$0xff] %v3341_v45  ;;  %v3342_v54 = vpack.c.bf16 %v2852_v51, %v2851_v44  ;;  %v2804_v55 = vpop.f32.mrb[36].mxu1  ;;  %v3403_v44 = vadd.f32 %v5159_v28, %v5174_v38 }
 0x1de   :  { %2961 = vst [vmem:[%s5320_s3] sm:$0xff] %v3333_v19  ;;  %v3334_v53 = vpack.c.bf16 %v2836_v46, %v2835_v43  ;;  %v2764_v52 = vpop.f32.mrb[4].mxu0  ;;  %v3427_v20 = vadd.f32 %v5188_v63, %v2804_v55  ;;  %v2806_v21 = vpop.f32.mrb[37].mxu1 }
 0x1df   :  { %v3390_v58 = vadd.f32 %v3389_v48, %v2764_v52  ;;  %v2766_v61 = vpop.f32.mrb[5].mxu0  ;;  %2970 = vst [vmem:[%s5320_s3 + $0x48] sm:$0xff] %v3342_v54  ;;  %v3430_v1 = vadd.f32 %v5191_v3, %v2806_v21  ;;  %v2808_v2 = vpop.f32.mrb[38].mxu1 }
 0x1e0   :  { %2962 = vst [vmem:[%s5320_s3 + $0x8] sm:$0xff] %v3334_v53  ;;  %v3392_v0 = vadd.f32 %v3391_v49, %v2766_v61  ;;  %v2768_v22 = vpop.f32.mrb[6].mxu0  ;;  %v2853_v63 = vmax.f32 %v3427_v20, 0.0  ;;  %v3433_v8 = vadd.f32 %v5194_v5, %v2808_v2  ;;  %v2810_v23 = vpop.f32.mrb[39].mxu1 }
 0x1e1   :  { %v2837_v4 = vmax.f32 %v3390_v58, 0.0  ;;  %v3394_v7 = vadd.f32 %v3393_v56, %v2768_v22  ;;  %v2770_v9 = vpop.f32.mrb[7].mxu0  ;;  %v2854_v11 = vmax.f32 %v3430_v1, 0.0  ;;  %v3436_v13 = vadd.f32 %v5196_v6, %v2810_v23 }
 0x1e2   :  { %v2838_v10 = vmax.f32 %v3392_v0, 0.0  ;;  %v3396_v12 = vadd.f32 %v3395_v62, %v2770_v9  ;;  %v2855_v14 = vmax.f32 %v3433_v8, 0.0  ;;  %v3405_v0 = vadd.f32 %v5161_v30, %v5172_v37 }
 0x1e3   :  { %v2839_v16 = vmax.f32 %v3394_v7, 0.0  ;;  %v3343_v17 = vpack.c.bf16 %v2854_v11, %v2853_v63  ;;  %v2856_v3 = vmax.f32 %v3436_v13, 0.0  ;;  %v3407_v1 = vadd.f32 %v5163_v31, %v5174_v38 }
 0x1e4   :  { %v3335_v27 = vpack.c.bf16 %v2838_v10, %v2837_v4  ;;  %v2840_v29 = vmax.f32 %v3396_v12, 0.0  ;;  %v3409_v4 = vadd.f32 %v5165_v32, %v5172_v37  ;;  %v3411_v8 = vadd.f32 %v5167_v34, %v5174_v38 }
 0x1e5   :  { %2971 = vst [vmem:[%s5320_s3 + $0x50] sm:$0xff] %v3343_v17  ;;  %v3344_v6 = vpack.c.bf16 %v2856_v3, %v2855_v14  ;;  %v2814_v41 = vpop.f32.mrb[40].mxu1 }
 0x1e6   :  { %2963 = vst [vmem:[%s5320_s3 + $0x10] sm:$0xff] %v3335_v27  ;;  %v3336_v5 = vpack.c.bf16 %v2840_v29, %v2839_v16  ;;  %v2774_v18 = vpop.f32.mrb[8].mxu0  ;;  %v3439_v24 = vadd.f32 %v5200_v15, %v2814_v41  ;;  %v2816_v25 = vpop.f32.mrb[41].mxu1 }
 0x1e7   :  { %v3398_v42 = vadd.f32 %v3397_v33, %v2774_v18  ;;  %v2776_v43 = vpop.f32.mrb[9].mxu0  ;;  %2972 = vst [vmem:[%s5320_s3 + $0x58] sm:$0xff] %v3344_v6  ;;  %v3442_v45 = vadd.f32 %v5203_v35, %v2816_v25  ;;  %v2818_v46 = vpop.f32.mrb[42].mxu1 }
 0x1e8   :  { %2964 = vst [vmem:[%s5320_s3 + $0x18] sm:$0xff] %v3336_v5  ;;  %v3400_v19 = vadd.f32 %v3399_v36, %v2776_v43  ;;  %v2778_v26 = vpop.f32.mrb[10].mxu0  ;;  %v2857_v15 = vmax.f32 %v3439_v24, 0.0  ;;  %v3445_v49 = vadd.f32 %v5206_v39, %v2818_v46  ;;  %v2820_v28 = vpop.f32.mrb[43].mxu1 }
 0x1e9   :  { %v2841_v51 = vmax.f32 %v3398_v42, 0.0  ;;  %v3402_v48 = vadd.f32 %v3401_v47, %v2778_v26  ;;  %v2780_v53 = vpop.f32.mrb[11].mxu0  ;;  %v2858_v52 = vmax.f32 %v3442_v45, 0.0  ;;  %v3448_v56 = vadd.f32 %v5208_v40, %v2820_v28 }
 0x1ea   :  { %v2842_v54 = vmax.f32 %v3400_v19, 0.0  ;;  %v3404_v55 = vadd.f32 %v3403_v44, %v2780_v53  ;;  %v2859_v20 = vmax.f32 %v3445_v49, 0.0 }
 0x1eb   :  { %v2843_v58 = vmax.f32 %v3402_v48, 0.0  ;;  %v3345_v21 = vpack.c.bf16 %v2858_v52, %v2857_v15  ;;  %v2860_v35 = vmax.f32 %v3448_v56, 0.0 }
 0x1ec   :  { %v3337_v61 = vpack.c.bf16 %v2842_v54, %v2841_v51  ;;  %v2844_v62 = vmax.f32 %v3404_v55, 0.0 }
 0x1ed   :  { %2973 = vst [vmem:[%s5320_s3 + $0x60] sm:$0xff] %v3345_v21  ;;  %v3346_v40 = vpack.c.bf16 %v2860_v35, %v2859_v20  ;;  %v2824_v2 = vpop.f32.mrb[44].mxu1 }
 0x1ee   :  { %2965 = vst [vmem:[%s5320_s3 + $0x20] sm:$0xff] %v3337_v61  ;;  %v3338_v39 = vpack.c.bf16 %v2844_v62, %v2843_v58  ;;  %v2784_v22 = vpop.f32.mrb[12].mxu0  ;;  %v3451_v30 = vadd.f32 %v5212_v50, %v2824_v2  ;;  %v2826_v31 = vpop.f32.mrb[45].mxu1 }
 0x1ef   :  { %v3406_v63 = vadd.f32 %v3405_v0, %v2784_v22  ;;  %v2786_v7 = vpop.f32.mrb[13].mxu0  ;;  %2974 = vst [vmem:[%s5320_s3 + $0x68] sm:$0xff] %v3346_v40  ;;  %v3454_v23 = vadd.f32 %v5215_v57, %v2826_v31  ;;  %v2828_v37 = vpop.f32.mrb[46].mxu1 }
 0x1f0   :  { %2966 = vst [vmem:[%s5320_s3 + $0x28] sm:$0xff] %v3338_v39  ;;  %v3408_v9 = vadd.f32 %v3407_v1, %v2786_v7  ;;  %v2788_v32 = vpop.f32.mrb[14].mxu0  ;;  %v2861_v50 = vmax.f32 %v3451_v30, 0.0  ;;  %v3457_v12 = vadd.f32 %v5218_v59, %v2828_v37  ;;  %v2830_v34 = vpop.f32.mrb[47].mxu1 }
 0x1f1   :  { %v2845_v10 = vmax.f32 %v3406_v63, 0.0  ;;  %v3410_v11 = vadd.f32 %v3409_v4, %v2788_v32  ;;  %v2790_v13 = vpop.f32.mrb[15].mxu0  ;;  %v2862_v16 = vmax.f32 %v3454_v23, 0.0  ;;  %v3460_v27 = vadd.f32 %v5220_v60, %v2830_v34 }
 0x1f2   :  { %v2846_v38 = vmax.f32 %v3408_v9, 0.0  ;;  %v3412_v14 = vadd.f32 %v3411_v8, %v2790_v13  ;;  %v2863_v29 = vmax.f32 %v3457_v12, 0.0 }
 0x1f3   :  { %v2847_v17 = vmax.f32 %v3410_v11, 0.0  ;;  %v3347_v33 = vpack.c.bf16 %v2862_v16, %v2861_v50  ;;  %v2864_v57 = vmax.f32 %v3460_v27, 0.0 }
 0x1f4   :  { %v3339_v3 = vpack.c.bf16 %v2846_v38, %v2845_v10  ;;  %v2848_v36 = vmax.f32 %v3412_v14, 0.0 }
 0x1f5   :  { %2975 = vst [vmem:[%s5320_s3 + $0x70] sm:$0xff] %v3347_v33  ;;  %v3348_v5 = vpack.c.bf16 %v2864_v57, %v2863_v29 }
 0x1f6   :  { %2967 = vst [vmem:[%s5320_s3 + $0x30] sm:$0xff] %v3339_v3  ;;  %v3340_v59 = vpack.c.bf16 %v2848_v36, %v2847_v17 }
 0x1f7   :  { %2976 = vst [vmem:[%s5320_s3 + $0x78] sm:$0xff] %v3348_v5 }
 0x1f8   :  { %2968 = vst [vmem:[%s5320_s3 + $0x38] sm:$0xff] %v3340_v59 }

// kernel: reduction_b_forward.6
= control target key start
LH: loop header
LB: loop body
LE: loop exit
PB: predicated region body
PF: predicated region fallthrough
CT: control target
= control target key end

     0   :  { %vm4623_vm0 = vcmask 519168   ;;  %s8701_s1 = inlined_call_operand.vmem [shape: bf16[1792,320], index: 1, kind: input, shape index: {}]   ;;  %s8702_s0 = inlined_call_operand.vmem [shape: bf16[128,1792], index: 0, kind: input, shape index: {}]   ;;  %s8703_s2 = inlined_call_operand.vmem [shape: f32[1,320], index: 2, kind: input, shape index: {}]   ;;  %s8704_s3 = inlined_call_operand.vmem [shape: bf16[128,320], index: 3, kind: output, shape index: {}]  }
   0x1   :  { %v5843_v0 = vld [vmem:[%s8701_s1 + $0x4] ss:$12 sps:$4 sm:$0xff]   ;;  %v5845_v1 = vld [vmem:[%s8701_s1 + $0xc8] ss:$12 sps:$4 sm:$0xff]   ;;  %v5846_v2 = vld [vmem:[%s8701_s1] ss:$12 sps:$4 sm:$0xff]  }
   0x2   :  { %2944 = vmatprep.subr.bf16.mxu0 %v5843_v0  ;;  %5171 = vmatprep.subr.bf16.mxu1 %v5845_v1  ;;  %v5847_v3 = vld [vmem:[%s8701_s1 + $0x8] ss:$12 sps:$4 sm:$0xff]   ;;  %v5850_v5 = vld [vmem:[%s8701_s1 + $0xe0] ss:$12 sps:$4 sm:$0xff]   ;;  %v5851_v6 = vld [vmem:[%s8701_s1 + $0x18] ss:$12 sps:$4 sm:$0xff]  }
   0x3   :  { %2945 = vmatpush1.bf16.msra.mxu0 %v5846_v2  ;;  %v5848_v4 = vld [vmem:[%s8701_s1 + $0x1c] ss:$12 sps:$4 sm:$0xff]   ;;  %5172 = vmatpush3.bf16.msra.mxu1 %v5847_v3  ;;  %v5852_v7 = vld [vmem:[%s8701_s1 + $0x20] ss:$12 sps:$4 sm:$0xff]   ;;  %v5855_v9 = vld [vmem:[%s8701_s1 + $0xf8] ss:$12 sps:$4 sm:$0xff]  }
   0x4   :  { %2946 = vmatprep.subr.bf16.mxu0 %v5848_v4  ;;  %5173 = vmatprep.subr.bf16.mxu1 %v5850_v5  ;;  %v5853_v8 = vld [vmem:[%s8701_s1 + $0x34] ss:$12 sps:$4 sm:$0xff]   ;;  %v5856_v10 = vld [vmem:[%s8701_s1 + $0x30] ss:$12 sps:$4 sm:$0xff]   ;;  %v5857_v11 = vld [vmem:[%s8701_s1 + $0x38] ss:$12 sps:$4 sm:$0xff]  }
   0x5   :  { %v5858_v12 = vld [vmem:[%s8701_s1 + $0x4c] ss:$12 sps:$4 sm:$0xff]   ;;  %v5860_v13 = vld [vmem:[%s8701_s1 + $0x110] ss:$12 sps:$4 sm:$0xff]   ;;  %v5861_v14 = vld [vmem:[%s8701_s1 + $0x48] ss:$12 sps:$4 sm:$0xff]  }
   0x6   :  { %v5862_v15 = vld [vmem:[%s8701_s1 + $0x50] ss:$12 sps:$4 sm:$0xff]   ;;  %v5865_v17 = vld [vmem:[%s8701_s1 + $0x128] ss:$12 sps:$4 sm:$0xff]   ;;  %v5866_v18 = vld [vmem:[%s8701_s1 + $0x60] ss:$12 sps:$4 sm:$0xff]  }
   0x7   :  { %2947 = vmatpush1.bf16.msra.mxu0 %v5851_v6  ;;  %5174 = vmatpush3.bf16.msra.mxu1 %v5852_v7  ;;  %v5863_v16 = vld [vmem:[%s8701_s1 + $0x64] ss:$12 sps:$4 sm:$0xff]   ;;  %v5867_v19 = vld [vmem:[%s8701_s1 + $0x68] ss:$12 sps:$4 sm:$0xff]   ;;  %v5870_v21 = vld [vmem:[%s8701_s1 + $0x140] ss:$12 sps:$4 sm:$0xff]  }
   0x8   :  { %2948 = vmatprep.subr.bf16.mxu0 %v5853_v8  ;;  %5175 = vmatprep.subr.bf16.mxu1 %v5855_v9  ;;  %v5868_v20 = vld [vmem:[%s8701_s1 + $0x7c] ss:$12 sps:$4 sm:$0xff]   ;;  %v5871_v22 = vld [vmem:[%s8701_s1 + $0x78] ss:$12 sps:$4 sm:$0xff]   ;;  %v5872_v23 = vld [vmem:[%s8701_s1 + $0x80] ss:$12 sps:$4 sm:$0xff]  }
   0x9   :  { %v5873_v24 = vld [vmem:[%s8701_s1 + $0x94] ss:$12 sps:$4 sm:$0xff]   ;;  %v5875_v25 = vld [vmem:[%s8701_s1 + $0x158] ss:$12 sps:$4 sm:$0xff]   ;;  %v5876_v26 = vld [vmem:[%s8701_s1 + $0x90] ss:$12 sps:$4 sm:$0xff]  }
   0xa   :  { %v5877_v27 = vld [vmem:[%s8701_s1 + $0x98] ss:$12 sps:$4 sm:$0xff]   ;;  %v5880_v29 = vld [vmem:[%s8701_s1 + $0x170] ss:$12 sps:$4 sm:$0xff]   ;;  %v5881_v30 = vld [vmem:[%s8701_s1 + $0xa8] ss:$12 sps:$4 sm:$0xff]  }
   0xb   :  { %2949 = vmatpush1.bf16.msra.mxu0 %v5856_v10  ;;  %5176 = vmatpush3.bf16.msra.mxu1 %v5857_v11  ;;  %v5878_v28 = vld [vmem:[%s8701_s1 + $0xac] ss:$12 sps:$4 sm:$0xff]   ;;  %v5885_v31 = vld [vmem:[%s8702_s0 + $0x4] ss:$56 sps:$4 sm:$0xff]   ;;  %v5894_v39 = vld [vmem:[%s8701_s1 + $0xf4] ss:$12 sps:$4 sm:$0xff]  }
   0xc   :  { %2950 = vmatprep.subr.bf16.mxu0 %v5858_v12  ;;  %5177 = vmatprep.subr.bf16.mxu1 %v5860_v13  ;;  %v5882_v32 = vld [vmem:[%s8701_s1 + $0xb0] ss:$12 sps:$4 sm:$0xff]   ;;  %v6585_v34 = vld [vmem:[%s8702_s0] ss:$56 sps:$4 sm:$0xff]   ;;  %v6596_v37 = vld [vmem:[%s8702_s0 + $0x74] ss:$56 sps:$4 sm:$0xff]  }
   0xd   :  { %v5886_v33 = vld [vmem:[%s8701_s1 + $0xc4] ss:$12 sps:$4 sm:$0xff]   ;;  %3767 = vmatprep.mubr.bf16.mxu1 %v5885_v31  ;;  %2976 = vmatprep.mubr.bf16.mxu0 %v5885_v31  ;;  %v5888_v35 = vld [vmem:[%s8701_s1 + $0xc0] ss:$12 sps:$4 sm:$0xff]   ;;  %v5889_v36 = vld [vmem:[%s8701_s1 + $0xdc] ss:$12 sps:$4 sm:$0xff]  }
   0xe   :  { %v5891_v38 = vld [vmem:[%s8701_s1 + $0xd8] ss:$12 sps:$4 sm:$0xff]   ;;  %v6609_v40 = vld [vmem:[%s8702_s0 + $0x70] ss:$56 sps:$4 sm:$0xff]   ;;  %v5906_v49 = vld [vmem:[%s8701_s1 + $0x120] ss:$12 sps:$4 sm:$0xff]  }
   0xf   :  { %2951 = vmatpush1.bf16.msra.mxu0 %v5861_v14  ;;  %5178 = vmatpush3.bf16.msra.mxu1 %v5862_v15  ;;  %v5897_v41 = vld [vmem:[%s8701_s1 + $0xf0] ss:$12 sps:$4 sm:$0xff]   ;;  %v5898_v42 = vld [vmem:[%s8701_s1 + $0x10c] ss:$12 sps:$4 sm:$0xff]   ;;  %v5900_v44 = vld [vmem:[%s8701_s1 + $0x108] ss:$12 sps:$4 sm:$0xff]  }
  0x10   :  { %2952 = vmatprep.subr.bf16.mxu0 %v5863_v16  ;;  %5179 = vmatprep.subr.bf16.mxu1 %v5865_v17  ;;  %v6620_v43 = vld [vmem:[%s8702_s0 + $0xe4] ss:$56 sps:$4 sm:$0xff]   ;;  %v5919_v45 = vld [vmem:[%s8701_s1 + $0x248] ss:$12 sps:$4 sm:$0xff]   ;;  %v6639_v48 = vld [vmem:[%s8702_s0 + $0xe0] ss:$56 sps:$4 sm:$0xff]  }
  0x11   :  { %v5903_v46 = vld [vmem:[%s8701_s1 + $0x124] ss:$12 sps:$4 sm:$0xff]   ;;  %v5922_v47 = vld [vmem:[%s8701_s1 + $0x188] ss:$12 sps:$4 sm:$0xff]   ;;  %v5930_v52 = vld [vmem:[%s8701_s1 + $0x260] ss:$12 sps:$4 sm:$0xff]  }
  0x12   :  { %v5907_v50 = vld [vmem:[%s8701_s1 + $0x13c] ss:$12 sps:$4 sm:$0xff]   ;;  %v6650_v51 = vld [vmem:[%s8702_s0 + $0x154] ss:$56 sps:$4 sm:$0xff]   ;;  %v5909_v54 = vld [vmem:[%s8701_s1 + $0x138] ss:$12 sps:$4 sm:$0xff]  }
  0x13   :  { %2953 = vmatpush1.bf16.msra.mxu0 %v5866_v18  ;;  %5180 = vmatpush3.bf16.msra.mxu1 %v5867_v19  ;;  %v5931_v53 = vld [vmem:[%s8701_s1 + $0x1a0] ss:$12 sps:$4 sm:$0xff]   ;;  %v6669_v56 = vld [vmem:[%s8702_s0 + $0x150] ss:$56 sps:$4 sm:$0xff]   ;;  %v5938_v58 = vld [vmem:[%s8701_s1 + $0x278] ss:$12 sps:$4 sm:$0xff]  }
  0x14   :  { %2954 = vmatprep.subr.bf16.mxu0 %v5868_v20  ;;  %5181 = vmatprep.subr.bf16.mxu1 %v5870_v21  ;;  %v5912_v55 = vld [vmem:[%s8701_s1 + $0x154] ss:$12 sps:$4 sm:$0xff]   ;;  %v5915_v57 = vld [vmem:[%s8701_s1 + $0x150] ss:$12 sps:$4 sm:$0xff]   ;;  %v5939_v59 = vld [vmem:[%s8701_s1 + $0x1b8] ss:$12 sps:$4 sm:$0xff]  }
  0x15   :  { %v5916_v60 = vld [vmem:[%s8701_s1 + $0x16c] ss:$12 sps:$4 sm:$0xff]   ;;  %v6686_v61 = vld [vmem:[%s8702_s0 + $0x1c4] ss:$56 sps:$4 sm:$0xff]   ;;  %v5918_v0 = vld [vmem:[%s8701_s1 + $0x168] ss:$12 sps:$4 sm:$0xff]  }
  0x16   :  { %v5943_v62 = vld [vmem:[%s8701_s1 + $0x290] ss:$12 sps:$4 sm:$0xff]   ;;  %v5923_v2 = vld [vmem:[%s8701_s1 + $0x180] ss:$12 sps:$4 sm:$0xff]   ;;  %v5951_v4 = vld [vmem:[%s8701_s1 + $0x2a8] ss:$12 sps:$4 sm:$0xff]  }
  0x17   :  { %2955 = vmatpush1.bf16.msra.mxu0 %v5871_v22  ;;  %5182 = vmatpush3.bf16.msra.mxu1 %v5872_v23  ;;  %v5944_v63 = vld [vmem:[%s8701_s1 + $0x1d0] ss:$12 sps:$4 sm:$0xff]   ;;  %v6708_v3 = vld [vmem:[%s8702_s0 + $0x1c0] ss:$56 sps:$4 sm:$0xff]   ;;  %v5952_v5 = vld [vmem:[%s8701_s1 + $0x1e8] ss:$12 sps:$4 sm:$0xff]  }
  0x18   :  { %2956 = vmatprep.subr.bf16.mxu0 %v5873_v24  ;;  %5183 = vmatprep.subr.bf16.mxu1 %v5875_v25  ;;  %v5925_v1 = vld [vmem:[%s8701_s1 + $0x184] ss:$12 sps:$4 sm:$0xff]   ;;  %v5929_v6 = vld [vmem:[%s8701_s1 + $0x19c] ss:$12 sps:$4 sm:$0xff]   ;;  %v6722_v7 = vld [vmem:[%s8702_s0 + $0x234] ss:$56 sps:$4 sm:$0xff]  }
  0x19   :  { %v5956_v8 = vld [vmem:[%s8701_s1 + $0x2c0] ss:$12 sps:$4 sm:$0xff]   ;;  %v5927_v10 = vld [vmem:[%s8701_s1 + $0x198] ss:$12 sps:$4 sm:$0xff]   ;;  %v5934_v12 = vld [vmem:[%s8701_s1 + $0x1b0] ss:$12 sps:$4 sm:$0xff]  }
  0x1a   :  { %v5957_v9 = vld [vmem:[%s8701_s1 + $0x200] ss:$12 sps:$4 sm:$0xff]   ;;  %v6746_v13 = vld [vmem:[%s8702_s0 + $0x230] ss:$56 sps:$4 sm:$0xff]   ;;  %v5964_v14 = vld [vmem:[%s8701_s1 + $0x2d8] ss:$12 sps:$4 sm:$0xff]  }
  0x1b   :  { %2957 = vmatpush1.bf16.msra.mxu0 %v5876_v26  ;;  %5184 = vmatpush3.bf16.msra.mxu1 %v5877_v27  ;;  %v5936_v11 = vld [vmem:[%s8701_s1 + $0x1b4] ss:$12 sps:$4 sm:$0xff]   ;;  %v5965_v15 = vld [vmem:[%s8701_s1 + $0x218] ss:$12 sps:$4 sm:$0xff]   ;;  %v5969_v18 = vld [vmem:[%s8701_s1 + $0x2f0] ss:$12 sps:$4 sm:$0xff]  }
  0x1c   :  { %2958 = vmatprep.subr.bf16.mxu0 %v5878_v28  ;;  %5185 = vmatprep.subr.bf16.mxu1 %v5880_v29  ;;  %v5942_v16 = vld [vmem:[%s8701_s1 + $0x1cc] ss:$12 sps:$4 sm:$0xff]   ;;  %v6760_v17 = vld [vmem:[%s8702_s0 + $0x2a4] ss:$56 sps:$4 sm:$0xff]   ;;  %v5940_v20 = vld [vmem:[%s8701_s1 + $0x1c8] ss:$12 sps:$4 sm:$0xff]  }
  0x1d   :  { %v5970_v19 = vld [vmem:[%s8701_s1 + $0x230] ss:$12 sps:$4 sm:$0xff]   ;;  %v5947_v22 = vld [vmem:[%s8701_s1 + $0x1e0] ss:$12 sps:$4 sm:$0xff]   ;;  %v5953_v26 = vld [vmem:[%s8701_s1 + $0x1f8] ss:$12 sps:$4 sm:$0xff]  }
  0x1e   :  { %v5949_v21 = vld [vmem:[%s8701_s1 + $0x1e4] ss:$12 sps:$4 sm:$0xff]   ;;  %v6784_v23 = vld [vmem:[%s8702_s0 + $0x2a0] ss:$56 sps:$4 sm:$0xff]   ;;  %v5955_v24 = vld [vmem:[%s8701_s1 + $0x1fc] ss:$12 sps:$4 sm:$0xff]  }
  0x1f   :  { %2959 = vmatpush1.bf16.msra.mxu0 %v5881_v30  ;;  %5186 = vmatpush3.bf16.msra.mxu1 %v5882_v32  ;;  %v6792_v25 = vld [vmem:[%s8702_s0 + $0x314] ss:$56 sps:$4 sm:$0xff]   ;;  %v5960_v28 = vld [vmem:[%s8701_s1 + $0x210] ss:$12 sps:$4 sm:$0xff]  }
  0x20   :  { %2960 = vmatprep.subr.bf16.mxu0 %v5886_v33  ;;  %5235 = vmatprep.subr.bf16.mxu1 %v5919_v45  ;;  %v5962_v27 = vld [vmem:[%s8701_s1 + $0x214] ss:$12 sps:$4 sm:$0xff]   ;;  %v6810_v29 = vld [vmem:[%s8702_s0 + $0x310] ss:$56 sps:$4 sm:$0xff]   ;;  %v5968_v30 = vld [vmem:[%s8701_s1 + $0x22c] ss:$12 sps:$4 sm:$0xff]  }
  0x21   :  { %v6818_v31 = vld [vmem:[%s8702_s0 + $0xc] ss:$56 sps:$4 sm:$0xff]   ;;  %v6007_v32 = vld [vmem:[%s8701_s1 + $0x3c8] ss:$12 sps:$4 sm:$0xff]  }
  0x22   :  { %3768 = vmatmul.mubr.bf16.vlgmr.msra.gmra.mrb[0].mxu1 %v6585_v34  ;;  %v5966_v33 = vld [vmem:[%s8701_s1 + $0x228] ss:$12 sps:$4 sm:$0xff]   ;;  %v6026_v45 = vld [vmem:[%s8701_s1 + $0x3f8] ss:$12 sps:$4 sm:$0xff]  }
  0x23   :  { %2961 = vmatpush1.bf16.msra.mxu0 %v5888_v35  ;;  %3775 = vmatprep.mubr.bf16.mxu1 %v6596_v37  ;;  %v6836_v35 = vld [vmem:[%s8702_s0 + $0x8] ss:$56 sps:$4 sm:$0xff]  }
  0x24   :  { %2962 = vmatprep.subr.bf16.mxu0 %v5889_v36  ;;  %5236 = vmatpush3.bf16.msra.mxu1 %v5922_v47  ;;  %v5974_v36 = vld [vmem:[%s8701_s1 + $0x240] ss:$12 sps:$4 sm:$0xff]  }
  0x25   :  { %5237 = vmatprep.subr.bf16.mxu1 %v5930_v52  ;;  %v5988_v47 = vld [vmem:[%s8701_s1 + $0x28c] ss:$12 sps:$4 sm:$0xff]   ;;  %v5993_v52 = vld [vmem:[%s8701_s1 + $0x2a4] ss:$12 sps:$4 sm:$0xff]  }
  0x27   :  { %2963 = vmatpush1.bf16.msra.mxu0 %v5891_v38  ;;  %v6847_v38 = vld [vmem:[%s8702_s0 + $0x7c] ss:$56 sps:$4 sm:$0xff]  }
  0x28   :  { %2964 = vmatprep.subr.bf16.mxu0 %v5894_v39  ;;  %5238 = vmatpush3.bf16.msra.mxu1 %v5931_v53  ;;  %v6010_v39 = vld [vmem:[%s8701_s1 + $0x308] ss:$12 sps:$4 sm:$0xff]   ;;  %v5991_v53 = vld [vmem:[%s8701_s1 + $0x2a0] ss:$12 sps:$4 sm:$0xff]  }
  0x29   :  { %5239 = vmatprep.subr.bf16.mxu1 %v5938_v58  ;;  %v6923_v58 = vld [vmem:[%s8702_s0 + $0x15c] ss:$56 sps:$4 sm:$0xff]  }
  0x2a   :  { %3776 = vmatmul.mubr.bf16.gmra.mrb[4].mxu1 %v6609_v40 }
  0x2b   :  { %2965 = vmatpush1.bf16.msra.mxu0 %v5897_v41  ;;  %3783 = vmatprep.mubr.bf16.mxu1 %v6620_v43  ;;  %v5977_v41 = vld [vmem:[%s8701_s1 + $0x258] ss:$12 sps:$4 sm:$0xff]  }
  0x2c   :  { %2966 = vmatprep.subr.bf16.mxu0 %v5898_v42  ;;  %5240 = vmatpush3.bf16.msra.mxu1 %v5939_v59  ;;  %v5984_v42 = vld [vmem:[%s8701_s1 + $0x274] ss:$12 sps:$4 sm:$0xff]  }
  0x2d   :  { %5241 = vmatprep.subr.bf16.mxu1 %v5943_v62  ;;  %v6040_v59 = vld [vmem:[%s8701_s1 + $0x368] ss:$12 sps:$4 sm:$0xff]  }
  0x2e   :  { %v6002_v62 = vld [vmem:[%s8701_s1 + $0x2d4] ss:$12 sps:$4 sm:$0xff]  }
  0x2f   :  { %2967 = vmatpush1.bf16.msra.mxu0 %v5900_v44  ;;  %v6019_v44 = vld [vmem:[%s8701_s1 + $0x320] ss:$12 sps:$4 sm:$0xff]  }
  0x30   :  { %2968 = vmatprep.subr.bf16.mxu0 %v5903_v46  ;;  %5242 = vmatpush3.bf16.msra.mxu1 %v5944_v63  ;;  %v6877_v46 = vld [vmem:[%s8702_s0 + $0x78] ss:$56 sps:$4 sm:$0xff]  }
  0x31   :  { %5243 = vmatprep.subr.bf16.mxu1 %v5951_v4  ;;  %v6000_v63 = vld [vmem:[%s8701_s1 + $0x2d0] ss:$12 sps:$4 sm:$0xff]   ;;  %v6961_v4 = vld [vmem:[%s8702_s0 + $0x1cc] ss:$56 sps:$4 sm:$0xff]  }
  0x32   :  { %3784 = vmatmul.mubr.bf16.gmra.mrb[8].mxu1 %v6639_v48 }
  0x33   :  { %2969 = vmatpush1.bf16.msra.mxu0 %v5906_v49  ;;  %3791 = vmatprep.mubr.bf16.mxu1 %v6650_v51  ;;  %v6027_v49 = vld [vmem:[%s8701_s1 + $0x338] ss:$12 sps:$4 sm:$0xff]  }
  0x34   :  { %2970 = vmatprep.subr.bf16.mxu0 %v5907_v50  ;;  %5244 = vmatpush3.bf16.msra.mxu1 %v5952_v5  ;;  %v6031_v50 = vld [vmem:[%s8701_s1 + $0x410] ss:$12 sps:$4 sm:$0xff]   ;;  %v6053_v5 = vld [vmem:[%s8701_s1 + $0x398] ss:$12 sps:$4 sm:$0xff]  }
  0x35   :  { %5245 = vmatprep.subr.bf16.mxu1 %v5956_v8  ;;  %v6013_v8 = vld [vmem:[%s8701_s1 + $0x304] ss:$12 sps:$4 sm:$0xff]  }
  0x37   :  { %2971 = vmatpush1.bf16.msra.mxu0 %v5909_v54  ;;  %v6032_v54 = vld [vmem:[%s8701_s1 + $0x350] ss:$12 sps:$4 sm:$0xff]  }
  0x38   :  { %2972 = vmatprep.subr.bf16.mxu0 %v5912_v55  ;;  %5246 = vmatpush3.bf16.msra.mxu1 %v5957_v9  ;;  %v6039_v55 = vld [vmem:[%s8701_s1 + $0x428] ss:$12 sps:$4 sm:$0xff]   ;;  %v6058_v9 = vld [vmem:[%s8701_s1 + $0x3b0] ss:$12 sps:$4 sm:$0xff]  }
  0x39   :  { %5247 = vmatprep.subr.bf16.mxu1 %v5964_v14  ;;  %v6015_v14 = vld [vmem:[%s8701_s1 + $0x318] ss:$12 sps:$4 sm:$0xff]  }
  0x3a   :  { %3792 = vmatmul.mubr.bf16.gmra.mrb[12].mxu1 %v6669_v56 }
  0x3b   :  { %2973 = vmatpush1.bf16.msra.mxu0 %v5915_v57  ;;  %3799 = vmatprep.mubr.bf16.mxu1 %v6686_v61  ;;  %v5997_v57 = vld [vmem:[%s8701_s1 + $0x2bc] ss:$12 sps:$4 sm:$0xff]  }
  0x3c   :  { %2974 = vmatprep.subr.bf16.mxu0 %v5916_v60  ;;  %5248 = vmatpush3.bf16.msra.mxu1 %v5965_v15  ;;  %v6044_v60 = vld [vmem:[%s8701_s1 + $0x440] ss:$12 sps:$4 sm:$0xff]  }
  0x3d   :  { %5249 = vmatprep.subr.bf16.mxu1 %v5969_v18  ;;  %v6024_v15 = vld [vmem:[%s8701_s1 + $0x334] ss:$12 sps:$4 sm:$0xff]   ;;  %v6030_v18 = vld [vmem:[%s8701_s1 + $0x34c] ss:$12 sps:$4 sm:$0xff]  }
  0x3f   :  { %2975 = vmatpush1.bf16.msra.mxu0 %v5918_v0  ;;  %v6045_v0 = vld [vmem:[%s8701_s1 + $0x380] ss:$12 sps:$4 sm:$0xff]  }
  0x40   :  { %3057 = vmatprep.subr.bf16.mxu0 %v5925_v1  ;;  %5250 = vmatpush3.bf16.msra.mxu1 %v5970_v19  ;;  %v6052_v1 = vld [vmem:[%s8701_s1 + $0x458] ss:$12 sps:$4 sm:$0xff]  }
  0x41   :  { %5299 = vmatprep.subr.bf16.mxu1 %v6007_v32  ;;  %v7022_v19 = vld [vmem:[%s8702_s0 + $0x2ac] ss:$56 sps:$4 sm:$0xff]  }
  0x42   :  { %2977 = vmatmul.mubr.bf16.vlgmr.msra.gmra.mrb[0].mxu0 %v6585_v34  ;;  %3800 = vmatmul.mubr.bf16.gmra.mrb[16].mxu1 %v6708_v3  ;;  %v5976_v34 = vld [vmem:[%s8701_s1 + $0x244] ss:$12 sps:$4 sm:$0xff]   ;;  %v7077_v32 = vld [vmem:[%s8702_s0 + $0x14] ss:$56 sps:$4 sm:$0xff]  }
  0x43   :  { %3058 = vmatpush1.bf16.msra.mxu0 %v5923_v2  ;;  %2986 = vmatprep.mubr.bf16.mxu0 %v6596_v37  ;;  %v5979_v37 = vld [vmem:[%s8701_s1 + $0x25c] ss:$12 sps:$4 sm:$0xff]   ;;  %v6953_v2 = vld [vmem:[%s8702_s0 + $0x158] ss:$56 sps:$4 sm:$0xff]  }
  0x44   :  { %3059 = vmatprep.subr.bf16.mxu0 %v5929_v6  ;;  %3807 = vmatprep.mubr.bf16.mxu1 %v6722_v7  ;;  %v6057_v6 = vld [vmem:[%s8701_s1 + $0x470] ss:$12 sps:$4 sm:$0xff]  }
  0x47   :  { %3060 = vmatpush1.bf16.msra.mxu0 %v5927_v10  ;;  %v6011_v10 = vld [vmem:[%s8701_s1 + $0x300] ss:$12 sps:$4 sm:$0xff]  }
  0x48   :  { %3061 = vmatprep.subr.bf16.mxu0 %v5936_v11  ;;  %v6988_v11 = vld [vmem:[%s8702_s0 + $0x1c8] ss:$56 sps:$4 sm:$0xff]  }
  0x4a   :  { %2987 = vmatmul.mubr.bf16.gmra.mrb[4].mxu0 %v6609_v40  ;;  %3808 = vmatmul.mubr.bf16.gmra.mrb[20].mxu1 %v6746_v13  ;;  %v6018_v40 = vld [vmem:[%s8701_s1 + $0x3e0] ss:$12 sps:$4 sm:$0xff]  }
  0x4b   :  { %3062 = vmatpush1.bf16.msra.mxu0 %v5934_v12  ;;  %2996 = vmatprep.mubr.bf16.mxu0 %v6620_v43  ;;  %v5982_v43 = vld [vmem:[%s8701_s1 + $0x270] ss:$12 sps:$4 sm:$0xff]  }
  0x4c   :  { %3063 = vmatprep.subr.bf16.mxu0 %v5942_v16  ;;  %3815 = vmatprep.mubr.bf16.mxu1 %v6760_v17  ;;  %v6017_v12 = vld [vmem:[%s8701_s1 + $0x31c] ss:$12 sps:$4 sm:$0xff]  }
  0x4d   :  { %v6022_v16 = vld [vmem:[%s8701_s1 + $0x330] ss:$12 sps:$4 sm:$0xff]  }
  0x4f   :  { %3064 = vmatpush1.bf16.msra.mxu0 %v5940_v20  ;;  %v6095_v20 = vld [vmem:[%s8701_s1 + $0x548] ss:$12 sps:$4 sm:$0xff]  }
  0x50   :  { %3065 = vmatprep.subr.bf16.mxu0 %v5949_v21  ;;  %v6028_v21 = vld [vmem:[%s8701_s1 + $0x348] ss:$12 sps:$4 sm:$0xff]  }
  0x52   :  { %2997 = vmatmul.mubr.bf16.gmra.mrb[8].mxu0 %v6639_v48  ;;  %3816 = vmatmul.mubr.bf16.gmra.mrb[24].mxu1 %v6784_v23  ;;  %v6885_v48 = vld [vmem:[%s8702_s0 + $0xec] ss:$56 sps:$4 sm:$0xff]  }
  0x53   :  { %3066 = vmatpush1.bf16.msra.mxu0 %v5947_v22  ;;  %3006 = vmatprep.mubr.bf16.mxu0 %v6650_v51  ;;  %v5986_v51 = vld [vmem:[%s8701_s1 + $0x288] ss:$12 sps:$4 sm:$0xff]   ;;  %v6037_v22 = vld [vmem:[%s8701_s1 + $0x364] ss:$12 sps:$4 sm:$0xff]  }
  0x54   :  { %3067 = vmatprep.subr.bf16.mxu0 %v5955_v24  ;;  %3823 = vmatprep.mubr.bf16.mxu1 %v6792_v25  ;;  %v7043_v24 = vld [vmem:[%s8702_s0 + $0x2a8] ss:$56 sps:$4 sm:$0xff]  }
  0x57   :  { %3068 = vmatpush1.bf16.msra.mxu0 %v5953_v26  ;;  %v7051_v26 = vld [vmem:[%s8702_s0 + $0x31c] ss:$56 sps:$4 sm:$0xff]  }
  0x58   :  { %3069 = vmatprep.subr.bf16.mxu0 %v5962_v27  ;;  %v6041_v27 = vld [vmem:[%s8701_s1 + $0x378] ss:$12 sps:$4 sm:$0xff]  }
  0x5a   :  { %3007 = vmatmul.mubr.bf16.gmra.mrb[12].mxu0 %v6669_v56  ;;  %3824 = vmatmul.mubr.bf16.gmra.mrb[28].mxu1 %v6810_v29  ;;  %v6915_v56 = vld [vmem:[%s8702_s0 + $0xe8] ss:$56 sps:$4 sm:$0xff]  }
  0x5b   :  { %3070 = vmatpush1.bf16.msra.mxu0 %v5960_v28  ;;  %3016 = vmatprep.mubr.bf16.mxu0 %v6686_v61  ;;  %v5995_v61 = vld [vmem:[%s8701_s1 + $0x2b8] ss:$12 sps:$4 sm:$0xff]   ;;  %v6050_v28 = vld [vmem:[%s8701_s1 + $0x394] ss:$12 sps:$4 sm:$0xff]  }
  0x5c   :  { %3071 = vmatprep.subr.bf16.mxu0 %v5968_v30  ;;  %3864 = vmatprep.mubr.bf16.mxu1 %v6818_v31  ;;  %v7069_v30 = vld [vmem:[%s8702_s0 + $0x318] ss:$56 sps:$4 sm:$0xff]  }
  0x5f   :  { %3072 = vmatpush1.bf16.msra.mxu0 %v5966_v33  ;;  %v6054_v33 = vld [vmem:[%s8701_s1 + $0x3a8] ss:$12 sps:$4 sm:$0xff]  }
  0x60   :  { %3073 = vmatprep.subr.bf16.mxu0 %v5976_v34  ;;  %v6064_v34 = vld [vmem:[%s8701_s1 + $0x3c4] ss:$12 sps:$4 sm:$0xff]  }
  0x62   :  { %3017 = vmatmul.mubr.bf16.gmra.mrb[16].mxu0 %v6708_v3  ;;  %3865 = vmatmul.mubr.bf16.vlgmr.msra.gmra.mrb[32].mxu1 %v6836_v35  ;;  %v6006_v3 = vld [vmem:[%s8701_s1 + $0x2ec] ss:$12 sps:$4 sm:$0xff]  }
  0x63   :  { %3074 = vmatpush1.bf16.msra.mxu0 %v5974_v36  ;;  %3026 = vmatprep.mubr.bf16.mxu0 %v6722_v7  ;;  %v6004_v7 = vld [vmem:[%s8701_s1 + $0x2e8] ss:$12 sps:$4 sm:$0xff]   ;;  %v6062_v36 = vld [vmem:[%s8701_s1 + $0x3c0] ss:$12 sps:$4 sm:$0xff]  }
  0x64   :  { %3075 = vmatprep.subr.bf16.mxu0 %v5979_v37  ;;  %3872 = vmatprep.mubr.bf16.mxu1 %v6847_v38  ;;  %v6067_v37 = vld [vmem:[%s8701_s1 + $0x3dc] ss:$12 sps:$4 sm:$0xff]  }
  0x65   :  { %5300 = vmatpush3.bf16.msra.mxu1 %v6010_v39  ;;  %v6098_v39 = vld [vmem:[%s8701_s1 + $0x488] ss:$12 sps:$4 sm:$0xff]  }
  0x66   :  { %5301 = vmatprep.subr.bf16.mxu1 %v6018_v40  ;;  %v6106_v40 = vld [vmem:[%s8701_s1 + $0x560] ss:$12 sps:$4 sm:$0xff]  }
  0x67   :  { %3076 = vmatpush1.bf16.msra.mxu0 %v5977_v41  ;;  %v6065_v41 = vld [vmem:[%s8701_s1 + $0x3d8] ss:$12 sps:$4 sm:$0xff]  }
  0x68   :  { %3077 = vmatprep.subr.bf16.mxu0 %v5984_v42  ;;  %v6072_v42 = vld [vmem:[%s8701_s1 + $0x3f4] ss:$12 sps:$4 sm:$0xff]  }
  0x69   :  { %5302 = vmatpush3.bf16.msra.mxu1 %v6019_v44  ;;  %v6107_v44 = vld [vmem:[%s8701_s1 + $0x4a0] ss:$12 sps:$4 sm:$0xff]  }
  0x6a   :  { %3027 = vmatmul.mubr.bf16.gmra.mrb[20].mxu0 %v6746_v13  ;;  %5303 = vmatprep.subr.bf16.mxu1 %v6026_v45  ;;  %v6996_v13 = vld [vmem:[%s8702_s0 + $0x23c] ss:$56 sps:$4 sm:$0xff]   ;;  %v6114_v45 = vld [vmem:[%s8701_s1 + $0x578] ss:$12 sps:$4 sm:$0xff]  }
  0x6b   :  { %3873 = vmatmul.mubr.bf16.gmra.mrb[36].mxu1 %v6877_v46  ;;  %3078 = vmatpush1.bf16.msra.mxu0 %v5982_v43  ;;  %v6070_v43 = vld [vmem:[%s8701_s1 + $0x3f0] ss:$12 sps:$4 sm:$0xff]  }
  0x6c   :  { %3079 = vmatprep.subr.bf16.mxu0 %v5988_v47  ;;  %3036 = vmatprep.mubr.bf16.mxu0 %v6760_v17  ;;  %v7014_v17 = vld [vmem:[%s8702_s0 + $0x238] ss:$56 sps:$4 sm:$0xff]  }
  0x6d   :  { %3880 = vmatprep.mubr.bf16.mxu1 %v6885_v48  ;;  %5304 = vmatpush3.bf16.msra.mxu1 %v6027_v49  ;;  %v6076_v47 = vld [vmem:[%s8701_s1 + $0x40c] ss:$12 sps:$4 sm:$0xff]  }
  0x6e   :  { %5305 = vmatprep.subr.bf16.mxu1 %v6031_v50  ;;  %v6115_v49 = vld [vmem:[%s8701_s1 + $0x4b8] ss:$12 sps:$4 sm:$0xff]   ;;  %v6119_v50 = vld [vmem:[%s8701_s1 + $0x590] ss:$12 sps:$4 sm:$0xff]  }
  0x6f   :  { %3080 = vmatpush1.bf16.msra.mxu0 %v5986_v51  ;;  %v6074_v51 = vld [vmem:[%s8701_s1 + $0x408] ss:$12 sps:$4 sm:$0xff]  }
  0x70   :  { %3081 = vmatprep.subr.bf16.mxu0 %v5993_v52  ;;  %v6081_v52 = vld [vmem:[%s8701_s1 + $0x424] ss:$12 sps:$4 sm:$0xff]  }
  0x71   :  { %5306 = vmatpush3.bf16.msra.mxu1 %v6032_v54  ;;  %v6127_v54 = vld [vmem:[%s8701_s1 + $0x5a8] ss:$12 sps:$4 sm:$0xff]  }
  0x72   :  { %3037 = vmatmul.mubr.bf16.gmra.mrb[24].mxu0 %v6784_v23  ;;  %5307 = vmatprep.subr.bf16.mxu1 %v6039_v55  ;;  %v6035_v23 = vld [vmem:[%s8701_s1 + $0x360] ss:$12 sps:$4 sm:$0xff]  }
  0x73   :  { %3881 = vmatmul.mubr.bf16.gmra.mrb[40].mxu1 %v6915_v56  ;;  %3082 = vmatpush1.bf16.msra.mxu0 %v5991_v53  ;;  %v6120_v53 = vld [vmem:[%s8701_s1 + $0x4d0] ss:$12 sps:$4 sm:$0xff]   ;;  %v6079_v55 = vld [vmem:[%s8701_s1 + $0x420] ss:$12 sps:$4 sm:$0xff]  }
  0x74   :  { %3083 = vmatprep.subr.bf16.mxu0 %v5997_v57  ;;  %3046 = vmatprep.mubr.bf16.mxu0 %v6792_v25  ;;  %v6043_v25 = vld [vmem:[%s8701_s1 + $0x37c] ss:$12 sps:$4 sm:$0xff]  }
  0x75   :  { %3888 = vmatprep.mubr.bf16.mxu1 %v6923_v58  ;;  %5308 = vmatpush3.bf16.msra.mxu1 %v6040_v59  ;;  %v6085_v57 = vld [vmem:[%s8701_s1 + $0x43c] ss:$12 sps:$4 sm:$0xff]  }
  0x76   :  { %5309 = vmatprep.subr.bf16.mxu1 %v6044_v60  ;;  %v6128_v59 = vld [vmem:[%s8701_s1 + $0x4e8] ss:$12 sps:$4 sm:$0xff]   ;;  %v6132_v60 = vld [vmem:[%s8701_s1 + $0x5c0] ss:$12 sps:$4 sm:$0xff]  }
  0x77   :  { %3084 = vmatpush1.bf16.msra.mxu0 %v5995_v61  ;;  %v6083_v61 = vld [vmem:[%s8701_s1 + $0x438] ss:$12 sps:$4 sm:$0xff]  }
  0x78   :  { %3085 = vmatprep.subr.bf16.mxu0 %v6002_v62  ;;  %v6090_v62 = vld [vmem:[%s8701_s1 + $0x454] ss:$12 sps:$4 sm:$0xff]  }
  0x79   :  { %5310 = vmatpush3.bf16.msra.mxu1 %v6045_v0  ;;  %v6140_v0 = vld [vmem:[%s8701_s1 + $0x5d8] ss:$12 sps:$4 sm:$0xff]  }
  0x7a   :  { %3047 = vmatmul.mubr.bf16.gmra.mrb[28].mxu0 %v6810_v29  ;;  %5311 = vmatprep.subr.bf16.mxu1 %v6052_v1  ;;  %v6048_v29 = vld [vmem:[%s8701_s1 + $0x390] ss:$12 sps:$4 sm:$0xff]  }
  0x7b   :  { %3889 = vmatmul.mubr.bf16.gmra.mrb[44].mxu1 %v6953_v2  ;;  %3086 = vmatpush1.bf16.msra.mxu0 %v6000_v63  ;;  %v6133_v63 = vld [vmem:[%s8701_s1 + $0x500] ss:$12 sps:$4 sm:$0xff]   ;;  %v6088_v1 = vld [vmem:[%s8701_s1 + $0x450] ss:$12 sps:$4 sm:$0xff]  }
  0x7c   :  { %3087 = vmatprep.subr.bf16.mxu0 %v6006_v3  ;;  %3089 = vmatprep.mubr.bf16.mxu0 %v6818_v31  ;;  %v6056_v31 = vld [vmem:[%s8701_s1 + $0x3ac] ss:$12 sps:$4 sm:$0xff]  }
  0x7d   :  { %3896 = vmatprep.mubr.bf16.mxu1 %v6961_v4  ;;  %5312 = vmatpush3.bf16.msra.mxu1 %v6053_v5  ;;  %v6094_v3 = vld [vmem:[%s8701_s1 + $0x46c] ss:$12 sps:$4 sm:$0xff]  }
  0x7e   :  { %5313 = vmatprep.subr.bf16.mxu1 %v6057_v6  ;;  %v6141_v5 = vld [vmem:[%s8701_s1 + $0x518] ss:$12 sps:$4 sm:$0xff]   ;;  %v6145_v6 = vld [vmem:[%s8701_s1 + $0x5f0] ss:$12 sps:$4 sm:$0xff]  }
  0x7f   :  { %3088 = vmatpush1.bf16.msra.mxu0 %v6004_v7  ;;  %v6092_v7 = vld [vmem:[%s8701_s1 + $0x468] ss:$12 sps:$4 sm:$0xff]  }
  0x80   :  { %3170 = vmatprep.subr.bf16.mxu0 %v6013_v8  ;;  %v6101_v8 = vld [vmem:[%s8701_s1 + $0x484] ss:$12 sps:$4 sm:$0xff]  }
  0x81   :  { %5314 = vmatpush3.bf16.msra.mxu1 %v6058_v9  ;;  %v6146_v9 = vld [vmem:[%s8701_s1 + $0x530] ss:$12 sps:$4 sm:$0xff]  }
  0x82   :  { %3090 = vmatmul.mubr.bf16.vlgmr.msra.gmra.mrb[0].mxu0 %v6836_v35  ;;  %5363 = vmatprep.subr.bf16.mxu1 %v6095_v20  ;;  %v7092_v35 = vld [vmem:[%s8702_s0 + $0x10] ss:$56 sps:$4 sm:$0xff]   ;;  %v7278_v20 = vld [vmem:[%s8702_s0 + $0x2b4] ss:$56 sps:$4 sm:$0xff]  }
  0x83   :  { %3897 = vmatmul.mubr.bf16.gmra.mrb[48].mxu1 %v6988_v11  ;;  %3171 = vmatpush1.bf16.msra.mxu0 %v6011_v10  ;;  %v6183_v10 = vld [vmem:[%s8701_s1 + $0x6c8] ss:$12 sps:$4 sm:$0xff]  }
  0x84   :  { %3172 = vmatprep.subr.bf16.mxu0 %v6017_v12  ;;  %3099 = vmatprep.mubr.bf16.mxu0 %v6847_v38  ;;  %v7103_v38 = vld [vmem:[%s8702_s0 + $0x84] ss:$56 sps:$4 sm:$0xff]   ;;  %v6102_v12 = vld [vmem:[%s8702_s0 + $0x1d0] ss:$56 sps:$4 sm:$0xff]  }
  0x85   :  { %3904 = vmatprep.mubr.bf16.mxu1 %v6996_v13 }
  0x87   :  { %3173 = vmatpush1.bf16.msra.mxu0 %v6015_v14  ;;  %v7253_v14 = vld [vmem:[%s8702_s0 + $0x244] ss:$56 sps:$4 sm:$0xff]  }
  0x88   :  { %3174 = vmatprep.subr.bf16.mxu0 %v6024_v15  ;;  %v6103_v15 = vld [vmem:[%s8701_s1 + $0x498] ss:$12 sps:$4 sm:$0xff]  }
  0x8a   :  { %3100 = vmatmul.mubr.bf16.gmra.mrb[4].mxu0 %v6877_v46  ;;  %v7133_v46 = vld [vmem:[%s8702_s0 + $0x80] ss:$56 sps:$4 sm:$0xff]  }
  0x8b   :  { %3905 = vmatmul.mubr.bf16.gmra.mrb[52].mxu1 %v7014_v17  ;;  %3175 = vmatpush1.bf16.msra.mxu0 %v6022_v16  ;;  %v6112_v16 = vld [vmem:[%s8701_s1 + $0x4b4] ss:$12 sps:$4 sm:$0xff]  }
  0x8c   :  { %3176 = vmatprep.subr.bf16.mxu0 %v6030_v18  ;;  %3109 = vmatprep.mubr.bf16.mxu0 %v6885_v48  ;;  %v7141_v48 = vld [vmem:[%s8702_s0 + $0xf4] ss:$56 sps:$4 sm:$0xff]   ;;  %v7270_v18 = vld [vmem:[%s8702_s0 + $0x240] ss:$56 sps:$4 sm:$0xff]  }
  0x8d   :  { %3912 = vmatprep.mubr.bf16.mxu1 %v7022_v19 }
  0x8f   :  { %3177 = vmatpush1.bf16.msra.mxu0 %v6028_v21  ;;  %v6116_v21 = vld [vmem:[%s8701_s1 + $0x4c8] ss:$12 sps:$4 sm:$0xff]  }
  0x90   :  { %3178 = vmatprep.subr.bf16.mxu0 %v6037_v22  ;;  %v6125_v22 = vld [vmem:[%s8701_s1 + $0x4e4] ss:$12 sps:$4 sm:$0xff]  }
  0x92   :  { %3110 = vmatmul.mubr.bf16.gmra.mrb[8].mxu0 %v6915_v56  ;;  %v7171_v56 = vld [vmem:[%s8702_s0 + $0xf0] ss:$56 sps:$4 sm:$0xff]  }
  0x93   :  { %3913 = vmatmul.mubr.bf16.gmra.mrb[56].mxu1 %v7043_v24  ;;  %3179 = vmatpush1.bf16.msra.mxu0 %v6035_v23  ;;  %v6123_v23 = vld [vmem:[%s8701_s1 + $0x4e0] ss:$12 sps:$4 sm:$0xff]  }
  0x94   :  { %3180 = vmatprep.subr.bf16.mxu0 %v6043_v25  ;;  %3119 = vmatprep.mubr.bf16.mxu0 %v6923_v58  ;;  %v7179_v58 = vld [vmem:[%s8702_s0 + $0x164] ss:$56 sps:$4 sm:$0xff]  }
  0x95   :  { %3920 = vmatprep.mubr.bf16.mxu1 %v7051_v26  ;;  %v6131_v25 = vld [vmem:[%s8701_s1 + $0x4fc] ss:$12 sps:$4 sm:$0xff]  }
  0x97   :  { %3181 = vmatpush1.bf16.msra.mxu0 %v6041_v27  ;;  %v6129_v27 = vld [vmem:[%s8701_s1 + $0x4f8] ss:$12 sps:$4 sm:$0xff]  }
  0x98   :  { %3182 = vmatprep.subr.bf16.mxu0 %v6050_v28  ;;  %v6138_v28 = vld [vmem:[%s8701_s1 + $0x514] ss:$12 sps:$4 sm:$0xff]  }
  0x9a   :  { %3120 = vmatmul.mubr.bf16.gmra.mrb[12].mxu0 %v6953_v2  ;;  %v7209_v2 = vld [vmem:[%s8702_s0 + $0x160] ss:$56 sps:$4 sm:$0xff]  }
  0x9b   :  { %3921 = vmatmul.mubr.bf16.gmra.mrb[60].mxu1 %v7069_v30  ;;  %3183 = vmatpush1.bf16.msra.mxu0 %v6048_v29  ;;  %v6136_v29 = vld [vmem:[%s8701_s1 + $0x510] ss:$12 sps:$4 sm:$0xff]  }
  0x9c   :  { %3184 = vmatprep.subr.bf16.mxu0 %v6056_v31  ;;  %3129 = vmatprep.mubr.bf16.mxu0 %v6961_v4  ;;  %v7217_v4 = vld [vmem:[%s8702_s0 + $0x1d4] ss:$56 sps:$4 sm:$0xff]  }
  0x9d   :  { %3961 = vmatprep.mubr.bf16.mxu1 %v7077_v32  ;;  %v6144_v31 = vld [vmem:[%s8701_s1 + $0x52c] ss:$12 sps:$4 sm:$0xff]  }
  0x9f   :  { %3185 = vmatpush1.bf16.msra.mxu0 %v6054_v33  ;;  %v6142_v33 = vld [vmem:[%s8701_s1 + $0x528] ss:$12 sps:$4 sm:$0xff]  }
  0xa0   :  { %3186 = vmatprep.subr.bf16.mxu0 %v6064_v34  ;;  %v6152_v34 = vld [vmem:[%s8701_s1 + $0x544] ss:$12 sps:$4 sm:$0xff]  }
  0xa2   :  { %3130 = vmatmul.mubr.bf16.gmra.mrb[16].mxu0 %v6988_v11  ;;  %v6099_v11 = vld [vmem:[%s8701_s1 + $0x480] ss:$12 sps:$4 sm:$0xff]  }
  0xa3   :  { %3962 = vmatmul.mubr.bf16.vlgmr.msra.gmra.mrb[64].mxu1 %v7092_v35  ;;  %3187 = vmatpush1.bf16.msra.mxu0 %v6062_v36  ;;  %v6150_v36 = vld [vmem:[%s8701_s1 + $0x540] ss:$12 sps:$4 sm:$0xff]  }
  0xa4   :  { %3188 = vmatprep.subr.bf16.mxu0 %v6067_v37  ;;  %3139 = vmatprep.mubr.bf16.mxu0 %v6996_v13  ;;  %v6105_v13 = vld [vmem:[%s8701_s1 + $0x49c] ss:$12 sps:$4 sm:$0xff]  }
  0xa5   :  { %3969 = vmatprep.mubr.bf16.mxu1 %v7103_v38  ;;  %5364 = vmatpush3.bf16.msra.mxu1 %v6098_v39  ;;  %v6155_v37 = vld [vmem:[%s8701_s1 + $0x55c] ss:$12 sps:$4 sm:$0xff]  }
  0xa6   :  { %5365 = vmatprep.subr.bf16.mxu1 %v6106_v40  ;;  %v6186_v39 = vld [vmem:[%s8701_s1 + $0x608] ss:$12 sps:$4 sm:$0xff]   ;;  %v6194_v40 = vld [vmem:[%s8701_s1 + $0x6e0] ss:$12 sps:$4 sm:$0xff]  }
  0xa7   :  { %3189 = vmatpush1.bf16.msra.mxu0 %v6065_v41  ;;  %v6153_v41 = vld [vmem:[%s8701_s1 + $0x558] ss:$12 sps:$4 sm:$0xff]  }
  0xa8   :  { %3190 = vmatprep.subr.bf16.mxu0 %v6072_v42  ;;  %v6160_v42 = vld [vmem:[%s8701_s1 + $0x574] ss:$12 sps:$4 sm:$0xff]  }
  0xa9   :  { %5366 = vmatpush3.bf16.msra.mxu1 %v6107_v44  ;;  %v6195_v44 = vld [vmem:[%s8701_s1 + $0x620] ss:$12 sps:$4 sm:$0xff]  }
  0xaa   :  { %3140 = vmatmul.mubr.bf16.gmra.mrb[20].mxu0 %v7014_v17  ;;  %5367 = vmatprep.subr.bf16.mxu1 %v6114_v45  ;;  %v6110_v17 = vld [vmem:[%s8701_s1 + $0x4b0] ss:$12 sps:$4 sm:$0xff]   ;;  %v6202_v45 = vld [vmem:[%s8701_s1 + $0x6f8] ss:$12 sps:$4 sm:$0xff]  }
  0xab   :  { %3970 = vmatmul.mubr.bf16.gmra.mrb[68].mxu1 %v7133_v46  ;;  %3191 = vmatpush1.bf16.msra.mxu0 %v6070_v43  ;;  %v6158_v43 = vld [vmem:[%s8701_s1 + $0x570] ss:$12 sps:$4 sm:$0xff]  }
  0xac   :  { %3192 = vmatprep.subr.bf16.mxu0 %v6076_v47  ;;  %3149 = vmatprep.mubr.bf16.mxu0 %v7022_v19  ;;  %v6118_v19 = vld [vmem:[%s8701_s1 + $0x4cc] ss:$12 sps:$4 sm:$0xff]  }
  0xad   :  { %3977 = vmatprep.mubr.bf16.mxu1 %v7141_v48  ;;  %5368 = vmatpush3.bf16.msra.mxu1 %v6115_v49  ;;  %v6164_v47 = vld [vmem:[%s8701_s1 + $0x58c] ss:$12 sps:$4 sm:$0xff]  }
  0xae   :  { %5369 = vmatprep.subr.bf16.mxu1 %v6119_v50  ;;  %v6203_v49 = vld [vmem:[%s8701_s1 + $0x638] ss:$12 sps:$4 sm:$0xff]   ;;  %v6207_v50 = vld [vmem:[%s8701_s1 + $0x710] ss:$12 sps:$4 sm:$0xff]  }
  0xaf   :  { %3193 = vmatpush1.bf16.msra.mxu0 %v6074_v51  ;;  %v6162_v51 = vld [vmem:[%s8701_s1 + $0x588] ss:$12 sps:$4 sm:$0xff]  }
  0xb0   :  { %3194 = vmatprep.subr.bf16.mxu0 %v6081_v52  ;;  %v6169_v52 = vld [vmem:[%s8701_s1 + $0x5a4] ss:$12 sps:$4 sm:$0xff]  }
  0xb1   :  { %5370 = vmatpush3.bf16.msra.mxu1 %v6120_v53  ;;  %v6208_v53 = vld [vmem:[%s8701_s1 + $0x650] ss:$12 sps:$4 sm:$0xff]  }
  0xb2   :  { %3150 = vmatmul.mubr.bf16.gmra.mrb[24].mxu0 %v7043_v24  ;;  %5371 = vmatprep.subr.bf16.mxu1 %v6127_v54  ;;  %v7296_v24 = vld [vmem:[%s8702_s0 + $0x2b0] ss:$56 sps:$4 sm:$0xff]   ;;  %v6167_v54 = vld [vmem:[%s8701_s1 + $0x5a0] ss:$12 sps:$4 sm:$0xff]  }
  0xb3   :  { %3978 = vmatmul.mubr.bf16.gmra.mrb[72].mxu1 %v7171_v56  ;;  %3195 = vmatpush1.bf16.msra.mxu0 %v6079_v55  ;;  %v6215_v55 = vld [vmem:[%s8701_s1 + $0x728] ss:$12 sps:$4 sm:$0xff]  }
  0xb4   :  { %3196 = vmatprep.subr.bf16.mxu0 %v6085_v57  ;;  %3159 = vmatprep.mubr.bf16.mxu0 %v7051_v26  ;;  %v7304_v26 = vld [vmem:[%s8702_s0 + $0x324] ss:$56 sps:$4 sm:$0xff]  }
  0xb5   :  { %3985 = vmatprep.mubr.bf16.mxu1 %v7179_v58  ;;  %5372 = vmatpush3.bf16.msra.mxu1 %v6128_v59  ;;  %v6173_v57 = vld [vmem:[%s8701_s1 + $0x5bc] ss:$12 sps:$4 sm:$0xff]  }
  0xb6   :  { %5373 = vmatprep.subr.bf16.mxu1 %v6132_v60  ;;  %v6216_v59 = vld [vmem:[%s8701_s1 + $0x668] ss:$12 sps:$4 sm:$0xff]   ;;  %v6220_v60 = vld [vmem:[%s8701_s1 + $0x740] ss:$12 sps:$4 sm:$0xff]  }
  0xb7   :  { %3197 = vmatpush1.bf16.msra.mxu0 %v6083_v61  ;;  %v6171_v61 = vld [vmem:[%s8701_s1 + $0x5b8] ss:$12 sps:$4 sm:$0xff]  }
  0xb8   :  { %3198 = vmatprep.subr.bf16.mxu0 %v6090_v62  ;;  %v6178_v62 = vld [vmem:[%s8701_s1 + $0x5d4] ss:$12 sps:$4 sm:$0xff]  }
  0xb9   :  { %5374 = vmatpush3.bf16.msra.mxu1 %v6133_v63  ;;  %v6176_v63 = vld [vmem:[%s8701_s1 + $0x5d0] ss:$12 sps:$4 sm:$0xff]  }
  0xba   :  { %3160 = vmatmul.mubr.bf16.gmra.mrb[28].mxu0 %v7069_v30  ;;  %5375 = vmatprep.subr.bf16.mxu1 %v6140_v0  ;;  %v7322_v30 = vld [vmem:[%s8702_s0 + $0x320] ss:$56 sps:$4 sm:$0xff]  }
  0xbb   :  { %3986 = vmatmul.mubr.bf16.gmra.mrb[76].mxu1 %v7209_v2  ;;  %3199 = vmatpush1.bf16.msra.mxu0 %v6088_v1  ;;  %v7455_v0 = vld [vmem:[%s8702_s0 + $0x168] ss:$56 sps:$4 sm:$0xff]  }
  0xbc   :  { %3200 = vmatprep.subr.bf16.mxu0 %v6094_v3  ;;  %3202 = vmatprep.mubr.bf16.mxu0 %v7077_v32  ;;  %v7330_v32 = vld [vmem:[%s8702_s0 + $0x1c] ss:$56 sps:$4 sm:$0xff]   ;;  %v6221_v1 = vld [vmem:[%s8701_s1 + $0x680] ss:$12 sps:$4 sm:$0xff]   ;;  %v6228_v3 = vld [vmem:[%s8701_s1 + $0x758] ss:$12 sps:$4 sm:$0xff]  }
  0xbd   :  { %3993 = vmatprep.mubr.bf16.mxu1 %v7217_v4  ;;  %5376 = vmatpush3.bf16.msra.mxu1 %v6141_v5  ;;  %v7469_v5 = vld [vmem:[%s8702_s0 + $0x1dc] ss:$56 sps:$4 sm:$0xff]  }
  0xbe   :  { %5377 = vmatprep.subr.bf16.mxu1 %v6145_v6 }
  0xbf   :  { %3201 = vmatpush1.bf16.msra.mxu0 %v6092_v7 }
  0xc0   :  { %3283 = vmatprep.subr.bf16.mxu0 %v6101_v8 }
  0xc1   :  { %5378 = vmatpush3.bf16.msra.mxu1 %v6146_v9 }
  0xc2   :  { %3203 = vmatmul.mubr.bf16.vlgmr.msra.gmra.mrb[0].mxu0 %v7092_v35  ;;  %5427 = vmatprep.subr.bf16.mxu1 %v6183_v10  ;;  %v7345_v35 = vld [vmem:[%s8702_s0 + $0x18] ss:$56 sps:$4 sm:$0xff]  }
  0xc3   :  { %3994 = vmatmul.mubr.bf16.gmra.mrb[80].mxu1 %v6102_v12  ;;  %3284 = vmatpush1.bf16.msra.mxu0 %v6099_v11  ;;  %v6229_v10 = vld [vmem:[%s8701_s1 + $0x698] ss:$12 sps:$4 sm:$0xff]  }
  0xc4   :  { %3285 = vmatprep.subr.bf16.mxu0 %v6105_v13  ;;  %3212 = vmatprep.mubr.bf16.mxu0 %v7103_v38  ;;  %v7356_v38 = vld [vmem:[%s8702_s0 + $0x8c] ss:$56 sps:$4 sm:$0xff]   ;;  %v6180_v13 = vld [vmem:[%s8701_s1 + $0x5e8] ss:$12 sps:$4 sm:$0xff]  }
  0xc5   :  { %4001 = vmatprep.mubr.bf16.mxu1 %v7253_v14 }
  0xc7   :  { %3286 = vmatpush1.bf16.msra.mxu0 %v6103_v15  ;;  %v6187_v15 = vld [vmem:[%s8701_s1 + $0x600] ss:$12 sps:$4 sm:$0xff]  }
  0xc8   :  { %3287 = vmatprep.subr.bf16.mxu0 %v6112_v16  ;;  %v6234_v16 = vld [vmem:[%s8701_s1 + $0x6b0] ss:$12 sps:$4 sm:$0xff]  }
  0xca   :  { %3213 = vmatmul.mubr.bf16.gmra.mrb[4].mxu0 %v7133_v46  ;;  %v7385_v46 = vld [vmem:[%s8702_s0 + $0x88] ss:$56 sps:$4 sm:$0xff]  }
  0xcb   :  { %4002 = vmatmul.mubr.bf16.gmra.mrb[84].mxu1 %v7270_v18  ;;  %3288 = vmatpush1.bf16.msra.mxu0 %v6110_v17 }
  0xcc   :  { %3289 = vmatprep.subr.bf16.mxu0 %v6118_v19  ;;  %3222 = vmatprep.mubr.bf16.mxu0 %v7141_v48  ;;  %v7393_v48 = vld [vmem:[%s8702_s0 + $0xfc] ss:$56 sps:$4 sm:$0xff]   ;;  %v7503_v19 = vld [vmem:[%s8702_s0 + $0x1d8] ss:$56 sps:$4 sm:$0xff]  }
  0xcd   :  { %4009 = vmatprep.mubr.bf16.mxu1 %v7278_v20 }
  0xcf   :  { %3290 = vmatpush1.bf16.msra.mxu0 %v6116_v21 }
  0xd0   :  { %3291 = vmatprep.subr.bf16.mxu0 %v6125_v22 }
  0xd2   :  { %3223 = vmatmul.mubr.bf16.gmra.mrb[8].mxu0 %v7171_v56  ;;  %v7423_v56 = vld [vmem:[%s8702_s0 + $0xf8] ss:$56 sps:$4 sm:$0xff]  }
  0xd3   :  { %4010 = vmatmul.mubr.bf16.gmra.mrb[88].mxu1 %v7296_v24  ;;  %3292 = vmatpush1.bf16.msra.mxu0 %v6123_v23 }
  0xd4   :  { %3293 = vmatprep.subr.bf16.mxu0 %v6131_v25  ;;  %3232 = vmatprep.mubr.bf16.mxu0 %v7179_v58  ;;  %v7431_v58 = vld [vmem:[%s8702_s0 + $0x16c] ss:$56 sps:$4 sm:$0xff]  }
  0xd5   :  { %4017 = vmatprep.mubr.bf16.mxu1 %v7304_v26 }
  0xd7   :  { %3294 = vmatpush1.bf16.msra.mxu0 %v6129_v27  ;;  %v6191_v27 = vld [vmem:[%s8701_s1 + $0x618] ss:$12 sps:$4 sm:$0xff]  }
  0xd8   :  { %3295 = vmatprep.subr.bf16.mxu0 %v6138_v28  ;;  %v6200_v28 = vld [vmem:[%s8701_s1 + $0x634] ss:$12 sps:$4 sm:$0xff]  }
  0xda   :  { %3233 = vmatmul.mubr.bf16.gmra.mrb[12].mxu0 %v7209_v2 }
  0xdb   :  { %4018 = vmatmul.mubr.bf16.gmra.mrb[92].mxu1 %v7322_v30  ;;  %3296 = vmatpush1.bf16.msra.mxu0 %v6136_v29  ;;  %v6198_v29 = vld [vmem:[%s8701_s1 + $0x630] ss:$12 sps:$4 sm:$0xff]  }
  0xdc   :  { %3297 = vmatprep.subr.bf16.mxu0 %v6144_v31  ;;  %3242 = vmatprep.mubr.bf16.mxu0 %v7217_v4  ;;  %v6182_v4 = vld [vmem:[%s8701_s1 + $0x5ec] ss:$12 sps:$4 sm:$0xff]   ;;  %v7533_v31 = vld [vmem:[%s8702_s0 + $0x248] ss:$56 sps:$4 sm:$0xff]  }
  0xdd   :  { %4058 = vmatprep.mubr.bf16.mxu1 %v7330_v32 }
  0xdf   :  { %3298 = vmatpush1.bf16.msra.mxu0 %v6142_v33 }
  0xe0   :  { %3299 = vmatprep.subr.bf16.mxu0 %v6152_v34 }
  0xe2   :  { %3243 = vmatmul.mubr.bf16.gmra.mrb[16].mxu0 %v6102_v12  ;;  %v6233_v12 = vld [vmem:[%s8701_s1 + $0x770] ss:$12 sps:$4 sm:$0xff]  }
  0xe3   :  { %4059 = vmatmul.mubr.bf16.vlgmr.msra.gmra.mrb[96].mxu1 %v7345_v35  ;;  %3300 = vmatpush1.bf16.msra.mxu0 %v6150_v36  ;;  %v7543_v36 = vld [vmem:[%s8702_s0 + $0x2bc] ss:$56 sps:$4 sm:$0xff]  }
  0xe4   :  { %3301 = vmatprep.subr.bf16.mxu0 %v6155_v37  ;;  %3252 = vmatprep.mubr.bf16.mxu0 %v7253_v14  ;;  %v6189_v14 = vld [vmem:[%s8701_s1 + $0x604] ss:$12 sps:$4 sm:$0xff]  }
  0xe5   :  { %4066 = vmatprep.mubr.bf16.mxu1 %v7356_v38  ;;  %5428 = vmatpush3.bf16.msra.mxu1 %v6186_v39  ;;  %v6204_v39 = vld [vmem:[%s8701_s1 + $0x648] ss:$12 sps:$4 sm:$0xff]  }
  0xe6   :  { %5429 = vmatprep.subr.bf16.mxu1 %v6194_v40  ;;  %v6213_v40 = vld [vmem:[%s8701_s1 + $0x664] ss:$12 sps:$4 sm:$0xff]  }
  0xe7   :  { %3302 = vmatpush1.bf16.msra.mxu0 %v6153_v41  ;;  %v6211_v41 = vld [vmem:[%s8701_s1 + $0x660] ss:$12 sps:$4 sm:$0xff]  }
  0xe8   :  { %3303 = vmatprep.subr.bf16.mxu0 %v6160_v42 }
  0xe9   :  { %5430 = vmatpush3.bf16.msra.mxu1 %v6195_v44 }
  0xea   :  { %3253 = vmatmul.mubr.bf16.gmra.mrb[20].mxu0 %v7270_v18  ;;  %5431 = vmatprep.subr.bf16.mxu1 %v6202_v45  ;;  %v6271_v18 = vld [vmem:[%s8701_s1 + $0x848] ss:$12 sps:$4 sm:$0xff]  }
  0xeb   :  { %4067 = vmatmul.mubr.bf16.gmra.mrb[100].mxu1 %v7385_v46  ;;  %3304 = vmatpush1.bf16.msra.mxu0 %v6158_v43  ;;  %v7563_v43 = vld [vmem:[%s8702_s0 + $0x2b8] ss:$56 sps:$4 sm:$0xff]   ;;  %v6219_v45 = vld [vmem:[%s8701_s1 + $0x67c] ss:$12 sps:$4 sm:$0xff]  }
  0xec   :  { %3305 = vmatprep.subr.bf16.mxu0 %v6164_v47  ;;  %3262 = vmatprep.mubr.bf16.mxu0 %v7278_v20  ;;  %v6193_v20 = vld [vmem:[%s8701_s1 + $0x61c] ss:$12 sps:$4 sm:$0xff]  }
  0xed   :  { %4074 = vmatprep.mubr.bf16.mxu1 %v7393_v48  ;;  %5432 = vmatpush3.bf16.msra.mxu1 %v6203_v49 }
  0xee   :  { %5433 = vmatprep.subr.bf16.mxu1 %v6207_v50 }
  0xef   :  { %3306 = vmatpush1.bf16.msra.mxu0 %v6162_v51  ;;  %v6217_v51 = vld [vmem:[%s8701_s1 + $0x678] ss:$12 sps:$4 sm:$0xff]  }
  0xf0   :  { %3307 = vmatprep.subr.bf16.mxu0 %v6169_v52  ;;  %v6226_v52 = vld [vmem:[%s8701_s1 + $0x694] ss:$12 sps:$4 sm:$0xff]  }
  0xf1   :  { %5434 = vmatpush3.bf16.msra.mxu1 %v6208_v53  ;;  %v6224_v53 = vld [vmem:[%s8701_s1 + $0x690] ss:$12 sps:$4 sm:$0xff]  }
  0xf2   :  { %3263 = vmatmul.mubr.bf16.gmra.mrb[24].mxu0 %v7296_v24  ;;  %5435 = vmatprep.subr.bf16.mxu1 %v6215_v55  ;;  %v7513_v24 = vld [vmem:[%s8702_s0 + $0x24c] ss:$56 sps:$4 sm:$0xff]   ;;  %v7593_v55 = vld [vmem:[%s8702_s0 + $0x328] ss:$56 sps:$4 sm:$0xff]  }
  0xf3   :  { %4075 = vmatmul.mubr.bf16.gmra.mrb[104].mxu1 %v7423_v56  ;;  %3308 = vmatpush1.bf16.msra.mxu0 %v6167_v54 }
  0xf4   :  { %3309 = vmatprep.subr.bf16.mxu0 %v6173_v57  ;;  %3272 = vmatprep.mubr.bf16.mxu0 %v7304_v26  ;;  %v6232_v57 = vld [vmem:[%s8701_s1 + $0x6ac] ss:$12 sps:$4 sm:$0xff]  }
  0xf5   :  { %4082 = vmatprep.mubr.bf16.mxu1 %v7431_v58  ;;  %5436 = vmatpush3.bf16.msra.mxu1 %v6216_v59  ;;  %v5187_v2 = vpop.f32.mrb[0].mxu1 }
  0xf6   :  { %5437 = vmatprep.subr.bf16.mxu1 %v6220_v60  ;;  %v5188_v6 = vpop.f32.mrb[1].mxu1  ;;  %v7603_v60 = vld [vmem:[%s8702_s0 + $0x24] ss:$56 sps:$4 sm:$0xff]  }
  0xf7   :  { %3310 = vmatpush1.bf16.msra.mxu0 %v6171_v61  ;;  %v7471_v7 = vadd.f32 %v5188_v6, %v5187_v2  ;;  %v5190_v8 = vpop.f32.mrb[2].mxu1  ;;  %v6238_v2 = vld [vmem:[%s8701_s1 + $0x6c0] ss:$12 sps:$4 sm:$0xff]  }
  0xf8   :  { %3311 = vmatprep.subr.bf16.mxu0 %v6178_v62  ;;  %v5191_v9 = vpop.f32.mrb[3].mxu1 }
  0xf9   :  { %5438 = vmatpush3.bf16.msra.mxu1 %v6221_v1  ;;  %v7477_v11 = vadd.f32 %v5191_v9, %v5190_v8  ;;  %v6240_v1 = vld [vmem:[%s8701_s1 + $0x6c4] ss:$12 sps:$4 sm:$0xff]   ;;  %v577_v8 = vlaneseq }
  0xfa   :  { %3273 = vmatmul.mubr.bf16.gmra.mrb[28].mxu0 %v7322_v30  ;;  %5439 = vmatprep.subr.bf16.mxu1 %v6228_v3 }
  0xfb   :  { %4083 = vmatmul.mubr.bf16.gmra.mrb[108].mxu1 %v7455_v0  ;;  %3312 = vmatpush1.bf16.msra.mxu0 %v6176_v63  ;;  %v6230_v63 = vld [vmem:[%s8701_s1 + $0x6a8] ss:$12 sps:$4 sm:$0xff]  }
  0xfc   :  { %3313 = vmatprep.subr.bf16.mxu0 %v6182_v4  ;;  %3315 = vmatprep.mubr.bf16.mxu0 %v7330_v32  ;;  %v6206_v32 = vld [vmem:[%s8701_s1 + $0x64c] ss:$12 sps:$4 sm:$0xff]   ;;  %v6243_v4 = vld [vmem:[%s8701_s1 + $0x6dc] ss:$12 sps:$4 sm:$0xff]  }
  0xfd   :  { %4090 = vmatprep.mubr.bf16.mxu1 %v7469_v5  ;;  %5440 = vmatpush3.bf16.msra.mxu1 %v6229_v10  ;;  %v5193_v17 = vpop.f32.mrb[4].mxu1 }
  0xfe   :  { %5441 = vmatprep.subr.bf16.mxu1 %v6233_v12  ;;  %v5194_v21 = vpop.f32.mrb[5].mxu1 }
  0xff   :  { %3314 = vmatpush1.bf16.msra.mxu0 %v6180_v13  ;;  %v7508_v22 = vadd.f32 %v5194_v21, %v5193_v17  ;;  %v5196_v23 = vpop.f32.mrb[6].mxu1  ;;  %v6274_v13 = vld [vmem:[%s8701_s1 + $0x788] ss:$12 sps:$4 sm:$0xff]   ;;  %v7648_v17 = vshrl.u32 %v577_v8, 7  ;;  %v6283_v21 = vld [vmem:[%s8701_s1 + $0x7a0] ss:$12 sps:$4 sm:$0xff]  }
 0x100   :  { %3396 = vmatprep.subr.bf16.mxu0 %v6189_v14  ;;  %v5197_v25 = vpop.f32.mrb[7].mxu1 }
 0x101   :  { %5442 = vmatpush3.bf16.msra.mxu1 %v6234_v16  ;;  %v7516_v26 = vadd.f32 %v5197_v25, %v5196_v23  ;;  %v6241_v16 = vld [vmem:[%s8701_s1 + $0x6d8] ss:$12 sps:$4 sm:$0xff]  }
 0x102   :  { %3316 = vmatmul.mubr.bf16.vlgmr.msra.gmra.mrb[0].mxu0 %v7345_v35  ;;  %5491 = vmatprep.subr.bf16.mxu1 %v6271_v18  ;;  %v6248_v18 = vld [vmem:[%s8701_s1 + $0x6f4] ss:$12 sps:$4 sm:$0xff]   ;;  %v6252_v25 = vld [vmem:[%s8701_s1 + $0x70c] ss:$12 sps:$4 sm:$0xff]  }
 0x103   :  { %4091 = vmatmul.mubr.bf16.gmra.mrb[112].mxu1 %v7503_v19  ;;  %3397 = vmatpush1.bf16.msra.mxu0 %v6187_v15  ;;  %v6282_v15 = vld [vmem:[%s8701_s1 + $0x860] ss:$12 sps:$4 sm:$0xff]  }
 0x104   :  { %3398 = vmatprep.subr.bf16.mxu0 %v6193_v20  ;;  %3325 = vmatprep.mubr.bf16.mxu0 %v7356_v38  ;;  %v7661_v20 = vld [vmem:[%s8702_s0 + $0x90] ss:$56 sps:$4 sm:$0xff]  }
 0x105   :  { %4098 = vmatprep.mubr.bf16.mxu1 %v7513_v24  ;;  %v5199_v30 = vpop.f32.mrb[8].mxu1 }
 0x106   :  { %v5200_v33 = vpop.f32.mrb[9].mxu1 }
 0x107   :  { %3399 = vmatpush1.bf16.msra.mxu0 %v6191_v27  ;;  %v7538_v34 = vadd.f32 %v5200_v33, %v5199_v30  ;;  %v5202_v35 = vpop.f32.mrb[10].mxu1  ;;  %v6291_v33 = vld [vmem:[%s8701_s1 + $0x7b8] ss:$12 sps:$4 sm:$0xff]  }
 0x108   :  { %3400 = vmatprep.subr.bf16.mxu0 %v6200_v28  ;;  %v5203_v37 = vpop.f32.mrb[11].mxu1  ;;  %v7675_v28 = vld [vmem:[%s8702_s0 + $0x104] ss:$56 sps:$4 sm:$0xff]  }
 0x109   :  { %v7546_v38 = vadd.f32 %v5203_v37, %v5202_v35  ;;  %v6295_v37 = vld [vmem:[%s8701_s1 + $0x890] ss:$12 sps:$4 sm:$0xff]  }
 0x10a   :  { %3326 = vmatmul.mubr.bf16.gmra.mrb[4].mxu0 %v7385_v46 }
 0x10b   :  { %4099 = vmatmul.mubr.bf16.gmra.mrb[116].mxu1 %v7533_v31  ;;  %3401 = vmatpush1.bf16.msra.mxu0 %v6198_v29 }
 0x10c   :  { %3402 = vmatprep.subr.bf16.mxu0 %v6206_v32  ;;  %3335 = vmatprep.mubr.bf16.mxu0 %v7393_v48  ;;  %v7573_v48 = vld [vmem:[%s8702_s0 + $0x32c] ss:$56 sps:$4 sm:$0xff]  }
 0x10d   :  { %4106 = vmatprep.mubr.bf16.mxu1 %v7543_v36  ;;  %v5205_v42 = vpop.f32.mrb[12].mxu1 }
 0x10e   :  { %v5206_v44 = vpop.f32.mrb[13].mxu1 }
 0x10f   :  { %3403 = vmatpush1.bf16.msra.mxu0 %v6204_v39  ;;  %v7568_v46 = vadd.f32 %v5206_v44, %v5205_v42  ;;  %v5208_v47 = vpop.f32.mrb[14].mxu1  ;;  %v6250_v39 = vld [vmem:[%s8701_s1 + $0x708] ss:$12 sps:$4 sm:$0xff]   ;;  %v7704_v42 = vld [vmem:[%s8702_s0 + $0x100] ss:$56 sps:$4 sm:$0xff]  }
 0x110   :  { %3404 = vmatprep.subr.bf16.mxu0 %v6213_v40  ;;  %v5209_v49 = vpop.f32.mrb[15].mxu1  ;;  %v587_v40 = vsub.s32 2, %v7648_v17 }
 0x111   :  { %v7576_v50 = vadd.f32 %v5209_v49, %v5208_v47  ;;  %v575_v47 = vld [vmem:[%s8703_s2] sm:$0x7] }
 0x112   :  { %3336 = vmatmul.mubr.bf16.gmra.mrb[8].mxu0 %v7423_v56 }
 0x113   :  { %4107 = vmatmul.mubr.bf16.gmra.mrb[120].mxu1 %v7563_v43  ;;  %3405 = vmatpush1.bf16.msra.mxu0 %v6211_v41  ;;  %v6255_v41 = vld [vmem:[%s8701_s1 + $0x720] ss:$12 sps:$4 sm:$0xff]  }
 0x114   :  { %3406 = vmatprep.subr.bf16.mxu0 %v6219_v45  ;;  %3345 = vmatprep.mubr.bf16.mxu0 %v7431_v58  ;;  %v6303_v45 = vld [vmem:[%s8701_s1 + $0x8a8] ss:$12 sps:$4 sm:$0xff]  }
 0x115   :  { %4114 = vmatprep.mubr.bf16.mxu1 %v7573_v48  ;;  %v5211_v54 = vpop.f32.mrb[16].mxu1 }
 0x116   :  { %v5212_v56 = vpop.f32.mrb[17].mxu1 }
 0x117   :  { %3407 = vmatpush1.bf16.msra.mxu0 %v6217_v51  ;;  %v7598_v58 = vadd.f32 %v5212_v56, %v5211_v54  ;;  %v5214_v59 = vpop.f32.mrb[18].mxu1  ;;  %v6261_v51 = vld [vmem:[%s8701_s1 + $0x73c] ss:$12 sps:$4 sm:$0xff]  }
 0x118   :  { %3408 = vmatprep.subr.bf16.mxu0 %v6226_v52  ;;  %v5215_v61 = vpop.f32.mrb[19].mxu1  ;;  %v7721_v52 = vld [vmem:[%s8702_s0 + $0x174] ss:$56 sps:$4 sm:$0xff]  }
 0x119   :  { %v7606_v62 = vadd.f32 %v5215_v61, %v5214_v59  ;;  %v6308_v61 = vld [vmem:[%s8701_s1 + $0x8c0] ss:$12 sps:$4 sm:$0xff]  }
 0x11a   :  { %3346 = vmatmul.mubr.bf16.gmra.mrb[12].mxu0 %v7455_v0  ;;  %v7620_v0 = vld [vmem:[%s8702_s0 + $0x20] ss:$56 sps:$4 sm:$0xff]  }
 0x11b   :  { %4115 = vmatmul.mubr.bf16.gmra.mrb[124].mxu1 %v7593_v55  ;;  %3409 = vmatpush1.bf16.msra.mxu0 %v6224_v53 }
 0x11c   :  { %3410 = vmatprep.subr.bf16.mxu0 %v6232_v57  ;;  %3355 = vmatprep.mubr.bf16.mxu0 %v7469_v5  ;;  %v7631_v5 = vld [vmem:[%s8702_s0 + $0x94] ss:$56 sps:$4 sm:$0xff]  }
 0x11d   :  { %4155 = vmatprep.mubr.bf16.mxu1 %v7603_v60  ;;  %v5217_v3 = vpop.f32.mrb[20].mxu1  ;;  %v6304_v57 = vld [vmem:[%s8701_s1 + $0x7e8] ss:$12 sps:$4 sm:$0xff]  }
 0x11e   :  { %v5218_v6 = vpop.f32.mrb[21].mxu1 }
 0x11f   :  { %3411 = vmatpush1.bf16.msra.mxu0 %v6230_v63  ;;  %v7633_v9 = vadd.f32 %v5218_v6, %v5217_v3  ;;  %v5220_v10 = vpop.f32.mrb[22].mxu1  ;;  %v6259_v63 = vld [vmem:[%s8701_s1 + $0x738] ss:$12 sps:$4 sm:$0xff]   ;;  %v7751_v3 = vld [vmem:[%s8702_s0 + $0x170] ss:$56 sps:$4 sm:$0xff]  }
 0x120   :  { %3412 = vmatprep.subr.bf16.mxu0 %v6240_v1  ;;  %v5221_v12 = vpop.f32.mrb[23].mxu1  ;;  %v7738_v1 = vrot.slane %v575_v47, %v587_v40  ;;  %v6316_v6 = vld [vmem:[%s8701_s1 + $0x8d8] ss:$12 sps:$4 sm:$0xff]  }
 0x121   :  { %v7639_v14 = vadd.f32 %v5221_v12, %v5220_v10  ;;  %v6270_v10 = vld [vmem:[%s8701_s1 + $0x76c] ss:$12 sps:$4 sm:$0xff]   ;;  %v7765_v12 = vld [vmem:[%s8702_s0 + $0x1e4] ss:$56 sps:$4 sm:$0xff]  }
 0x122   :  { %3356 = vmatmul.mubr.bf16.gmra.mrb[16].mxu0 %v7503_v19  ;;  %v6246_v19 = vld [vmem:[%s8701_s1 + $0x6f0] ss:$12 sps:$4 sm:$0xff]  }
 0x123   :  { %4156 = vmatmul.mubr.bf16.vlgmr.msra.gmra.mrb[128].mxu1 %v7620_v0  ;;  %3413 = vmatpush1.bf16.msra.mxu0 %v6238_v2  ;;  %v6264_v2 = vld [vmem:[%s8701_s1 + $0x750] ss:$12 sps:$4 sm:$0xff]  }
 0x124   :  { %3414 = vmatprep.subr.bf16.mxu0 %v6243_v4  ;;  %3365 = vmatprep.mubr.bf16.mxu0 %v7513_v24  ;;  %v6290_v24 = vld [vmem:[%s8701_s1 + $0x878] ss:$12 sps:$4 sm:$0xff]  }
 0x125   :  { %4163 = vmatprep.mubr.bf16.mxu1 %v7631_v5  ;;  %5492 = vmatpush3.bf16.msra.mxu1 %v6274_v13  ;;  %v5223_v23 = vpop.f32.mrb[24].mxu1  ;;  %v3770_v13 = vadd.f32 %v7471_v7, %v7738_v1  ;;  %v6321_v7 = vld [vmem:[%s8701_s1 + $0x8f0] ss:$12 sps:$4 sm:$0xff]  }
 0x126   :  { %5493 = vmatprep.subr.bf16.mxu1 %v6282_v15  ;;  %v5224_v27 = vpop.f32.mrb[25].mxu1 }
 0x127   :  { %3415 = vmatpush1.bf16.msra.mxu0 %v6241_v16  ;;  %v7677_v29 = vadd.f32 %v5224_v27, %v5223_v23  ;;  %v5226_v30 = vpop.f32.mrb[26].mxu1 }
 0x128   :  { %3416 = vmatprep.subr.bf16.mxu0 %v6248_v18  ;;  %v5227_v32 = vpop.f32.mrb[27].mxu1 }
 0x129   :  { %5494 = vmatpush3.bf16.msra.mxu1 %v6283_v21  ;;  %v7683_v35 = vadd.f32 %v5227_v32, %v5226_v30  ;;  %v3773_v21 = vadd.f32 %v7477_v11, %v7738_v1  ;;  %v6277_v11 = vld [vmem:[%s8701_s1 + $0x784] ss:$12 sps:$4 sm:$0xff]  }
 0x12a   :  { %3366 = vmatmul.mubr.bf16.gmra.mrb[20].mxu0 %v7533_v31  ;;  %5495 = vmatprep.subr.bf16.mxu1 %v6290_v24  ;;  %v6257_v31 = vld [vmem:[%s8701_s1 + $0x724] ss:$12 sps:$4 sm:$0xff]  }
 0x12b   :  { %4164 = vmatmul.mubr.bf16.gmra.mrb[132].mxu1 %v7661_v20  ;;  %3417 = vmatpush1.bf16.msra.mxu0 %v6246_v19  ;;  %v6317_v19 = vld [vmem:[%s8701_s1 + $0x818] ss:$12 sps:$4 sm:$0xff]   ;;  %v6322_v30 = vld [vmem:[%s8701_s1 + $0x830] ss:$12 sps:$4 sm:$0xff]  }
 0x12c   :  { %3418 = vmatprep.subr.bf16.mxu0 %v6252_v25  ;;  %3375 = vmatprep.mubr.bf16.mxu0 %v7543_v36  ;;  %v6296_v36 = vld [vmem:[%s8701_s1 + $0x7d0] ss:$12 sps:$4 sm:$0xff]   ;;  %v6268_v25 = vld [vmem:[%s8701_s1 + $0x768] ss:$12 sps:$4 sm:$0xff]  }
 0x12d   :  { %4171 = vmatprep.mubr.bf16.mxu1 %v7675_v28  ;;  %5496 = vmatpush3.bf16.msra.mxu1 %v6291_v33  ;;  %v5229_v44 = vpop.f32.mrb[28].mxu1 }
 0x12e   :  { %5497 = vmatprep.subr.bf16.mxu1 %v6295_v37  ;;  %v5230_v49 = vpop.f32.mrb[29].mxu1  ;;  %v7803_v37 = vld [vmem:[%s8702_s0 + $0x1e0] ss:$56 sps:$4 sm:$0xff]  }
 0x12f   :  { %3419 = vmatpush1.bf16.msra.mxu0 %v6250_v39  ;;  %v7723_v53 = vadd.f32 %v5230_v49, %v5229_v44  ;;  %v5232_v54 = vpop.f32.mrb[30].mxu1  ;;  %v3778_v39 = vadd.f32 %v7508_v22, %v7738_v1  ;;  %v7813_v44 = vld [vmem:[%s8702_s0 + $0x254] ss:$56 sps:$4 sm:$0xff]   ;;  %v6279_v49 = vld [vmem:[%s8701_s1 + $0x798] ss:$12 sps:$4 sm:$0xff]  }
 0x130   :  { %3420 = vmatprep.subr.bf16.mxu0 %v6257_v31  ;;  %v5233_v56 = vpop.f32.mrb[31].mxu1 }
 0x131   :  { %5498 = vmatpush3.bf16.msra.mxu1 %v6296_v36  ;;  %v7729_v59 = vadd.f32 %v5233_v56, %v5232_v54  ;;  %v6286_v54 = vld [vmem:[%s8701_s1 + $0x7b0] ss:$12 sps:$4 sm:$0xff]  }
 0x132   :  { %3376 = vmatmul.mubr.bf16.gmra.mrb[24].mxu0 %v7563_v43  ;;  %5499 = vmatprep.subr.bf16.mxu1 %v6303_v45  ;;  %v6266_v43 = vld [vmem:[%s8701_s1 + $0x754] ss:$12 sps:$4 sm:$0xff]   ;;  %v3781_v45 = vadd.f32 %v7516_v26, %v7738_v1 }
 0x133   :  { %4172 = vmatmul.mubr.bf16.gmra.mrb[136].mxu1 %v7704_v42  ;;  %3421 = vmatpush1.bf16.msra.mxu0 %v6255_v41  ;;  %v6281_v41 = vld [vmem:[%s8701_s1 + $0x79c] ss:$12 sps:$4 sm:$0xff]   ;;  %v6288_v26 = vld [vmem:[%s8701_s1 + $0x7b4] ss:$12 sps:$4 sm:$0xff]  }
 0x134   :  { %3422 = vmatprep.subr.bf16.mxu0 %v6261_v51  ;;  %3385 = vmatprep.mubr.bf16.mxu0 %v7573_v48  ;;  %v6309_v48 = vld [vmem:[%s8701_s1 + $0x800] ss:$12 sps:$4 sm:$0xff]  }
 0x135   :  { %4179 = vmatprep.mubr.bf16.mxu1 %v7721_v52  ;;  %5500 = vmatpush3.bf16.msra.mxu1 %v6304_v57  ;;  %v5251_v4 = vpop.f32.mrb[32].mxu1  ;;  %v7837_v57 = vld [vmem:[%s8702_s0 + $0x250] ss:$56 sps:$4 sm:$0xff]  }
 0x136   :  { %5501 = vmatprep.subr.bf16.mxu1 %v6308_v61  ;;  %v5252_v8 = vpop.f32.mrb[33].mxu1 }
 0x137   :  { %3423 = vmatpush1.bf16.msra.mxu0 %v6259_v63  ;;  %v5253_v15 = vadd.f32 %v5252_v8, %v5251_v4  ;;  %v5254_v16 = vpop.f32.mrb[34].mxu1  ;;  %v3789_v4 = vadd.f32 %v7546_v38, %v7738_v1  ;;  %v6301_v38 = vld [vmem:[%s8701_s1 + $0x7e4] ss:$12 sps:$4 sm:$0xff]  }
 0x138   :  { %3424 = vmatprep.subr.bf16.mxu0 %v6266_v43  ;;  %v5255_v18 = vpop.f32.mrb[35].mxu1  ;;  %v6294_v43 = vld [vmem:[%s8701_s1 + $0x7cc] ss:$12 sps:$4 sm:$0xff]  }
 0x139   :  { %5502 = vmatpush3.bf16.msra.mxu1 %v6309_v48  ;;  %v7774_v23 = vadd.f32 %v5253_v15, %v3770_v13  ;;  %v5256_v24 = vadd.f32 %v5255_v18, %v5254_v16  ;;  %v7847_v48 = vld [vmem:[%s8702_s0 + $0x2c4] ss:$56 sps:$4 sm:$0xff]   ;;  %v6299_v15 = vld [vmem:[%s8701_s1 + $0x7e0] ss:$12 sps:$4 sm:$0xff]  }
 0x13a   :  { %3386 = vmatmul.mubr.bf16.gmra.mrb[28].mxu0 %v7593_v55  ;;  %5503 = vmatprep.subr.bf16.mxu1 %v6316_v6  ;;  %v6275_v55 = vld [vmem:[%s8701_s1 + $0x780] ss:$12 sps:$4 sm:$0xff]  }
 0x13b   :  { %4180 = vmatmul.mubr.bf16.gmra.mrb[140].mxu1 %v7751_v3  ;;  %3425 = vmatpush1.bf16.msra.mxu0 %v6264_v2  ;;  %v7784_v27 = vadd.f32 %v5256_v24, %v3773_v21  ;;  %v7871_v16 = vld [vmem:[%s8702_s0 + $0x2c0] ss:$56 sps:$4 sm:$0xff]   ;;  %v6307_v21 = vld [vmem:[%s8701_s1 + $0x7fc] ss:$12 sps:$4 sm:$0xff]  }
 0x13c   :  { %3426 = vmatprep.subr.bf16.mxu0 %v6270_v10  ;;  %3428 = vmatprep.mubr.bf16.mxu0 %v7603_v60  ;;  %v6359_v60 = vld [vmem:[%s8701_s1 + $0x9c8] ss:$12 sps:$4 sm:$0xff]  }
 0x13d   :  { %4187 = vmatprep.mubr.bf16.mxu1 %v7765_v12  ;;  %5504 = vmatpush3.bf16.msra.mxu1 %v6317_v19 }
 0x13e   :  { %v5257_v32 = vpop.f32.mrb[36].mxu1  ;;  %5505 = vmatprep.subr.bf16.mxu1 %v6321_v7  ;;  %v7881_v7 = vld [vmem:[%s8702_s0 + $0x334] ss:$56 sps:$4 sm:$0xff]  }
 0x13f   :  { %v5258_v33 = vpop.f32.mrb[37].mxu1  ;;  %3427 = vmatpush1.bf16.msra.mxu0 %v6268_v25  ;;  %v3797_v25 = vadd.f32 %v7576_v50, %v7738_v1  ;;  %v6314_v50 = vld [vmem:[%s8701_s1 + $0x814] ss:$12 sps:$4 sm:$0xff]  }
 0x140   :  { %v5259_v40 = vadd.f32 %v5258_v33, %v5257_v32  ;;  %v5260_v31 = vpop.f32.mrb[38].mxu1  ;;  %3509 = vmatprep.subr.bf16.mxu0 %v6277_v11  ;;  %v7905_v33 = vld [vmem:[%s8702_s0 + $0x330] ss:$56 sps:$4 sm:$0xff]  }
 0x141   :  { %v5261_v36 = vpop.f32.mrb[39].mxu1  ;;  %5506 = vmatpush3.bf16.msra.mxu1 %v6322_v30 }
 0x142   :  { %v7817_v47 = vadd.f32 %v5259_v40, %v3778_v39  ;;  %v5262_v22 = vadd.f32 %v5261_v36, %v5260_v31  ;;  %3429 = vmatmul.mubr.bf16.vlgmr.msra.gmra.mrb[0].mxu0 %v7620_v0  ;;  %5555 = vmatprep.subr.bf16.mxu1 %v6359_v60  ;;  %v6312_v60 = vld [vmem:[%s8701_s1 + $0x810] ss:$12 sps:$4 sm:$0xff]   ;;  %v6320_v31 = vld [vmem:[%s8701_s1 + $0x82c] ss:$12 sps:$4 sm:$0xff]  }
 0x143   :  { %4188 = vmatmul.mubr.bf16.gmra.mrb[144].mxu1 %v7803_v37  ;;  %3510 = vmatpush1.bf16.msra.mxu0 %v6275_v55  ;;  %v7915_v36 = vld [vmem:[%s8702_s0 + $0x2c] ss:$56 sps:$4 sm:$0xff]  }
 0x144   :  { %v7824_v51 = vadd.f32 %v5262_v22, %v3781_v45  ;;  %3511 = vmatprep.subr.bf16.mxu0 %v6281_v41  ;;  %3438 = vmatprep.mubr.bf16.mxu0 %v7631_v5  ;;  %v3786_v5 = vadd.f32 %v7538_v34, %v7738_v1  ;;  %v6292_v34 = vld [vmem:[%s8701_s1 + $0x7c8] ss:$12 sps:$4 sm:$0xff]   ;;  %v3805_v45 = vadd.f32 %v7606_v62, %v7738_v1  ;;  %v6328_v62 = vld [vmem:[%s8701_s1 + $0x844] ss:$12 sps:$4 sm:$0xff]  }
 0x145   :  { %4195 = vmatprep.mubr.bf16.mxu1 %v7813_v44 }
 0x146   :  { %v5263_v0 = vpop.f32.mrb[40].mxu1 }
 0x147   :  { %v5264_v56 = vpop.f32.mrb[41].mxu1  ;;  %3512 = vmatpush1.bf16.msra.mxu0 %v6279_v49 }
 0x148   :  { %v5265_v61 = vadd.f32 %v5264_v56, %v5263_v0  ;;  %v5266_v63 = vpop.f32.mrb[42].mxu1  ;;  %3513 = vmatprep.subr.bf16.mxu0 %v6288_v26  ;;  %v6326_v56 = vld [vmem:[%s8701_s1 + $0x840] ss:$12 sps:$4 sm:$0xff]  }
 0x149   :  { %v5267_v2 = vpop.f32.mrb[43].mxu1 }
 0x14a   :  { %v7851_v6 = vadd.f32 %v5265_v61, %v3786_v5  ;;  %v5268_v8 = vadd.f32 %v5267_v2, %v5266_v63  ;;  %3439 = vmatmul.mubr.bf16.gmra.mrb[4].mxu0 %v7661_v20  ;;  %v6331_v63 = vld [vmem:[%s8701_s1 + $0x85c] ss:$12 sps:$4 sm:$0xff]  }
 0x14b   :  { %4196 = vmatmul.mubr.bf16.gmra.mrb[148].mxu1 %v7837_v57  ;;  %3514 = vmatpush1.bf16.msra.mxu0 %v6286_v54  ;;  %v7936_v54 = vld [vmem:[%s8702_s0 + $0x28] ss:$56 sps:$4 sm:$0xff]   ;;  %v7949_v2 = vld [vmem:[%s8702_s0 + $0x9c] ss:$56 sps:$4 sm:$0xff]  }
 0x14c   :  { %v7858_v10 = vadd.f32 %v5268_v8, %v3789_v4  ;;  %3515 = vmatprep.subr.bf16.mxu0 %v6294_v43  ;;  %3448 = vmatprep.mubr.bf16.mxu0 %v7675_v28  ;;  %v3794_v28 = vadd.f32 %v7568_v46, %v7738_v1  ;;  %v6305_v46 = vld [vmem:[%s8701_s1 + $0x7f8] ss:$12 sps:$4 sm:$0xff]   ;;  %v6362_v4 = vld [vmem:[%s8701_s1 + $0x908] ss:$12 sps:$4 sm:$0xff]  }
 0x14d   :  { %4203 = vmatprep.mubr.bf16.mxu1 %v7847_v48 }
 0x14e   :  { %v5269_v13 = vpop.f32.mrb[44].mxu1 }
 0x14f   :  { %v5270_v20 = vpop.f32.mrb[45].mxu1  ;;  %3516 = vmatpush1.bf16.msra.mxu0 %v6292_v34 }
 0x150   :  { %v5271_v18 = vadd.f32 %v5270_v20, %v5269_v13  ;;  %v5272_v19 = vpop.f32.mrb[46].mxu1  ;;  %3517 = vmatprep.subr.bf16.mxu0 %v6301_v38  ;;  %v6370_v38 = vld [vmem:[%s8701_s1 + $0x9e0] ss:$12 sps:$4 sm:$0xff]   ;;  %v6329_v13 = vld [vmem:[%s8701_s1 + $0x858] ss:$12 sps:$4 sm:$0xff]  }
 0x151   :  { %v5273_v24 = vpop.f32.mrb[47].mxu1 }
 0x152   :  { %v7885_v11 = vadd.f32 %v5271_v18, %v3794_v28  ;;  %v5274_v55 = vadd.f32 %v5273_v24, %v5272_v19  ;;  %3449 = vmatmul.mubr.bf16.gmra.mrb[8].mxu0 %v7704_v42  ;;  %v6378_v28 = vld [vmem:[%s8701_s1 + $0x9f8] ss:$12 sps:$4 sm:$0xff]  }
 0x153   :  { %4204 = vmatmul.mubr.bf16.gmra.mrb[152].mxu1 %v7871_v16  ;;  %3518 = vmatpush1.bf16.msra.mxu0 %v6299_v15  ;;  %v7985_v19 = vld [vmem:[%s8702_s0 + $0x98] ss:$56 sps:$4 sm:$0xff]  }
 0x154   :  { %v7892_v30 = vadd.f32 %v5274_v55, %v3797_v25  ;;  %3519 = vmatprep.subr.bf16.mxu0 %v6307_v21  ;;  %3458 = vmatprep.mubr.bf16.mxu0 %v7721_v52  ;;  %v3802_v52 = vadd.f32 %v7598_v58, %v7738_v1  ;;  %v6318_v58 = vld [vmem:[%s8701_s1 + $0x828] ss:$12 sps:$4 sm:$0xff]   ;;  %v3818_v21 = vadd.f32 %v7677_v29, %v7738_v1  ;;  %v6340_v55 = vld [vmem:[%s8701_s1 + $0x88c] ss:$12 sps:$4 sm:$0xff]  }
 0x155   :  { %4211 = vmatprep.mubr.bf16.mxu1 %v7881_v7  ;;  %v3821_v29 = vadd.f32 %v7683_v35, %v7738_v1  ;;  %v6345_v35 = vld [vmem:[%s8701_s1 + $0x8a4] ss:$12 sps:$4 sm:$0xff]  }
 0x156   :  { %v5275_v32 = vpop.f32.mrb[48].mxu1 }
 0x157   :  { %v5276_v42 = vpop.f32.mrb[49].mxu1  ;;  %3520 = vmatpush1.bf16.msra.mxu0 %v6305_v46 }
 0x158   :  { %v5277_v39 = vadd.f32 %v5276_v42, %v5275_v32  ;;  %v5278_v40 = vpop.f32.mrb[50].mxu1  ;;  %3521 = vmatprep.subr.bf16.mxu0 %v6314_v50  ;;  %v7995_v50 = vld [vmem:[%s8702_s0 + $0x10c] ss:$56 sps:$4 sm:$0xff]  }
 0x159   :  { %v5279_v41 = vpop.f32.mrb[51].mxu1  ;;  %v6379_v32 = vld [vmem:[%s8701_s1 + $0x938] ss:$12 sps:$4 sm:$0xff]  }
 0x15a   :  { %v7919_v22 = vadd.f32 %v5277_v39, %v3802_v52  ;;  %v5280_v49 = vadd.f32 %v5279_v41, %v5278_v40  ;;  %3459 = vmatmul.mubr.bf16.gmra.mrb[12].mxu0 %v7751_v3  ;;  %v6383_v52 = vld [vmem:[%s8701_s1 + $0xa10] ss:$12 sps:$4 sm:$0xff]   ;;  %v6338_v39 = vld [vmem:[%s8701_s1 + $0x888] ss:$12 sps:$4 sm:$0xff]  }
 0x15b   :  { %4212 = vmatmul.mubr.bf16.gmra.mrb[156].mxu1 %v7905_v33  ;;  %3522 = vmatpush1.bf16.msra.mxu0 %v6312_v60  ;;  %v6391_v41 = vld [vmem:[%s8701_s1 + $0xa28] ss:$12 sps:$4 sm:$0xff]  }
 0x15c   :  { %v7926_v26 = vadd.f32 %v5280_v49, %v3805_v45  ;;  %3523 = vmatprep.subr.bf16.mxu0 %v6320_v31  ;;  %3468 = vmatprep.mubr.bf16.mxu0 %v7765_v12  ;;  %v3810_v12 = vadd.f32 %v7633_v9, %v7738_v1  ;;  %v3813_v9 = vadd.f32 %v7639_v14, %v7738_v1  ;;  %v6336_v14 = vld [vmem:[%s8701_s1 + $0x874] ss:$12 sps:$4 sm:$0xff]  }
 0x15d   :  { %4252 = vmatprep.mubr.bf16.mxu1 %v7915_v36  ;;  %v8031_v49 = vld [vmem:[%s8702_s0 + $0x108] ss:$56 sps:$4 sm:$0xff]  }
 0x15e   :  { %v5281_v0 = vpop.f32.mrb[52].mxu1 }
 0x15f   :  { %v5282_v3 = vpop.f32.mrb[53].mxu1  ;;  %3524 = vmatpush1.bf16.msra.mxu0 %v6318_v58  ;;  %v3826_v58 = vadd.f32 %v7723_v53, %v7738_v1  ;;  %v3829_v53 = vadd.f32 %v7729_v59, %v7738_v1  ;;  %v6354_v59 = vld [vmem:[%s8701_s1 + $0x8d4] ss:$12 sps:$4 sm:$0xff]  }
 0x160   :  { %v5283_v5 = vadd.f32 %v5282_v3, %v5281_v0  ;;  %v5284_v61 = vpop.f32.mrb[54].mxu1  ;;  %3525 = vmatprep.subr.bf16.mxu0 %v6328_v62  ;;  %v6349_v3 = vld [vmem:[%s8701_s1 + $0x8bc] ss:$12 sps:$4 sm:$0xff]   ;;  %v6397_v1 = vld [vmem:[%s8701_s1 + $0x980] ss:$12 sps:$4 sm:$0xff]  }
 0x161   :  { %v5285_v43 = vpop.f32.mrb[55].mxu1 }
 0x162   :  { %v7956_v8 = vadd.f32 %v5283_v5, %v3810_v12  ;;  %v5286_v34 = vadd.f32 %v5285_v43, %v5284_v61  ;;  %3469 = vmatmul.mubr.bf16.gmra.mrb[16].mxu0 %v7803_v37  ;;  %v6371_v37 = vld [vmem:[%s8701_s1 + $0x920] ss:$12 sps:$4 sm:$0xff]   ;;  %v8041_v12 = vld [vmem:[%s8702_s0 + $0x17c] ss:$56 sps:$4 sm:$0xff]  }
 0x163   :  { %4253 = vmatmul.mubr.bf16.vlgmr.msra.gmra.mrb[160].mxu1 %v7936_v54  ;;  %3526 = vmatpush1.bf16.msra.mxu0 %v6326_v56  ;;  %v6392_v5 = vld [vmem:[%s8701_s1 + $0x968] ss:$12 sps:$4 sm:$0xff]   ;;  %v6396_v43 = vld [vmem:[%s8701_s1 + $0xa40] ss:$12 sps:$4 sm:$0xff]  }
 0x164   :  { %v7966_v20 = vadd.f32 %v5286_v34, %v3813_v9  ;;  %3527 = vmatprep.subr.bf16.mxu0 %v6331_v63  ;;  %3478 = vmatprep.mubr.bf16.mxu0 %v7813_v44  ;;  %v6334_v44 = vld [vmem:[%s8701_s1 + $0x870] ss:$12 sps:$4 sm:$0xff]   ;;  %v6404_v34 = vld [vmem:[%s8701_s1 + $0xa58] ss:$12 sps:$4 sm:$0xff]  }
 0x165   :  { %4260 = vmatprep.mubr.bf16.mxu1 %v7949_v2  ;;  %5556 = vmatpush3.bf16.msra.mxu1 %v6362_v4  ;;  %v6347_v4 = vld [vmem:[%s8701_s1 + $0x8b8] ss:$12 sps:$4 sm:$0xff]  }
 0x166   :  { %v5287_v15 = vpop.f32.mrb[56].mxu1  ;;  %5557 = vmatprep.subr.bf16.mxu1 %v6370_v38 }
 0x167   :  { %v5288_v18 = vpop.f32.mrb[57].mxu1  ;;  %3528 = vmatpush1.bf16.msra.mxu0 %v6329_v13  ;;  %v8077_v13 = vld [vmem:[%s8702_s0 + $0x178] ss:$56 sps:$4 sm:$0xff]  }
 0x168   :  { %v5289_v24 = vadd.f32 %v5288_v18, %v5287_v15  ;;  %v5290_v25 = vpop.f32.mrb[58].mxu1  ;;  %3529 = vmatprep.subr.bf16.mxu0 %v6336_v14  ;;  %v6358_v15 = vld [vmem:[%s8701_s1 + $0x8ec] ss:$12 sps:$4 sm:$0xff]  }
 0x169   :  { %v5291_v46 = vpop.f32.mrb[59].mxu1  ;;  %5558 = vmatpush3.bf16.msra.mxu1 %v6371_v37  ;;  %v8085_v18 = vld [vmem:[%s8702_s0 + $0x1ec] ss:$56 sps:$4 sm:$0xff]  }
 0x16a   :  { %v8002_v42 = vadd.f32 %v5289_v24, %v3818_v21  ;;  %v5292_v60 = vadd.f32 %v5291_v46, %v5290_v25  ;;  %3479 = vmatmul.mubr.bf16.gmra.mrb[20].mxu0 %v7837_v57  ;;  %5559 = vmatprep.subr.bf16.mxu1 %v6378_v28  ;;  %v6384_v57 = vld [vmem:[%s8701_s1 + $0x950] ss:$12 sps:$4 sm:$0xff]  }
 0x16b   :  { %4261 = vmatmul.mubr.bf16.gmra.mrb[164].mxu1 %v7985_v19  ;;  %3530 = vmatpush1.bf16.msra.mxu0 %v6334_v44  ;;  %v6405_v44 = vld [vmem:[%s8701_s1 + $0x998] ss:$12 sps:$4 sm:$0xff]   ;;  %v6409_v25 = vld [vmem:[%s8701_s1 + $0xa70] ss:$12 sps:$4 sm:$0xff]  }
 0x16c   :  { %v8012_v40 = vadd.f32 %v5292_v60, %v3821_v29  ;;  %3531 = vmatprep.subr.bf16.mxu0 %v6340_v55  ;;  %3488 = vmatprep.mubr.bf16.mxu0 %v7847_v48  ;;  %v6343_v48 = vld [vmem:[%s8701_s1 + $0x8a0] ss:$12 sps:$4 sm:$0xff]   ;;  %v6356_v55 = vld [vmem:[%s8701_s1 + $0x8e8] ss:$12 sps:$4 sm:$0xff]  }
 0x16d   :  { %4268 = vmatprep.mubr.bf16.mxu1 %v7995_v50  ;;  %5560 = vmatpush3.bf16.msra.mxu1 %v6379_v32 }
 0x16e   :  { %v5293_v31 = vpop.f32.mrb[60].mxu1  ;;  %5561 = vmatprep.subr.bf16.mxu1 %v6383_v52 }
 0x16f   :  { %v5294_v45 = vpop.f32.mrb[61].mxu1  ;;  %3532 = vmatpush1.bf16.msra.mxu0 %v6338_v39  ;;  %v6369_v39 = vld [vmem:[%s8701_s1 + $0x91c] ss:$12 sps:$4 sm:$0xff]  }
 0x170   :  { %v5295_v62 = vadd.f32 %v5294_v45, %v5293_v31  ;;  %v5296_v0 = vpop.f32.mrb[62].mxu1  ;;  %3533 = vmatprep.subr.bf16.mxu0 %v6345_v35  ;;  %v6367_v45 = vld [vmem:[%s8701_s1 + $0x918] ss:$12 sps:$4 sm:$0xff]  }
 0x171   :  { %v5297_v56 = vpop.f32.mrb[63].mxu1  ;;  %5562 = vmatpush3.bf16.msra.mxu1 %v6384_v57  ;;  %v8126_v57 = vld [vmem:[%s8702_s0 + $0x25c] ss:$56 sps:$4 sm:$0xff]  }
 0x172   :  { %v8048_v61 = vadd.f32 %v5295_v62, %v3826_v58  ;;  %v5298_v63 = vadd.f32 %v5297_v56, %v5296_v0  ;;  %3489 = vmatmul.mubr.bf16.gmra.mrb[24].mxu0 %v7871_v16  ;;  %5563 = vmatprep.subr.bf16.mxu1 %v6391_v41  ;;  %v6374_v62 = vld [vmem:[%s8701_s1 + $0x930] ss:$12 sps:$4 sm:$0xff]  }
 0x173   :  { %4269 = vmatmul.mubr.bf16.gmra.mrb[168].mxu1 %v8031_v49  ;;  %3534 = vmatpush1.bf16.msra.mxu0 %v6343_v48 }
 0x174   :  { %v8058_v9 = vadd.f32 %v5298_v63, %v3829_v53  ;;  %3535 = vmatprep.subr.bf16.mxu0 %v6349_v3  ;;  %3498 = vmatprep.mubr.bf16.mxu0 %v7881_v7  ;;  %v6352_v7 = vld [vmem:[%s8701_s1 + $0x8d0] ss:$12 sps:$4 sm:$0xff]   ;;  %v6382_v3 = vld [vmem:[%s8701_s1 + $0x94c] ss:$12 sps:$4 sm:$0xff]  }
 0x175   :  { %4276 = vmatprep.mubr.bf16.mxu1 %v8041_v12  ;;  %5564 = vmatpush3.bf16.msra.mxu1 %v6392_v5  ;;  %v8158_v5 = vld [vmem:[%s8702_s0 + $0x2cc] ss:$56 sps:$4 sm:$0xff]  }
 0x176   :  { %v5315_v16 = vpop.f32.mrb[64].mxu1  ;;  %5565 = vmatprep.subr.bf16.mxu1 %v6396_v43  ;;  %v6380_v43 = vld [vmem:[%s8701_s1 + $0x948] ss:$12 sps:$4 sm:$0xff]  }
 0x177   :  { %v5316_v38 = vpop.f32.mrb[65].mxu1  ;;  %3536 = vmatpush1.bf16.msra.mxu0 %v6347_v4 }
 0x178   :  { %v5317_v14 = vadd.f32 %v5316_v38, %v5315_v16  ;;  %v5318_v37 = vpop.f32.mrb[66].mxu1  ;;  %3537 = vmatprep.subr.bf16.mxu0 %v6354_v59 }
 0x179   :  { %v5319_v28 = vpop.f32.mrb[67].mxu1  ;;  %5566 = vmatpush3.bf16.msra.mxu1 %v6397_v1  ;;  %v6387_v1 = vld [vmem:[%s8701_s1 + $0x960] ss:$12 sps:$4 sm:$0xff]  }
 0x17a   :  { %v8091_v21 = vadd.f32 %v5317_v14, %v7774_v23  ;;  %v5320_v24 = vadd.f32 %v5319_v28, %v5318_v37  ;;  %3499 = vmatmul.mubr.bf16.gmra.mrb[28].mxu0 %v7905_v33  ;;  %5567 = vmatprep.subr.bf16.mxu1 %v6404_v34  ;;  %v6365_v23 = vld [vmem:[%s8701_s1 + $0x904] ss:$12 sps:$4 sm:$0xff]   ;;  %v6395_v34 = vld [vmem:[%s8701_s1 + $0x97c] ss:$12 sps:$4 sm:$0xff]  }
 0x17b   :  { %4277 = vmatmul.mubr.bf16.gmra.mrb[172].mxu1 %v8077_v13  ;;  %3538 = vmatpush1.bf16.msra.mxu0 %v6352_v7  ;;  %v6410_v33 = vld [vmem:[%s8701_s1 + $0x9b0] ss:$12 sps:$4 sm:$0xff]  }
 0x17c   :  { %v8102_v46 = vadd.f32 %v5320_v24, %v7784_v27  ;;  %3539 = vmatprep.subr.bf16.mxu0 %v6358_v15  ;;  %3541 = vmatprep.mubr.bf16.mxu0 %v7915_v36  ;;  %v6363_v27 = vld [vmem:[%s8701_s1 + $0x900] ss:$12 sps:$4 sm:$0xff]   ;;  %v8190_v7 = vld [vmem:[%s8702_s0 + $0x33c] ss:$56 sps:$4 sm:$0xff]   ;;  %v6393_v15 = vld [vmem:[%s8701_s1 + $0x978] ss:$12 sps:$4 sm:$0xff]  }
 0x17d   :  { %4284 = vmatprep.mubr.bf16.mxu1 %v8085_v18  ;;  %5568 = vmatpush3.bf16.msra.mxu1 %v6405_v44  ;;  %v8118_v36 = vld [vmem:[%s8702_s0 + $0x1e8] ss:$56 sps:$4 sm:$0xff]   ;;  %v6400_v24 = vld [vmem:[%s8701_s1 + $0x990] ss:$12 sps:$4 sm:$0xff]  }
 0x17e   :  { %v5321_v32 = vpop.f32.mrb[68].mxu1  ;;  %5569 = vmatprep.subr.bf16.mxu1 %v6409_v25 }
 0x17f   :  { %v5322_v29 = vpop.f32.mrb[69].mxu1  ;;  %3540 = vmatpush1.bf16.msra.mxu0 %v6356_v55  ;;  %v6408_v55 = vld [vmem:[%s8701_s1 + $0x9ac] ss:$12 sps:$4 sm:$0xff]  }
 0x180   :  { %v5323_v60 = vadd.f32 %v5322_v29, %v5321_v32  ;;  %v5324_v52 = vpop.f32.mrb[70].mxu1  ;;  %3622 = vmatprep.subr.bf16.mxu0 %v6365_v23 }
 0x181   :  { %v5325_v35 = vpop.f32.mrb[71].mxu1  ;;  %5570 = vmatpush3.bf16.msra.mxu1 %v6410_v33  ;;  %v8222_v33 = vld [vmem:[%s8702_s0 + $0x34] ss:$56 sps:$4 sm:$0xff]  }
 0x182   :  { %v8129_v31 = vadd.f32 %v5323_v60, %v7817_v47  ;;  %v5326_v41 = vadd.f32 %v5325_v35, %v5324_v52  ;;  %3542 = vmatmul.mubr.bf16.vlgmr.msra.gmra.mrb[0].mxu0 %v7936_v54  ;;  %v6376_v47 = vld [vmem:[%s8701_s1 + $0x934] ss:$12 sps:$4 sm:$0xff]  }
 0x183   :  { %4285 = vmatmul.mubr.bf16.gmra.mrb[176].mxu1 %v8118_v36  ;;  %3623 = vmatpush1.bf16.msra.mxu0 %v6363_v27  ;;  %v6406_v27 = vld [vmem:[%s8701_s1 + $0x9a8] ss:$12 sps:$4 sm:$0xff]  }
 0x184   :  { %v8137_v48 = vadd.f32 %v5326_v41, %v7824_v51  ;;  %3624 = vmatprep.subr.bf16.mxu0 %v6369_v39  ;;  %3551 = vmatprep.mubr.bf16.mxu0 %v7949_v2  ;;  %v8150_v51 = vld [vmem:[%s8702_s0 + $0x258] ss:$56 sps:$4 sm:$0xff]   ;;  %v6419_v41 = vld [vmem:[%s8701_s1 + $0x9dc] ss:$12 sps:$4 sm:$0xff]  }
 0x185   :  { %4292 = vmatprep.mubr.bf16.mxu1 %v8126_v57  ;;  %v8243_v39 = vld [vmem:[%s8702_s0 + $0x30] ss:$56 sps:$4 sm:$0xff]  }
 0x186   :  { %v5327_v54 = vpop.f32.mrb[72].mxu1 }
 0x187   :  { %v5328_v58 = vpop.f32.mrb[73].mxu1  ;;  %3625 = vmatpush1.bf16.msra.mxu0 %v6367_v45 }
 0x188   :  { %v5329_v0 = vadd.f32 %v5328_v58, %v5327_v54  ;;  %v5330_v2 = vpop.f32.mrb[74].mxu1  ;;  %3626 = vmatprep.subr.bf16.mxu0 %v6376_v47  ;;  %v8254_v47 = vld [vmem:[%s8702_s0 + $0xa4] ss:$56 sps:$4 sm:$0xff]  }
 0x189   :  { %v5331_v56 = vpop.f32.mrb[75].mxu1 }
 0x18a   :  { %v8161_v53 = vadd.f32 %v5329_v0, %v7851_v6  ;;  %v5332_v63 = vadd.f32 %v5331_v56, %v5330_v2  ;;  %3552 = vmatmul.mubr.bf16.gmra.mrb[4].mxu0 %v7985_v19  ;;  %v6389_v6 = vld [vmem:[%s8701_s1 + $0x964] ss:$12 sps:$4 sm:$0xff]  }
 0x18b   :  { %4293 = vmatmul.mubr.bf16.gmra.mrb[180].mxu1 %v8150_v51  ;;  %3627 = vmatpush1.bf16.msra.mxu0 %v6374_v62  ;;  %v6417_v62 = vld [vmem:[%s8701_s1 + $0x9d8] ss:$12 sps:$4 sm:$0xff]  }
 0x18c   :  { %v8169_v4 = vadd.f32 %v5332_v63, %v7858_v10  ;;  %3628 = vmatprep.subr.bf16.mxu0 %v6382_v3  ;;  %3561 = vmatprep.mubr.bf16.mxu0 %v7995_v50  ;;  %v8182_v10 = vld [vmem:[%s8702_s0 + $0x2c8] ss:$56 sps:$4 sm:$0xff]   ;;  %v6422_v3 = vld [vmem:[%s8701_s1 + $0x9f0] ss:$12 sps:$4 sm:$0xff]   ;;  %v6428_v63 = vld [vmem:[%s8701_s1 + $0xa0c] ss:$12 sps:$4 sm:$0xff]  }
 0x18d   :  { %4300 = vmatprep.mubr.bf16.mxu1 %v8158_v5 }
 0x18e   :  { %v5333_v19 = vpop.f32.mrb[76].mxu1 }
 0x18f   :  { %v5334_v59 = vpop.f32.mrb[77].mxu1  ;;  %3629 = vmatpush1.bf16.msra.mxu0 %v6380_v43 }
 0x190   :  { %v5335_v16 = vadd.f32 %v5334_v59, %v5333_v19  ;;  %v5336_v50 = vpop.f32.mrb[78].mxu1  ;;  %3630 = vmatprep.subr.bf16.mxu0 %v6389_v6  ;;  %v8286_v6 = vld [vmem:[%s8702_s0 + $0x114] ss:$56 sps:$4 sm:$0xff]  }
 0x191   :  { %v5337_v38 = vpop.f32.mrb[79].mxu1 }
 0x192   :  { %v8193_v14 = vadd.f32 %v5335_v16, %v7885_v11  ;;  %v5338_v37 = vadd.f32 %v5337_v38, %v5336_v50  ;;  %3562 = vmatmul.mubr.bf16.gmra.mrb[8].mxu0 %v8031_v49  ;;  %v6402_v11 = vld [vmem:[%s8701_s1 + $0x994] ss:$12 sps:$4 sm:$0xff]  }
 0x193   :  { %4301 = vmatmul.mubr.bf16.gmra.mrb[184].mxu1 %v8182_v10  ;;  %3631 = vmatpush1.bf16.msra.mxu0 %v6387_v1  ;;  %v6426_v1 = vld [vmem:[%s8701_s1 + $0xa08] ss:$12 sps:$4 sm:$0xff]  }
 0x194   :  { %v8201_v28 = vadd.f32 %v5338_v37, %v7892_v30  ;;  %3632 = vmatprep.subr.bf16.mxu0 %v6395_v34  ;;  %3571 = vmatprep.mubr.bf16.mxu0 %v8041_v12  ;;  %v8214_v30 = vld [vmem:[%s8702_s0 + $0x338] ss:$56 sps:$4 sm:$0xff]   ;;  %v6431_v34 = vld [vmem:[%s8701_s1 + $0xa20] ss:$12 sps:$4 sm:$0xff]   ;;  %v6437_v37 = vld [vmem:[%s8701_s1 + $0xa3c] ss:$12 sps:$4 sm:$0xff]  }
 0x195   :  { %4308 = vmatprep.mubr.bf16.mxu1 %v8190_v7 }
 0x196   :  { %v5339_v49 = vpop.f32.mrb[80].mxu1 }
 0x197   :  { %v5340_v44 = vpop.f32.mrb[81].mxu1  ;;  %3633 = vmatpush1.bf16.msra.mxu0 %v6393_v15 }
 0x198   :  { %v5341_v25 = vadd.f32 %v5340_v44, %v5339_v49  ;;  %v5342_v12 = vpop.f32.mrb[82].mxu1  ;;  %3634 = vmatprep.subr.bf16.mxu0 %v6402_v11  ;;  %v8318_v11 = vld [vmem:[%s8702_s0 + $0x184] ss:$56 sps:$4 sm:$0xff]  }
 0x199   :  { %v5343_v23 = vpop.f32.mrb[83].mxu1 }
 0x19a   :  { %v8225_v32 = vadd.f32 %v5341_v25, %v7919_v22  ;;  %v5344_v29 = vadd.f32 %v5343_v23, %v5342_v12  ;;  %3572 = vmatmul.mubr.bf16.gmra.mrb[12].mxu0 %v8077_v13  ;;  %v6416_v22 = vld [vmem:[%s8701_s1 + $0x9c4] ss:$12 sps:$4 sm:$0xff]  }
 0x19b   :  { %4309 = vmatmul.mubr.bf16.gmra.mrb[188].mxu1 %v8214_v30  ;;  %3635 = vmatpush1.bf16.msra.mxu0 %v6400_v24  ;;  %v6435_v24 = vld [vmem:[%s8701_s1 + $0xa38] ss:$12 sps:$4 sm:$0xff]  }
 0x19c   :  { %v8233_v60 = vadd.f32 %v5344_v29, %v7926_v26  ;;  %3636 = vmatprep.subr.bf16.mxu0 %v6408_v55  ;;  %3581 = vmatprep.mubr.bf16.mxu0 %v8085_v18  ;;  %v6414_v26 = vld [vmem:[%s8701_s1 + $0x9c0] ss:$12 sps:$4 sm:$0xff]   ;;  %v6440_v55 = vld [vmem:[%s8701_s1 + $0xa50] ss:$12 sps:$4 sm:$0xff]  }
 0x19d   :  { %4349 = vmatprep.mubr.bf16.mxu1 %v8222_v33  ;;  %v6446_v29 = vld [vmem:[%s8701_s1 + $0xa6c] ss:$12 sps:$4 sm:$0xff]  }
 0x19e   :  { %v5345_v13 = vpop.f32.mrb[84].mxu1 }
 0x19f   :  { %v5346_v52 = vpop.f32.mrb[85].mxu1  ;;  %3637 = vmatpush1.bf16.msra.mxu0 %v6406_v27 }
 0x1a0   :  { %v5347_v35 = vadd.f32 %v5346_v52, %v5345_v13  ;;  %v5348_v18 = vpop.f32.mrb[86].mxu1  ;;  %3638 = vmatprep.subr.bf16.mxu0 %v6416_v22  ;;  %v8350_v22 = vld [vmem:[%s8702_s0 + $0x1f4] ss:$56 sps:$4 sm:$0xff]  }
 0x1a1   :  { %v5349_v45 = vpop.f32.mrb[87].mxu1 }
 0x1a2   :  { %v8257_v54 = vadd.f32 %v5347_v35, %v7956_v8  ;;  %v5350_v58 = vadd.f32 %v5349_v45, %v5348_v18  ;;  %3582 = vmatmul.mubr.bf16.gmra.mrb[16].mxu0 %v8118_v36  ;;  %v6424_v8 = vld [vmem:[%s8701_s1 + $0x9f4] ss:$12 sps:$4 sm:$0xff]  }
 0x1a3   :  { %4350 = vmatmul.mubr.bf16.vlgmr.msra.gmra.mrb[192].mxu1 %v8243_v39  ;;  %3639 = vmatpush1.bf16.msra.mxu0 %v6414_v26  ;;  %v6444_v26 = vld [vmem:[%s8701_s1 + $0xa68] ss:$12 sps:$4 sm:$0xff]  }
 0x1a4   :  { %v8265_v0 = vadd.f32 %v5350_v58, %v7966_v20  ;;  %3640 = vmatprep.subr.bf16.mxu0 %v6419_v41  ;;  %3591 = vmatprep.mubr.bf16.mxu0 %v8126_v57  ;;  %v8278_v20 = vld [vmem:[%s8702_s0 + $0xa0] ss:$56 sps:$4 sm:$0xff]   ;;  %v6450_v58 = vld [vmem:[%s8702_s0 + $0x264] ss:$56 sps:$4 sm:$0xff]  }
 0x1a5   :  { %4357 = vmatprep.mubr.bf16.mxu1 %v8254_v47 }
 0x1a6   :  { %v5351_v36 = vpop.f32.mrb[88].mxu1 }
 0x1a7   :  { %v5352_v2 = vpop.f32.mrb[89].mxu1  ;;  %3641 = vmatpush1.bf16.msra.mxu0 %v6417_v62 }
 0x1a8   :  { %v5353_v56 = vadd.f32 %v5352_v2, %v5351_v36  ;;  %v5354_v57 = vpop.f32.mrb[90].mxu1  ;;  %3642 = vmatprep.subr.bf16.mxu0 %v6424_v8 }
 0x1a9   :  { %v5355_v43 = vpop.f32.mrb[91].mxu1 }
 0x1aa   :  { %v8289_v19 = vadd.f32 %v5353_v56, %v8002_v42  ;;  %v5356_v59 = vadd.f32 %v5355_v43, %v5354_v57  ;;  %3592 = vmatmul.mubr.bf16.gmra.mrb[20].mxu0 %v8150_v51  ;;  %v6433_v42 = vld [vmem:[%s8701_s1 + $0xa24] ss:$12 sps:$4 sm:$0xff]  }
 0x1ab   :  { %4358 = vmatmul.mubr.bf16.gmra.mrb[196].mxu1 %v8278_v20  ;;  %3643 = vmatpush1.bf16.msra.mxu0 %v6422_v3  ;;  %v6452_v3 = vld [vmem:[%s8702_s0 + $0x260] ss:$56 sps:$4 sm:$0xff]  }
 0x1ac   :  { %v8297_v16 = vadd.f32 %v5356_v59, %v8012_v40  ;;  %3644 = vmatprep.subr.bf16.mxu0 %v6428_v63  ;;  %3601 = vmatprep.mubr.bf16.mxu0 %v8158_v5  ;;  %v8310_v40 = vld [vmem:[%s8702_s0 + $0x110] ss:$56 sps:$4 sm:$0xff]  }
 0x1ad   :  { %4365 = vmatprep.mubr.bf16.mxu1 %v8286_v6 }
 0x1ae   :  { %v5357_v51 = vpop.f32.mrb[92].mxu1 }
 0x1af   :  { %v5358_v50 = vpop.f32.mrb[93].mxu1  ;;  %3645 = vmatpush1.bf16.msra.mxu0 %v6426_v1  ;;  %v6455_v1 = vld [vmem:[%s8702_s0 + $0x2d0] ss:$56 sps:$4 sm:$0xff]  }
 0x1b0   :  { %v5359_v38 = vadd.f32 %v5358_v50, %v5357_v51  ;;  %v5360_v5 = vpop.f32.mrb[94].mxu1  ;;  %3646 = vmatprep.subr.bf16.mxu0 %v6433_v42 }
 0x1b1   :  { %v5361_v15 = vpop.f32.mrb[95].mxu1 }
 0x1b2   :  { %v8321_v49 = vadd.f32 %v5359_v38, %v8048_v61  ;;  %v5362_v44 = vadd.f32 %v5361_v15, %v5360_v5  ;;  %3602 = vmatmul.mubr.bf16.gmra.mrb[24].mxu0 %v8182_v10  ;;  %v6442_v61 = vld [vmem:[%s8701_s1 + $0xa54] ss:$12 sps:$4 sm:$0xff]  }
 0x1b3   :  { %4366 = vmatmul.mubr.bf16.gmra.mrb[200].mxu1 %v8310_v40  ;;  %3647 = vmatpush1.bf16.msra.mxu0 %v6431_v34  ;;  %v6458_v5 = vld [vmem:[%s8702_s0 + $0x340] ss:$56 sps:$4 sm:$0xff]  }
 0x1b4   :  { %v8329_v25 = vadd.f32 %v5362_v44, %v8058_v9  ;;  %3648 = vmatprep.subr.bf16.mxu0 %v6437_v37  ;;  %3611 = vmatprep.mubr.bf16.mxu0 %v8190_v7  ;;  %v8342_v9 = vld [vmem:[%s8702_s0 + $0x180] ss:$56 sps:$4 sm:$0xff]  }
 0x1b5   :  { %4373 = vmatprep.mubr.bf16.mxu1 %v8318_v11 }
 0x1b6   :  { %v5379_v10 = vpop.f32.mrb[96].mxu1 }
 0x1b7   :  { %v5380_v12 = vpop.f32.mrb[97].mxu1  ;;  %3649 = vmatpush1.bf16.msra.mxu0 %v6435_v24 }
 0x1b8   :  { %v5381_v23 = vadd.f32 %v5380_v12, %v5379_v10  ;;  %v5382_v7 = vpop.f32.mrb[98].mxu1  ;;  %3650 = vmatprep.subr.bf16.mxu0 %v6442_v61 }
 0x1b9   :  { %v5383_v27 = vpop.f32.mrb[99].mxu1 }
 0x1ba   :  { %v8353_v13 = vadd.f32 %v5381_v23, %v8091_v21  ;;  %v5384_v52 = vadd.f32 %v5383_v27, %v5382_v7  ;;  %3612 = vmatmul.mubr.bf16.gmra.mrb[28].mxu0 %v8214_v30  ;;  %v6449_v30 = vld [vmem:[%s8702_s0 + $0x1f0] ss:$56 sps:$4 sm:$0xff]  }
 0x1bb   :  { %4374 = vmatmul.mubr.bf16.gmra.mrb[204].mxu1 %v8342_v9  ;;  %3651 = vmatpush1.bf16.msra.mxu0 %v6440_v55 }
 0x1bc   :  { %v8361_v35 = vadd.f32 %v5384_v52, %v8102_v46  ;;  %3652 = vmatprep.subr.bf16.mxu0 %v6446_v29  ;;  %3654 = vmatprep.mubr.bf16.mxu0 %v8222_v33 }
 0x1bd   :  { %4381 = vmatprep.mubr.bf16.mxu1 %v8350_v22 }
 0x1be   :  { %v5385_v21 = vpop.f32.mrb[100].mxu1 }
 0x1bf   :  { %v5386_v18 = vpop.f32.mrb[101].mxu1  ;;  %3653 = vmatpush1.bf16.msra.mxu0 %v6444_v26 }
 0x1c0   :  { %v5387_v41 = vadd.f32 %v5386_v18, %v5385_v21  ;;  %v5388_v45 = vpop.f32.mrb[102].mxu1 }
 0x1c1   :  { %v5389_v46 = vpop.f32.mrb[103].mxu1 }
 0x1c2   :  { %v8372_v62 = vadd.f32 %v5387_v41, %v8129_v31  ;;  %v5390_v33 = vadd.f32 %v5389_v46, %v5388_v45  ;;  %3655 = vmatmul.mubr.bf16.vlgmr.msra.gmra.mrb[0].mxu0 %v8243_v39  ;;  %v6453_v31 = vld [vmem:[%s8702_s0 + $0x2d4] ss:$56 sps:$4 sm:$0xff]  }
 0x1c3   :  { %4382 = vmatmul.mubr.bf16.gmra.mrb[208].mxu1 %v6449_v30  ;;  %3664 = vmatprep.mubr.bf16.mxu0 %v8254_v47 }
 0x1c4   :  { %v8377_v8 = vadd.f32 %v5390_v33, %v8137_v48  ;;  %4389 = vmatprep.mubr.bf16.mxu1 %v6450_v58 }
 0x1c6   :  { %v5391_v36 = vpop.f32.mrb[104].mxu1 }
 0x1c7   :  { %v5392_v2 = vpop.f32.mrb[105].mxu1 }
 0x1c8   :  { %v5393_v56 = vadd.f32 %v5392_v2, %v5391_v36  ;;  %v5394_v57 = vpop.f32.mrb[106].mxu1 }
 0x1c9   :  { %v5395_v39 = vpop.f32.mrb[107].mxu1 }
 0x1ca   :  { %v8386_v63 = vadd.f32 %v5393_v56, %v8161_v53  ;;  %v5396_v47 = vadd.f32 %v5395_v39, %v5394_v57  ;;  %3665 = vmatmul.mubr.bf16.gmra.mrb[4].mxu0 %v8278_v20  ;;  %v6456_v53 = vld [vmem:[%s8702_s0 + $0x344] ss:$56 sps:$4 sm:$0xff]  }
 0x1cb   :  { %4390 = vmatmul.mubr.bf16.gmra.mrb[212].mxu1 %v6452_v3  ;;  %3674 = vmatprep.mubr.bf16.mxu0 %v8286_v6 }
 0x1cc   :  { %v8391_v48 = vadd.f32 %v5396_v47, %v8169_v4  ;;  %4397 = vmatprep.mubr.bf16.mxu1 %v6453_v31 }
 0x1ce   :  { %v5397_v43 = vpop.f32.mrb[108].mxu1 }
 0x1cf   :  { %v5398_v59 = vpop.f32.mrb[109].mxu1 }
 0x1d0   :  { %v5399_v42 = vadd.f32 %v5398_v59, %v5397_v43  ;;  %v5400_v51 = vpop.f32.mrb[110].mxu1 }
 0x1d1   :  { %v5401_v20 = vpop.f32.mrb[111].mxu1 }
 0x1d2   :  { %v8400_v50 = vadd.f32 %v5399_v42, %v8193_v14  ;;  %v5402_v6 = vadd.f32 %v5401_v20, %v5400_v51  ;;  %3675 = vmatmul.mubr.bf16.gmra.mrb[8].mxu0 %v8310_v40 }
 0x1d3   :  { %4398 = vmatmul.mubr.bf16.gmra.mrb[216].mxu1 %v6455_v1  ;;  %3684 = vmatprep.mubr.bf16.mxu0 %v8318_v11 }
 0x1d4   :  { %v8405_v4 = vadd.f32 %v5402_v6, %v8201_v28  ;;  %4405 = vmatprep.mubr.bf16.mxu1 %v6456_v53 }
 0x1d6   :  { %v5403_v34 = vpop.f32.mrb[112].mxu1 }
 0x1d7   :  { %v5404_v38 = vpop.f32.mrb[113].mxu1 }
 0x1d8   :  { %v5405_v37 = vadd.f32 %v5404_v38, %v5403_v34  ;;  %v5406_v15 = vpop.f32.mrb[114].mxu1 }
 0x1d9   :  { %v5407_v14 = vpop.f32.mrb[115].mxu1 }
 0x1da   :  { %v8411_v44 = vadd.f32 %v5405_v37, %v8225_v32  ;;  %v5408_v40 = vadd.f32 %v5407_v14, %v5406_v15  ;;  %3685 = vmatmul.mubr.bf16.gmra.mrb[12].mxu0 %v8342_v9 }
 0x1db   :  { %4406 = vmatmul.mubr.bf16.gmra.mrb[220].mxu1 %v6458_v5  ;;  %3694 = vmatprep.mubr.bf16.mxu0 %v8350_v22 }
 0x1dc   :  { %v8416_v28 = vadd.f32 %v5408_v40, %v8233_v60 }
 0x1de   :  { %v5409_v11 = vpop.f32.mrb[116].mxu1 }
 0x1df   :  { %v5410_v24 = vpop.f32.mrb[117].mxu1 }
 0x1e0   :  { %v5411_v61 = vadd.f32 %v5410_v24, %v5409_v11  ;;  %v5412_v10 = vpop.f32.mrb[118].mxu1 }
 0x1e1   :  { %v5413_v12 = vpop.f32.mrb[119].mxu1 }
 0x1e2   :  { %v8419_v55 = vadd.f32 %v5411_v61, %v8257_v54  ;;  %v5414_v23 = vadd.f32 %v5413_v12, %v5412_v10  ;;  %3695 = vmatmul.mubr.bf16.gmra.mrb[16].mxu0 %v6449_v30 }
 0x1e3   :  { %3704 = vmatprep.mubr.bf16.mxu0 %v6450_v58 }
 0x1e4   :  { %v8422_v32 = vadd.f32 %v5414_v23, %v8265_v0 }
 0x1e6   :  { %v5415_v9 = vpop.f32.mrb[120].mxu1 }
 0x1e7   :  { %v5416_v7 = vpop.f32.mrb[121].mxu1 }
 0x1e8   :  { %v5417_v29 = vadd.f32 %v5416_v7, %v5415_v9  ;;  %v5418_v27 = vpop.f32.mrb[122].mxu1 }
 0x1e9   :  { %v5419_v60 = vpop.f32.mrb[123].mxu1 }
 0x1ea   :  { %v8425_v22 = vadd.f32 %v5417_v29, %v8289_v19  ;;  %v5420_v52 = vadd.f32 %v5419_v60, %v5418_v27  ;;  %3705 = vmatmul.mubr.bf16.gmra.mrb[20].mxu0 %v6452_v3 }
 0x1eb   :  { %3714 = vmatprep.mubr.bf16.mxu0 %v6453_v31 }
 0x1ec   :  { %v8428_v54 = vadd.f32 %v5420_v52, %v8297_v16 }
 0x1ee   :  { %v5421_v26 = vpop.f32.mrb[124].mxu1 }
 0x1ef   :  { %v5422_v21 = vpop.f32.mrb[125].mxu1 }
 0x1f0   :  { %v5423_v18 = vadd.f32 %v5422_v21, %v5421_v26  ;;  %v5424_v30 = vpop.f32.mrb[126].mxu1 }
 0x1f1   :  { %v5425_v0 = vpop.f32.mrb[127].mxu1 }
 0x1f2   :  { %v8431_v41 = vadd.f32 %v5423_v18, %v8321_v49  ;;  %v5426_v45 = vadd.f32 %v5425_v0, %v5424_v30  ;;  %3715 = vmatmul.mubr.bf16.gmra.mrb[24].mxu0 %v6455_v1 }
 0x1f3   :  { %3724 = vmatprep.mubr.bf16.mxu0 %v6456_v53 }
 0x1f4   :  { %v8434_v19 = vadd.f32 %v5426_v45, %v8329_v25 }
 0x1f6   :  { %v5443_v58 = vpop.f32.mrb[128].mxu1 }
 0x1f7   :  { %v5444_v46 = vpop.f32.mrb[129].mxu1 }
 0x1f8   :  { %v5445_v33 = vadd.f32 %v5444_v46, %v5443_v58  ;;  %v5446_v36 = vpop.f32.mrb[130].mxu1 }
 0x1f9   :  { %v5447_v16 = vpop.f32.mrb[131].mxu1 }
 0x1fa   :  { %v8437_v2 = vadd.f32 %v5445_v33, %v8353_v13  ;;  %v5448_v3 = vadd.f32 %v5447_v16, %v5446_v36  ;;  %3725 = vmatmul.mubr.bf16.gmra.mrb[28].mxu0 %v6458_v5 }
 0x1fc   :  { %v8440_v56 = vadd.f32 %v5448_v3, %v8361_v35 }
 0x1fe   :  { %v5449_v49 = vpop.f32.mrb[132].mxu1 }
 0x1ff   :  { %v5450_v57 = vpop.f32.mrb[133].mxu1 }
 0x200   :  { %v5451_v31 = vadd.f32 %v5450_v57, %v5449_v49  ;;  %v5452_v39 = vpop.f32.mrb[134].mxu1 }
 0x201   :  { %v5453_v47 = vpop.f32.mrb[135].mxu1 }
 0x202   :  { %v8443_v25 = vadd.f32 %v5451_v31, %v8372_v62  ;;  %v5454_v43 = vadd.f32 %v5453_v47, %v5452_v39 }
 0x204   :  { %v8446_v59 = vadd.f32 %v5454_v43, %v8377_v8 }
 0x206   :  { %v5455_v1 = vpop.f32.mrb[136].mxu1 }
 0x207   :  { %v5456_v13 = vpop.f32.mrb[137].mxu1 }
 0x208   :  { %v5457_v42 = vadd.f32 %v5456_v13, %v5455_v1  ;;  %v5458_v51 = vpop.f32.mrb[138].mxu1 }
 0x209   :  { %v5459_v53 = vpop.f32.mrb[139].mxu1 }
 0x20a   :  { %v8449_v35 = vadd.f32 %v5457_v42, %v8386_v63  ;;  %v5460_v20 = vadd.f32 %v5459_v53, %v5458_v51 }
 0x20c   :  { %v8452_v6 = vadd.f32 %v5460_v20, %v8391_v48 }
 0x20e   :  { %v5461_v34 = vpop.f32.mrb[140].mxu1 }
 0x20f   :  { %v5462_v38 = vpop.f32.mrb[141].mxu1 }
 0x210   :  { %v5463_v62 = vadd.f32 %v5462_v38, %v5461_v34  ;;  %v5464_v5 = vpop.f32.mrb[142].mxu1 }
 0x211   :  { %v5465_v37 = vpop.f32.mrb[143].mxu1 }
 0x212   :  { %v8455_v8 = vadd.f32 %v5463_v62, %v8400_v50  ;;  %v5466_v15 = vadd.f32 %v5465_v37, %v5464_v5 }
 0x214   :  { %v8458_v14 = vadd.f32 %v5466_v15, %v8405_v4 }
 0x216   :  { %v5467_v40 = vpop.f32.mrb[144].mxu1 }
 0x217   :  { %v5468_v11 = vpop.f32.mrb[145].mxu1 }
 0x218   :  { %v5469_v63 = vadd.f32 %v5468_v11, %v5467_v40  ;;  %v5470_v24 = vpop.f32.mrb[146].mxu1 }
 0x219   :  { %v5471_v61 = vpop.f32.mrb[147].mxu1 }
 0x21a   :  { %v8461_v48 = vadd.f32 %v5469_v63, %v8411_v44  ;;  %v5472_v10 = vadd.f32 %v5471_v61, %v5470_v24 }
 0x21c   :  { %v8464_v12 = vadd.f32 %v5472_v10, %v8416_v28 }
 0x21e   :  { %v5473_v23 = vpop.f32.mrb[148].mxu1 }
 0x21f   :  { %v5474_v9 = vpop.f32.mrb[149].mxu1 }
 0x220   :  { %v5475_v50 = vadd.f32 %v5474_v9, %v5473_v23  ;;  %v5476_v7 = vpop.f32.mrb[150].mxu1 }
 0x221   :  { %v5477_v29 = vpop.f32.mrb[151].mxu1 }
 0x222   :  { %v8467_v4 = vadd.f32 %v5475_v50, %v8419_v55  ;;  %v5478_v27 = vadd.f32 %v5477_v29, %v5476_v7 }
 0x224   :  { %v8470_v60 = vadd.f32 %v5478_v27, %v8422_v32 }
 0x226   :  { %v5479_v52 = vpop.f32.mrb[152].mxu1 }
 0x227   :  { %v5480_v26 = vpop.f32.mrb[153].mxu1 }
 0x228   :  { %v5481_v44 = vadd.f32 %v5480_v26, %v5479_v52  ;;  %v5482_v21 = vpop.f32.mrb[154].mxu1 }
 0x229   :  { %v5483_v18 = vpop.f32.mrb[155].mxu1 }
 0x22a   :  { %v8473_v28 = vadd.f32 %v5481_v44, %v8425_v22  ;;  %v5484_v30 = vadd.f32 %v5483_v18, %v5482_v21 }
 0x22c   :  { %v8476_v0 = vadd.f32 %v5484_v30, %v8428_v54 }
 0x22e   :  { %v5485_v45 = vpop.f32.mrb[156].mxu1 }
 0x22f   :  { %v5486_v58 = vpop.f32.mrb[157].mxu1 }
 0x230   :  { %v5487_v55 = vadd.f32 %v5486_v58, %v5485_v45  ;;  %v5488_v46 = vpop.f32.mrb[158].mxu1 }
 0x231   :  { %v5489_v33 = vpop.f32.mrb[159].mxu1 }
 0x232   :  { %v8479_v32 = vadd.f32 %v5487_v55, %v8431_v41  ;;  %v5490_v36 = vadd.f32 %v5489_v33, %v5488_v46 }
 0x234   :  { %v8482_v16 = vadd.f32 %v5490_v36, %v8434_v19 }
 0x236   :  { %v5507_v3 = vpop.f32.mrb[160].mxu1 }
 0x237   :  { %v5508_v49 = vpop.f32.mrb[161].mxu1 }
 0x238   :  { %v5509_v22 = vadd.f32 %v5508_v49, %v5507_v3  ;;  %v5510_v57 = vpop.f32.mrb[162].mxu1 }
 0x239   :  { %v5511_v31 = vpop.f32.mrb[163].mxu1 }
 0x23a   :  { %v8485_v54 = vadd.f32 %v5509_v22, %v8437_v2  ;;  %v5512_v39 = vadd.f32 %v5511_v31, %v5510_v57 }
 0x23c   :  { %v8488_v47 = vadd.f32 %v5512_v39, %v8440_v56 }
 0x23e   :  { %v5513_v43 = vpop.f32.mrb[164].mxu1 }
 0x23f   :  { %v5514_v1 = vpop.f32.mrb[165].mxu1 }
 0x240   :  { %v5515_v41 = vadd.f32 %v5514_v1, %v5513_v43  ;;  %v5516_v13 = vpop.f32.mrb[166].mxu1 }
 0x241   :  { %v5517_v42 = vpop.f32.mrb[167].mxu1 }
 0x242   :  { %v8491_v19 = vadd.f32 %v5515_v41, %v8443_v25  ;;  %v5518_v51 = vadd.f32 %v5517_v42, %v5516_v13 }
 0x244   :  { %v8494_v53 = vadd.f32 %v5518_v51, %v8446_v59 }
 0x246   :  { %v5519_v20 = vpop.f32.mrb[168].mxu1 }
 0x247   :  { %v5520_v34 = vpop.f32.mrb[169].mxu1 }
 0x248   :  { %v5521_v2 = vadd.f32 %v5520_v34, %v5519_v20  ;;  %v5522_v38 = vpop.f32.mrb[170].mxu1 }
 0x249   :  { %v5523_v62 = vpop.f32.mrb[171].mxu1 }
 0x24a   :  { %v8497_v56 = vadd.f32 %v5521_v2, %v8449_v35  ;;  %v5524_v5 = vadd.f32 %v5523_v62, %v5522_v38 }
 0x24c   :  { %v8500_v37 = vadd.f32 %v5524_v5, %v8452_v6 }
 0x24e   :  { %v5525_v15 = vpop.f32.mrb[172].mxu1 }
 0x24f   :  { %v5526_v40 = vpop.f32.mrb[173].mxu1 }
 0x250   :  { %v5527_v25 = vadd.f32 %v5526_v40, %v5525_v15  ;;  %v5528_v11 = vpop.f32.mrb[174].mxu1 }
 0x251   :  { %v5529_v63 = vpop.f32.mrb[175].mxu1 }
 0x252   :  { %v8503_v59 = vadd.f32 %v5527_v25, %v8455_v8  ;;  %v5530_v24 = vadd.f32 %v5529_v63, %v5528_v11 }
 0x254   :  { %v8506_v61 = vadd.f32 %v5530_v24, %v8458_v14 }
 0x256   :  { %v5531_v10 = vpop.f32.mrb[176].mxu1 }
 0x257   :  { %v5532_v23 = vpop.f32.mrb[177].mxu1 }
 0x258   :  { %v5533_v35 = vadd.f32 %v5532_v23, %v5531_v10  ;;  %v5534_v9 = vpop.f32.mrb[178].mxu1 }
 0x259   :  { %v5535_v50 = vpop.f32.mrb[179].mxu1 }
 0x25a   :  { %v8509_v6 = vadd.f32 %v5533_v35, %v8461_v48  ;;  %v5536_v7 = vadd.f32 %v5535_v50, %v5534_v9 }
 0x25c   :  { %v8512_v29 = vadd.f32 %v5536_v7, %v8464_v12 }
 0x25e   :  { %v5537_v27 = vpop.f32.mrb[180].mxu1 }
 0x25f   :  { %v5538_v52 = vpop.f32.mrb[181].mxu1 }
 0x260   :  { %v5539_v8 = vadd.f32 %v5538_v52, %v5537_v27  ;;  %v5540_v26 = vpop.f32.mrb[182].mxu1 }
 0x261   :  { %v5541_v44 = vpop.f32.mrb[183].mxu1 }
 0x262   :  { %v8515_v14 = vadd.f32 %v5539_v8, %v8467_v4  ;;  %v5542_v21 = vadd.f32 %v5541_v44, %v5540_v26  ;;  %v579_v26 = vsub.s32 0, %v7648_v17 }
 0x264   :  { %v8518_v18 = vadd.f32 %v5542_v21, %v8470_v60  ;;  %v583_v21 = vsub.s32 1, %v7648_v17  ;;  %v6459_v17 = vld [vmem:[%s8703_s2] sm:$0x7] }
 0x266   :  { %v5543_v30 = vpop.f32.mrb[184].mxu1 }
 0x267   :  { %v5544_v45 = vpop.f32.mrb[185].mxu1 }
 0x268   :  { %v5545_v48 = vadd.f32 %v5544_v45, %v5543_v30  ;;  %v5546_v58 = vpop.f32.mrb[186].mxu1 }
 0x269   :  { %v5547_v55 = vpop.f32.mrb[187].mxu1 }
 0x26a   :  { %v8521_v12 = vadd.f32 %v5545_v48, %v8473_v28  ;;  %v5548_v46 = vadd.f32 %v5547_v55, %v5546_v58  ;;  %v8568_v55 = vrot.slane %v6459_v17, %v579_v26 }
 0x26c   :  { %v8524_v33 = vadd.f32 %v5548_v46, %v8476_v0  ;;  %v8570_v46 = vrot.slane %v6459_v17, %v583_v21 }
 0x26e   :  { %v5549_v36 = vpop.f32.mrb[188].mxu1 }
 0x26f   :  { %v5550_v3 = vpop.f32.mrb[189].mxu1 }
 0x270   :  { %v5551_v4 = vadd.f32 %v5550_v3, %v5549_v36  ;;  %v5552_v49 = vpop.f32.mrb[190].mxu1 }
 0x271   :  { %v5553_v22 = vpop.f32.mrb[191].mxu1 }
 0x272   :  { %v8527_v60 = vadd.f32 %v5551_v4, %v8479_v32  ;;  %v5554_v57 = vadd.f32 %v5553_v22, %v5552_v49 }
 0x274   :  { %v8530_v31 = vadd.f32 %v5554_v57, %v8482_v16 }
 0x276   :  { %v5571_v39 = vpop.f32.mrb[192].mxu1 }
 0x277   :  { %v5572_v43 = vpop.f32.mrb[193].mxu1 }
 0x278   :  { %v5573_v28 = vadd.f32 %v5572_v43, %v5571_v39  ;;  %v5574_v1 = vpop.f32.mrb[194].mxu1 }
 0x279   :  { %v5575_v41 = vpop.f32.mrb[195].mxu1 }
 0x27a   :  { %v4352_v0 = vadd.f32 %v5573_v28, %v8485_v54  ;;  %v5576_v13 = vadd.f32 %v5575_v41, %v5574_v1 }
 0x27c   :  { %v4416_v42 = vmax.f32 %v4352_v0, 0.0  ;;  %v4355_v51 = vadd.f32 %v5576_v13, %v8488_v47 }
 0x27e   :  { %v5140_v20 = vpack.c.bf16 %v4416_v42, %v4416_v42  ;;  %v4419_v34 = vmax.f32 %v4355_v51, 0.0  ;;  %v5577_v32 = vpop.f32.mrb[196].mxu1 }
 0x27f   :  { %v5578_v2 = vpop.f32.mrb[197].mxu1 }
 0x280   :  { %4624 = vst.msk [vmem:[%s8704_s3 + $0x8] sm:$0xf] %vm4623_vm0, %v5140_v20  ;;  %v5142_v16 = vpack.c.bf16 %v4419_v34, %v4419_v34  ;;  %v5579_v38 = vadd.f32 %v5578_v2, %v5577_v32  ;;  %v5580_v62 = vpop.f32.mrb[198].mxu1 }
 0x281   :  { %v5581_v5 = vpop.f32.mrb[199].mxu1 }
 0x282   :  { %4626 = vst.msk [vmem:[%s8704_s3 + $0x14] sm:$0xf] %vm4623_vm0, %v5142_v16  ;;  %v4360_v54 = vadd.f32 %v5579_v38, %v8491_v19  ;;  %v5582_v47 = vadd.f32 %v5581_v5, %v5580_v62 }
 0x284   :  { %v4422_v15 = vmax.f32 %v4360_v54, 0.0  ;;  %v4363_v40 = vadd.f32 %v5582_v47, %v8494_v53 }
 0x286   :  { %v5144_v25 = vpack.c.bf16 %v4422_v15, %v4422_v15  ;;  %v4425_v11 = vmax.f32 %v4363_v40, 0.0  ;;  %v5583_v63 = vpop.f32.mrb[200].mxu1 }
 0x287   :  { %v5584_v24 = vpop.f32.mrb[201].mxu1 }
 0x288   :  { %4628 = vst.msk [vmem:[%s8704_s3 + $0x20] sm:$0xf] %vm4623_vm0, %v5144_v25  ;;  %v5146_v10 = vpack.c.bf16 %v4425_v11, %v4425_v11  ;;  %v5585_v23 = vadd.f32 %v5584_v24, %v5583_v63  ;;  %v5586_v35 = vpop.f32.mrb[202].mxu1 }
 0x289   :  { %v5587_v9 = vpop.f32.mrb[203].mxu1 }
 0x28a   :  { %4630 = vst.msk [vmem:[%s8704_s3 + $0x2c] sm:$0xf] %vm4623_vm0, %v5146_v10  ;;  %v4368_v19 = vadd.f32 %v5585_v23, %v8497_v56  ;;  %v5588_v53 = vadd.f32 %v5587_v9, %v5586_v35 }
 0x28c   :  { %v4428_v50 = vmax.f32 %v4368_v19, 0.0  ;;  %v4371_v7 = vadd.f32 %v5588_v53, %v8500_v37 }
 0x28e   :  { %v5148_v27 = vpack.c.bf16 %v4428_v50, %v4428_v50  ;;  %v4431_v52 = vmax.f32 %v4371_v7, 0.0  ;;  %v5589_v8 = vpop.f32.mrb[204].mxu1 }
 0x28f   :  { %v5590_v44 = vpop.f32.mrb[205].mxu1 }
 0x290   :  { %4632 = vst.msk [vmem:[%s8704_s3 + $0x38] sm:$0xf] %vm4623_vm0, %v5148_v27  ;;  %v5150_v30 = vpack.c.bf16 %v4431_v52, %v4431_v52  ;;  %v5591_v45 = vadd.f32 %v5590_v44, %v5589_v8  ;;  %v5592_v56 = vpop.f32.mrb[206].mxu1 }
 0x291   :  { %v5593_v48 = vpop.f32.mrb[207].mxu1 }
 0x292   :  { %4634 = vst.msk [vmem:[%s8704_s3 + $0x44] sm:$0xf] %vm4623_vm0, %v5150_v30  ;;  %v4376_v37 = vadd.f32 %v5591_v45, %v8503_v59  ;;  %v5594_v58 = vadd.f32 %v5593_v48, %v5592_v56 }
 0x294   :  { %v4434_v36 = vmax.f32 %v4376_v37, 0.0  ;;  %v4379_v3 = vadd.f32 %v5594_v58, %v8506_v61 }
 0x295   :  { %v3656_v4 = vpop.f32.mrb[0].mxu0 }
 0x296   :  { %v5152_v49 = vpack.c.bf16 %v4434_v36, %v4434_v36  ;;  %v4437_v22 = vmax.f32 %v4379_v3, 0.0  ;;  %v5619_v57 = vadd.f32 %v3656_v4, %v8568_v55  ;;  %v5595_v39 = vpop.f32.mrb[208].mxu1  ;;  %v3658_v43 = vpop.f32.mrb[1].mxu0 }
 0x297   :  { %v5620_v59 = vadd.f32 %v3658_v43, %v8570_v46  ;;  %v5596_v28 = vpop.f32.mrb[209].mxu1  ;;  %v3660_v1 = vpop.f32.mrb[2].mxu0 }
 0x298   :  { %4636 = vst.msk [vmem:[%s8704_s3 + $0x50] sm:$0xf] %vm4623_vm0, %v5152_v49  ;;  %v5154_v41 = vpack.c.bf16 %v4437_v22, %v4437_v22  ;;  %v4414_v0 = vmax.f32 %v5619_v57, 0.0  ;;  %v5597_v13 = vadd.f32 %v5596_v28, %v5595_v39  ;;  %v5621_v61 = vadd.f32 %v3660_v1, %v8568_v55  ;;  %v5598_v42 = vpop.f32.mrb[210].mxu1  ;;  %v3662_v51 = vpop.f32.mrb[3].mxu0 }
 0x299   :  { %v4415_v20 = vmax.f32 %v5620_v59, 0.0  ;;  %v5622_v34 = vadd.f32 %v3662_v51, %v8570_v46  ;;  %v5599_v32 = vpop.f32.mrb[211].mxu1 }
 0x29a   :  { %4638 = vst.msk [vmem:[%s8704_s3 + $0x5c] sm:$0xf] %vm4623_vm0, %v5154_v41  ;;  %v4384_v2 = vadd.f32 %v5597_v13, %v8509_v6  ;;  %v4417_v16 = vmax.f32 %v5621_v61, 0.0  ;;  %v5600_v38 = vadd.f32 %v5599_v32, %v5598_v42 }
 0x29b   :  { %v5139_v62 = vpack.c.bf16 %v4415_v20, %v4414_v0  ;;  %v4418_v5 = vmax.f32 %v5622_v34, 0.0 }
 0x29c   :  { %v4440_v54 = vmax.f32 %v4384_v2, 0.0  ;;  %v4387_v47 = vadd.f32 %v5600_v38, %v8512_v29 }
 0x29d   :  { %4622 = vst [vmem:[%s8704_s3] sm:$0xff] %v5139_v62  ;;  %v5141_v15 = vpack.c.bf16 %v4418_v5, %v4417_v16  ;;  %v3666_v40 = vpop.f32.mrb[4].mxu0 }
 0x29e   :  { %v5156_v25 = vpack.c.bf16 %v4440_v54, %v4440_v54  ;;  %v4443_v11 = vmax.f32 %v4387_v47, 0.0  ;;  %v5623_v63 = vadd.f32 %v3666_v40, %v8568_v55  ;;  %v5601_v24 = vpop.f32.mrb[212].mxu1  ;;  %v3668_v10 = vpop.f32.mrb[5].mxu0 }
 0x29f   :  { %4625 = vst [vmem:[%s8704_s3 + $0xc] sm:$0xff] %v5141_v15  ;;  %v5624_v6 = vadd.f32 %v3668_v10, %v8570_v46  ;;  %v5602_v23 = vpop.f32.mrb[213].mxu1  ;;  %v3670_v29 = vpop.f32.mrb[6].mxu0 }
 0x2a0   :  { %4640 = vst.msk [vmem:[%s8704_s3 + $0x68] sm:$0xf] %vm4623_vm0, %v5156_v25  ;;  %v5158_v35 = vpack.c.bf16 %v4443_v11, %v4443_v11  ;;  %v4420_v9 = vmax.f32 %v5623_v63, 0.0  ;;  %v5603_v19 = vadd.f32 %v5602_v23, %v5601_v24  ;;  %v5625_v53 = vadd.f32 %v3670_v29, %v8568_v55  ;;  %v5604_v50 = vpop.f32.mrb[214].mxu1  ;;  %v3672_v7 = vpop.f32.mrb[7].mxu0 }
 0x2a1   :  { %v4421_v27 = vmax.f32 %v5624_v6, 0.0  ;;  %v5626_v52 = vadd.f32 %v3672_v7, %v8570_v46  ;;  %v5605_v8 = vpop.f32.mrb[215].mxu1 }
 0x2a2   :  { %4642 = vst.msk [vmem:[%s8704_s3 + $0x74] sm:$0xf] %vm4623_vm0, %v5158_v35  ;;  %v4392_v26 = vadd.f32 %v5603_v19, %v8515_v14  ;;  %v4423_v44 = vmax.f32 %v5625_v53, 0.0  ;;  %v5606_v21 = vadd.f32 %v5605_v8, %v5604_v50 }
 0x2a3   :  { %v5143_v30 = vpack.c.bf16 %v4421_v27, %v4420_v9  ;;  %v4424_v45 = vmax.f32 %v5626_v52, 0.0 }
 0x2a4   :  { %v4446_v56 = vmax.f32 %v4392_v26, 0.0  ;;  %v4395_v48 = vadd.f32 %v5606_v21, %v8518_v18 }
 0x2a5   :  { %4627 = vst [vmem:[%s8704_s3 + $0x18] sm:$0xff] %v5143_v30  ;;  %v5145_v37 = vpack.c.bf16 %v4424_v45, %v4423_v44  ;;  %v3676_v58 = vpop.f32.mrb[8].mxu0 }
 0x2a6   :  { %v5160_v17 = vpack.c.bf16 %v4446_v56, %v4446_v56  ;;  %v4449_v36 = vmax.f32 %v4395_v48, 0.0  ;;  %v5627_v3 = vadd.f32 %v3676_v58, %v8568_v55  ;;  %v5607_v4 = vpop.f32.mrb[216].mxu1  ;;  %v3678_v49 = vpop.f32.mrb[9].mxu0 }
 0x2a7   :  { %4629 = vst [vmem:[%s8704_s3 + $0x24] sm:$0xff] %v5145_v37  ;;  %v5628_v14 = vadd.f32 %v3678_v49, %v8570_v46  ;;  %v5608_v22 = vpop.f32.mrb[217].mxu1  ;;  %v3680_v18 = vpop.f32.mrb[10].mxu0 }
 0x2a8   :  { %4644 = vst.msk [vmem:[%s8704_s3 + $0x80] sm:$0xf] %vm4623_vm0, %v5160_v17  ;;  %v5162_v57 = vpack.c.bf16 %v4449_v36, %v4449_v36  ;;  %v4426_v39 = vmax.f32 %v5627_v3, 0.0  ;;  %v5609_v43 = vadd.f32 %v5608_v22, %v5607_v4  ;;  %v5629_v59 = vadd.f32 %v3680_v18, %v8568_v55  ;;  %v5610_v28 = vpop.f32.mrb[218].mxu1  ;;  %v3682_v1 = vpop.f32.mrb[11].mxu0 }
 0x2a9   :  { %v4427_v41 = vmax.f32 %v5628_v14, 0.0  ;;  %v5630_v0 = vadd.f32 %v3682_v1, %v8570_v46  ;;  %v5611_v13 = vpop.f32.mrb[219].mxu1 }
 0x2aa   :  { %4646 = vst.msk [vmem:[%s8704_s3 + $0x8c] sm:$0xf] %vm4623_vm0, %v5162_v57  ;;  %v4400_v61 = vadd.f32 %v5609_v43, %v8521_v12  ;;  %v4429_v42 = vmax.f32 %v5629_v59, 0.0  ;;  %v5612_v51 = vadd.f32 %v5611_v13, %v5610_v28 }
 0x2ab   :  { %v5147_v20 = vpack.c.bf16 %v4427_v41, %v4426_v39  ;;  %v4430_v34 = vmax.f32 %v5630_v0, 0.0 }
 0x2ac   :  { %v4452_v32 = vmax.f32 %v4400_v61, 0.0  ;;  %v4403_v2 = vadd.f32 %v5612_v51, %v8524_v33 }
 0x2ad   :  { %4631 = vst [vmem:[%s8704_s3 + $0x30] sm:$0xff] %v5147_v20  ;;  %v5149_v16 = vpack.c.bf16 %v4430_v34, %v4429_v42  ;;  %v3686_v38 = vpop.f32.mrb[12].mxu0 }
 0x2ae   :  { %v5164_v62 = vpack.c.bf16 %v4452_v32, %v4452_v32  ;;  %v4455_v5 = vmax.f32 %v4403_v2, 0.0  ;;  %v5631_v54 = vadd.f32 %v3686_v38, %v8568_v55  ;;  %v5613_v47 = vpop.f32.mrb[220].mxu1  ;;  %v3688_v15 = vpop.f32.mrb[13].mxu0 }
 0x2af   :  { %4633 = vst [vmem:[%s8704_s3 + $0x3c] sm:$0xff] %v5149_v16  ;;  %v5632_v12 = vadd.f32 %v3688_v15, %v8570_v46  ;;  %v5614_v40 = vpop.f32.mrb[221].mxu1  ;;  %v3690_v33 = vpop.f32.mrb[14].mxu0 }
 0x2b0   :  { %4648 = vst.msk [vmem:[%s8704_s3 + $0x98] sm:$0xf] %vm4623_vm0, %v5164_v62  ;;  %v5166_v25 = vpack.c.bf16 %v4455_v5, %v4455_v5  ;;  %v4432_v11 = vmax.f32 %v5631_v54, 0.0  ;;  %v5615_v63 = vadd.f32 %v5614_v40, %v5613_v47  ;;  %v5633_v24 = vadd.f32 %v3690_v33, %v8568_v55  ;;  %v5616_v10 = vpop.f32.mrb[222].mxu1  ;;  %v3692_v6 = vpop.f32.mrb[15].mxu0 }
 0x2b1   :  { %v4433_v23 = vmax.f32 %v5632_v12, 0.0  ;;  %v5634_v29 = vadd.f32 %v3692_v6, %v8570_v46  ;;  %v5617_v35 = vpop.f32.mrb[223].mxu1 }
 0x2b2   :  { %4650 = vst.msk [vmem:[%s8704_s3 + $0xa4] sm:$0xf] %vm4623_vm0, %v5166_v25  ;;  %v4408_v9 = vadd.f32 %v5615_v63, %v8527_v60  ;;  %v4435_v19 = vmax.f32 %v5633_v24, 0.0  ;;  %v5618_v53 = vadd.f32 %v5617_v35, %v5616_v10 }
 0x2b3   :  { %v5151_v50 = vpack.c.bf16 %v4433_v23, %v4432_v11  ;;  %v4436_v7 = vmax.f32 %v5634_v29, 0.0 }
 0x2b4   :  { %v4458_v27 = vmax.f32 %v4408_v9, 0.0  ;;  %v4411_v52 = vadd.f32 %v5618_v53, %v8530_v31 }
 0x2b5   :  { %4635 = vst [vmem:[%s8704_s3 + $0x48] sm:$0xff] %v5151_v50  ;;  %v5153_v8 = vpack.c.bf16 %v4436_v7, %v4435_v19  ;;  %v3696_v26 = vpop.f32.mrb[16].mxu0 }
 0x2b6   :  { %v5168_v44 = vpack.c.bf16 %v4458_v27, %v4458_v27  ;;  %v4461_v21 = vmax.f32 %v4411_v52, 0.0  ;;  %v5635_v30 = vadd.f32 %v3696_v26, %v8568_v55  ;;  %v3698_v45 = vpop.f32.mrb[17].mxu0 }
 0x2b7   :  { %4637 = vst [vmem:[%s8704_s3 + $0x54] sm:$0xff] %v5153_v8  ;;  %v5636_v60 = vadd.f32 %v3698_v45, %v8570_v46  ;;  %v3700_v56 = vpop.f32.mrb[18].mxu0 }
 0x2b8   :  { %4652 = vst.msk [vmem:[%s8704_s3 + $0xb0] sm:$0xf] %vm4623_vm0, %v5168_v44  ;;  %v5170_v31 = vpack.c.bf16 %v4461_v21, %v4461_v21  ;;  %v4438_v48 = vmax.f32 %v5635_v30, 0.0  ;;  %v5637_v37 = vadd.f32 %v3700_v56, %v8568_v55  ;;  %v3702_v58 = vpop.f32.mrb[19].mxu0 }
 0x2b9   :  { %v4439_v17 = vmax.f32 %v5636_v60, 0.0  ;;  %v5638_v36 = vadd.f32 %v3702_v58, %v8570_v46 }
 0x2ba   :  { %4654 = vst.msk [vmem:[%s8704_s3 + $0xbc] sm:$0xf] %vm4623_vm0, %v5170_v31  ;;  %v4441_v3 = vmax.f32 %v5637_v37, 0.0 }
 0x2bb   :  { %v5155_v4 = vpack.c.bf16 %v4439_v17, %v4438_v48  ;;  %v4442_v49 = vmax.f32 %v5638_v36, 0.0 }
 0x2bd   :  { %4639 = vst [vmem:[%s8704_s3 + $0x60] sm:$0xff] %v5155_v4  ;;  %v5157_v14 = vpack.c.bf16 %v4442_v49, %v4441_v3  ;;  %v3706_v22 = vpop.f32.mrb[20].mxu0 }
 0x2be   :  { %v5639_v18 = vadd.f32 %v3706_v22, %v8568_v55  ;;  %v3708_v57 = vpop.f32.mrb[21].mxu0 }
 0x2bf   :  { %4641 = vst [vmem:[%s8704_s3 + $0x6c] sm:$0xff] %v5157_v14  ;;  %v5640_v39 = vadd.f32 %v3708_v57, %v8570_v46  ;;  %v3710_v43 = vpop.f32.mrb[22].mxu0 }
 0x2c0   :  { %v4444_v59 = vmax.f32 %v5639_v18, 0.0  ;;  %v5641_v28 = vadd.f32 %v3710_v43, %v8568_v55  ;;  %v3712_v1 = vpop.f32.mrb[23].mxu0 }
 0x2c1   :  { %v4445_v41 = vmax.f32 %v5640_v39, 0.0  ;;  %v5642_v0 = vadd.f32 %v3712_v1, %v8570_v46 }
 0x2c2   :  { %v4447_v13 = vmax.f32 %v5641_v28, 0.0 }
 0x2c3   :  { %v5159_v61 = vpack.c.bf16 %v4445_v41, %v4444_v59  ;;  %v4448_v42 = vmax.f32 %v5642_v0, 0.0 }
 0x2c5   :  { %4643 = vst [vmem:[%s8704_s3 + $0x78] sm:$0xff] %v5159_v61  ;;  %v5161_v51 = vpack.c.bf16 %v4448_v42, %v4447_v13  ;;  %v3716_v20 = vpop.f32.mrb[24].mxu0 }
 0x2c6   :  { %v5643_v34 = vadd.f32 %v3716_v20, %v8568_v55  ;;  %v3718_v32 = vpop.f32.mrb[25].mxu0 }
 0x2c7   :  { %4645 = vst [vmem:[%s8704_s3 + $0x84] sm:$0xff] %v5161_v51  ;;  %v5644_v2 = vadd.f32 %v3718_v32, %v8570_v46  ;;  %v3720_v16 = vpop.f32.mrb[26].mxu0 }
 0x2c8   :  { %v4450_v38 = vmax.f32 %v5643_v34, 0.0  ;;  %v5645_v62 = vadd.f32 %v3720_v16, %v8568_v55  ;;  %v3722_v5 = vpop.f32.mrb[27].mxu0 }
 0x2c9   :  { %v4451_v54 = vmax.f32 %v5644_v2, 0.0  ;;  %v5646_v47 = vadd.f32 %v3722_v5, %v8570_v46 }
 0x2ca   :  { %v4453_v15 = vmax.f32 %v5645_v62, 0.0 }
 0x2cb   :  { %v5163_v12 = vpack.c.bf16 %v4451_v54, %v4450_v38  ;;  %v4454_v40 = vmax.f32 %v5646_v47, 0.0 }
 0x2cd   :  { %4647 = vst [vmem:[%s8704_s3 + $0x90] sm:$0xff] %v5163_v12  ;;  %v5165_v33 = vpack.c.bf16 %v4454_v40, %v4453_v15  ;;  %v3726_v25 = vpop.f32.mrb[28].mxu0 }
 0x2ce   :  { %v5647_v11 = vadd.f32 %v3726_v25, %v8568_v55  ;;  %v3728_v63 = vpop.f32.mrb[29].mxu0 }
 0x2cf   :  { %4649 = vst [vmem:[%s8704_s3 + $0x9c] sm:$0xff] %v5165_v33  ;;  %v5648_v24 = vadd.f32 %v3728_v63, %v8570_v46  ;;  %v3730_v10 = vpop.f32.mrb[30].mxu0 }
 0x2d0   :  { %v4456_v6 = vmax.f32 %v5647_v11, 0.0  ;;  %v5649_v23 = vadd.f32 %v3730_v10, %v8568_v55  ;;  %v3732_v29 = vpop.f32.mrb[31].mxu0 }
 0x2d1   :  { %v4457_v35 = vmax.f32 %v5648_v24, 0.0  ;;  %v5650_v9 = vadd.f32 %v3732_v29, %v8570_v46 }
 0x2d2   :  { %v4459_v19 = vmax.f32 %v5649_v23, 0.0 }
 0x2d3   :  { %v5167_v53 = vpack.c.bf16 %v4457_v35, %v4456_v6  ;;  %v4460_v50 = vmax.f32 %v5650_v9, 0.0 }
 0x2d5   :  { %4651 = vst [vmem:[%s8704_s3 + $0xa8] sm:$0xff] %v5167_v53  ;;  %v5169_v7 = vpack.c.bf16 %v4460_v50, %v4459_v19 }
 0x2d7   :  { %4653 = vst [vmem:[%s8704_s3 + $0xb4] sm:$0xff] %v5169_v7 }

// kernel: reduction_b_forward.7
= control target key start
LH: loop header
LB: loop body
LE: loop exit
PB: predicated region body
PF: predicated region fallthrough
CT: control target
= control target key end

     0   :  { %vm1500_vm0 = vcmask 523264   ;;  %s12357_s1 = inlined_call_operand.vmem [shape: bf16[1728,192], index: 1, kind: input, shape index: {}]   ;;  %s12358_s4 = inlined_call_operand.vmem [shape: bf16[2880,320], index: 4, kind: input, shape index: {}]   ;;  %s12359_s0 = inlined_call_operand.vmem [shape: bf16[32,1728], index: 0, kind: input, shape index: {}]   ;;  %s12360_s3 = inlined_call_operand.vmem [shape: bf16[32,2880], index: 3, kind: input, shape index: {}]   ;;  %s12361_s2 = inlined_call_operand.vmem [shape: f32[1,192], index: 2, kind: input, shape index: {}]   ;;  %s12362_s6 = inlined_call_operand.vmem [shape: f32[32,192], index: 6, kind: output, shape index: {0}]   ;;  %s12363_s5 = inlined_call_operand.vmem [shape: f32[1,320], index: 5, kind: input, shape index: {}]   ;;  %s12364_s7 = inlined_call_operand.vmem [shape: f32[32,320], index: 7, kind: output, shape index: {1}]  }
   0x1   :  { %v8366_v0 = vld [vmem:[%s12357_s1 + $0x4] ss:$8 sps:$4 sm:$0xff]   ;;  %v8370_v2 = vld [vmem:[%s12357_s1] ss:$8 sps:$4 sm:$0xff]   ;;  %v8372_v4 = vld [vmem:[%s12357_s1 + $0x14] ss:$8 sps:$4 sm:$0xff]  }
   0x2   :  { %v8368_v1 = vld [vmem:[%s12358_s4 + $0x4] ss:$12 sps:$4 sm:$0xff]   ;;  %1507 = vmatprep.subr.bf16.mxu0 %v8366_v0  ;;  %v8371_v3 = vld [vmem:[%s12358_s4] ss:$12 sps:$4 sm:$0xff]   ;;  %v8374_v5 = vld [vmem:[%s12358_s4 + $0x1c] ss:$12 sps:$4 sm:$0xff]  }
   0x3   :  { %5795 = vmatprep.subr.bf16.mxu1 %v8368_v1  ;;  %1508 = vmatpush1.bf16.msra.mxu0 %v8370_v2  ;;  %v8376_v6 = vld [vmem:[%s12357_s1 + $0x10] ss:$8 sps:$4 sm:$0xff]   ;;  %v8378_v8 = vld [vmem:[%s12357_s1 + $0x24] ss:$8 sps:$4 sm:$0xff]   ;;  %v8380_v9 = vld [vmem:[%s12358_s4 + $0x34] ss:$12 sps:$4 sm:$0xff]  }
   0x4   :  { %5796 = vmatpush1.bf16.msra.mxu1 %v8371_v3  ;;  %1509 = vmatprep.subr.bf16.mxu0 %v8372_v4  ;;  %v8377_v7 = vld [vmem:[%s12358_s4 + $0x18] ss:$12 sps:$4 sm:$0xff]   ;;  %v8382_v10 = vld [vmem:[%s12357_s1 + $0x20] ss:$8 sps:$4 sm:$0xff]   ;;  %v8383_v11 = vld [vmem:[%s12358_s4 + $0x30] ss:$12 sps:$4 sm:$0xff]  }
   0x5   :  { %5797 = vmatprep.subr.bf16.mxu1 %v8374_v5  ;;  %v8384_v12 = vld [vmem:[%s12357_s1 + $0x34] ss:$8 sps:$4 sm:$0xff]   ;;  %v8386_v13 = vld [vmem:[%s12358_s4 + $0x4c] ss:$12 sps:$4 sm:$0xff]   ;;  %v8392_v17 = vld [vmem:[%s12358_s4 + $0x64] ss:$12 sps:$4 sm:$0xff]  }
   0x6   :  { %v8388_v14 = vld [vmem:[%s12357_s1 + $0x30] ss:$8 sps:$4 sm:$0xff]   ;;  %v8389_v15 = vld [vmem:[%s12358_s4 + $0x48] ss:$12 sps:$4 sm:$0xff]   ;;  %v8390_v16 = vld [vmem:[%s12357_s1 + $0x44] ss:$8 sps:$4 sm:$0xff]  }
   0x7   :  { %1510 = vmatpush1.bf16.msra.mxu0 %v8376_v6  ;;  %v8394_v18 = vld [vmem:[%s12357_s1 + $0x40] ss:$8 sps:$4 sm:$0xff]   ;;  %v8396_v20 = vld [vmem:[%s12357_s1 + $0x54] ss:$8 sps:$4 sm:$0xff]   ;;  %v8400_v22 = vld [vmem:[%s12357_s1 + $0x50] ss:$8 sps:$4 sm:$0xff]  }
   0x8   :  { %5798 = vmatpush1.bf16.msra.mxu1 %v8377_v7  ;;  %1511 = vmatprep.subr.bf16.mxu0 %v8378_v8  ;;  %v8395_v19 = vld [vmem:[%s12358_s4 + $0x60] ss:$12 sps:$4 sm:$0xff]   ;;  %v8398_v21 = vld [vmem:[%s12358_s4 + $0x7c] ss:$12 sps:$4 sm:$0xff]   ;;  %v8401_v23 = vld [vmem:[%s12358_s4 + $0x78] ss:$12 sps:$4 sm:$0xff]  }
   0x9   :  { %5799 = vmatprep.subr.bf16.mxu1 %v8380_v9  ;;  %v8402_v24 = vld [vmem:[%s12357_s1 + $0x64] ss:$8 sps:$4 sm:$0xff]   ;;  %v8404_v25 = vld [vmem:[%s12358_s4 + $0x94] ss:$12 sps:$4 sm:$0xff]   ;;  %v8407_v27 = vld [vmem:[%s12358_s4 + $0x90] ss:$12 sps:$4 sm:$0xff]  }
   0xa   :  { %v8406_v26 = vld [vmem:[%s12357_s1 + $0x60] ss:$8 sps:$4 sm:$0xff]   ;;  %v8408_v28 = vld [vmem:[%s12357_s1 + $0x74] ss:$8 sps:$4 sm:$0xff]   ;;  %v8410_v29 = vld [vmem:[%s12358_s4 + $0xac] ss:$12 sps:$4 sm:$0xff]  }
   0xb   :  { %1512 = vmatpush1.bf16.msra.mxu0 %v8382_v10  ;;  %v8412_v30 = vld [vmem:[%s12357_s1 + $0x70] ss:$8 sps:$4 sm:$0xff]   ;;  %v8413_v31 = vld [vmem:[%s12358_s4 + $0xa8] ss:$12 sps:$4 sm:$0xff]   ;;  %v8414_v32 = vld [vmem:[%s12357_s1 + $0x84] ss:$8 sps:$4 sm:$0xff]  }
   0xc   :  { %5800 = vmatpush1.bf16.msra.mxu1 %v8383_v11  ;;  %1513 = vmatprep.subr.bf16.mxu0 %v8384_v12  ;;  %v8416_v33 = vld [vmem:[%s12358_s4 + $0xc4] ss:$12 sps:$4 sm:$0xff]   ;;  %v8418_v34 = vld [vmem:[%s12357_s1 + $0x80] ss:$8 sps:$4 sm:$0xff]   ;;  %v8420_v36 = vld [vmem:[%s12357_s1 + $0x94] ss:$8 sps:$4 sm:$0xff]  }
   0xd   :  { %5801 = vmatprep.subr.bf16.mxu1 %v8386_v13  ;;  %v8419_v35 = vld [vmem:[%s12358_s4 + $0xc0] ss:$12 sps:$4 sm:$0xff]   ;;  %v8422_v37 = vld [vmem:[%s12358_s4 + $0xdc] ss:$12 sps:$4 sm:$0xff]   ;;  %v8424_v38 = vld [vmem:[%s12357_s1 + $0x90] ss:$8 sps:$4 sm:$0xff]  }
   0xe   :  { %v8425_v39 = vld [vmem:[%s12358_s4 + $0xd8] ss:$12 sps:$4 sm:$0xff]   ;;  %v8428_v41 = vld [vmem:[%s12358_s4 + $0xf4] ss:$12 sps:$4 sm:$0xff]   ;;  %v8431_v43 = vld [vmem:[%s12358_s4 + $0xf0] ss:$12 sps:$4 sm:$0xff]  }
   0xf   :  { %1514 = vmatpush1.bf16.msra.mxu0 %v8388_v14  ;;  %v8426_v40 = vld [vmem:[%s12357_s1 + $0xa4] ss:$8 sps:$4 sm:$0xff]   ;;  %v8430_v42 = vld [vmem:[%s12357_s1 + $0xa0] ss:$8 sps:$4 sm:$0xff]   ;;  %v8432_v44 = vld [vmem:[%s12357_s1 + $0xb4] ss:$8 sps:$4 sm:$0xff]  }
  0x10   :  { %5802 = vmatpush1.bf16.msra.mxu1 %v8389_v15  ;;  %1515 = vmatprep.subr.bf16.mxu0 %v8390_v16  ;;  %v8434_v45 = vld [vmem:[%s12358_s4 + $0x10c] ss:$12 sps:$4 sm:$0xff]   ;;  %v8437_v47 = vld [vmem:[%s12358_s4 + $0x108] ss:$12 sps:$4 sm:$0xff]   ;;  %v8464_v48 = vld [vmem:[%s12359_s0 + $0x4] ss:$56 sps:$4 sm:$0xff]  }
  0x11   :  { %5803 = vmatprep.subr.bf16.mxu1 %v8392_v17  ;;  %v8436_v46 = vld [vmem:[%s12357_s1 + $0xb0] ss:$8 sps:$4 sm:$0xff]   ;;  %v8438_v49 = vld [vmem:[%s12357_s1 + $0xc4] ss:$8 sps:$4 sm:$0xff]   ;;  %1539 = vmatprep.mubr.bf16.mxu0 %v8464_v48  ;;  %v8442_v52 = vld [vmem:[%s12357_s1 + $0xc0] ss:$8 sps:$4 sm:$0xff]  }
  0x12   :  { %v8440_v50 = vld [vmem:[%s12358_s4 + $0x124] ss:$12 sps:$4 sm:$0xff]   ;;  %v8443_v53 = vld [vmem:[%s12358_s4 + $0x120] ss:$12 sps:$4 sm:$0xff]   ;;  %v8444_v54 = vld [vmem:[%s12357_s1 + $0xd4] ss:$8 sps:$4 sm:$0xff]  }
  0x13   :  { %1516 = vmatpush1.bf16.msra.mxu0 %v8394_v18  ;;  %v8470_v51 = vld [vmem:[%s12360_s3 + $0x4] ss:$92 sps:$4 sm:$0xff]   ;;  %v8446_v55 = vld [vmem:[%s12358_s4 + $0x13c] ss:$12 sps:$4 sm:$0xff]   ;;  %v8448_v56 = vld [vmem:[%s12357_s1 + $0xd0] ss:$8 sps:$4 sm:$0xff]  }
  0x14   :  { %5804 = vmatpush1.bf16.msra.mxu1 %v8395_v19  ;;  %1517 = vmatprep.subr.bf16.mxu0 %v8396_v20  ;;  %v8449_v57 = vld [vmem:[%s12358_s4 + $0x138] ss:$12 sps:$4 sm:$0xff]   ;;  %v8452_v59 = vld [vmem:[%s12358_s4 + $0x154] ss:$12 sps:$4 sm:$0xff]   ;;  %v8455_v61 = vld [vmem:[%s12358_s4 + $0x150] ss:$12 sps:$4 sm:$0xff]  }
  0x15   :  { %5805 = vmatprep.subr.bf16.mxu1 %v8398_v21  ;;  %5827 = vmatprep.mubr.bf16.mxu1 %v8470_v51  ;;  %v8450_v58 = vld [vmem:[%s12357_s1 + $0xe4] ss:$8 sps:$4 sm:$0xff]   ;;  %v8454_v60 = vld [vmem:[%s12357_s1 + $0xe0] ss:$8 sps:$4 sm:$0xff]   ;;  %v8456_v62 = vld [vmem:[%s12357_s1 + $0xf4] ss:$8 sps:$4 sm:$0xff]  }
  0x16   :  { %v8458_v63 = vld [vmem:[%s12358_s4 + $0x16c] ss:$12 sps:$4 sm:$0xff]   ;;  %v8461_v1 = vld [vmem:[%s12358_s4 + $0x168] ss:$12 sps:$4 sm:$0xff]   ;;  %v8473_v3 = vld [vmem:[%s12358_s4 + $0x184] ss:$12 sps:$4 sm:$0xff]  }
  0x17   :  { %1518 = vmatpush1.bf16.msra.mxu0 %v8400_v22  ;;  %v8460_v0 = vld [vmem:[%s12357_s1 + $0xf0] ss:$8 sps:$4 sm:$0xff]   ;;  %v8467_v2 = vld [vmem:[%s12357_s1 + $0x104] ss:$8 sps:$4 sm:$0xff]   ;;  %v8465_v5 = vld [vmem:[%s12357_s1 + $0x100] ss:$8 sps:$4 sm:$0xff]  }
  0x18   :  { %5806 = vmatpush1.bf16.msra.mxu1 %v8401_v23  ;;  %1519 = vmatprep.subr.bf16.mxu0 %v8402_v24  ;;  %v8462_v4 = vld [vmem:[%s12359_s0] ss:$56 sps:$4 sm:$0xff]   ;;  %v8476_v8 = vld [vmem:[%s12357_s1 + $0x114] ss:$8 sps:$4 sm:$0xff]   ;;  %v8482_v12 = vld [vmem:[%s12357_s1 + $0x124] ss:$8 sps:$4 sm:$0xff]  }
  0x19   :  { %5807 = vmatprep.subr.bf16.mxu1 %v8404_v25  ;;  %v8468_v6 = vld [vmem:[%s12360_s3] ss:$92 sps:$4 sm:$0xff]   ;;  %v8474_v10 = vld [vmem:[%s12357_s1 + $0x110] ss:$8 sps:$4 sm:$0xff]   ;;  %v8489_v19 = vld [vmem:[%s12358_s4 + $0x1c8] ss:$12 sps:$4 sm:$0xff]  }
  0x1a   :  { %v8471_v7 = vld [vmem:[%s12358_s4 + $0x180] ss:$12 sps:$4 sm:$0xff]   ;;  %v8479_v9 = vld [vmem:[%s12358_s4 + $0x19c] ss:$12 sps:$4 sm:$0xff]   ;;  %v8477_v11 = vld [vmem:[%s12358_s4 + $0x198] ss:$12 sps:$4 sm:$0xff]  }
  0x1b   :  { %1520 = vmatpush1.bf16.msra.mxu0 %v8406_v26  ;;  %v8485_v13 = vld [vmem:[%s12358_s4 + $0x1b4] ss:$12 sps:$4 sm:$0xff]   ;;  %v8483_v15 = vld [vmem:[%s12358_s4 + $0x1b0] ss:$12 sps:$4 sm:$0xff]   ;;  %v8491_v17 = vld [vmem:[%s12358_s4 + $0x1cc] ss:$12 sps:$4 sm:$0xff]  }
  0x1c   :  { %5808 = vmatpush1.bf16.msra.mxu1 %v8407_v27  ;;  %1521 = vmatprep.subr.bf16.mxu0 %v8408_v28  ;;  %v8480_v14 = vld [vmem:[%s12357_s1 + $0x120] ss:$8 sps:$4 sm:$0xff]   ;;  %v8488_v16 = vld [vmem:[%s12357_s1 + $0x134] ss:$8 sps:$4 sm:$0xff]   ;;  %v8486_v18 = vld [vmem:[%s12357_s1 + $0x130] ss:$8 sps:$4 sm:$0xff]  }
  0x1d   :  { %5809 = vmatprep.subr.bf16.mxu1 %v8410_v29  ;;  %v8494_v20 = vld [vmem:[%s12357_s1 + $0x144] ss:$8 sps:$4 sm:$0xff]   ;;  %v8492_v22 = vld [vmem:[%s12357_s1 + $0x140] ss:$8 sps:$4 sm:$0xff]   ;;  %v8500_v24 = vld [vmem:[%s12357_s1 + $0x154] ss:$8 sps:$4 sm:$0xff]  }
  0x1e   :  { %v8497_v21 = vld [vmem:[%s12358_s4 + $0x1e4] ss:$12 sps:$4 sm:$0xff]   ;;  %v8495_v23 = vld [vmem:[%s12358_s4 + $0x1e0] ss:$12 sps:$4 sm:$0xff]   ;;  %v8503_v25 = vld [vmem:[%s12358_s4 + $0x1fc] ss:$12 sps:$4 sm:$0xff]  }
  0x1f   :  { %1522 = vmatpush1.bf16.msra.mxu0 %v8412_v30  ;;  %v8498_v26 = vld [vmem:[%s12357_s1 + $0x150] ss:$8 sps:$4 sm:$0xff]   ;;  %v8552_v28 = vld [vmem:[%s12359_s0 + $0x74] ss:$56 sps:$4 sm:$0xff]  }
  0x20   :  { %5810 = vmatpush1.bf16.msra.mxu1 %v8413_v31  ;;  %1523 = vmatprep.subr.bf16.mxu0 %v8414_v32  ;;  %v8501_v27 = vld [vmem:[%s12358_s4 + $0x1f8] ss:$12 sps:$4 sm:$0xff]   ;;  %v8509_v30 = vld [vmem:[%s12358_s4 + $0x214] ss:$12 sps:$4 sm:$0xff]  }
  0x21   :  { %5811 = vmatprep.subr.bf16.mxu1 %v8416_v33  ;;  %v8506_v29 = vld [vmem:[%s12357_s1 + $0x164] ss:$8 sps:$4 sm:$0xff]   ;;  %v8557_v31 = vld [vmem:[%s12360_s3 + $0xbc] ss:$92 sps:$4 sm:$0xff]   ;;  %v8504_v32 = vld [vmem:[%s12357_s1 + $0x160] ss:$8 sps:$4 sm:$0xff]  }
  0x22   :  { %v8507_v33 = vld [vmem:[%s12358_s4 + $0x210] ss:$12 sps:$4 sm:$0xff]   ;;  %v8533_v51 = vld [vmem:[%s12358_s4 + $0x274] ss:$12 sps:$4 sm:$0xff]  }
  0x23   :  { %1524 = vmatpush1.bf16.msra.mxu0 %v8418_v34  ;;  %v8562_v34 = vld [vmem:[%s12359_s0 + $0x70] ss:$56 sps:$4 sm:$0xff]  }
  0x24   :  { %5812 = vmatpush1.bf16.msra.mxu1 %v8419_v35  ;;  %1525 = vmatprep.subr.bf16.mxu0 %v8420_v36  ;;  %v8563_v35 = vld [vmem:[%s12360_s3 + $0xb8] ss:$92 sps:$4 sm:$0xff]  }
  0x25   :  { %5813 = vmatprep.subr.bf16.mxu1 %v8422_v37  ;;  %v8512_v36 = vld [vmem:[%s12357_s1 + $0x174] ss:$8 sps:$4 sm:$0xff]   ;;  %v8515_v37 = vld [vmem:[%s12358_s4 + $0x22c] ss:$12 sps:$4 sm:$0xff]  }
  0x26   :  { %v8522_v48 = vld [vmem:[%s12357_s1 + $0x190] ss:$8 sps:$4 sm:$0xff]  }
  0x27   :  { %1526 = vmatpush1.bf16.msra.mxu0 %v8424_v38  ;;  %v8510_v38 = vld [vmem:[%s12357_s1 + $0x170] ss:$8 sps:$4 sm:$0xff]  }
  0x28   :  { %5814 = vmatpush1.bf16.msra.mxu1 %v8425_v39  ;;  %1527 = vmatprep.subr.bf16.mxu0 %v8426_v40  ;;  %v8513_v39 = vld [vmem:[%s12358_s4 + $0x228] ss:$12 sps:$4 sm:$0xff]   ;;  %v8572_v40 = vld [vmem:[%s12359_s0 + $0xc] ss:$56 sps:$4 sm:$0xff]  }
  0x29   :  { %5815 = vmatprep.subr.bf16.mxu1 %v8428_v41  ;;  %v8518_v41 = vld [vmem:[%s12357_s1 + $0x184] ss:$8 sps:$4 sm:$0xff]  }
  0x2b   :  { %1528 = vmatpush1.bf16.msra.mxu0 %v8430_v42  ;;  %v8521_v42 = vld [vmem:[%s12358_s4 + $0x244] ss:$12 sps:$4 sm:$0xff]  }
  0x2c   :  { %5816 = vmatpush1.bf16.msra.mxu1 %v8431_v43  ;;  %1529 = vmatprep.subr.bf16.mxu0 %v8432_v44  ;;  %v8578_v43 = vld [vmem:[%s12360_s3 + $0xc] ss:$92 sps:$4 sm:$0xff]  }
  0x2d   :  { %5817 = vmatprep.subr.bf16.mxu1 %v8434_v45  ;;  %v8516_v44 = vld [vmem:[%s12357_s1 + $0x180] ss:$8 sps:$4 sm:$0xff]  }
  0x2e   :  { %v8519_v45 = vld [vmem:[%s12358_s4 + $0x240] ss:$12 sps:$4 sm:$0xff]  }
  0x2f   :  { %1530 = vmatpush1.bf16.msra.mxu0 %v8436_v46  ;;  %v8524_v46 = vld [vmem:[%s12357_s1 + $0x194] ss:$8 sps:$4 sm:$0xff]  }
  0x30   :  { %5818 = vmatpush1.bf16.msra.mxu1 %v8437_v47  ;;  %1531 = vmatprep.subr.bf16.mxu0 %v8438_v49  ;;  %v8527_v47 = vld [vmem:[%s12358_s4 + $0x25c] ss:$12 sps:$4 sm:$0xff]   ;;  %v8525_v49 = vld [vmem:[%s12358_s4 + $0x258] ss:$12 sps:$4 sm:$0xff]  }
  0x31   :  { %5819 = vmatprep.subr.bf16.mxu1 %v8440_v50  ;;  %v8530_v50 = vld [vmem:[%s12357_s1 + $0x1a4] ss:$8 sps:$4 sm:$0xff]  }
  0x33   :  { %1532 = vmatpush1.bf16.msra.mxu0 %v8442_v52  ;;  %v8528_v52 = vld [vmem:[%s12357_s1 + $0x1a0] ss:$8 sps:$4 sm:$0xff]  }
  0x34   :  { %5820 = vmatpush1.bf16.msra.mxu1 %v8443_v53  ;;  %1533 = vmatprep.subr.bf16.mxu0 %v8444_v54  ;;  %v8531_v53 = vld [vmem:[%s12358_s4 + $0x270] ss:$12 sps:$4 sm:$0xff]  }
  0x35   :  { %5821 = vmatprep.subr.bf16.mxu1 %v8446_v55  ;;  %v8536_v54 = vld [vmem:[%s12357_s1 + $0x1b4] ss:$8 sps:$4 sm:$0xff]   ;;  %v8539_v55 = vld [vmem:[%s12358_s4 + $0x28c] ss:$12 sps:$4 sm:$0xff]  }
  0x37   :  { %1534 = vmatpush1.bf16.msra.mxu0 %v8448_v56  ;;  %v8534_v56 = vld [vmem:[%s12357_s1 + $0x1b0] ss:$8 sps:$4 sm:$0xff]  }
  0x38   :  { %5822 = vmatpush1.bf16.msra.mxu1 %v8449_v57  ;;  %1535 = vmatprep.subr.bf16.mxu0 %v8450_v58  ;;  %v8537_v57 = vld [vmem:[%s12358_s4 + $0x288] ss:$12 sps:$4 sm:$0xff]   ;;  %v8542_v58 = vld [vmem:[%s12357_s1 + $0x1c4] ss:$8 sps:$4 sm:$0xff]  }
  0x39   :  { %5823 = vmatprep.subr.bf16.mxu1 %v8452_v59  ;;  %v8545_v59 = vld [vmem:[%s12358_s4 + $0x2a4] ss:$12 sps:$4 sm:$0xff]  }
  0x3b   :  { %1536 = vmatpush1.bf16.msra.mxu0 %v8454_v60  ;;  %v8540_v60 = vld [vmem:[%s12357_s1 + $0x1c0] ss:$8 sps:$4 sm:$0xff]  }
  0x3c   :  { %5824 = vmatpush1.bf16.msra.mxu1 %v8455_v61  ;;  %1537 = vmatprep.subr.bf16.mxu0 %v8456_v62  ;;  %v8543_v61 = vld [vmem:[%s12358_s4 + $0x2a0] ss:$12 sps:$4 sm:$0xff]   ;;  %v8548_v62 = vld [vmem:[%s12357_s1 + $0x1d4] ss:$8 sps:$4 sm:$0xff]  }
  0x3d   :  { %5825 = vmatprep.subr.bf16.mxu1 %v8458_v63  ;;  %v8551_v63 = vld [vmem:[%s12358_s4 + $0x2bc] ss:$12 sps:$4 sm:$0xff]  }
  0x3f   :  { %1538 = vmatpush1.bf16.msra.mxu0 %v8460_v0  ;;  %v8546_v0 = vld [vmem:[%s12357_s1 + $0x1d0] ss:$8 sps:$4 sm:$0xff]  }
  0x40   :  { %5826 = vmatpush1.bf16.msra.mxu1 %v8461_v1  ;;  %1560 = vmatprep.subr.bf16.mxu0 %v8467_v2  ;;  %v8549_v1 = vld [vmem:[%s12358_s4 + $0x2b8] ss:$12 sps:$4 sm:$0xff]  }
  0x41   :  { %5848 = vmatprep.subr.bf16.mxu1 %v8473_v3  ;;  %v8556_v2 = vld [vmem:[%s12357_s1 + $0x1e4] ss:$8 sps:$4 sm:$0xff]   ;;  %v8561_v3 = vld [vmem:[%s12358_s4 + $0x2d4] ss:$12 sps:$4 sm:$0xff]  }
  0x42   :  { %1540 = vmatmul.mubr.bf16.vlgmr.msra.gmra.mrb[0].mxu0 %v8462_v4  ;;  %v8554_v4 = vld [vmem:[%s12357_s1 + $0x1e0] ss:$8 sps:$4 sm:$0xff]  }
  0x43   :  { %5828 = vmatmul.mubr.bf16.vlgmr.msra.gmra.mrb[0].mxu1 %v8468_v6  ;;  %1561 = vmatpush1.bf16.msra.mxu0 %v8465_v5  ;;  %v8559_v5 = vld [vmem:[%s12358_s4 + $0x2d0] ss:$12 sps:$4 sm:$0xff]  }
  0x44   :  { %5849 = vmatpush1.bf16.msra.mxu1 %v8471_v7  ;;  %1562 = vmatprep.subr.bf16.mxu0 %v8476_v8  ;;  %v8566_v6 = vld [vmem:[%s12357_s1 + $0x1f4] ss:$8 sps:$4 sm:$0xff]   ;;  %v8569_v7 = vld [vmem:[%s12358_s4 + $0x2ec] ss:$12 sps:$4 sm:$0xff]  }
  0x45   :  { %5850 = vmatprep.subr.bf16.mxu1 %v8479_v9  ;;  %1549 = vmatprep.mubr.bf16.mxu0 %v8552_v28  ;;  %v8564_v8 = vld [vmem:[%s12357_s1 + $0x1f0] ss:$8 sps:$4 sm:$0xff]   ;;  %v8567_v9 = vld [vmem:[%s12358_s4 + $0x2e8] ss:$12 sps:$4 sm:$0xff]  }
  0x46   :  { %5837 = vmatprep.mubr.bf16.mxu1 %v8557_v31  ;;  %v8596_v28 = vld [vmem:[%s12357_s1 + $0x234] ss:$8 sps:$4 sm:$0xff]  }
  0x47   :  { %1563 = vmatpush1.bf16.msra.mxu0 %v8474_v10  ;;  %v8575_v10 = vld [vmem:[%s12357_s1 + $0x204] ss:$8 sps:$4 sm:$0xff]   ;;  %v8597_v31 = vld [vmem:[%s12358_s4 + $0x348] ss:$12 sps:$4 sm:$0xff]  }
  0x48   :  { %5851 = vmatpush1.bf16.msra.mxu1 %v8477_v11  ;;  %1564 = vmatprep.subr.bf16.mxu0 %v8482_v12  ;;  %v8581_v11 = vld [vmem:[%s12358_s4 + $0x304] ss:$12 sps:$4 sm:$0xff]   ;;  %v8570_v12 = vld [vmem:[%s12359_s0 + $0x8] ss:$56 sps:$4 sm:$0xff]  }
  0x49   :  { %5852 = vmatprep.subr.bf16.mxu1 %v8485_v13  ;;  %v8573_v13 = vld [vmem:[%s12357_s1 + $0x200] ss:$8 sps:$4 sm:$0xff]  }
  0x4a   :  { %1550 = vmatmul.mubr.bf16.gmra.mrb[4].mxu0 %v8562_v34  ;;  %v8605_v34 = vld [vmem:[%s12358_s4 + $0x364] ss:$12 sps:$4 sm:$0xff]  }
  0x4b   :  { %1565 = vmatpush1.bf16.msra.mxu0 %v8480_v14  ;;  %5838 = vmatmul.mubr.bf16.gmra.mrb[4].mxu1 %v8563_v35  ;;  %v8576_v14 = vld [vmem:[%s12360_s3 + $0x8] ss:$92 sps:$4 sm:$0xff]   ;;  %v8686_v35 = vld [vmem:[%s12360_s3 + $0x14] ss:$92 sps:$4 sm:$0xff]  }
  0x4c   :  { %5853 = vmatpush1.bf16.msra.mxu1 %v8483_v15  ;;  %1566 = vmatprep.subr.bf16.mxu0 %v8488_v16  ;;  %v8579_v15 = vld [vmem:[%s12358_s4 + $0x300] ss:$12 sps:$4 sm:$0xff]   ;;  %v8584_v16 = vld [vmem:[%s12357_s1 + $0x214] ss:$8 sps:$4 sm:$0xff]  }
  0x4d   :  { %5854 = vmatprep.subr.bf16.mxu1 %v8491_v17  ;;  %1592 = vmatprep.mubr.bf16.mxu0 %v8572_v40  ;;  %v8587_v17 = vld [vmem:[%s12358_s4 + $0x31c] ss:$12 sps:$4 sm:$0xff]   ;;  %v8606_v40 = vld [vmem:[%s12357_s1 + $0x250] ss:$8 sps:$4 sm:$0xff]  }
  0x4e   :  { %5880 = vmatprep.mubr.bf16.mxu1 %v8578_v43  ;;  %v8617_v43 = vld [vmem:[%s12358_s4 + $0x394] ss:$12 sps:$4 sm:$0xff]  }
  0x4f   :  { %1567 = vmatpush1.bf16.msra.mxu0 %v8486_v18  ;;  %v8582_v18 = vld [vmem:[%s12357_s1 + $0x210] ss:$8 sps:$4 sm:$0xff]  }
  0x50   :  { %5855 = vmatpush1.bf16.msra.mxu1 %v8489_v19  ;;  %1568 = vmatprep.subr.bf16.mxu0 %v8494_v20  ;;  %v8585_v19 = vld [vmem:[%s12358_s4 + $0x318] ss:$12 sps:$4 sm:$0xff]   ;;  %v8660_v20 = vld [vmem:[%s12359_s0 + $0x7c] ss:$56 sps:$4 sm:$0xff]  }
  0x51   :  { %5856 = vmatprep.subr.bf16.mxu1 %v8497_v21  ;;  %v8590_v21 = vld [vmem:[%s12357_s1 + $0x224] ss:$8 sps:$4 sm:$0xff]  }
  0x53   :  { %1569 = vmatpush1.bf16.msra.mxu0 %v8492_v22  ;;  %v8593_v22 = vld [vmem:[%s12358_s4 + $0x334] ss:$12 sps:$4 sm:$0xff]  }
  0x54   :  { %5857 = vmatpush1.bf16.msra.mxu1 %v8495_v23  ;;  %1570 = vmatprep.subr.bf16.mxu0 %v8500_v24  ;;  %v8665_v23 = vld [vmem:[%s12360_s3 + $0xc4] ss:$92 sps:$4 sm:$0xff]  }
  0x55   :  { %5858 = vmatprep.subr.bf16.mxu1 %v8503_v25  ;;  %v8588_v24 = vld [vmem:[%s12357_s1 + $0x220] ss:$8 sps:$4 sm:$0xff]   ;;  %v8591_v25 = vld [vmem:[%s12358_s4 + $0x330] ss:$12 sps:$4 sm:$0xff]  }
  0x57   :  { %1571 = vmatpush1.bf16.msra.mxu0 %v8498_v26  ;;  %v8670_v26 = vld [vmem:[%s12359_s0 + $0x78] ss:$56 sps:$4 sm:$0xff]  }
  0x58   :  { %5859 = vmatpush1.bf16.msra.mxu1 %v8501_v27  ;;  %1572 = vmatprep.subr.bf16.mxu0 %v8506_v29  ;;  %v8671_v27 = vld [vmem:[%s12360_s3 + $0xc0] ss:$92 sps:$4 sm:$0xff]   ;;  %v8599_v29 = vld [vmem:[%s12358_s4 + $0x34c] ss:$12 sps:$4 sm:$0xff]  }
  0x59   :  { %5860 = vmatprep.subr.bf16.mxu1 %v8509_v30  ;;  %v8594_v30 = vld [vmem:[%s12357_s1 + $0x230] ss:$8 sps:$4 sm:$0xff]  }
  0x5b   :  { %1573 = vmatpush1.bf16.msra.mxu0 %v8504_v32  ;;  %v8680_v32 = vld [vmem:[%s12359_s0 + $0x14] ss:$56 sps:$4 sm:$0xff]  }
  0x5c   :  { %5861 = vmatpush1.bf16.msra.mxu1 %v8507_v33  ;;  %1574 = vmatprep.subr.bf16.mxu0 %v8512_v36  ;;  %v8602_v33 = vld [vmem:[%s12357_s1 + $0x244] ss:$8 sps:$4 sm:$0xff]   ;;  %v8600_v36 = vld [vmem:[%s12357_s1 + $0x240] ss:$8 sps:$4 sm:$0xff]  }
  0x5d   :  { %5862 = vmatprep.subr.bf16.mxu1 %v8515_v37  ;;  %v8603_v37 = vld [vmem:[%s12358_s4 + $0x360] ss:$12 sps:$4 sm:$0xff]  }
  0x5f   :  { %1575 = vmatpush1.bf16.msra.mxu0 %v8510_v38  ;;  %v8608_v38 = vld [vmem:[%s12357_s1 + $0x254] ss:$8 sps:$4 sm:$0xff]  }
  0x60   :  { %5863 = vmatpush1.bf16.msra.mxu1 %v8513_v39  ;;  %1576 = vmatprep.subr.bf16.mxu0 %v8518_v41  ;;  %v8611_v39 = vld [vmem:[%s12358_s4 + $0x37c] ss:$12 sps:$4 sm:$0xff]   ;;  %v8609_v41 = vld [vmem:[%s12358_s4 + $0x378] ss:$12 sps:$4 sm:$0xff]  }
  0x61   :  { %5864 = vmatprep.subr.bf16.mxu1 %v8521_v42  ;;  %v8614_v42 = vld [vmem:[%s12357_s1 + $0x264] ss:$8 sps:$4 sm:$0xff]  }
  0x63   :  { %1577 = vmatpush1.bf16.msra.mxu0 %v8516_v44  ;;  %v8612_v44 = vld [vmem:[%s12357_s1 + $0x260] ss:$8 sps:$4 sm:$0xff]  }
  0x64   :  { %5865 = vmatpush1.bf16.msra.mxu1 %v8519_v45  ;;  %1578 = vmatprep.subr.bf16.mxu0 %v8524_v46  ;;  %v8615_v45 = vld [vmem:[%s12358_s4 + $0x390] ss:$12 sps:$4 sm:$0xff]  }
  0x65   :  { %5866 = vmatprep.subr.bf16.mxu1 %v8527_v47  ;;  %v8620_v46 = vld [vmem:[%s12357_s1 + $0x274] ss:$8 sps:$4 sm:$0xff]   ;;  %v8623_v47 = vld [vmem:[%s12358_s4 + $0x3ac] ss:$12 sps:$4 sm:$0xff]  }
  0x67   :  { %1579 = vmatpush1.bf16.msra.mxu0 %v8522_v48  ;;  %v8618_v48 = vld [vmem:[%s12357_s1 + $0x270] ss:$8 sps:$4 sm:$0xff]  }
  0x68   :  { %5867 = vmatpush1.bf16.msra.mxu1 %v8525_v49  ;;  %1580 = vmatprep.subr.bf16.mxu0 %v8530_v50  ;;  %v8621_v49 = vld [vmem:[%s12358_s4 + $0x3a8] ss:$12 sps:$4 sm:$0xff]   ;;  %v8626_v50 = vld [vmem:[%s12357_s1 + $0x284] ss:$8 sps:$4 sm:$0xff]  }
  0x69   :  { %5868 = vmatprep.subr.bf16.mxu1 %v8533_v51  ;;  %v8629_v51 = vld [vmem:[%s12358_s4 + $0x3c4] ss:$12 sps:$4 sm:$0xff]  }
  0x6b   :  { %1581 = vmatpush1.bf16.msra.mxu0 %v8528_v52  ;;  %v8624_v52 = vld [vmem:[%s12357_s1 + $0x280] ss:$8 sps:$4 sm:$0xff]  }
  0x6c   :  { %5869 = vmatpush1.bf16.msra.mxu1 %v8531_v53  ;;  %1582 = vmatprep.subr.bf16.mxu0 %v8536_v54  ;;  %v8627_v53 = vld [vmem:[%s12358_s4 + $0x3c0] ss:$12 sps:$4 sm:$0xff]   ;;  %v8632_v54 = vld [vmem:[%s12357_s1 + $0x294] ss:$8 sps:$4 sm:$0xff]  }
  0x6d   :  { %5870 = vmatprep.subr.bf16.mxu1 %v8539_v55  ;;  %v8635_v55 = vld [vmem:[%s12358_s4 + $0x3dc] ss:$12 sps:$4 sm:$0xff]  }
  0x6f   :  { %1583 = vmatpush1.bf16.msra.mxu0 %v8534_v56  ;;  %v8630_v56 = vld [vmem:[%s12357_s1 + $0x290] ss:$8 sps:$4 sm:$0xff]  }
  0x70   :  { %5871 = vmatpush1.bf16.msra.mxu1 %v8537_v57  ;;  %1584 = vmatprep.subr.bf16.mxu0 %v8542_v58  ;;  %v8633_v57 = vld [vmem:[%s12358_s4 + $0x3d8] ss:$12 sps:$4 sm:$0xff]  }
  0x71   :  { %5872 = vmatprep.subr.bf16.mxu1 %v8545_v59  ;;  %v8638_v58 = vld [vmem:[%s12357_s1 + $0x2a4] ss:$8 sps:$4 sm:$0xff]   ;;  %v8641_v59 = vld [vmem:[%s12358_s4 + $0x3f4] ss:$12 sps:$4 sm:$0xff]  }
  0x73   :  { %1585 = vmatpush1.bf16.msra.mxu0 %v8540_v60  ;;  %v8636_v60 = vld [vmem:[%s12357_s1 + $0x2a0] ss:$8 sps:$4 sm:$0xff]  }
  0x74   :  { %5873 = vmatpush1.bf16.msra.mxu1 %v8543_v61  ;;  %1586 = vmatprep.subr.bf16.mxu0 %v8548_v62  ;;  %v8639_v61 = vld [vmem:[%s12358_s4 + $0x3f0] ss:$12 sps:$4 sm:$0xff]  }
  0x75   :  { %5874 = vmatprep.subr.bf16.mxu1 %v8551_v63  ;;  %v8644_v62 = vld [vmem:[%s12357_s1 + $0x2b4] ss:$8 sps:$4 sm:$0xff]   ;;  %v8647_v63 = vld [vmem:[%s12358_s4 + $0x40c] ss:$12 sps:$4 sm:$0xff]  }
  0x77   :  { %1587 = vmatpush1.bf16.msra.mxu0 %v8546_v0  ;;  %v8642_v0 = vld [vmem:[%s12357_s1 + $0x2b0] ss:$8 sps:$4 sm:$0xff]  }
  0x78   :  { %5875 = vmatpush1.bf16.msra.mxu1 %v8549_v1  ;;  %1588 = vmatprep.subr.bf16.mxu0 %v8556_v2  ;;  %v8645_v1 = vld [vmem:[%s12358_s4 + $0x408] ss:$12 sps:$4 sm:$0xff]   ;;  %v8650_v2 = vld [vmem:[%s12357_s1 + $0x2c4] ss:$8 sps:$4 sm:$0xff]  }
  0x79   :  { %5876 = vmatprep.subr.bf16.mxu1 %v8561_v3  ;;  %v8653_v3 = vld [vmem:[%s12358_s4 + $0x424] ss:$12 sps:$4 sm:$0xff]  }
  0x7b   :  { %1589 = vmatpush1.bf16.msra.mxu0 %v8554_v4  ;;  %v8648_v4 = vld [vmem:[%s12357_s1 + $0x2c0] ss:$8 sps:$4 sm:$0xff]  }
  0x7c   :  { %5877 = vmatpush1.bf16.msra.mxu1 %v8559_v5  ;;  %1590 = vmatprep.subr.bf16.mxu0 %v8566_v6  ;;  %v8651_v5 = vld [vmem:[%s12358_s4 + $0x420] ss:$12 sps:$4 sm:$0xff]   ;;  %v8656_v6 = vld [vmem:[%s12357_s1 + $0x2d4] ss:$8 sps:$4 sm:$0xff]  }
  0x7d   :  { %5878 = vmatprep.subr.bf16.mxu1 %v8569_v7  ;;  %v8659_v7 = vld [vmem:[%s12358_s4 + $0x43c] ss:$12 sps:$4 sm:$0xff]  }
  0x7f   :  { %1591 = vmatpush1.bf16.msra.mxu0 %v8564_v8  ;;  %v8654_v8 = vld [vmem:[%s12357_s1 + $0x2d0] ss:$8 sps:$4 sm:$0xff]  }
  0x80   :  { %5879 = vmatpush1.bf16.msra.mxu1 %v8567_v9  ;;  %1613 = vmatprep.subr.bf16.mxu0 %v8575_v10  ;;  %v8657_v9 = vld [vmem:[%s12358_s4 + $0x438] ss:$12 sps:$4 sm:$0xff]  }
  0x81   :  { %5901 = vmatprep.subr.bf16.mxu1 %v8581_v11  ;;  %v8664_v10 = vld [vmem:[%s12357_s1 + $0x2e4] ss:$8 sps:$4 sm:$0xff]   ;;  %v8669_v11 = vld [vmem:[%s12358_s4 + $0x454] ss:$12 sps:$4 sm:$0xff]  }
  0x82   :  { %1593 = vmatmul.mubr.bf16.vlgmr.msra.gmra.mrb[0].mxu0 %v8570_v12  ;;  %v8662_v12 = vld [vmem:[%s12357_s1 + $0x2e0] ss:$8 sps:$4 sm:$0xff]  }
  0x83   :  { %5881 = vmatmul.mubr.bf16.vlgmr.msra.gmra.mrb[0].mxu1 %v8576_v14  ;;  %1614 = vmatpush1.bf16.msra.mxu0 %v8573_v13  ;;  %v8667_v13 = vld [vmem:[%s12358_s4 + $0x450] ss:$12 sps:$4 sm:$0xff]  }
  0x84   :  { %5902 = vmatpush1.bf16.msra.mxu1 %v8579_v15  ;;  %1615 = vmatprep.subr.bf16.mxu0 %v8584_v16  ;;  %v8674_v14 = vld [vmem:[%s12357_s1 + $0x2f4] ss:$8 sps:$4 sm:$0xff]   ;;  %v8677_v15 = vld [vmem:[%s12358_s4 + $0x46c] ss:$12 sps:$4 sm:$0xff]  }
  0x85   :  { %5903 = vmatprep.subr.bf16.mxu1 %v8587_v17  ;;  %1602 = vmatprep.mubr.bf16.mxu0 %v8660_v20  ;;  %v8672_v16 = vld [vmem:[%s12357_s1 + $0x2f0] ss:$8 sps:$4 sm:$0xff]   ;;  %v8675_v17 = vld [vmem:[%s12358_s4 + $0x468] ss:$12 sps:$4 sm:$0xff]  }
  0x86   :  { %5890 = vmatprep.mubr.bf16.mxu1 %v8665_v23  ;;  %v8678_v20 = vld [vmem:[%s12359_s0 + $0x10] ss:$56 sps:$4 sm:$0xff]   ;;  %v8687_v23 = vld [vmem:[%s12358_s4 + $0x480] ss:$12 sps:$4 sm:$0xff]  }
  0x87   :  { %1616 = vmatpush1.bf16.msra.mxu0 %v8582_v18  ;;  %v8683_v18 = vld [vmem:[%s12357_s1 + $0x304] ss:$8 sps:$4 sm:$0xff]  }
  0x88   :  { %5904 = vmatpush1.bf16.msra.mxu1 %v8585_v19  ;;  %1617 = vmatprep.subr.bf16.mxu0 %v8590_v21  ;;  %v8689_v19 = vld [vmem:[%s12358_s4 + $0x484] ss:$12 sps:$4 sm:$0xff]   ;;  %v8681_v21 = vld [vmem:[%s12357_s1 + $0x300] ss:$8 sps:$4 sm:$0xff]  }
  0x89   :  { %5905 = vmatprep.subr.bf16.mxu1 %v8593_v22  ;;  %v8684_v22 = vld [vmem:[%s12360_s3 + $0x10] ss:$92 sps:$4 sm:$0xff]  }
  0x8a   :  { %1603 = vmatmul.mubr.bf16.gmra.mrb[4].mxu0 %v8670_v26  ;;  %v8768_v26 = vld [vmem:[%s12359_s0 + $0x84] ss:$56 sps:$4 sm:$0xff]  }
  0x8b   :  { %5891 = vmatmul.mubr.bf16.gmra.mrb[4].mxu1 %v8671_v27  ;;  %1618 = vmatpush1.bf16.msra.mxu0 %v8588_v24  ;;  %v8692_v24 = vld [vmem:[%s12357_s1 + $0x314] ss:$8 sps:$4 sm:$0xff]   ;;  %v8773_v27 = vld [vmem:[%s12360_s3 + $0xcc] ss:$92 sps:$4 sm:$0xff]  }
  0x8c   :  { %5906 = vmatpush1.bf16.msra.mxu1 %v8591_v25  ;;  %1619 = vmatprep.subr.bf16.mxu0 %v8596_v28  ;;  %v8695_v25 = vld [vmem:[%s12358_s4 + $0x49c] ss:$12 sps:$4 sm:$0xff]   ;;  %v8690_v28 = vld [vmem:[%s12357_s1 + $0x310] ss:$8 sps:$4 sm:$0xff]  }
  0x8d   :  { %5907 = vmatprep.subr.bf16.mxu1 %v8599_v29  ;;  %1645 = vmatprep.mubr.bf16.mxu0 %v8680_v32  ;;  %v8693_v29 = vld [vmem:[%s12358_s4 + $0x498] ss:$12 sps:$4 sm:$0xff]   ;;  %v8696_v32 = vld [vmem:[%s12357_s1 + $0x320] ss:$8 sps:$4 sm:$0xff]  }
  0x8e   :  { %5933 = vmatprep.mubr.bf16.mxu1 %v8686_v35  ;;  %v8779_v35 = vld [vmem:[%s12360_s3 + $0xc8] ss:$92 sps:$4 sm:$0xff]  }
  0x8f   :  { %1620 = vmatpush1.bf16.msra.mxu0 %v8594_v30  ;;  %v8698_v30 = vld [vmem:[%s12357_s1 + $0x324] ss:$8 sps:$4 sm:$0xff]  }
  0x90   :  { %5908 = vmatpush1.bf16.msra.mxu1 %v8597_v31  ;;  %1621 = vmatprep.subr.bf16.mxu0 %v8602_v33  ;;  %v8701_v31 = vld [vmem:[%s12358_s4 + $0x4b4] ss:$12 sps:$4 sm:$0xff]   ;;  %v8699_v33 = vld [vmem:[%s12358_s4 + $0x4b0] ss:$12 sps:$4 sm:$0xff]  }
  0x91   :  { %5909 = vmatprep.subr.bf16.mxu1 %v8605_v34  ;;  %v8778_v34 = vld [vmem:[%s12359_s0 + $0x80] ss:$56 sps:$4 sm:$0xff]  }
  0x93   :  { %1622 = vmatpush1.bf16.msra.mxu0 %v8600_v36  ;;  %v8704_v36 = vld [vmem:[%s12357_s1 + $0x334] ss:$8 sps:$4 sm:$0xff]  }
  0x94   :  { %5910 = vmatpush1.bf16.msra.mxu1 %v8603_v37  ;;  %1623 = vmatprep.subr.bf16.mxu0 %v8608_v38  ;;  %v8707_v37 = vld [vmem:[%s12358_s4 + $0x4cc] ss:$12 sps:$4 sm:$0xff]   ;;  %v8788_v38 = vld [vmem:[%s12359_s0 + $0x1c] ss:$56 sps:$4 sm:$0xff]  }
  0x95   :  { %5911 = vmatprep.subr.bf16.mxu1 %v8611_v39  ;;  %v8794_v39 = vld [vmem:[%s12360_s3 + $0x1c] ss:$92 sps:$4 sm:$0xff]  }
  0x97   :  { %1624 = vmatpush1.bf16.msra.mxu0 %v8606_v40  ;;  %v8702_v40 = vld [vmem:[%s12357_s1 + $0x330] ss:$8 sps:$4 sm:$0xff]  }
  0x98   :  { %5912 = vmatpush1.bf16.msra.mxu1 %v8609_v41  ;;  %1625 = vmatprep.subr.bf16.mxu0 %v8614_v42  ;;  %v8705_v41 = vld [vmem:[%s12358_s4 + $0x4c8] ss:$12 sps:$4 sm:$0xff]   ;;  %v8710_v42 = vld [vmem:[%s12357_s1 + $0x344] ss:$8 sps:$4 sm:$0xff]  }
  0x99   :  { %5913 = vmatprep.subr.bf16.mxu1 %v8617_v43  ;;  %v8713_v43 = vld [vmem:[%s12358_s4 + $0x4e4] ss:$12 sps:$4 sm:$0xff]  }
  0x9b   :  { %1626 = vmatpush1.bf16.msra.mxu0 %v8612_v44  ;;  %v8708_v44 = vld [vmem:[%s12357_s1 + $0x340] ss:$8 sps:$4 sm:$0xff]  }
  0x9c   :  { %5914 = vmatpush1.bf16.msra.mxu1 %v8615_v45  ;;  %1627 = vmatprep.subr.bf16.mxu0 %v8620_v46  ;;  %v8711_v45 = vld [vmem:[%s12358_s4 + $0x4e0] ss:$12 sps:$4 sm:$0xff]   ;;  %v8716_v46 = vld [vmem:[%s12357_s1 + $0x354] ss:$8 sps:$4 sm:$0xff]  }
  0x9d   :  { %5915 = vmatprep.subr.bf16.mxu1 %v8623_v47  ;;  %v8719_v47 = vld [vmem:[%s12358_s4 + $0x4fc] ss:$12 sps:$4 sm:$0xff]  }
  0x9f   :  { %1628 = vmatpush1.bf16.msra.mxu0 %v8618_v48  ;;  %v8714_v48 = vld [vmem:[%s12357_s1 + $0x350] ss:$8 sps:$4 sm:$0xff]  }
  0xa0   :  { %5916 = vmatpush1.bf16.msra.mxu1 %v8621_v49  ;;  %1629 = vmatprep.subr.bf16.mxu0 %v8626_v50  ;;  %v8717_v49 = vld [vmem:[%s12358_s4 + $0x4f8] ss:$12 sps:$4 sm:$0xff]  }
  0xa1   :  { %5917 = vmatprep.subr.bf16.mxu1 %v8629_v51  ;;  %v8722_v50 = vld [vmem:[%s12357_s1 + $0x364] ss:$8 sps:$4 sm:$0xff]   ;;  %v8725_v51 = vld [vmem:[%s12358_s4 + $0x514] ss:$12 sps:$4 sm:$0xff]  }
  0xa3   :  { %1630 = vmatpush1.bf16.msra.mxu0 %v8624_v52  ;;  %v8720_v52 = vld [vmem:[%s12357_s1 + $0x360] ss:$8 sps:$4 sm:$0xff]  }
  0xa4   :  { %5918 = vmatpush1.bf16.msra.mxu1 %v8627_v53  ;;  %1631 = vmatprep.subr.bf16.mxu0 %v8632_v54  ;;  %v8723_v53 = vld [vmem:[%s12358_s4 + $0x510] ss:$12 sps:$4 sm:$0xff]  }
  0xa5   :  { %5919 = vmatprep.subr.bf16.mxu1 %v8635_v55  ;;  %v8728_v54 = vld [vmem:[%s12357_s1 + $0x374] ss:$8 sps:$4 sm:$0xff]   ;;  %v8731_v55 = vld [vmem:[%s12358_s4 + $0x52c] ss:$12 sps:$4 sm:$0xff]  }
  0xa7   :  { %1632 = vmatpush1.bf16.msra.mxu0 %v8630_v56  ;;  %v8726_v56 = vld [vmem:[%s12357_s1 + $0x370] ss:$8 sps:$4 sm:$0xff]  }
  0xa8   :  { %5920 = vmatpush1.bf16.msra.mxu1 %v8633_v57  ;;  %1633 = vmatprep.subr.bf16.mxu0 %v8638_v58  ;;  %v8729_v57 = vld [vmem:[%s12358_s4 + $0x528] ss:$12 sps:$4 sm:$0xff]   ;;  %v8734_v58 = vld [vmem:[%s12357_s1 + $0x384] ss:$8 sps:$4 sm:$0xff]  }
  0xa9   :  { %5921 = vmatprep.subr.bf16.mxu1 %v8641_v59  ;;  %v8737_v59 = vld [vmem:[%s12358_s4 + $0x544] ss:$12 sps:$4 sm:$0xff]  }
  0xab   :  { %1634 = vmatpush1.bf16.msra.mxu0 %v8636_v60  ;;  %v8732_v60 = vld [vmem:[%s12357_s1 + $0x380] ss:$8 sps:$4 sm:$0xff]  }
  0xac   :  { %5922 = vmatpush1.bf16.msra.mxu1 %v8639_v61  ;;  %1635 = vmatprep.subr.bf16.mxu0 %v8644_v62  ;;  %v8735_v61 = vld [vmem:[%s12358_s4 + $0x540] ss:$12 sps:$4 sm:$0xff]   ;;  %v8740_v62 = vld [vmem:[%s12357_s1 + $0x394] ss:$8 sps:$4 sm:$0xff]  }
  0xad   :  { %5923 = vmatprep.subr.bf16.mxu1 %v8647_v63  ;;  %v8743_v63 = vld [vmem:[%s12358_s4 + $0x55c] ss:$12 sps:$4 sm:$0xff]  }
  0xaf   :  { %1636 = vmatpush1.bf16.msra.mxu0 %v8642_v0  ;;  %v8738_v0 = vld [vmem:[%s12357_s1 + $0x390] ss:$8 sps:$4 sm:$0xff]  }
  0xb0   :  { %5924 = vmatpush1.bf16.msra.mxu1 %v8645_v1  ;;  %1637 = vmatprep.subr.bf16.mxu0 %v8650_v2  ;;  %v8741_v1 = vld [vmem:[%s12358_s4 + $0x558] ss:$12 sps:$4 sm:$0xff]  }
  0xb1   :  { %5925 = vmatprep.subr.bf16.mxu1 %v8653_v3  ;;  %v8746_v2 = vld [vmem:[%s12357_s1 + $0x3a4] ss:$8 sps:$4 sm:$0xff]   ;;  %v8749_v3 = vld [vmem:[%s12358_s4 + $0x574] ss:$12 sps:$4 sm:$0xff]  }
  0xb3   :  { %1638 = vmatpush1.bf16.msra.mxu0 %v8648_v4  ;;  %v8744_v4 = vld [vmem:[%s12357_s1 + $0x3a0] ss:$8 sps:$4 sm:$0xff]  }
  0xb4   :  { %5926 = vmatpush1.bf16.msra.mxu1 %v8651_v5  ;;  %1639 = vmatprep.subr.bf16.mxu0 %v8656_v6  ;;  %v8747_v5 = vld [vmem:[%s12358_s4 + $0x570] ss:$12 sps:$4 sm:$0xff]  }
  0xb5   :  { %5927 = vmatprep.subr.bf16.mxu1 %v8659_v7  ;;  %v8752_v6 = vld [vmem:[%s12357_s1 + $0x3b4] ss:$8 sps:$4 sm:$0xff]   ;;  %v8755_v7 = vld [vmem:[%s12358_s4 + $0x58c] ss:$12 sps:$4 sm:$0xff]  }
  0xb7   :  { %1640 = vmatpush1.bf16.msra.mxu0 %v8654_v8  ;;  %v8750_v8 = vld [vmem:[%s12357_s1 + $0x3b0] ss:$8 sps:$4 sm:$0xff]  }
  0xb8   :  { %5928 = vmatpush1.bf16.msra.mxu1 %v8657_v9  ;;  %1641 = vmatprep.subr.bf16.mxu0 %v8664_v10  ;;  %v8753_v9 = vld [vmem:[%s12358_s4 + $0x588] ss:$12 sps:$4 sm:$0xff]   ;;  %v8758_v10 = vld [vmem:[%s12357_s1 + $0x3c4] ss:$8 sps:$4 sm:$0xff]  }
  0xb9   :  { %5929 = vmatprep.subr.bf16.mxu1 %v8669_v11  ;;  %v8761_v11 = vld [vmem:[%s12358_s4 + $0x5a4] ss:$12 sps:$4 sm:$0xff]  }
  0xbb   :  { %1642 = vmatpush1.bf16.msra.mxu0 %v8662_v12  ;;  %v8756_v12 = vld [vmem:[%s12357_s1 + $0x3c0] ss:$8 sps:$4 sm:$0xff]  }
  0xbc   :  { %5930 = vmatpush1.bf16.msra.mxu1 %v8667_v13  ;;  %1643 = vmatprep.subr.bf16.mxu0 %v8674_v14  ;;  %v8759_v13 = vld [vmem:[%s12358_s4 + $0x5a0] ss:$12 sps:$4 sm:$0xff]   ;;  %v8764_v14 = vld [vmem:[%s12357_s1 + $0x3d4] ss:$8 sps:$4 sm:$0xff]  }
  0xbd   :  { %5931 = vmatprep.subr.bf16.mxu1 %v8677_v15  ;;  %v8767_v15 = vld [vmem:[%s12358_s4 + $0x5bc] ss:$12 sps:$4 sm:$0xff]  }
  0xbf   :  { %1644 = vmatpush1.bf16.msra.mxu0 %v8672_v16  ;;  %v8762_v16 = vld [vmem:[%s12357_s1 + $0x3d0] ss:$8 sps:$4 sm:$0xff]  }
  0xc0   :  { %5932 = vmatpush1.bf16.msra.mxu1 %v8675_v17  ;;  %1666 = vmatprep.subr.bf16.mxu0 %v8683_v18  ;;  %v8765_v17 = vld [vmem:[%s12358_s4 + $0x5b8] ss:$12 sps:$4 sm:$0xff]  }
  0xc1   :  { %5954 = vmatprep.subr.bf16.mxu1 %v8689_v19  ;;  %v8772_v18 = vld [vmem:[%s12357_s1 + $0x3e4] ss:$8 sps:$4 sm:$0xff]   ;;  %v8777_v19 = vld [vmem:[%s12358_s4 + $0x5d4] ss:$12 sps:$4 sm:$0xff]  }
  0xc2   :  { %1646 = vmatmul.mubr.bf16.vlgmr.msra.gmra.mrb[0].mxu0 %v8678_v20  ;;  %v8770_v20 = vld [vmem:[%s12357_s1 + $0x3e0] ss:$8 sps:$4 sm:$0xff]  }
  0xc3   :  { %5934 = vmatmul.mubr.bf16.vlgmr.msra.gmra.mrb[0].mxu1 %v8684_v22  ;;  %1667 = vmatpush1.bf16.msra.mxu0 %v8681_v21  ;;  %v8775_v21 = vld [vmem:[%s12358_s4 + $0x5d0] ss:$12 sps:$4 sm:$0xff]  }
  0xc4   :  { %5955 = vmatpush1.bf16.msra.mxu1 %v8687_v23  ;;  %1668 = vmatprep.subr.bf16.mxu0 %v8692_v24  ;;  %v8782_v22 = vld [vmem:[%s12357_s1 + $0x3f4] ss:$8 sps:$4 sm:$0xff]   ;;  %v8785_v23 = vld [vmem:[%s12358_s4 + $0x5ec] ss:$12 sps:$4 sm:$0xff]  }
  0xc5   :  { %5956 = vmatprep.subr.bf16.mxu1 %v8695_v25  ;;  %1655 = vmatprep.mubr.bf16.mxu0 %v8768_v26  ;;  %v8780_v24 = vld [vmem:[%s12357_s1 + $0x3f0] ss:$8 sps:$4 sm:$0xff]   ;;  %v8783_v25 = vld [vmem:[%s12358_s4 + $0x5e8] ss:$12 sps:$4 sm:$0xff]   ;;  %v8791_v26 = vld [vmem:[%s12357_s1 + $0x404] ss:$8 sps:$4 sm:$0xff]  }
  0xc6   :  { %5943 = vmatprep.mubr.bf16.mxu1 %v8773_v27  ;;  %v8797_v27 = vld [vmem:[%s12358_s4 + $0x604] ss:$12 sps:$4 sm:$0xff]  }
  0xc7   :  { %1669 = vmatpush1.bf16.msra.mxu0 %v8690_v28  ;;  %v8786_v28 = vld [vmem:[%s12359_s0 + $0x18] ss:$56 sps:$4 sm:$0xff]  }
  0xc8   :  { %5957 = vmatpush1.bf16.msra.mxu1 %v8693_v29  ;;  %1670 = vmatprep.subr.bf16.mxu0 %v8698_v30  ;;  %v8789_v29 = vld [vmem:[%s12357_s1 + $0x400] ss:$8 sps:$4 sm:$0xff]   ;;  %v8792_v30 = vld [vmem:[%s12360_s3 + $0x18] ss:$92 sps:$4 sm:$0xff]  }
  0xc9   :  { %5958 = vmatprep.subr.bf16.mxu1 %v8701_v31  ;;  %v8795_v31 = vld [vmem:[%s12358_s4 + $0x600] ss:$12 sps:$4 sm:$0xff]  }
  0xca   :  { %1656 = vmatmul.mubr.bf16.gmra.mrb[4].mxu0 %v8778_v34  ;;  %v8876_v34 = vld [vmem:[%s12359_s0 + $0x8c] ss:$56 sps:$4 sm:$0xff]  }
  0xcb   :  { %5944 = vmatmul.mubr.bf16.gmra.mrb[4].mxu1 %v8779_v35  ;;  %1671 = vmatpush1.bf16.msra.mxu0 %v8696_v32  ;;  %v8800_v32 = vld [vmem:[%s12357_s1 + $0x414] ss:$8 sps:$4 sm:$0xff]  }
  0xcc   :  { %5959 = vmatpush1.bf16.msra.mxu1 %v8699_v33  ;;  %1672 = vmatprep.subr.bf16.mxu0 %v8704_v36  ;;  %v8803_v33 = vld [vmem:[%s12358_s4 + $0x61c] ss:$12 sps:$4 sm:$0xff]   ;;  %v8881_v35 = vld [vmem:[%s12360_s3 + $0xd4] ss:$92 sps:$4 sm:$0xff]  }
  0xcd   :  { %5960 = vmatprep.subr.bf16.mxu1 %v8707_v37  ;;  %1698 = vmatprep.mubr.bf16.mxu0 %v8788_v38  ;;  %v8798_v36 = vld [vmem:[%s12357_s1 + $0x410] ss:$8 sps:$4 sm:$0xff]   ;;  %v8806_v38 = vld [vmem:[%s12357_s1 + $0x424] ss:$8 sps:$4 sm:$0xff]  }
  0xce   :  { %5986 = vmatprep.mubr.bf16.mxu1 %v8794_v39  ;;  %v8801_v37 = vld [vmem:[%s12358_s4 + $0x618] ss:$12 sps:$4 sm:$0xff]   ;;  %v8809_v39 = vld [vmem:[%s12358_s4 + $0x634] ss:$12 sps:$4 sm:$0xff]  }
  0xcf   :  { %1673 = vmatpush1.bf16.msra.mxu0 %v8702_v40  ;;  %v8804_v40 = vld [vmem:[%s12357_s1 + $0x420] ss:$8 sps:$4 sm:$0xff]  }
  0xd0   :  { %5961 = vmatpush1.bf16.msra.mxu1 %v8705_v41  ;;  %1674 = vmatprep.subr.bf16.mxu0 %v8710_v42  ;;  %v8807_v41 = vld [vmem:[%s12358_s4 + $0x630] ss:$12 sps:$4 sm:$0xff]   ;;  %v8886_v42 = vld [vmem:[%s12359_s0 + $0x88] ss:$56 sps:$4 sm:$0xff]  }
  0xd1   :  { %5962 = vmatprep.subr.bf16.mxu1 %v8713_v43  ;;  %v8887_v43 = vld [vmem:[%s12360_s3 + $0xd0] ss:$92 sps:$4 sm:$0xff]  }
  0xd3   :  { %1675 = vmatpush1.bf16.msra.mxu0 %v8708_v44  ;;  %v8812_v44 = vld [vmem:[%s12357_s1 + $0x434] ss:$8 sps:$4 sm:$0xff]  }
  0xd4   :  { %5963 = vmatpush1.bf16.msra.mxu1 %v8711_v45  ;;  %1676 = vmatprep.subr.bf16.mxu0 %v8716_v46  ;;  %v8815_v45 = vld [vmem:[%s12358_s4 + $0x64c] ss:$12 sps:$4 sm:$0xff]   ;;  %v8896_v46 = vld [vmem:[%s12359_s0 + $0x24] ss:$56 sps:$4 sm:$0xff]  }
  0xd5   :  { %5964 = vmatprep.subr.bf16.mxu1 %v8719_v47  ;;  %v8902_v47 = vld [vmem:[%s12360_s3 + $0x24] ss:$92 sps:$4 sm:$0xff]  }
  0xd7   :  { %1677 = vmatpush1.bf16.msra.mxu0 %v8714_v48  ;;  %v8810_v48 = vld [vmem:[%s12357_s1 + $0x430] ss:$8 sps:$4 sm:$0xff]  }
  0xd8   :  { %5965 = vmatpush1.bf16.msra.mxu1 %v8717_v49  ;;  %1678 = vmatprep.subr.bf16.mxu0 %v8722_v50  ;;  %v8813_v49 = vld [vmem:[%s12358_s4 + $0x648] ss:$12 sps:$4 sm:$0xff]   ;;  %v8818_v50 = vld [vmem:[%s12357_s1 + $0x444] ss:$8 sps:$4 sm:$0xff]  }
  0xd9   :  { %5966 = vmatprep.subr.bf16.mxu1 %v8725_v51  ;;  %v8821_v51 = vld [vmem:[%s12358_s4 + $0x664] ss:$12 sps:$4 sm:$0xff]  }
  0xdb   :  { %1679 = vmatpush1.bf16.msra.mxu0 %v8720_v52  ;;  %v8816_v52 = vld [vmem:[%s12357_s1 + $0x440] ss:$8 sps:$4 sm:$0xff]  }
  0xdc   :  { %5967 = vmatpush1.bf16.msra.mxu1 %v8723_v53  ;;  %1680 = vmatprep.subr.bf16.mxu0 %v8728_v54  ;;  %v8819_v53 = vld [vmem:[%s12358_s4 + $0x660] ss:$12 sps:$4 sm:$0xff]   ;;  %v8824_v54 = vld [vmem:[%s12357_s1 + $0x454] ss:$8 sps:$4 sm:$0xff]  }
  0xdd   :  { %5968 = vmatprep.subr.bf16.mxu1 %v8731_v55  ;;  %v8827_v55 = vld [vmem:[%s12358_s4 + $0x67c] ss:$12 sps:$4 sm:$0xff]  }
  0xdf   :  { %1681 = vmatpush1.bf16.msra.mxu0 %v8726_v56  ;;  %v8822_v56 = vld [vmem:[%s12357_s1 + $0x450] ss:$8 sps:$4 sm:$0xff]  }
  0xe0   :  { %5969 = vmatpush1.bf16.msra.mxu1 %v8729_v57  ;;  %1682 = vmatprep.subr.bf16.mxu0 %v8734_v58  ;;  %v8825_v57 = vld [vmem:[%s12358_s4 + $0x678] ss:$12 sps:$4 sm:$0xff]  }
  0xe1   :  { %5970 = vmatprep.subr.bf16.mxu1 %v8737_v59  ;;  %v8830_v58 = vld [vmem:[%s12357_s1 + $0x464] ss:$8 sps:$4 sm:$0xff]   ;;  %v8833_v59 = vld [vmem:[%s12358_s4 + $0x694] ss:$12 sps:$4 sm:$0xff]  }
  0xe3   :  { %1683 = vmatpush1.bf16.msra.mxu0 %v8732_v60  ;;  %v8828_v60 = vld [vmem:[%s12357_s1 + $0x460] ss:$8 sps:$4 sm:$0xff]  }
  0xe4   :  { %5971 = vmatpush1.bf16.msra.mxu1 %v8735_v61  ;;  %1684 = vmatprep.subr.bf16.mxu0 %v8740_v62  ;;  %v8831_v61 = vld [vmem:[%s12358_s4 + $0x690] ss:$12 sps:$4 sm:$0xff]  }
  0xe5   :  { %5972 = vmatprep.subr.bf16.mxu1 %v8743_v63  ;;  %v8836_v62 = vld [vmem:[%s12357_s1 + $0x474] ss:$8 sps:$4 sm:$0xff]   ;;  %v8839_v63 = vld [vmem:[%s12358_s4 + $0x6ac] ss:$12 sps:$4 sm:$0xff]  }
  0xe7   :  { %1685 = vmatpush1.bf16.msra.mxu0 %v8738_v0  ;;  %v8834_v0 = vld [vmem:[%s12357_s1 + $0x470] ss:$8 sps:$4 sm:$0xff]  }
  0xe8   :  { %5973 = vmatpush1.bf16.msra.mxu1 %v8741_v1  ;;  %1686 = vmatprep.subr.bf16.mxu0 %v8746_v2  ;;  %v8837_v1 = vld [vmem:[%s12358_s4 + $0x6a8] ss:$12 sps:$4 sm:$0xff]   ;;  %v8842_v2 = vld [vmem:[%s12357_s1 + $0x484] ss:$8 sps:$4 sm:$0xff]  }
  0xe9   :  { %5974 = vmatprep.subr.bf16.mxu1 %v8749_v3  ;;  %v8845_v3 = vld [vmem:[%s12358_s4 + $0x6c4] ss:$12 sps:$4 sm:$0xff]  }
  0xeb   :  { %1687 = vmatpush1.bf16.msra.mxu0 %v8744_v4  ;;  %v8840_v4 = vld [vmem:[%s12357_s1 + $0x480] ss:$8 sps:$4 sm:$0xff]  }
  0xec   :  { %5975 = vmatpush1.bf16.msra.mxu1 %v8747_v5  ;;  %1688 = vmatprep.subr.bf16.mxu0 %v8752_v6  ;;  %v8843_v5 = vld [vmem:[%s12358_s4 + $0x6c0] ss:$12 sps:$4 sm:$0xff]   ;;  %v8848_v6 = vld [vmem:[%s12357_s1 + $0x494] ss:$8 sps:$4 sm:$0xff]  }
  0xed   :  { %5976 = vmatprep.subr.bf16.mxu1 %v8755_v7  ;;  %v8851_v7 = vld [vmem:[%s12358_s4 + $0x6dc] ss:$12 sps:$4 sm:$0xff]  }
  0xef   :  { %1689 = vmatpush1.bf16.msra.mxu0 %v8750_v8  ;;  %v8846_v8 = vld [vmem:[%s12357_s1 + $0x490] ss:$8 sps:$4 sm:$0xff]  }
  0xf0   :  { %5977 = vmatpush1.bf16.msra.mxu1 %v8753_v9  ;;  %1690 = vmatprep.subr.bf16.mxu0 %v8758_v10  ;;  %v8849_v9 = vld [vmem:[%s12358_s4 + $0x6d8] ss:$12 sps:$4 sm:$0xff]  }
  0xf1   :  { %5978 = vmatprep.subr.bf16.mxu1 %v8761_v11  ;;  %v8854_v10 = vld [vmem:[%s12357_s1 + $0x4a4] ss:$8 sps:$4 sm:$0xff]   ;;  %v8857_v11 = vld [vmem:[%s12358_s4 + $0x6f4] ss:$12 sps:$4 sm:$0xff]  }
  0xf3   :  { %1691 = vmatpush1.bf16.msra.mxu0 %v8756_v12  ;;  %v8852_v12 = vld [vmem:[%s12357_s1 + $0x4a0] ss:$8 sps:$4 sm:$0xff]  }
  0xf4   :  { %5979 = vmatpush1.bf16.msra.mxu1 %v8759_v13  ;;  %1692 = vmatprep.subr.bf16.mxu0 %v8764_v14  ;;  %v8855_v13 = vld [vmem:[%s12358_s4 + $0x6f0] ss:$12 sps:$4 sm:$0xff]  }
  0xf5   :  { %5980 = vmatprep.subr.bf16.mxu1 %v8767_v15  ;;  %v8860_v14 = vld [vmem:[%s12357_s1 + $0x4b4] ss:$8 sps:$4 sm:$0xff]   ;;  %v8863_v15 = vld [vmem:[%s12358_s4 + $0x70c] ss:$12 sps:$4 sm:$0xff]  }
  0xf7   :  { %1693 = vmatpush1.bf16.msra.mxu0 %v8762_v16  ;;  %v8858_v16 = vld [vmem:[%s12357_s1 + $0x4b0] ss:$8 sps:$4 sm:$0xff]  }
  0xf8   :  { %5981 = vmatpush1.bf16.msra.mxu1 %v8765_v17  ;;  %1694 = vmatprep.subr.bf16.mxu0 %v8772_v18  ;;  %v8861_v17 = vld [vmem:[%s12358_s4 + $0x708] ss:$12 sps:$4 sm:$0xff]   ;;  %v8866_v18 = vld [vmem:[%s12357_s1 + $0x4c4] ss:$8 sps:$4 sm:$0xff]  }
  0xf9   :  { %5982 = vmatprep.subr.bf16.mxu1 %v8777_v19  ;;  %v8869_v19 = vld [vmem:[%s12358_s4 + $0x724] ss:$12 sps:$4 sm:$0xff]  }
  0xfb   :  { %1695 = vmatpush1.bf16.msra.mxu0 %v8770_v20  ;;  %v8864_v20 = vld [vmem:[%s12357_s1 + $0x4c0] ss:$8 sps:$4 sm:$0xff]  }
  0xfc   :  { %5983 = vmatpush1.bf16.msra.mxu1 %v8775_v21  ;;  %1696 = vmatprep.subr.bf16.mxu0 %v8782_v22  ;;  %v8867_v21 = vld [vmem:[%s12358_s4 + $0x720] ss:$12 sps:$4 sm:$0xff]   ;;  %v8872_v22 = vld [vmem:[%s12357_s1 + $0x4d4] ss:$8 sps:$4 sm:$0xff]  }
  0xfd   :  { %5984 = vmatprep.subr.bf16.mxu1 %v8785_v23  ;;  %v8875_v23 = vld [vmem:[%s12358_s4 + $0x73c] ss:$12 sps:$4 sm:$0xff]  }
  0xff   :  { %1697 = vmatpush1.bf16.msra.mxu0 %v8780_v24  ;;  %v8870_v24 = vld [vmem:[%s12357_s1 + $0x4d0] ss:$8 sps:$4 sm:$0xff]  }
 0x100   :  { %5985 = vmatpush1.bf16.msra.mxu1 %v8783_v25  ;;  %1719 = vmatprep.subr.bf16.mxu0 %v8791_v26  ;;  %v8873_v25 = vld [vmem:[%s12358_s4 + $0x738] ss:$12 sps:$4 sm:$0xff]  }
 0x101   :  { %6007 = vmatprep.subr.bf16.mxu1 %v8797_v27  ;;  %v8880_v26 = vld [vmem:[%s12357_s1 + $0x4e4] ss:$8 sps:$4 sm:$0xff]   ;;  %v8885_v27 = vld [vmem:[%s12358_s4 + $0x754] ss:$12 sps:$4 sm:$0xff]  }
 0x102   :  { %1699 = vmatmul.mubr.bf16.vlgmr.msra.gmra.mrb[0].mxu0 %v8786_v28  ;;  %v8878_v28 = vld [vmem:[%s12357_s1 + $0x4e0] ss:$8 sps:$4 sm:$0xff]  }
 0x103   :  { %5987 = vmatmul.mubr.bf16.vlgmr.msra.gmra.mrb[0].mxu1 %v8792_v30  ;;  %1720 = vmatpush1.bf16.msra.mxu0 %v8789_v29  ;;  %v8883_v29 = vld [vmem:[%s12358_s4 + $0x750] ss:$12 sps:$4 sm:$0xff]  }
 0x104   :  { %6008 = vmatpush1.bf16.msra.mxu1 %v8795_v31  ;;  %1721 = vmatprep.subr.bf16.mxu0 %v8800_v32  ;;  %v8890_v30 = vld [vmem:[%s12357_s1 + $0x4f4] ss:$8 sps:$4 sm:$0xff]   ;;  %v8893_v31 = vld [vmem:[%s12358_s4 + $0x76c] ss:$12 sps:$4 sm:$0xff]  }
 0x105   :  { %6009 = vmatprep.subr.bf16.mxu1 %v8803_v33  ;;  %1708 = vmatprep.mubr.bf16.mxu0 %v8876_v34  ;;  %v8888_v32 = vld [vmem:[%s12357_s1 + $0x4f0] ss:$8 sps:$4 sm:$0xff]   ;;  %v8891_v33 = vld [vmem:[%s12358_s4 + $0x768] ss:$12 sps:$4 sm:$0xff]   ;;  %v8899_v34 = vld [vmem:[%s12357_s1 + $0x504] ss:$8 sps:$4 sm:$0xff]  }
 0x106   :  { %5996 = vmatprep.mubr.bf16.mxu1 %v8881_v35  ;;  %v8894_v35 = vld [vmem:[%s12359_s0 + $0x20] ss:$56 sps:$4 sm:$0xff]  }
 0x107   :  { %1722 = vmatpush1.bf16.msra.mxu0 %v8798_v36  ;;  %v8905_v36 = vld [vmem:[%s12358_s4 + $0x784] ss:$12 sps:$4 sm:$0xff]  }
 0x108   :  { %6010 = vmatpush1.bf16.msra.mxu1 %v8801_v37  ;;  %1723 = vmatprep.subr.bf16.mxu0 %v8806_v38  ;;  %v8897_v37 = vld [vmem:[%s12357_s1 + $0x500] ss:$8 sps:$4 sm:$0xff]  }
 0x109   :  { %6011 = vmatprep.subr.bf16.mxu1 %v8809_v39  ;;  %v8900_v38 = vld [vmem:[%s12360_s3 + $0x20] ss:$92 sps:$4 sm:$0xff]  }
 0x10a   :  { %1709 = vmatmul.mubr.bf16.gmra.mrb[4].mxu0 %v8886_v42  ;;  %v8903_v39 = vld [vmem:[%s12358_s4 + $0x780] ss:$12 sps:$4 sm:$0xff]  }
 0x10b   :  { %5997 = vmatmul.mubr.bf16.gmra.mrb[4].mxu1 %v8887_v43  ;;  %1724 = vmatpush1.bf16.msra.mxu0 %v8804_v40  ;;  %v8908_v40 = vld [vmem:[%s12357_s1 + $0x514] ss:$8 sps:$4 sm:$0xff]  }
 0x10c   :  { %6012 = vmatpush1.bf16.msra.mxu1 %v8807_v41  ;;  %1725 = vmatprep.subr.bf16.mxu0 %v8812_v44  ;;  %v8911_v41 = vld [vmem:[%s12358_s4 + $0x79c] ss:$12 sps:$4 sm:$0xff]   ;;  %v8984_v42 = vld [vmem:[%s12359_s0 + $0x94] ss:$56 sps:$4 sm:$0xff]   ;;  %v8906_v44 = vld [vmem:[%s12357_s1 + $0x510] ss:$8 sps:$4 sm:$0xff]  }
 0x10d   :  { %6013 = vmatprep.subr.bf16.mxu1 %v8815_v45  ;;  %1751 = vmatprep.mubr.bf16.mxu0 %v8896_v46  ;;  %v8989_v43 = vld [vmem:[%s12360_s3 + $0xdc] ss:$92 sps:$4 sm:$0xff]   ;;  %v8914_v46 = vld [vmem:[%s12357_s1 + $0x524] ss:$8 sps:$4 sm:$0xff]  }
 0x10e   :  { %6039 = vmatprep.mubr.bf16.mxu1 %v8902_v47  ;;  %v8909_v45 = vld [vmem:[%s12358_s4 + $0x798] ss:$12 sps:$4 sm:$0xff]   ;;  %v8917_v47 = vld [vmem:[%s12358_s4 + $0x7b4] ss:$12 sps:$4 sm:$0xff]  }
 0x10f   :  { %1726 = vmatpush1.bf16.msra.mxu0 %v8810_v48  ;;  %v8912_v48 = vld [vmem:[%s12357_s1 + $0x520] ss:$8 sps:$4 sm:$0xff]  }
 0x110   :  { %6014 = vmatpush1.bf16.msra.mxu1 %v8813_v49  ;;  %1727 = vmatprep.subr.bf16.mxu0 %v8818_v50  ;;  %v8915_v49 = vld [vmem:[%s12358_s4 + $0x7b0] ss:$12 sps:$4 sm:$0xff]  }
 0x111   :  { %6015 = vmatprep.subr.bf16.mxu1 %v8821_v51  ;;  %v8920_v50 = vld [vmem:[%s12357_s1 + $0x534] ss:$8 sps:$4 sm:$0xff]   ;;  %v8994_v51 = vld [vmem:[%s12359_s0 + $0x90] ss:$56 sps:$4 sm:$0xff]  }
 0x113   :  { %1728 = vmatpush1.bf16.msra.mxu0 %v8816_v52  ;;  %v8995_v52 = vld [vmem:[%s12360_s3 + $0xd8] ss:$92 sps:$4 sm:$0xff]  }
 0x114   :  { %6016 = vmatpush1.bf16.msra.mxu1 %v8819_v53  ;;  %1729 = vmatprep.subr.bf16.mxu0 %v8824_v54  ;;  %v8923_v53 = vld [vmem:[%s12358_s4 + $0x7cc] ss:$12 sps:$4 sm:$0xff]  }
 0x115   :  { %6017 = vmatprep.subr.bf16.mxu1 %v8827_v55  ;;  %v9004_v54 = vld [vmem:[%s12359_s0 + $0x2c] ss:$56 sps:$4 sm:$0xff]  }
 0x116   :  { %v9010_v55 = vld [vmem:[%s12360_s3 + $0x2c] ss:$92 sps:$4 sm:$0xff]  }
 0x117   :  { %1730 = vmatpush1.bf16.msra.mxu0 %v8822_v56  ;;  %v8918_v56 = vld [vmem:[%s12357_s1 + $0x530] ss:$8 sps:$4 sm:$0xff]  }
 0x118   :  { %6018 = vmatpush1.bf16.msra.mxu1 %v8825_v57  ;;  %1731 = vmatprep.subr.bf16.mxu0 %v8830_v58  ;;  %v8921_v57 = vld [vmem:[%s12358_s4 + $0x7c8] ss:$12 sps:$4 sm:$0xff]   ;;  %v8926_v58 = vld [vmem:[%s12357_s1 + $0x544] ss:$8 sps:$4 sm:$0xff]  }
 0x119   :  { %6019 = vmatprep.subr.bf16.mxu1 %v8833_v59  ;;  %v8929_v59 = vld [vmem:[%s12358_s4 + $0x7e4] ss:$12 sps:$4 sm:$0xff]  }
 0x11b   :  { %1732 = vmatpush1.bf16.msra.mxu0 %v8828_v60  ;;  %v8924_v60 = vld [vmem:[%s12357_s1 + $0x540] ss:$8 sps:$4 sm:$0xff]  }
 0x11c   :  { %6020 = vmatpush1.bf16.msra.mxu1 %v8831_v61  ;;  %1733 = vmatprep.subr.bf16.mxu0 %v8836_v62  ;;  %v8927_v61 = vld [vmem:[%s12358_s4 + $0x7e0] ss:$12 sps:$4 sm:$0xff]   ;;  %v8932_v62 = vld [vmem:[%s12357_s1 + $0x554] ss:$8 sps:$4 sm:$0xff]  }
 0x11d   :  { %6021 = vmatprep.subr.bf16.mxu1 %v8839_v63  ;;  %v8935_v63 = vld [vmem:[%s12358_s4 + $0x7fc] ss:$12 sps:$4 sm:$0xff]  }
 0x11f   :  { %1734 = vmatpush1.bf16.msra.mxu0 %v8834_v0  ;;  %v8930_v0 = vld [vmem:[%s12357_s1 + $0x550] ss:$8 sps:$4 sm:$0xff]  }
 0x120   :  { %6022 = vmatpush1.bf16.msra.mxu1 %v8837_v1  ;;  %1735 = vmatprep.subr.bf16.mxu0 %v8842_v2  ;;  %v8933_v1 = vld [vmem:[%s12358_s4 + $0x7f8] ss:$12 sps:$4 sm:$0xff]  }
 0x121   :  { %6023 = vmatprep.subr.bf16.mxu1 %v8845_v3  ;;  %v8938_v2 = vld [vmem:[%s12357_s1 + $0x564] ss:$8 sps:$4 sm:$0xff]   ;;  %v8941_v3 = vld [vmem:[%s12358_s4 + $0x814] ss:$12 sps:$4 sm:$0xff]  }
 0x123   :  { %1736 = vmatpush1.bf16.msra.mxu0 %v8840_v4  ;;  %v8936_v4 = vld [vmem:[%s12357_s1 + $0x560] ss:$8 sps:$4 sm:$0xff]  }
 0x124   :  { %6024 = vmatpush1.bf16.msra.mxu1 %v8843_v5  ;;  %1737 = vmatprep.subr.bf16.mxu0 %v8848_v6  ;;  %v8939_v5 = vld [vmem:[%s12358_s4 + $0x810] ss:$12 sps:$4 sm:$0xff]  }
 0x125   :  { %6025 = vmatprep.subr.bf16.mxu1 %v8851_v7  ;;  %v8944_v6 = vld [vmem:[%s12357_s1 + $0x574] ss:$8 sps:$4 sm:$0xff]   ;;  %v8947_v7 = vld [vmem:[%s12358_s4 + $0x82c] ss:$12 sps:$4 sm:$0xff]  }
 0x127   :  { %1738 = vmatpush1.bf16.msra.mxu0 %v8846_v8  ;;  %v8942_v8 = vld [vmem:[%s12357_s1 + $0x570] ss:$8 sps:$4 sm:$0xff]  }
 0x128   :  { %6026 = vmatpush1.bf16.msra.mxu1 %v8849_v9  ;;  %1739 = vmatprep.subr.bf16.mxu0 %v8854_v10  ;;  %v8945_v9 = vld [vmem:[%s12358_s4 + $0x828] ss:$12 sps:$4 sm:$0xff]   ;;  %v8950_v10 = vld [vmem:[%s12357_s1 + $0x584] ss:$8 sps:$4 sm:$0xff]  }
 0x129   :  { %6027 = vmatprep.subr.bf16.mxu1 %v8857_v11  ;;  %v8953_v11 = vld [vmem:[%s12358_s4 + $0x844] ss:$12 sps:$4 sm:$0xff]  }
 0x12b   :  { %1740 = vmatpush1.bf16.msra.mxu0 %v8852_v12  ;;  %v8948_v12 = vld [vmem:[%s12357_s1 + $0x580] ss:$8 sps:$4 sm:$0xff]  }
 0x12c   :  { %6028 = vmatpush1.bf16.msra.mxu1 %v8855_v13  ;;  %1741 = vmatprep.subr.bf16.mxu0 %v8860_v14  ;;  %v8951_v13 = vld [vmem:[%s12358_s4 + $0x840] ss:$12 sps:$4 sm:$0xff]   ;;  %v8956_v14 = vld [vmem:[%s12357_s1 + $0x594] ss:$8 sps:$4 sm:$0xff]  }
 0x12d   :  { %6029 = vmatprep.subr.bf16.mxu1 %v8863_v15  ;;  %v8959_v15 = vld [vmem:[%s12358_s4 + $0x85c] ss:$12 sps:$4 sm:$0xff]  }
 0x12f   :  { %1742 = vmatpush1.bf16.msra.mxu0 %v8858_v16  ;;  %v8954_v16 = vld [vmem:[%s12357_s1 + $0x590] ss:$8 sps:$4 sm:$0xff]  }
 0x130   :  { %6030 = vmatpush1.bf16.msra.mxu1 %v8861_v17  ;;  %1743 = vmatprep.subr.bf16.mxu0 %v8866_v18  ;;  %v8957_v17 = vld [vmem:[%s12358_s4 + $0x858] ss:$12 sps:$4 sm:$0xff]  }
 0x131   :  { %6031 = vmatprep.subr.bf16.mxu1 %v8869_v19  ;;  %v8962_v18 = vld [vmem:[%s12357_s1 + $0x5a4] ss:$8 sps:$4 sm:$0xff]   ;;  %v8965_v19 = vld [vmem:[%s12358_s4 + $0x874] ss:$12 sps:$4 sm:$0xff]  }
 0x133   :  { %1744 = vmatpush1.bf16.msra.mxu0 %v8864_v20  ;;  %v8960_v20 = vld [vmem:[%s12357_s1 + $0x5a0] ss:$8 sps:$4 sm:$0xff]  }
 0x134   :  { %6032 = vmatpush1.bf16.msra.mxu1 %v8867_v21  ;;  %1745 = vmatprep.subr.bf16.mxu0 %v8872_v22  ;;  %v8963_v21 = vld [vmem:[%s12358_s4 + $0x870] ss:$12 sps:$4 sm:$0xff]  }
 0x135   :  { %6033 = vmatprep.subr.bf16.mxu1 %v8875_v23  ;;  %v8968_v22 = vld [vmem:[%s12357_s1 + $0x5b4] ss:$8 sps:$4 sm:$0xff]   ;;  %v8971_v23 = vld [vmem:[%s12358_s4 + $0x88c] ss:$12 sps:$4 sm:$0xff]  }
 0x137   :  { %1746 = vmatpush1.bf16.msra.mxu0 %v8870_v24  ;;  %v8966_v24 = vld [vmem:[%s12357_s1 + $0x5b0] ss:$8 sps:$4 sm:$0xff]  }
 0x138   :  { %6034 = vmatpush1.bf16.msra.mxu1 %v8873_v25  ;;  %1747 = vmatprep.subr.bf16.mxu0 %v8880_v26  ;;  %v8969_v25 = vld [vmem:[%s12358_s4 + $0x888] ss:$12 sps:$4 sm:$0xff]   ;;  %v8974_v26 = vld [vmem:[%s12357_s1 + $0x5c4] ss:$8 sps:$4 sm:$0xff]  }
 0x139   :  { %6035 = vmatprep.subr.bf16.mxu1 %v8885_v27  ;;  %v8977_v27 = vld [vmem:[%s12358_s4 + $0x8a4] ss:$12 sps:$4 sm:$0xff]  }
 0x13b   :  { %1748 = vmatpush1.bf16.msra.mxu0 %v8878_v28  ;;  %v8972_v28 = vld [vmem:[%s12357_s1 + $0x5c0] ss:$8 sps:$4 sm:$0xff]  }
 0x13c   :  { %6036 = vmatpush1.bf16.msra.mxu1 %v8883_v29  ;;  %1749 = vmatprep.subr.bf16.mxu0 %v8890_v30  ;;  %v8975_v29 = vld [vmem:[%s12358_s4 + $0x8a0] ss:$12 sps:$4 sm:$0xff]   ;;  %v8980_v30 = vld [vmem:[%s12357_s1 + $0x5d4] ss:$8 sps:$4 sm:$0xff]  }
 0x13d   :  { %6037 = vmatprep.subr.bf16.mxu1 %v8893_v31  ;;  %v8983_v31 = vld [vmem:[%s12358_s4 + $0x8bc] ss:$12 sps:$4 sm:$0xff]  }
 0x13f   :  { %1750 = vmatpush1.bf16.msra.mxu0 %v8888_v32  ;;  %v8978_v32 = vld [vmem:[%s12357_s1 + $0x5d0] ss:$8 sps:$4 sm:$0xff]  }
 0x140   :  { %6038 = vmatpush1.bf16.msra.mxu1 %v8891_v33  ;;  %1772 = vmatprep.subr.bf16.mxu0 %v8899_v34  ;;  %v8981_v33 = vld [vmem:[%s12358_s4 + $0x8b8] ss:$12 sps:$4 sm:$0xff]  }
 0x141   :  { %6060 = vmatprep.subr.bf16.mxu1 %v8905_v36  ;;  %v8988_v34 = vld [vmem:[%s12357_s1 + $0x5e4] ss:$8 sps:$4 sm:$0xff]   ;;  %v8986_v36 = vld [vmem:[%s12357_s1 + $0x5e0] ss:$8 sps:$4 sm:$0xff]  }
 0x142   :  { %1752 = vmatmul.mubr.bf16.vlgmr.msra.gmra.mrb[0].mxu0 %v8894_v35  ;;  %v8993_v35 = vld [vmem:[%s12358_s4 + $0x8d4] ss:$12 sps:$4 sm:$0xff]  }
 0x143   :  { %6040 = vmatmul.mubr.bf16.vlgmr.msra.gmra.mrb[0].mxu1 %v8900_v38  ;;  %1773 = vmatpush1.bf16.msra.mxu0 %v8897_v37  ;;  %v8991_v37 = vld [vmem:[%s12358_s4 + $0x8d0] ss:$12 sps:$4 sm:$0xff]  }
 0x144   :  { %6061 = vmatpush1.bf16.msra.mxu1 %v8903_v39  ;;  %1774 = vmatprep.subr.bf16.mxu0 %v8908_v40  ;;  %v8998_v38 = vld [vmem:[%s12357_s1 + $0x5f4] ss:$8 sps:$4 sm:$0xff]   ;;  %v9001_v39 = vld [vmem:[%s12358_s4 + $0x8ec] ss:$12 sps:$4 sm:$0xff]  }
 0x145   :  { %6062 = vmatprep.subr.bf16.mxu1 %v8911_v41  ;;  %1761 = vmatprep.mubr.bf16.mxu0 %v8984_v42  ;;  %v8996_v40 = vld [vmem:[%s12357_s1 + $0x5f0] ss:$8 sps:$4 sm:$0xff]   ;;  %v8999_v41 = vld [vmem:[%s12358_s4 + $0x8e8] ss:$12 sps:$4 sm:$0xff]   ;;  %v9007_v42 = vld [vmem:[%s12357_s1 + $0x604] ss:$8 sps:$4 sm:$0xff]  }
 0x146   :  { %6049 = vmatprep.mubr.bf16.mxu1 %v8989_v43  ;;  %v9002_v43 = vld [vmem:[%s12359_s0 + $0x28] ss:$56 sps:$4 sm:$0xff]  }
 0x147   :  { %1775 = vmatpush1.bf16.msra.mxu0 %v8906_v44  ;;  %v9008_v44 = vld [vmem:[%s12360_s3 + $0x28] ss:$92 sps:$4 sm:$0xff]  }
 0x148   :  { %6063 = vmatpush1.bf16.msra.mxu1 %v8909_v45  ;;  %1776 = vmatprep.subr.bf16.mxu0 %v8914_v46  ;;  %v9013_v45 = vld [vmem:[%s12358_s4 + $0x904] ss:$12 sps:$4 sm:$0xff]   ;;  %v9005_v46 = vld [vmem:[%s12357_s1 + $0x600] ss:$8 sps:$4 sm:$0xff]  }
 0x149   :  { %6064 = vmatprep.subr.bf16.mxu1 %v8917_v47  ;;  %v9011_v47 = vld [vmem:[%s12358_s4 + $0x900] ss:$12 sps:$4 sm:$0xff]  }
 0x14a   :  { %1762 = vmatmul.mubr.bf16.gmra.mrb[4].mxu0 %v8994_v51  ;;  %v9099_v51 = vld [vmem:[%s12360_s3 + $0xe4] ss:$92 sps:$4 sm:$0xff]  }
 0x14b   :  { %6050 = vmatmul.mubr.bf16.gmra.mrb[4].mxu1 %v8995_v52  ;;  %1777 = vmatpush1.bf16.msra.mxu0 %v8912_v48  ;;  %v9016_v48 = vld [vmem:[%s12357_s1 + $0x614] ss:$8 sps:$4 sm:$0xff]   ;;  %v9014_v52 = vld [vmem:[%s12357_s1 + $0x610] ss:$8 sps:$4 sm:$0xff]  }
 0x14c   :  { %6065 = vmatpush1.bf16.msra.mxu1 %v8915_v49  ;;  %1778 = vmatprep.subr.bf16.mxu0 %v8920_v50  ;;  %v9019_v49 = vld [vmem:[%s12358_s4 + $0x91c] ss:$12 sps:$4 sm:$0xff]  }
 0x14d   :  { %6066 = vmatprep.subr.bf16.mxu1 %v8923_v53  ;;  %1804 = vmatprep.mubr.bf16.mxu0 %v9004_v54  ;;  %v9068_v50 = vld [vmem:[%s12359_s0 + $0x9c] ss:$56 sps:$4 sm:$0xff]   ;;  %v9017_v53 = vld [vmem:[%s12358_s4 + $0x918] ss:$12 sps:$4 sm:$0xff]  }
 0x14e   :  { %6092 = vmatprep.mubr.bf16.mxu1 %v9010_v55  ;;  %v9022_v54 = vld [vmem:[%s12357_s1 + $0x624] ss:$8 sps:$4 sm:$0xff]   ;;  %v9025_v55 = vld [vmem:[%s12358_s4 + $0x934] ss:$12 sps:$4 sm:$0xff]  }
 0x14f   :  { %1779 = vmatpush1.bf16.msra.mxu0 %v8918_v56  ;;  %v9020_v56 = vld [vmem:[%s12357_s1 + $0x620] ss:$8 sps:$4 sm:$0xff]  }
 0x150   :  { %6067 = vmatpush1.bf16.msra.mxu1 %v8921_v57  ;;  %1780 = vmatprep.subr.bf16.mxu0 %v8926_v58  ;;  %v9023_v57 = vld [vmem:[%s12358_s4 + $0x930] ss:$12 sps:$4 sm:$0xff]  }
 0x151   :  { %6068 = vmatprep.subr.bf16.mxu1 %v8929_v59  ;;  %v9070_v58 = vld [vmem:[%s12359_s0 + $0x98] ss:$56 sps:$4 sm:$0xff]   ;;  %v9105_v59 = vld [vmem:[%s12360_s3 + $0xe0] ss:$92 sps:$4 sm:$0xff]  }
 0x153   :  { %1781 = vmatpush1.bf16.msra.mxu0 %v8924_v60  ;;  %v9028_v60 = vld [vmem:[%s12357_s1 + $0x634] ss:$8 sps:$4 sm:$0xff]  }
 0x154   :  { %6069 = vmatpush1.bf16.msra.mxu1 %v8927_v61  ;;  %1782 = vmatprep.subr.bf16.mxu0 %v8932_v62  ;;  %v9031_v61 = vld [vmem:[%s12358_s4 + $0x94c] ss:$12 sps:$4 sm:$0xff]  }
 0x155   :  { %6070 = vmatprep.subr.bf16.mxu1 %v8935_v63  ;;  %v9026_v62 = vld [vmem:[%s12357_s1 + $0x630] ss:$8 sps:$4 sm:$0xff]   ;;  %v9085_v63 = vld [vmem:[%s12359_s0 + $0x34] ss:$56 sps:$4 sm:$0xff]  }
 0x157   :  { %1783 = vmatpush1.bf16.msra.mxu0 %v8930_v0  ;;  %v9114_v0 = vld [vmem:[%s12360_s3 + $0x34] ss:$92 sps:$4 sm:$0xff]  }
 0x158   :  { %6071 = vmatpush1.bf16.msra.mxu1 %v8933_v1  ;;  %1784 = vmatprep.subr.bf16.mxu0 %v8938_v2  ;;  %v9029_v1 = vld [vmem:[%s12358_s4 + $0x948] ss:$12 sps:$4 sm:$0xff]   ;;  %v9034_v2 = vld [vmem:[%s12357_s1 + $0x644] ss:$8 sps:$4 sm:$0xff]  }
 0x159   :  { %6072 = vmatprep.subr.bf16.mxu1 %v8941_v3  ;;  %v9037_v3 = vld [vmem:[%s12358_s4 + $0x964] ss:$12 sps:$4 sm:$0xff]  }
 0x15b   :  { %1785 = vmatpush1.bf16.msra.mxu0 %v8936_v4  ;;  %v9032_v4 = vld [vmem:[%s12357_s1 + $0x640] ss:$8 sps:$4 sm:$0xff]  }
 0x15c   :  { %6073 = vmatpush1.bf16.msra.mxu1 %v8939_v5  ;;  %1786 = vmatprep.subr.bf16.mxu0 %v8944_v6  ;;  %v9035_v5 = vld [vmem:[%s12358_s4 + $0x960] ss:$12 sps:$4 sm:$0xff]   ;;  %v9040_v6 = vld [vmem:[%s12357_s1 + $0x654] ss:$8 sps:$4 sm:$0xff]  }
 0x15d   :  { %6074 = vmatprep.subr.bf16.mxu1 %v8947_v7  ;;  %v9043_v7 = vld [vmem:[%s12358_s4 + $0x97c] ss:$12 sps:$4 sm:$0xff]  }
 0x15f   :  { %1787 = vmatpush1.bf16.msra.mxu0 %v8942_v8  ;;  %v9038_v8 = vld [vmem:[%s12357_s1 + $0x650] ss:$8 sps:$4 sm:$0xff]  }
 0x160   :  { %6075 = vmatpush1.bf16.msra.mxu1 %v8945_v9  ;;  %1788 = vmatprep.subr.bf16.mxu0 %v8950_v10  ;;  %v9041_v9 = vld [vmem:[%s12358_s4 + $0x978] ss:$12 sps:$4 sm:$0xff]  }
 0x161   :  { %6076 = vmatprep.subr.bf16.mxu1 %v8953_v11  ;;  %v9046_v10 = vld [vmem:[%s12357_s1 + $0x664] ss:$8 sps:$4 sm:$0xff]   ;;  %v9049_v11 = vld [vmem:[%s12358_s4 + $0x994] ss:$12 sps:$4 sm:$0xff]  }
 0x163   :  { %1789 = vmatpush1.bf16.msra.mxu0 %v8948_v12  ;;  %v9044_v12 = vld [vmem:[%s12357_s1 + $0x660] ss:$8 sps:$4 sm:$0xff]  }
 0x164   :  { %6077 = vmatpush1.bf16.msra.mxu1 %v8951_v13  ;;  %1790 = vmatprep.subr.bf16.mxu0 %v8956_v14  ;;  %v9047_v13 = vld [vmem:[%s12358_s4 + $0x990] ss:$12 sps:$4 sm:$0xff]  }
 0x165   :  { %6078 = vmatprep.subr.bf16.mxu1 %v8959_v15  ;;  %v9052_v14 = vld [vmem:[%s12357_s1 + $0x674] ss:$8 sps:$4 sm:$0xff]   ;;  %v9055_v15 = vld [vmem:[%s12358_s4 + $0x9ac] ss:$12 sps:$4 sm:$0xff]  }
 0x167   :  { %1791 = vmatpush1.bf16.msra.mxu0 %v8954_v16  ;;  %v9050_v16 = vld [vmem:[%s12357_s1 + $0x670] ss:$8 sps:$4 sm:$0xff]  }
 0x168   :  { %6079 = vmatpush1.bf16.msra.mxu1 %v8957_v17  ;;  %1792 = vmatprep.subr.bf16.mxu0 %v8962_v18  ;;  %v9053_v17 = vld [vmem:[%s12358_s4 + $0x9a8] ss:$12 sps:$4 sm:$0xff]   ;;  %v9058_v18 = vld [vmem:[%s12357_s1 + $0x684] ss:$8 sps:$4 sm:$0xff]  }
 0x169   :  { %6080 = vmatprep.subr.bf16.mxu1 %v8965_v19  ;;  %v9061_v19 = vld [vmem:[%s12358_s4 + $0x9c4] ss:$12 sps:$4 sm:$0xff]  }
 0x16b   :  { %1793 = vmatpush1.bf16.msra.mxu0 %v8960_v20  ;;  %v9056_v20 = vld [vmem:[%s12357_s1 + $0x680] ss:$8 sps:$4 sm:$0xff]  }
 0x16c   :  { %6081 = vmatpush1.bf16.msra.mxu1 %v8963_v21  ;;  %1794 = vmatprep.subr.bf16.mxu0 %v8968_v22  ;;  %v9059_v21 = vld [vmem:[%s12358_s4 + $0x9c0] ss:$12 sps:$4 sm:$0xff]   ;;  %v9064_v22 = vld [vmem:[%s12357_s1 + $0x694] ss:$8 sps:$4 sm:$0xff]  }
 0x16d   :  { %6082 = vmatprep.subr.bf16.mxu1 %v8971_v23  ;;  %v9067_v23 = vld [vmem:[%s12358_s4 + $0x9dc] ss:$12 sps:$4 sm:$0xff]  }
 0x16f   :  { %1795 = vmatpush1.bf16.msra.mxu0 %v8966_v24  ;;  %v9062_v24 = vld [vmem:[%s12357_s1 + $0x690] ss:$8 sps:$4 sm:$0xff]  }
 0x170   :  { %6083 = vmatpush1.bf16.msra.mxu1 %v8969_v25  ;;  %1796 = vmatprep.subr.bf16.mxu0 %v8974_v26  ;;  %v9065_v25 = vld [vmem:[%s12358_s4 + $0x9d8] ss:$12 sps:$4 sm:$0xff]  }
 0x171   :  { %6084 = vmatprep.subr.bf16.mxu1 %v8977_v27  ;;  %v9073_v26 = vld [vmem:[%s12357_s1 + $0x6a4] ss:$8 sps:$4 sm:$0xff]   ;;  %v9076_v27 = vld [vmem:[%s12358_s4 + $0x9f4] ss:$12 sps:$4 sm:$0xff]  }
 0x173   :  { %1797 = vmatpush1.bf16.msra.mxu0 %v8972_v28  ;;  %v9071_v28 = vld [vmem:[%s12357_s1 + $0x6a0] ss:$8 sps:$4 sm:$0xff]  }
 0x174   :  { %6085 = vmatpush1.bf16.msra.mxu1 %v8975_v29  ;;  %1798 = vmatprep.subr.bf16.mxu0 %v8980_v30  ;;  %v9074_v29 = vld [vmem:[%s12358_s4 + $0x9f0] ss:$12 sps:$4 sm:$0xff]  }
 0x175   :  { %6086 = vmatprep.subr.bf16.mxu1 %v8983_v31  ;;  %v9079_v30 = vld [vmem:[%s12357_s1 + $0x6b4] ss:$8 sps:$4 sm:$0xff]   ;;  %v9082_v31 = vld [vmem:[%s12358_s4 + $0xa0c] ss:$12 sps:$4 sm:$0xff]  }
 0x177   :  { %1799 = vmatpush1.bf16.msra.mxu0 %v8978_v32  ;;  %v9077_v32 = vld [vmem:[%s12357_s1 + $0x6b0] ss:$8 sps:$4 sm:$0xff]  }
 0x178   :  { %6087 = vmatpush1.bf16.msra.mxu1 %v8981_v33  ;;  %1800 = vmatprep.subr.bf16.mxu0 %v8988_v34  ;;  %v9080_v33 = vld [vmem:[%s12358_s4 + $0xa08] ss:$12 sps:$4 sm:$0xff]   ;;  %v9088_v34 = vld [vmem:[%s12358_s4 + $0xa24] ss:$12 sps:$4 sm:$0xff]  }
 0x179   :  { %6088 = vmatprep.subr.bf16.mxu1 %v8993_v35  ;;  %v9083_v35 = vld [vmem:[%s12359_s0 + $0x30] ss:$56 sps:$4 sm:$0xff]  }
 0x17b   :  { %1801 = vmatpush1.bf16.msra.mxu0 %v8986_v36  ;;  %v9089_v36 = vld [vmem:[%s12358_s4 + $0xc8] ss:$12 sps:$4 sm:$0xff]  }
 0x17c   :  { %6089 = vmatpush1.bf16.msra.mxu1 %v8991_v37  ;;  %1802 = vmatprep.subr.bf16.mxu0 %v8998_v38  ;;  %v9086_v37 = vld [vmem:[%s12358_s4 + $0xa20] ss:$12 sps:$4 sm:$0xff]   ;;  %v9090_v38 = vld [vmem:[%s12358_s4 + $0x8] ss:$12 sps:$4 sm:$0xff]  }
 0x17d   :  { %6090 = vmatprep.subr.bf16.mxu1 %v9001_v39  ;;  %v9093_v39 = vld [vmem:[%s12358_s4 + $0xa3c] ss:$12 sps:$4 sm:$0xff]  }
 0x17f   :  { %1803 = vmatpush1.bf16.msra.mxu0 %v8996_v40  ;;  %v9094_v40 = vld [vmem:[%s12358_s4 + $0xe0] ss:$12 sps:$4 sm:$0xff]  }
 0x180   :  { %6091 = vmatpush1.bf16.msra.mxu1 %v8999_v41  ;;  %1825 = vmatprep.subr.bf16.mxu0 %v9007_v42  ;;  %v9096_v41 = vld [vmem:[%s12359_s0 + $0xa4] ss:$56 sps:$4 sm:$0xff]  }
 0x181   :  { %6113 = vmatprep.subr.bf16.mxu1 %v9013_v45  ;;  %v9091_v42 = vld [vmem:[%s12358_s4 + $0xa38] ss:$12 sps:$4 sm:$0xff]   ;;  %v9103_v45 = vld [vmem:[%s12358_s4 + $0xa54] ss:$12 sps:$4 sm:$0xff]  }
 0x182   :  { %1805 = vmatmul.mubr.bf16.vlgmr.msra.gmra.mrb[0].mxu0 %v9002_v43  ;;  %v9095_v43 = vld [vmem:[%s12358_s4 + $0x20] ss:$12 sps:$4 sm:$0xff]  }
 0x183   :  { %6093 = vmatmul.mubr.bf16.vlgmr.msra.gmra.mrb[0].mxu1 %v9008_v44  ;;  %1826 = vmatpush1.bf16.msra.mxu0 %v9005_v46  ;;  %v9098_v44 = vld [vmem:[%s12359_s0 + $0xa0] ss:$56 sps:$4 sm:$0xff]  }
 0x184   :  { %6114 = vmatpush1.bf16.msra.mxu1 %v9011_v47  ;;  %1827 = vmatprep.subr.bf16.mxu0 %v9016_v48  ;;  %v9104_v46 = vld [vmem:[%s12358_s4 + $0xf8] ss:$12 sps:$4 sm:$0xff]   ;;  %v9101_v47 = vld [vmem:[%s12358_s4 + $0xa50] ss:$12 sps:$4 sm:$0xff]  }
 0x185   :  { %6115 = vmatprep.subr.bf16.mxu1 %v9019_v49  ;;  %1814 = vmatprep.mubr.bf16.mxu0 %v9068_v50  ;;  %v9106_v48 = vld [vmem:[%s12358_s4 + $0x38] ss:$12 sps:$4 sm:$0xff]   ;;  %v9110_v50 = vld [vmem:[%s12358_s4 + $0x110] ss:$12 sps:$4 sm:$0xff]  }
 0x186   :  { %6102 = vmatprep.mubr.bf16.mxu1 %v9099_v51  ;;  %v9109_v49 = vld [vmem:[%s12358_s4 + $0xa6c] ss:$12 sps:$4 sm:$0xff]   ;;  %v9107_v51 = vld [vmem:[%s12358_s4 + $0xa68] ss:$12 sps:$4 sm:$0xff]  }
 0x187   :  { %1828 = vmatpush1.bf16.msra.mxu0 %v9014_v52  ;;  %v9111_v52 = vld [vmem:[%s12358_s4 + $0x50] ss:$12 sps:$4 sm:$0xff]  }
 0x188   :  { %6116 = vmatpush1.bf16.msra.mxu1 %v9017_v53  ;;  %1829 = vmatprep.subr.bf16.mxu0 %v9022_v54  ;;  %v9112_v53 = vld [vmem:[%s12360_s3 + $0x30] ss:$92 sps:$4 sm:$0xff]  }
 0x189   :  { %6117 = vmatprep.subr.bf16.mxu1 %v9025_v55  ;;  %v9117_v54 = vld [vmem:[%s12358_s4 + $0xa84] ss:$12 sps:$4 sm:$0xff]   ;;  %v9118_v55 = vld [vmem:[%s12358_s4 + $0x128] ss:$12 sps:$4 sm:$0xff]  }
 0x18a   :  { %1815 = vmatmul.mubr.bf16.gmra.mrb[4].mxu0 %v9070_v58  ;;  %v9119_v58 = vld [vmem:[%s12358_s4 + $0x68] ss:$12 sps:$4 sm:$0xff]  }
 0x18b   :  { %6103 = vmatmul.mubr.bf16.gmra.mrb[4].mxu1 %v9105_v59  ;;  %1830 = vmatpush1.bf16.msra.mxu0 %v9020_v56  ;;  %v9115_v56 = vld [vmem:[%s12358_s4 + $0xa80] ss:$12 sps:$4 sm:$0xff]   ;;  %v9122_v59 = vld [vmem:[%s12358_s4 + $0xa9c] ss:$12 sps:$4 sm:$0xff]  }
 0x18c   :  { %6118 = vmatpush1.bf16.msra.mxu1 %v9023_v57  ;;  %1831 = vmatprep.subr.bf16.mxu0 %v9028_v60  ;;  %v9520_v57 = vld [vmem:[%s12360_s3 + $0x4] ss:$92 sps:$4 sm:$0xff]  }
 0x18d   :  { %6119 = vmatprep.subr.bf16.mxu1 %v9031_v61  ;;  %7295 = vmatprep.mubr.msk.bf16.mxu0 %vm1500_vm0, %v9085_v63  ;;  %v9123_v60 = vld [vmem:[%s12358_s4 + $0x140] ss:$12 sps:$4 sm:$0xff]  }
 0x18e   :  { %6145 = vmatprep.mubr.bf16.mxu1 %v9114_v0  ;;  %v9185_v61 = vld [vmem:[%s12360_s3 + $0xec] ss:$92 sps:$4 sm:$0xff]   ;;  %v9127_v0 = vld [vmem:[%s12358_s4 + $0xab4] ss:$12 sps:$4 sm:$0xff]  }
 0x18f   :  { %1832 = vmatpush1.bf16.msra.mxu0 %v9026_v62  ;;  %v9120_v62 = vld [vmem:[%s12358_s4 + $0xa98] ss:$12 sps:$4 sm:$0xff]   ;;  %v9124_v63 = vld [vmem:[%s12358_s4 + $0x80] ss:$12 sps:$4 sm:$0xff]  }
 0x190   :  { %6120 = vmatpush1.bf16.msra.mxu1 %v9029_v1  ;;  %1833 = vmatprep.subr.bf16.mxu0 %v9034_v2  ;;  %v9128_v1 = vld [vmem:[%s12358_s4 + $0x158] ss:$12 sps:$4 sm:$0xff]   ;;  %v9125_v2 = vld [vmem:[%s12358_s4 + $0xab0] ss:$12 sps:$4 sm:$0xff]  }
 0x191   :  { %6121 = vmatprep.subr.bf16.mxu1 %v9037_v3  ;;  %v9129_v3 = vld [vmem:[%s12358_s4 + $0x98] ss:$12 sps:$4 sm:$0xff]  }
 0x193   :  { %1834 = vmatpush1.bf16.msra.mxu0 %v9032_v4  ;;  %v9191_v4 = vld [vmem:[%s12360_s3 + $0xe8] ss:$92 sps:$4 sm:$0xff]  }
 0x194   :  { %6122 = vmatpush1.bf16.msra.mxu1 %v9035_v5  ;;  %1835 = vmatprep.subr.bf16.mxu0 %v9040_v6  ;;  %v9132_v5 = vld [vmem:[%s12358_s4 + $0xacc] ss:$12 sps:$4 sm:$0xff]   ;;  %v9133_v6 = vld [vmem:[%s12358_s4 + $0x170] ss:$12 sps:$4 sm:$0xff]  }
 0x195   :  { %6123 = vmatprep.subr.bf16.mxu1 %v9043_v7  ;;  %v9200_v7 = vld [vmem:[%s12360_s3 + $0x3c] ss:$92 sps:$4 sm:$0xff]  }
 0x197   :  { %1836 = vmatpush1.bf16.msra.mxu0 %v9038_v8  ;;  %v9130_v8 = vld [vmem:[%s12358_s4 + $0xac8] ss:$12 sps:$4 sm:$0xff]  }
 0x198   :  { %6124 = vmatpush1.bf16.msra.mxu1 %v9041_v9  ;;  %1837 = vmatprep.subr.bf16.mxu0 %v9046_v10  ;;  %v9134_v9 = vld [vmem:[%s12358_s4 + $0xb0] ss:$12 sps:$4 sm:$0xff]  }
 0x199   :  { %6125 = vmatprep.subr.bf16.mxu1 %v9049_v11  ;;  %v9137_v10 = vld [vmem:[%s12358_s4 + $0xae4] ss:$12 sps:$4 sm:$0xff]   ;;  %v9138_v11 = vld [vmem:[%s12358_s4 + $0x248] ss:$12 sps:$4 sm:$0xff]  }
 0x19b   :  { %1838 = vmatpush1.bf16.msra.mxu0 %v9044_v12  ;;  %v9135_v12 = vld [vmem:[%s12358_s4 + $0xae0] ss:$12 sps:$4 sm:$0xff]  }
 0x19c   :  { %6126 = vmatpush1.bf16.msra.mxu1 %v9047_v13  ;;  %1839 = vmatprep.subr.bf16.mxu0 %v9052_v14  ;;  %v9139_v13 = vld [vmem:[%s12358_s4 + $0x188] ss:$12 sps:$4 sm:$0xff]  }
 0x19d   :  { %6127 = vmatprep.subr.bf16.mxu1 %v9055_v15  ;;  %v9142_v14 = vld [vmem:[%s12358_s4 + $0xafc] ss:$12 sps:$4 sm:$0xff]   ;;  %v9143_v15 = vld [vmem:[%s12358_s4 + $0x260] ss:$12 sps:$4 sm:$0xff]  }
 0x19f   :  { %1840 = vmatpush1.bf16.msra.mxu0 %v9050_v16  ;;  %v9140_v16 = vld [vmem:[%s12358_s4 + $0xaf8] ss:$12 sps:$4 sm:$0xff]  }
 0x1a0   :  { %6128 = vmatpush1.bf16.msra.mxu1 %v9053_v17  ;;  %1841 = vmatprep.subr.bf16.mxu0 %v9058_v18  ;;  %v9521_v17 = vld [vmem:[%s12360_s3] ss:$92 sps:$4 sm:$0xff]  }
 0x1a1   :  { %6129 = vmatprep.subr.bf16.mxu1 %v9061_v19  ;;  %v9144_v18 = vld [vmem:[%s12358_s4 + $0x1a0] ss:$12 sps:$4 sm:$0xff]  }
 0x1a2   :  { %v9147_v19 = vld [vmem:[%s12358_s4 + $0xb14] ss:$12 sps:$4 sm:$0xff]  }
 0x1a3   :  { %1842 = vmatpush1.bf16.msra.mxu0 %v9056_v20  ;;  %v9148_v20 = vld [vmem:[%s12358_s4 + $0x278] ss:$12 sps:$4 sm:$0xff]  }
 0x1a4   :  { %6130 = vmatpush1.bf16.msra.mxu1 %v9059_v21  ;;  %1843 = vmatprep.subr.bf16.mxu0 %v9064_v22  ;;  %v9145_v21 = vld [vmem:[%s12358_s4 + $0xb10] ss:$12 sps:$4 sm:$0xff]  }
 0x1a5   :  { %6131 = vmatprep.subr.bf16.mxu1 %v9067_v23  ;;  %v9522_v22 = vld [vmem:[%s12360_s3 + $0xbc] ss:$92 sps:$4 sm:$0xff]  }
 0x1a6   :  { %v9149_v23 = vld [vmem:[%s12358_s4 + $0x1b8] ss:$12 sps:$4 sm:$0xff]  }
 0x1a7   :  { %1844 = vmatpush1.bf16.msra.mxu0 %v9062_v24  ;;  %v9152_v24 = vld [vmem:[%s12358_s4 + $0xb2c] ss:$12 sps:$4 sm:$0xff]  }
 0x1a8   :  { %6132 = vmatpush1.bf16.msra.mxu1 %v9065_v25  ;;  %1845 = vmatprep.subr.bf16.mxu0 %v9073_v26  ;;  %v9153_v25 = vld [vmem:[%s12358_s4 + $0x290] ss:$12 sps:$4 sm:$0xff]   ;;  %v9150_v26 = vld [vmem:[%s12358_s4 + $0xb28] ss:$12 sps:$4 sm:$0xff]  }
 0x1a9   :  { %6133 = vmatprep.subr.bf16.mxu1 %v9076_v27  ;;  %v9523_v27 = vld [vmem:[%s12360_s3 + $0xb8] ss:$92 sps:$4 sm:$0xff]  }
 0x1ab   :  { %1846 = vmatpush1.bf16.msra.mxu0 %v9071_v28  ;;  %v9154_v28 = vld [vmem:[%s12358_s4 + $0x1d0] ss:$12 sps:$4 sm:$0xff]  }
 0x1ac   :  { %6134 = vmatpush1.bf16.msra.mxu1 %v9074_v29  ;;  %1847 = vmatprep.subr.bf16.mxu0 %v9079_v30  ;;  %v9157_v29 = vld [vmem:[%s12358_s4 + $0xb44] ss:$12 sps:$4 sm:$0xff]   ;;  %v9158_v30 = vld [vmem:[%s12358_s4 + $0x2a8] ss:$12 sps:$4 sm:$0xff]  }
 0x1ad   :  { %6135 = vmatprep.subr.bf16.mxu1 %v9082_v31  ;;  %v9155_v31 = vld [vmem:[%s12358_s4 + $0xb40] ss:$12 sps:$4 sm:$0xff]  }
 0x1af   :  { %1848 = vmatpush1.bf16.msra.mxu0 %v9077_v32  ;;  %v9524_v32 = vld [vmem:[%s12360_s3 + $0xc] ss:$92 sps:$4 sm:$0xff]  }
 0x1b0   :  { %6136 = vmatpush1.bf16.msra.mxu1 %v9080_v33  ;;  %7887 = vmatprep.subr.bf16.mxu0 %v9089_v36  ;;  %v9159_v33 = vld [vmem:[%s12358_s4 + $0x1e8] ss:$12 sps:$4 sm:$0xff]   ;;  %v9160_v36 = vld [vmem:[%s12358_s4 + $0xb58] ss:$12 sps:$4 sm:$0xff]  }
 0x1b1   :  { %6137 = vmatprep.subr.bf16.mxu1 %v9088_v34  ;;  %v9162_v34 = vld [vmem:[%s12358_s4 + $0xb5c] ss:$12 sps:$4 sm:$0xff]  }
 0x1b2   :  { %1858 = vmatmul.mubr.bf16.vlgmr.msra.gmra.mrb[0].mxu0 %v9083_v35  ;;  %v9163_v35 = vld [vmem:[%s12358_s4 + $0x2c0] ss:$12 sps:$4 sm:$0xff]  }
 0x1b3   :  { %7888 = vmatpush3.bf16.msra.mxu0 %v9090_v38  ;;  %7296 = vmatprep.mubr.msk.bf16.mxu0 %vm1500_vm0, %v9096_v41  ;;  %v9167_v38 = vld [vmem:[%s12358_s4 + $0xb74] ss:$12 sps:$4 sm:$0xff]   ;;  %v9169_v41 = vld [vmem:[%s12358_s4 + $0x218] ss:$12 sps:$4 sm:$0xff]  }
 0x1b4   :  { %6138 = vmatpush1.bf16.msra.mxu1 %v9086_v37  ;;  %7889 = vmatprep.subr.bf16.mxu0 %v9094_v40  ;;  %v9164_v37 = vld [vmem:[%s12358_s4 + $0x200] ss:$12 sps:$4 sm:$0xff]   ;;  %v9165_v40 = vld [vmem:[%s12358_s4 + $0xb70] ss:$12 sps:$4 sm:$0xff]  }
 0x1b5   :  { %6139 = vmatprep.subr.bf16.mxu1 %v9093_v39  ;;  %v9168_v39 = vld [vmem:[%s12358_s4 + $0x2d8] ss:$12 sps:$4 sm:$0xff]  }
 0x1b7   :  { %7890 = vmatpush3.bf16.msra.mxu0 %v9095_v43  ;;  %v9173_v43 = vld [vmem:[%s12358_s4 + $0x2f0] ss:$12 sps:$4 sm:$0xff]  }
 0x1b8   :  { %6140 = vmatpush1.bf16.msra.mxu1 %v9091_v42  ;;  %7891 = vmatprep.subr.bf16.mxu0 %v9104_v46  ;;  %v9172_v42 = vld [vmem:[%s12358_s4 + $0xb8c] ss:$12 sps:$4 sm:$0xff]   ;;  %v9177_v46 = vld [vmem:[%s12358_s4 + $0xba4] ss:$12 sps:$4 sm:$0xff]  }
 0x1b9   :  { %6141 = vmatprep.subr.bf16.mxu1 %v9103_v45  ;;  %v9174_v45 = vld [vmem:[%s12358_s4 + $0x230] ss:$12 sps:$4 sm:$0xff]  }
 0x1ba   :  { %1868 = vmatmul.mubr.bf16.gmra.mrb[4].mxu0 %v9098_v44  ;;  %v9170_v44 = vld [vmem:[%s12358_s4 + $0xb88] ss:$12 sps:$4 sm:$0xff]  }
 0x1bb   :  { %7892 = vmatpush3.bf16.msra.mxu0 %v9106_v48  ;;  %6463 = vmatprep.mubr.bf16.mxu0 %v9520_v57  ;;  %v9175_v48 = vld [vmem:[%s12358_s4 + $0xba0] ss:$12 sps:$4 sm:$0xff]  }
 0x1bc   :  { %6142 = vmatpush1.bf16.msra.mxu1 %v9101_v47  ;;  %7893 = vmatprep.subr.bf16.mxu0 %v9110_v50  ;;  %v9178_v47 = vld [vmem:[%s12358_s4 + $0x3c8] ss:$12 sps:$4 sm:$0xff]   ;;  %v9526_v57 = vld [vmem:[%s12360_s3 + $0xc4] ss:$92 sps:$4 sm:$0xff]  }
 0x1bd   :  { %6143 = vmatprep.subr.bf16.mxu1 %v9109_v49  ;;  %v9179_v49 = vld [vmem:[%s12358_s4 + $0x308] ss:$12 sps:$4 sm:$0xff]  }
 0x1be   :  { %v9182_v50 = vld [vmem:[%s12358_s4 + $0xbbc] ss:$12 sps:$4 sm:$0xff]  }
 0x1bf   :  { %7894 = vmatpush3.bf16.msra.mxu0 %v9111_v52  ;;  %v9180_v52 = vld [vmem:[%s12358_s4 + $0xbb8] ss:$12 sps:$4 sm:$0xff]  }
 0x1c0   :  { %6144 = vmatpush1.bf16.msra.mxu1 %v9107_v51  ;;  %7895 = vmatprep.subr.bf16.mxu0 %v9118_v55  ;;  %v9183_v51 = vld [vmem:[%s12358_s4 + $0x3e0] ss:$12 sps:$4 sm:$0xff]  }
 0x1c1   :  { %6166 = vmatprep.subr.bf16.mxu1 %v9117_v54  ;;  %v9184_v54 = vld [vmem:[%s12358_s4 + $0x320] ss:$12 sps:$4 sm:$0xff]  }
 0x1c2   :  { %v9189_v55 = vld [vmem:[%s12358_s4 + $0xbd4] ss:$12 sps:$4 sm:$0xff]  }
 0x1c3   :  { %6146 = vmatmul.mubr.bf16.vlgmr.msra.gmra.mrb[0].mxu1 %v9112_v53  ;;  %7896 = vmatpush3.bf16.msra.mxu0 %v9119_v58  ;;  %v9525_v53 = vld [vmem:[%s12360_s3 + $0x8] ss:$92 sps:$4 sm:$0xff]   ;;  %v9187_v58 = vld [vmem:[%s12358_s4 + $0xbd0] ss:$12 sps:$4 sm:$0xff]  }
 0x1c4   :  { %6167 = vmatpush1.bf16.msra.mxu1 %v9115_v56  ;;  %7897 = vmatprep.subr.bf16.mxu0 %v9123_v60  ;;  %v9190_v56 = vld [vmem:[%s12358_s4 + $0x3f8] ss:$12 sps:$4 sm:$0xff]  }
 0x1c5   :  { %6168 = vmatprep.subr.bf16.mxu1 %v9122_v59  ;;  %6155 = vmatprep.mubr.bf16.mxu1 %v9185_v61  ;;  %v9192_v59 = vld [vmem:[%s12358_s4 + $0x338] ss:$12 sps:$4 sm:$0xff]   ;;  %v9196_v61 = vld [vmem:[%s12358_s4 + $0x410] ss:$12 sps:$4 sm:$0xff]  }
 0x1c6   :  { %v9195_v60 = vld [vmem:[%s12358_s4 + $0xbec] ss:$12 sps:$4 sm:$0xff]  }
 0x1c7   :  { %7898 = vmatpush3.bf16.msra.mxu0 %v9124_v63  ;;  %v9527_v63 = vld [vmem:[%s12360_s3 + $0xc0] ss:$92 sps:$4 sm:$0xff]  }
 0x1c8   :  { %6169 = vmatpush1.bf16.msra.mxu1 %v9120_v62  ;;  %7899 = vmatprep.subr.bf16.mxu0 %v9128_v1  ;;  %v9193_v62 = vld [vmem:[%s12358_s4 + $0xbe8] ss:$12 sps:$4 sm:$0xff]   ;;  %v9203_v1 = vld [vmem:[%s12358_s4 + $0xc04] ss:$12 sps:$4 sm:$0xff]  }
 0x1c9   :  { %6170 = vmatprep.subr.bf16.mxu1 %v9127_v0  ;;  %v9197_v0 = vld [vmem:[%s12358_s4 + $0x350] ss:$12 sps:$4 sm:$0xff]  }
 0x1cb   :  { %6156 = vmatmul.mubr.bf16.gmra.mrb[4].mxu1 %v9191_v4  ;;  %7900 = vmatpush3.bf16.msra.mxu0 %v9129_v3  ;;  %v9198_v3 = vld [vmem:[%s12360_s3 + $0x38] ss:$92 sps:$4 sm:$0xff]  }
 0x1cc   :  { %6171 = vmatpush1.bf16.msra.mxu1 %v9125_v2  ;;  %7901 = vmatprep.subr.bf16.mxu0 %v9133_v6  ;;  %v9204_v2 = vld [vmem:[%s12358_s4 + $0x428] ss:$12 sps:$4 sm:$0xff]  }
 0x1cd   :  { %6172 = vmatprep.subr.bf16.mxu1 %v9132_v5  ;;  %6198 = vmatprep.mubr.bf16.mxu1 %v9200_v7  ;;  %v9528_v4 = vld [vmem:[%s12360_s3 + $0x14] ss:$92 sps:$4 sm:$0xff]   ;;  %v9201_v5 = vld [vmem:[%s12358_s4 + $0xc00] ss:$12 sps:$4 sm:$0xff]   ;;  %v9208_v7 = vld [vmem:[%s12358_s4 + $0xc1c] ss:$12 sps:$4 sm:$0xff]  }
 0x1ce   :  { %v9205_v6 = vld [vmem:[%s12358_s4 + $0x368] ss:$12 sps:$4 sm:$0xff]  }
 0x1cf   :  { %7902 = vmatpush3.bf16.msra.mxu0 %v9134_v9  ;;  %v9206_v9 = vld [vmem:[%s12358_s4 + $0xc18] ss:$12 sps:$4 sm:$0xff]  }
 0x1d0   :  { %6173 = vmatpush1.bf16.msra.mxu1 %v9130_v8  ;;  %7915 = vmatprep.subr.bf16.mxu0 %v9138_v11  ;;  %v9209_v8 = vld [vmem:[%s12358_s4 + $0x440] ss:$12 sps:$4 sm:$0xff]  }
 0x1d1   :  { %6174 = vmatprep.subr.bf16.mxu1 %v9137_v10  ;;  %v9271_v10 = vld [vmem:[%s12360_s3 + $0xf4] ss:$92 sps:$4 sm:$0xff]   ;;  %v9210_v11 = vld [vmem:[%s12358_s4 + $0x380] ss:$12 sps:$4 sm:$0xff]  }
 0x1d2   :  { %6464 = vmatmul.mubr.bf16.vlgmr.msra.gmra.mrb[8].mxu0 %v9521_v17  ;;  %v9218_v17 = vld [vmem:[%s12358_s4 + $0xc4c] ss:$12 sps:$4 sm:$0xff]  }
 0x1d3   :  { %7916 = vmatpush3.bf16.msra.mxu0 %v9139_v13  ;;  %6471 = vmatprep.mubr.bf16.mxu0 %v9522_v22  ;;  %v9214_v13 = vld [vmem:[%s12358_s4 + $0x458] ss:$12 sps:$4 sm:$0xff]  }
 0x1d4   :  { %6175 = vmatpush1.bf16.msra.mxu1 %v9135_v12  ;;  %7917 = vmatprep.subr.bf16.mxu0 %v9143_v15  ;;  %v9213_v12 = vld [vmem:[%s12358_s4 + $0xc34] ss:$12 sps:$4 sm:$0xff]   ;;  %v9215_v15 = vld [vmem:[%s12358_s4 + $0x398] ss:$12 sps:$4 sm:$0xff]  }
 0x1d5   :  { %6176 = vmatprep.subr.bf16.mxu1 %v9142_v14  ;;  %v9211_v14 = vld [vmem:[%s12358_s4 + $0xc30] ss:$12 sps:$4 sm:$0xff]  }
 0x1d6   :  { %v9223_v22 = vld [vmem:[%s12358_s4 + $0xc64] ss:$12 sps:$4 sm:$0xff]  }
 0x1d7   :  { %7918 = vmatpush3.bf16.msra.mxu0 %v9144_v18  ;;  %v9219_v18 = vld [vmem:[%s12358_s4 + $0x470] ss:$12 sps:$4 sm:$0xff]  }
 0x1d8   :  { %6177 = vmatpush1.bf16.msra.mxu1 %v9140_v16  ;;  %7919 = vmatprep.subr.bf16.mxu0 %v9148_v20  ;;  %v9277_v16 = vld [vmem:[%s12360_s3 + $0xf0] ss:$92 sps:$4 sm:$0xff]  }
 0x1d9   :  { %6178 = vmatprep.subr.bf16.mxu1 %v9147_v19  ;;  %v9216_v19 = vld [vmem:[%s12358_s4 + $0xc48] ss:$12 sps:$4 sm:$0xff]   ;;  %v9220_v20 = vld [vmem:[%s12358_s4 + $0x3b0] ss:$12 sps:$4 sm:$0xff]  }
 0x1da   :  { %6472 = vmatmul.mubr.bf16.gmra.mrb[12].mxu0 %v9523_v27  ;;  %v9229_v27 = vld [vmem:[%s12358_s4 + $0x560] ss:$12 sps:$4 sm:$0xff]  }
 0x1db   :  { %7920 = vmatpush3.bf16.msra.mxu0 %v9149_v23  ;;  %6512 = vmatprep.mubr.bf16.mxu0 %v9524_v32  ;;  %v9224_v23 = vld [vmem:[%s12358_s4 + $0x548] ss:$12 sps:$4 sm:$0xff]   ;;  %v9234_v32 = vld [vmem:[%s12358_s4 + $0x578] ss:$12 sps:$4 sm:$0xff]  }
 0x1dc   :  { %6179 = vmatpush1.bf16.msra.mxu1 %v9145_v21  ;;  %7921 = vmatprep.subr.bf16.mxu0 %v9153_v25  ;;  %v9286_v21 = vld [vmem:[%s12360_s3 + $0x44] ss:$92 sps:$4 sm:$0xff]   ;;  %v9225_v25 = vld [vmem:[%s12358_s4 + $0x488] ss:$12 sps:$4 sm:$0xff]  }
 0x1dd   :  { %6180 = vmatprep.subr.bf16.mxu1 %v9152_v24  ;;  %v9221_v24 = vld [vmem:[%s12358_s4 + $0xc60] ss:$12 sps:$4 sm:$0xff]  }
 0x1df   :  { %7922 = vmatpush3.bf16.msra.mxu0 %v9154_v28  ;;  %v9226_v28 = vld [vmem:[%s12358_s4 + $0xc78] ss:$12 sps:$4 sm:$0xff]  }
 0x1e0   :  { %6181 = vmatpush1.bf16.msra.mxu1 %v9150_v26  ;;  %7923 = vmatprep.subr.bf16.mxu0 %v9158_v30  ;;  %v9228_v26 = vld [vmem:[%s12358_s4 + $0xc7c] ss:$12 sps:$4 sm:$0xff]   ;;  %v9529_v30 = vld [vmem:[%s12360_s3 + $0x10] ss:$92 sps:$4 sm:$0xff]  }
 0x1e1   :  { %6182 = vmatprep.subr.bf16.mxu1 %v9157_v29  ;;  %v9230_v29 = vld [vmem:[%s12358_s4 + $0x4a0] ss:$12 sps:$4 sm:$0xff]  }
 0x1e3   :  { %7924 = vmatpush3.bf16.msra.mxu0 %v9159_v33  ;;  %v9530_v33 = vld [vmem:[%s12360_s3 + $0xcc] ss:$92 sps:$4 sm:$0xff]  }
 0x1e4   :  { %6183 = vmatpush1.bf16.msra.mxu1 %v9155_v31  ;;  %7925 = vmatprep.subr.bf16.mxu0 %v9163_v35  ;;  %v9233_v31 = vld [vmem:[%s12358_s4 + $0xc94] ss:$12 sps:$4 sm:$0xff]   ;;  %v9235_v35 = vld [vmem:[%s12358_s4 + $0x4b8] ss:$12 sps:$4 sm:$0xff]  }
 0x1e5   :  { %6184 = vmatprep.subr.bf16.mxu1 %v9162_v34  ;;  %v9231_v34 = vld [vmem:[%s12358_s4 + $0xc90] ss:$12 sps:$4 sm:$0xff]  }
 0x1e7   :  { %7926 = vmatpush3.bf16.msra.mxu0 %v9164_v37  ;;  %v9239_v37 = vld [vmem:[%s12358_s4 + $0x590] ss:$12 sps:$4 sm:$0xff]  }
 0x1e8   :  { %6185 = vmatpush1.bf16.msra.mxu1 %v9160_v36  ;;  %7927 = vmatprep.subr.bf16.mxu0 %v9168_v39  ;;  %v9238_v36 = vld [vmem:[%s12358_s4 + $0xcac] ss:$12 sps:$4 sm:$0xff]   ;;  %v9531_v39 = vld [vmem:[%s12360_s3 + $0xc8] ss:$92 sps:$4 sm:$0xff]  }
 0x1e9   :  { %6186 = vmatprep.subr.bf16.mxu1 %v9167_v38  ;;  %v9236_v38 = vld [vmem:[%s12358_s4 + $0xca8] ss:$12 sps:$4 sm:$0xff]  }
 0x1eb   :  { %7928 = vmatpush3.bf16.msra.mxu0 %v9169_v41  ;;  %v9243_v41 = vld [vmem:[%s12358_s4 + $0xcc4] ss:$12 sps:$4 sm:$0xff]  }
 0x1ec   :  { %6187 = vmatpush1.bf16.msra.mxu1 %v9165_v40  ;;  %7929 = vmatprep.subr.bf16.mxu0 %v9173_v43  ;;  %v9240_v40 = vld [vmem:[%s12358_s4 + $0x4d0] ss:$12 sps:$4 sm:$0xff]   ;;  %v9241_v43 = vld [vmem:[%s12358_s4 + $0xcc0] ss:$12 sps:$4 sm:$0xff]  }
 0x1ed   :  { %6188 = vmatprep.subr.bf16.mxu1 %v9172_v42  ;;  %v9244_v42 = vld [vmem:[%s12358_s4 + $0x5a8] ss:$12 sps:$4 sm:$0xff]  }
 0x1ef   :  { %7930 = vmatpush3.bf16.msra.mxu0 %v9174_v45  ;;  %v9245_v45 = vld [vmem:[%s12358_s4 + $0x4e8] ss:$12 sps:$4 sm:$0xff]  }
 0x1f0   :  { %6189 = vmatpush1.bf16.msra.mxu1 %v9170_v44  ;;  %7943 = vmatprep.subr.bf16.mxu0 %v9178_v47  ;;  %v9532_v44 = vld [vmem:[%s12360_s3 + $0x1c] ss:$92 sps:$4 sm:$0xff]   ;;  %v9249_v47 = vld [vmem:[%s12358_s4 + $0x5c0] ss:$12 sps:$4 sm:$0xff]  }
 0x1f1   :  { %6190 = vmatprep.subr.bf16.mxu1 %v9177_v46  ;;  %v9248_v46 = vld [vmem:[%s12358_s4 + $0xcdc] ss:$12 sps:$4 sm:$0xff]  }
 0x1f2   :  { %6513 = vmatmul.mubr.bf16.vlgmr.msra.gmra.mrb[16].mxu0 %v9525_v53  ;;  %v9255_v53 = vld [vmem:[%s12358_s4 + $0x518] ss:$12 sps:$4 sm:$0xff]  }
 0x1f3   :  { %7944 = vmatpush3.bf16.msra.mxu0 %v9179_v49  ;;  %6520 = vmatprep.mubr.bf16.mxu0 %v9526_v57  ;;  %v9250_v49 = vld [vmem:[%s12358_s4 + $0x500] ss:$12 sps:$4 sm:$0xff]   ;;  %v9260_v57 = vld [vmem:[%s12358_s4 + $0x530] ss:$12 sps:$4 sm:$0xff]  }
 0x1f4   :  { %6191 = vmatpush1.bf16.msra.mxu1 %v9175_v48  ;;  %7945 = vmatprep.subr.bf16.mxu0 %v9183_v51  ;;  %v9246_v48 = vld [vmem:[%s12358_s4 + $0xcd8] ss:$12 sps:$4 sm:$0xff]  }
 0x1f5   :  { %6192 = vmatprep.subr.bf16.mxu1 %v9182_v50  ;;  %v9253_v50 = vld [vmem:[%s12358_s4 + $0xcf4] ss:$12 sps:$4 sm:$0xff]   ;;  %v9254_v51 = vld [vmem:[%s12358_s4 + $0x5d8] ss:$12 sps:$4 sm:$0xff]  }
 0x1f7   :  { %7946 = vmatpush3.bf16.msra.mxu0 %v9184_v54  ;;  %v9258_v54 = vld [vmem:[%s12358_s4 + $0xd0c] ss:$12 sps:$4 sm:$0xff]  }
 0x1f8   :  { %6193 = vmatpush1.bf16.msra.mxu1 %v9180_v52  ;;  %7947 = vmatprep.subr.bf16.mxu0 %v9190_v56  ;;  %v9251_v52 = vld [vmem:[%s12358_s4 + $0xcf0] ss:$12 sps:$4 sm:$0xff]   ;;  %v9256_v56 = vld [vmem:[%s12358_s4 + $0xd08] ss:$12 sps:$4 sm:$0xff]  }
 0x1f9   :  { %6194 = vmatprep.subr.bf16.mxu1 %v9189_v55  ;;  %v9259_v55 = vld [vmem:[%s12358_s4 + $0x5f0] ss:$12 sps:$4 sm:$0xff]  }
 0x1fa   :  { %6521 = vmatmul.mubr.bf16.gmra.mrb[20].mxu0 %v9527_v63  ;;  %v9269_v63 = vld [vmem:[%s12358_s4 + $0x6e0] ss:$12 sps:$4 sm:$0xff]  }
 0x1fb   :  { %7948 = vmatpush3.bf16.msra.mxu0 %v9192_v59  ;;  %6561 = vmatprep.mubr.bf16.mxu0 %v9528_v4  ;;  %v9264_v59 = vld [vmem:[%s12358_s4 + $0x6c8] ss:$12 sps:$4 sm:$0xff]   ;;  %v9276_v4 = vld [vmem:[%s12358_s4 + $0x6f8] ss:$12 sps:$4 sm:$0xff]  }
 0x1fc   :  { %6195 = vmatpush1.bf16.msra.mxu1 %v9187_v58  ;;  %7949 = vmatprep.subr.bf16.mxu0 %v9196_v61  ;;  %v9263_v58 = vld [vmem:[%s12358_s4 + $0xd24] ss:$12 sps:$4 sm:$0xff]   ;;  %v9265_v61 = vld [vmem:[%s12358_s4 + $0x608] ss:$12 sps:$4 sm:$0xff]  }
 0x1fd   :  { %6196 = vmatprep.subr.bf16.mxu1 %v9195_v60  ;;  %v9261_v60 = vld [vmem:[%s12358_s4 + $0xd20] ss:$12 sps:$4 sm:$0xff]  }
 0x1ff   :  { %7950 = vmatpush3.bf16.msra.mxu0 %v9197_v0  ;;  %v9266_v0 = vld [vmem:[%s12358_s4 + $0xd38] ss:$12 sps:$4 sm:$0xff]  }
 0x200   :  { %6197 = vmatpush1.bf16.msra.mxu1 %v9193_v62  ;;  %7951 = vmatprep.subr.bf16.mxu0 %v9204_v2  ;;  %v9268_v62 = vld [vmem:[%s12358_s4 + $0xd3c] ss:$12 sps:$4 sm:$0xff]   ;;  %v9270_v2 = vld [vmem:[%s12358_s4 + $0x620] ss:$12 sps:$4 sm:$0xff]  }
 0x201   :  { %6219 = vmatprep.subr.bf16.mxu1 %v9203_v1  ;;  %v9533_v1 = vld [vmem:[%s12360_s3 + $0x18] ss:$92 sps:$4 sm:$0xff]  }
 0x203   :  { %6199 = vmatmul.mubr.bf16.vlgmr.msra.gmra.mrb[0].mxu1 %v9198_v3  ;;  %7952 = vmatpush3.bf16.msra.mxu0 %v9205_v6  ;;  %v9275_v3 = vld [vmem:[%s12358_s4 + $0xd54] ss:$12 sps:$4 sm:$0xff]   ;;  %v9273_v6 = vld [vmem:[%s12358_s4 + $0xd50] ss:$12 sps:$4 sm:$0xff]  }
 0x204   :  { %6220 = vmatpush1.bf16.msra.mxu1 %v9201_v5  ;;  %7953 = vmatprep.subr.bf16.mxu0 %v9209_v8  ;;  %v9534_v5 = vld [vmem:[%s12360_s3 + $0xd4] ss:$92 sps:$4 sm:$0xff]   ;;  %v9281_v8 = vld [vmem:[%s12358_s4 + $0xd6c] ss:$12 sps:$4 sm:$0xff]  }
 0x205   :  { %6221 = vmatprep.subr.bf16.mxu1 %v9208_v7  ;;  %6208 = vmatprep.mubr.bf16.mxu1 %v9271_v10  ;;  %v9278_v7 = vld [vmem:[%s12358_s4 + $0x638] ss:$12 sps:$4 sm:$0xff]   ;;  %v9279_v10 = vld [vmem:[%s12358_s4 + $0xd68] ss:$12 sps:$4 sm:$0xff]  }
 0x207   :  { %7954 = vmatpush3.bf16.msra.mxu0 %v9210_v11  ;;  %v9535_v11 = vld [vmem:[%s12360_s3 + $0xd0] ss:$92 sps:$4 sm:$0xff]  }
 0x208   :  { %6222 = vmatpush1.bf16.msra.mxu1 %v9206_v9  ;;  %7955 = vmatprep.subr.bf16.mxu0 %v9214_v13  ;;  %v9282_v9 = vld [vmem:[%s12358_s4 + $0x710] ss:$12 sps:$4 sm:$0xff]  }
 0x209   :  { %6223 = vmatprep.subr.bf16.mxu1 %v9213_v12  ;;  %v9283_v12 = vld [vmem:[%s12358_s4 + $0x650] ss:$12 sps:$4 sm:$0xff]  }
 0x20a   :  { %v9289_v13 = vld [vmem:[%s12358_s4 + $0xd84] ss:$12 sps:$4 sm:$0xff]  }
 0x20b   :  { %6209 = vmatmul.mubr.bf16.gmra.mrb[4].mxu1 %v9277_v16  ;;  %7956 = vmatpush3.bf16.msra.mxu0 %v9215_v15  ;;  %v11564_v15 = vld [vmem:[%s12360_s3 + $0x40] ss:$92 sps:$4 sm:$0xff]  }
 0x20c   :  { %6224 = vmatpush1.bf16.msra.mxu1 %v9211_v14  ;;  %7957 = vmatprep.subr.bf16.mxu0 %v9219_v18  ;;  %v9290_v14 = vld [vmem:[%s12358_s4 + $0x728] ss:$12 sps:$4 sm:$0xff]   ;;  %v9536_v16 = vld [vmem:[%s12360_s3 + $0x24] ss:$92 sps:$4 sm:$0xff]  }
 0x20d   :  { %6225 = vmatprep.subr.bf16.mxu1 %v9218_v17  ;;  %6251 = vmatprep.mubr.bf16.mxu1 %v9286_v21  ;;  %v9287_v17 = vld [vmem:[%s12358_s4 + $0xd80] ss:$12 sps:$4 sm:$0xff]   ;;  %v9291_v18 = vld [vmem:[%s12358_s4 + $0x668] ss:$12 sps:$4 sm:$0xff]   ;;  %v9292_v21 = vld [vmem:[%s12358_s4 + $0xd98] ss:$12 sps:$4 sm:$0xff]  }
 0x20f   :  { %7958 = vmatpush3.bf16.msra.mxu0 %v9220_v20  ;;  %v9295_v20 = vld [vmem:[%s12358_s4 + $0x740] ss:$12 sps:$4 sm:$0xff]  }
 0x210   :  { %6226 = vmatpush1.bf16.msra.mxu1 %v9216_v19  ;;  %7971 = vmatprep.subr.bf16.mxu0 %v9224_v23  ;;  %v9294_v19 = vld [vmem:[%s12358_s4 + $0xd9c] ss:$12 sps:$4 sm:$0xff]  }
 0x211   :  { %6227 = vmatprep.subr.bf16.mxu1 %v9223_v22  ;;  %v9296_v22 = vld [vmem:[%s12358_s4 + $0x680] ss:$12 sps:$4 sm:$0xff]   ;;  %v11590_v23 = vld [vmem:[%s12360_s3 + $0xfc] ss:$92 sps:$4 sm:$0xff]  }
 0x212   :  { %6562 = vmatmul.mubr.bf16.vlgmr.msra.gmra.mrb[24].mxu0 %v9529_v30  ;;  %v9305_v30 = vld [vmem:[%s12358_s4 + $0x770] ss:$12 sps:$4 sm:$0xff]  }
 0x213   :  { %7972 = vmatpush3.bf16.msra.mxu0 %v9225_v25  ;;  %6569 = vmatprep.mubr.bf16.mxu0 %v9530_v33  ;;  %v9300_v25 = vld [vmem:[%s12358_s4 + $0x758] ss:$12 sps:$4 sm:$0xff]   ;;  %v11626_v33 = vld [vmem:[%s12360_s3 + $0x4c] ss:$92 sps:$4 sm:$0xff]  }
 0x214   :  { %6228 = vmatpush1.bf16.msra.mxu1 %v9221_v24  ;;  %7973 = vmatprep.subr.bf16.mxu0 %v9229_v27  ;;  %v9299_v24 = vld [vmem:[%s12358_s4 + $0xdb4] ss:$12 sps:$4 sm:$0xff]  }
 0x215   :  { %6229 = vmatprep.subr.bf16.mxu1 %v9228_v26  ;;  %v9297_v26 = vld [vmem:[%s12358_s4 + $0xdb0] ss:$12 sps:$4 sm:$0xff]   ;;  %v11606_v27 = vld [vmem:[%s12360_s3 + $0xf8] ss:$92 sps:$4 sm:$0xff]  }
 0x217   :  { %7974 = vmatpush3.bf16.msra.mxu0 %v9230_v29  ;;  %v9304_v29 = vld [vmem:[%s12358_s4 + $0xdcc] ss:$12 sps:$4 sm:$0xff]  }
 0x218   :  { %6230 = vmatpush1.bf16.msra.mxu1 %v9226_v28  ;;  %7975 = vmatprep.subr.bf16.mxu0 %v9234_v32  ;;  %v9301_v28 = vld [vmem:[%s12358_s4 + $0x698] ss:$12 sps:$4 sm:$0xff]   ;;  %v9306_v32 = vld [vmem:[%s12358_s4 + $0x6b0] ss:$12 sps:$4 sm:$0xff]  }
 0x219   :  { %6231 = vmatprep.subr.bf16.mxu1 %v9233_v31  ;;  %v9302_v31 = vld [vmem:[%s12358_s4 + $0xdc8] ss:$12 sps:$4 sm:$0xff]  }
 0x21a   :  { %6570 = vmatmul.mubr.bf16.gmra.mrb[28].mxu0 %v9531_v39  ;;  %v9315_v39 = vld [vmem:[%s12358_s4 + $0x860] ss:$12 sps:$4 sm:$0xff]  }
 0x21b   :  { %7976 = vmatpush3.bf16.msra.mxu0 %v9235_v35  ;;  %6610 = vmatprep.mubr.bf16.mxu0 %v9532_v44  ;;  %v9310_v35 = vld [vmem:[%s12358_s4 + $0x848] ss:$12 sps:$4 sm:$0xff]   ;;  %v9320_v44 = vld [vmem:[%s12358_s4 + $0x878] ss:$12 sps:$4 sm:$0xff]  }
 0x21c   :  { %6232 = vmatpush1.bf16.msra.mxu1 %v9231_v34  ;;  %7977 = vmatprep.subr.bf16.mxu0 %v9239_v37  ;;  %v9309_v34 = vld [vmem:[%s12358_s4 + $0xde4] ss:$12 sps:$4 sm:$0xff]   ;;  %v9311_v37 = vld [vmem:[%s12358_s4 + $0x788] ss:$12 sps:$4 sm:$0xff]  }
 0x21d   :  { %6233 = vmatprep.subr.bf16.mxu1 %v9238_v36  ;;  %v9307_v36 = vld [vmem:[%s12358_s4 + $0xde0] ss:$12 sps:$4 sm:$0xff]  }
 0x21f   :  { %7978 = vmatpush3.bf16.msra.mxu0 %v9240_v40  ;;  %v9312_v40 = vld [vmem:[%s12358_s4 + $0xdf8] ss:$12 sps:$4 sm:$0xff]  }
 0x220   :  { %6234 = vmatpush1.bf16.msra.mxu1 %v9236_v38  ;;  %7979 = vmatprep.subr.bf16.mxu0 %v9244_v42  ;;  %v9314_v38 = vld [vmem:[%s12358_s4 + $0xdfc] ss:$12 sps:$4 sm:$0xff]   ;;  %v9316_v42 = vld [vmem:[%s12358_s4 + $0x7a0] ss:$12 sps:$4 sm:$0xff]  }
 0x221   :  { %6235 = vmatprep.subr.bf16.mxu1 %v9243_v41  ;;  %v9537_v41 = vld [vmem:[%s12360_s3 + $0x20] ss:$92 sps:$4 sm:$0xff]  }
 0x223   :  { %7980 = vmatpush3.bf16.msra.mxu0 %v9245_v45  ;;  %v9538_v45 = vld [vmem:[%s12360_s3 + $0xdc] ss:$92 sps:$4 sm:$0xff]  }
 0x224   :  { %6236 = vmatpush1.bf16.msra.mxu1 %v9241_v43  ;;  %7981 = vmatprep.subr.bf16.mxu0 %v9249_v47  ;;  %v9319_v43 = vld [vmem:[%s12358_s4 + $0xe14] ss:$12 sps:$4 sm:$0xff]   ;;  %v9321_v47 = vld [vmem:[%s12358_s4 + $0x7b8] ss:$12 sps:$4 sm:$0xff]  }
 0x225   :  { %6237 = vmatprep.subr.bf16.mxu1 %v9248_v46  ;;  %v9317_v46 = vld [vmem:[%s12358_s4 + $0xe10] ss:$12 sps:$4 sm:$0xff]  }
 0x227   :  { %7982 = vmatpush3.bf16.msra.mxu0 %v9250_v49  ;;  %v9325_v49 = vld [vmem:[%s12358_s4 + $0x890] ss:$12 sps:$4 sm:$0xff]  }
 0x228   :  { %6238 = vmatpush1.bf16.msra.mxu1 %v9246_v48  ;;  %7983 = vmatprep.subr.bf16.mxu0 %v9254_v51  ;;  %v9324_v48 = vld [vmem:[%s12358_s4 + $0xe2c] ss:$12 sps:$4 sm:$0xff]  }
 0x229   :  { %6239 = vmatprep.subr.bf16.mxu1 %v9253_v50  ;;  %v9322_v50 = vld [vmem:[%s12358_s4 + $0xe28] ss:$12 sps:$4 sm:$0xff]  }
 0x22a   :  { %v9539_v51 = vld [vmem:[%s12360_s3 + $0xd8] ss:$92 sps:$4 sm:$0xff]  }
 0x22b   :  { %7984 = vmatpush3.bf16.msra.mxu0 %v9255_v53  ;;  %v9329_v53 = vld [vmem:[%s12358_s4 + $0xe44] ss:$12 sps:$4 sm:$0xff]  }
 0x22c   :  { %6240 = vmatpush1.bf16.msra.mxu1 %v9251_v52  ;;  %7985 = vmatprep.subr.bf16.mxu0 %v9259_v55  ;;  %v9326_v52 = vld [vmem:[%s12358_s4 + $0x7d0] ss:$12 sps:$4 sm:$0xff]   ;;  %v9540_v55 = vld [vmem:[%s12360_s3 + $0x2c] ss:$92 sps:$4 sm:$0xff]  }
 0x22d   :  { %6241 = vmatprep.subr.bf16.mxu1 %v9258_v54  ;;  %v9330_v54 = vld [vmem:[%s12358_s4 + $0x8a8] ss:$12 sps:$4 sm:$0xff]  }
 0x22f   :  { %7986 = vmatpush3.bf16.msra.mxu0 %v9260_v57  ;;  %v9331_v57 = vld [vmem:[%s12358_s4 + $0x7e8] ss:$12 sps:$4 sm:$0xff]  }
 0x230   :  { %6242 = vmatpush1.bf16.msra.mxu1 %v9256_v56  ;;  %7999 = vmatprep.subr.bf16.mxu0 %v9264_v59  ;;  %v9327_v56 = vld [vmem:[%s12358_s4 + $0xe40] ss:$12 sps:$4 sm:$0xff]  }
 0x231   :  { %6243 = vmatprep.subr.bf16.mxu1 %v9263_v58  ;;  %v9334_v58 = vld [vmem:[%s12358_s4 + $0xe5c] ss:$12 sps:$4 sm:$0xff]   ;;  %v9335_v59 = vld [vmem:[%s12358_s4 + $0x8c0] ss:$12 sps:$4 sm:$0xff]  }
 0x232   :  { %6611 = vmatmul.mubr.bf16.vlgmr.msra.gmra.mrb[32].mxu0 %v9533_v1  ;;  %v9341_v1 = vld [vmem:[%s12358_s4 + $0x818] ss:$12 sps:$4 sm:$0xff]  }
 0x233   :  { %8000 = vmatpush3.bf16.msra.mxu0 %v9265_v61  ;;  %6618 = vmatprep.mubr.bf16.mxu0 %v9534_v5  ;;  %v9336_v61 = vld [vmem:[%s12358_s4 + $0x800] ss:$12 sps:$4 sm:$0xff]   ;;  %v9346_v5 = vld [vmem:[%s12358_s4 + $0x830] ss:$12 sps:$4 sm:$0xff]  }
 0x234   :  { %6244 = vmatpush1.bf16.msra.mxu1 %v9261_v60  ;;  %8001 = vmatprep.subr.bf16.mxu0 %v9269_v63  ;;  %v9332_v60 = vld [vmem:[%s12358_s4 + $0xe58] ss:$12 sps:$4 sm:$0xff]  }
 0x235   :  { %6245 = vmatprep.subr.bf16.mxu1 %v9268_v62  ;;  %v9339_v62 = vld [vmem:[%s12358_s4 + $0xe74] ss:$12 sps:$4 sm:$0xff]   ;;  %v9340_v63 = vld [vmem:[%s12358_s4 + $0x8d8] ss:$12 sps:$4 sm:$0xff]  }
 0x237   :  { %8002 = vmatpush3.bf16.msra.mxu0 %v9270_v2  ;;  %v9344_v2 = vld [vmem:[%s12358_s4 + $0xe8c] ss:$12 sps:$4 sm:$0xff]  }
 0x238   :  { %6246 = vmatpush1.bf16.msra.mxu1 %v9266_v0  ;;  %8003 = vmatprep.subr.bf16.mxu0 %v9276_v4  ;;  %v9337_v0 = vld [vmem:[%s12358_s4 + $0xe70] ss:$12 sps:$4 sm:$0xff]   ;;  %v9342_v4 = vld [vmem:[%s12358_s4 + $0xe88] ss:$12 sps:$4 sm:$0xff]  }
 0x239   :  { %6247 = vmatprep.subr.bf16.mxu1 %v9275_v3  ;;  %v9345_v3 = vld [vmem:[%s12358_s4 + $0x8f0] ss:$12 sps:$4 sm:$0xff]  }
 0x23a   :  { %6619 = vmatmul.mubr.bf16.gmra.mrb[36].mxu0 %v9535_v11  ;;  %v9355_v11 = vld [vmem:[%s12358_s4 + $0x9e0] ss:$12 sps:$4 sm:$0xff]  }
 0x23b   :  { %8004 = vmatpush3.bf16.msra.mxu0 %v9278_v7  ;;  %6659 = vmatprep.mubr.bf16.mxu0 %v9536_v16  ;;  %v9350_v7 = vld [vmem:[%s12358_s4 + $0x9c8] ss:$12 sps:$4 sm:$0xff]  }
 0x23c   :  { %6248 = vmatpush1.bf16.msra.mxu1 %v9273_v6  ;;  %8005 = vmatprep.subr.bf16.mxu0 %v9282_v9  ;;  %v9349_v6 = vld [vmem:[%s12358_s4 + $0xea4] ss:$12 sps:$4 sm:$0xff]   ;;  %v9351_v9 = vld [vmem:[%s12358_s4 + $0x908] ss:$12 sps:$4 sm:$0xff]  }
 0x23d   :  { %6249 = vmatprep.subr.bf16.mxu1 %v9281_v8  ;;  %v9347_v8 = vld [vmem:[%s12358_s4 + $0xea0] ss:$12 sps:$4 sm:$0xff]  }
 0x23e   :  { %v9361_v16 = vld [vmem:[%s12358_s4 + $0xed4] ss:$12 sps:$4 sm:$0xff]  }
 0x23f   :  { %8006 = vmatpush3.bf16.msra.mxu0 %v9283_v12  ;;  %v9541_v12 = vld [vmem:[%s12360_s3 + $0x28] ss:$92 sps:$4 sm:$0xff]  }
 0x240   :  { %6250 = vmatpush1.bf16.msra.mxu1 %v9279_v10  ;;  %8007 = vmatprep.subr.bf16.mxu0 %v9290_v14  ;;  %v9354_v10 = vld [vmem:[%s12358_s4 + $0xebc] ss:$12 sps:$4 sm:$0xff]   ;;  %v9356_v14 = vld [vmem:[%s12358_s4 + $0x920] ss:$12 sps:$4 sm:$0xff]  }
 0x241   :  { %6272 = vmatprep.subr.bf16.mxu1 %v9289_v13  ;;  %v9352_v13 = vld [vmem:[%s12358_s4 + $0xeb8] ss:$12 sps:$4 sm:$0xff]  }
 0x243   :  { %6252 = vmatmul.mubr.bf16.vlgmr.msra.gmra.mrb[0].mxu1 %v11564_v15  ;;  %8008 = vmatpush3.bf16.msra.mxu0 %v9291_v18  ;;  %v9542_v18 = vld [vmem:[%s12360_s3 + $0xe4] ss:$92 sps:$4 sm:$0xff]  }
 0x244   :  { %6273 = vmatpush1.bf16.msra.mxu1 %v9287_v17  ;;  %8009 = vmatprep.subr.bf16.mxu0 %v9295_v20  ;;  %v9362_v17 = vld [vmem:[%s12358_s4 + $0x9f8] ss:$12 sps:$4 sm:$0xff]   ;;  %v9359_v20 = vld [vmem:[%s12358_s4 + $0xed0] ss:$12 sps:$4 sm:$0xff]  }
 0x245   :  { %6274 = vmatprep.subr.bf16.mxu1 %v9294_v19  ;;  %6261 = vmatprep.mubr.bf16.mxu1 %v11590_v23  ;;  %v272_v19 = vlaneseq }
 0x247   :  { %8010 = vmatpush3.bf16.msra.mxu0 %v9296_v22  ;;  %v9367_v22 = vld [vmem:[%s12358_s4 + $0xeec] ss:$12 sps:$4 sm:$0xff]  }
 0x248   :  { %6275 = vmatpush1.bf16.msra.mxu1 %v9292_v21  ;;  %8011 = vmatprep.subr.bf16.mxu0 %v9300_v25  ;;  %v9364_v21 = vld [vmem:[%s12358_s4 + $0x938] ss:$12 sps:$4 sm:$0xff]   ;;  %v9543_v25 = vld [vmem:[%s12360_s3 + $0xe0] ss:$92 sps:$4 sm:$0xff]  }
 0x249   :  { %6276 = vmatprep.subr.bf16.mxu1 %v9299_v24  ;;  %v9368_v24 = vld [vmem:[%s12358_s4 + $0xa10] ss:$12 sps:$4 sm:$0xff]  }
 0x24b   :  { %6262 = vmatmul.mubr.bf16.gmra.mrb[4].mxu1 %v11606_v27  ;;  %8012 = vmatpush3.bf16.msra.mxu0 %v9301_v28  ;;  %v9365_v28 = vld [vmem:[%s12358_s4 + $0xee8] ss:$12 sps:$4 sm:$0xff]  }
 0x24c   :  { %6277 = vmatpush1.bf16.msra.mxu1 %v9297_v26  ;;  %8013 = vmatprep.subr.bf16.mxu0 %v9305_v30  ;;  %v11789_v26 = vshrl.u32 %v272_v19, 7  ;;  %v9375_v30 = vld [vmem:[%s12358_s4 + $0xf04] ss:$12 sps:$4 sm:$0xff]   ;;  %v9401_v19 = vld [vmem:[%s12358_s4 + $0xb60] ss:$12 sps:$4 sm:$0xff]  }
 0x24d   :  { %6278 = vmatprep.subr.bf16.mxu1 %v9304_v29  ;;  %6304 = vmatprep.mubr.bf16.mxu1 %v11626_v33  ;;  %v9369_v29 = vld [vmem:[%s12358_s4 + $0x950] ss:$12 sps:$4 sm:$0xff]  }
 0x24f   :  { %8014 = vmatpush3.bf16.msra.mxu0 %v9306_v32  ;;  %v9544_v32 = vld [vmem:[%s12360_s3 + $0x34] ss:$92 sps:$4 sm:$0xff]  }
 0x250   :  { %6279 = vmatpush1.bf16.msra.mxu1 %v9302_v31  ;;  %8027 = vmatprep.subr.bf16.mxu0 %v9310_v35  ;;  %v9376_v31 = vld [vmem:[%s12358_s4 + $0xa28] ss:$12 sps:$4 sm:$0xff]   ;;  %v9373_v35 = vld [vmem:[%s12358_s4 + $0xf00] ss:$12 sps:$4 sm:$0xff]  }
 0x251   :  { %6280 = vmatprep.subr.bf16.mxu1 %v9309_v34  ;;  %v11809_v34 = vld [vmem:[%s12360_s3 + $0x48] ss:$92 sps:$4 sm:$0xff]  }
 0x252   :  { %6660 = vmatmul.mubr.bf16.vlgmr.msra.gmra.mrb[40].mxu0 %v9537_v41  ;;  %v9381_v41 = vld [vmem:[%s12358_s4 + $0xa40] ss:$12 sps:$4 sm:$0xff]  }
 0x253   :  { %8028 = vmatpush3.bf16.msra.mxu0 %v9311_v37  ;;  %6667 = vmatprep.mubr.bf16.mxu0 %v9538_v45  ;;  %v9377_v37 = vld [vmem:[%s12358_s4 + $0x968] ss:$12 sps:$4 sm:$0xff]   ;;  %v9378_v45 = vld [vmem:[%s12358_s4 + $0xf18] ss:$12 sps:$4 sm:$0xff]  }
 0x254   :  { %6281 = vmatpush1.bf16.msra.mxu1 %v9307_v36  ;;  %8029 = vmatprep.subr.bf16.mxu0 %v9315_v39  ;;  %v274_v36 = vsub.s32 0, %v11789_v26  ;;  %v278_v39 = vsub.s32 1, %v11789_v26 }
 0x255   :  { %6282 = vmatprep.subr.bf16.mxu1 %v9314_v38  ;;  %v270_v38 = vld [vmem:[%s12361_s2] sm:$0x3] }
 0x257   :  { %8030 = vmatpush3.bf16.msra.mxu0 %v9316_v42  ;;  %v11831_v42 = vld [vmem:[%s12360_s3 + $0x104] ss:$92 sps:$4 sm:$0xff]  }
 0x258   :  { %6283 = vmatpush1.bf16.msra.mxu1 %v9312_v40  ;;  %8031 = vmatprep.subr.bf16.mxu0 %v9320_v44  ;;  %v9380_v40 = vld [vmem:[%s12358_s4 + $0xf1c] ss:$12 sps:$4 sm:$0xff]   ;;  %v279_v44 = vrot.slane %v270_v38, %v278_v39 }
 0x259   :  { %6284 = vmatprep.subr.bf16.mxu1 %v9319_v43  ;;  %v275_v43 = vrot.slane %v270_v38, %v274_v36  ;;  %v9410_v38 = vld [vmem:[%s12358_s4 + $0xfac] ss:$12 sps:$4 sm:$0xff]  }
 0x25a   :  { %6668 = vmatmul.mubr.bf16.gmra.mrb[44].mxu0 %v9539_v51 }
 0x25b   :  { %8032 = vmatpush3.bf16.msra.mxu0 %v9321_v47  ;;  %6708 = vmatprep.mubr.bf16.mxu0 %v9540_v55  ;;  %v9385_v47 = vld [vmem:[%s12358_s4 + $0xf34] ss:$12 sps:$4 sm:$0xff]   ;;  %v9383_v55 = vld [vmem:[%s12358_s4 + $0xf30] ss:$12 sps:$4 sm:$0xff]  }
 0x25c   :  { %6285 = vmatpush1.bf16.msra.mxu1 %v9317_v46  ;;  %8033 = vmatprep.subr.bf16.mxu0 %v9325_v49  ;;  %v9382_v46 = vld [vmem:[%s12358_s4 + $0x980] ss:$12 sps:$4 sm:$0xff]  }
 0x25d   :  { %6286 = vmatprep.subr.bf16.mxu1 %v9324_v48  ;;  %v9386_v48 = vld [vmem:[%s12358_s4 + $0xa58] ss:$12 sps:$4 sm:$0xff]  }
 0x25f   :  { %8034 = vmatpush3.bf16.msra.mxu0 %v9326_v52  ;;  %v11854_v52 = vld [vmem:[%s12360_s3 + $0x100] ss:$92 sps:$4 sm:$0xff]  }
 0x260   :  { %6287 = vmatpush1.bf16.msra.mxu1 %v9322_v50  ;;  %8035 = vmatprep.subr.bf16.mxu0 %v9330_v54 }
 0x261   :  { %6288 = vmatprep.subr.bf16.mxu1 %v9329_v53 }
 0x263   :  { %8036 = vmatpush3.bf16.msra.mxu0 %v9331_v57 }
 0x264   :  { %6289 = vmatpush1.bf16.msra.mxu1 %v9327_v56  ;;  %8037 = vmatprep.subr.bf16.mxu0 %v9335_v59  ;;  %v9387_v56 = vld [vmem:[%s12358_s4 + $0x998] ss:$12 sps:$4 sm:$0xff]  }
 0x265   :  { %6290 = vmatprep.subr.bf16.mxu1 %v9334_v58 }
 0x267   :  { %8038 = vmatpush3.bf16.msra.mxu0 %v9336_v61  ;;  %v9391_v61 = vld [vmem:[%s12358_s4 + $0xa70] ss:$12 sps:$4 sm:$0xff]  }
 0x268   :  { %6291 = vmatpush1.bf16.msra.mxu1 %v9332_v60  ;;  %8039 = vmatprep.subr.bf16.mxu0 %v9340_v63  ;;  %v9390_v60 = vld [vmem:[%s12358_s4 + $0xf4c] ss:$12 sps:$4 sm:$0xff]  }
 0x269   :  { %6292 = vmatprep.subr.bf16.mxu1 %v9339_v62 }
 0x26b   :  { %8040 = vmatpush3.bf16.msra.mxu0 %v9341_v1 }
 0x26c   :  { %6293 = vmatpush1.bf16.msra.mxu1 %v9337_v0  ;;  %8041 = vmatprep.subr.bf16.mxu0 %v9345_v3  ;;  %v11871_v0 = vld [vmem:[%s12360_s3 + $0x54] ss:$92 sps:$4 sm:$0xff]  }
 0x26d   :  { %6294 = vmatprep.subr.bf16.mxu1 %v9344_v2  ;;  %v9388_v3 = vld [vmem:[%s12358_s4 + $0xf48] ss:$12 sps:$4 sm:$0xff]  }
 0x26f   :  { %8042 = vmatpush3.bf16.msra.mxu0 %v9346_v5  ;;  %v9395_v5 = vld [vmem:[%s12358_s4 + $0xf64] ss:$12 sps:$4 sm:$0xff]  }
 0x270   :  { %6295 = vmatpush1.bf16.msra.mxu1 %v9342_v4  ;;  %8055 = vmatprep.subr.bf16.mxu0 %v9350_v7  ;;  %v9392_v4 = vld [vmem:[%s12358_s4 + $0x9b0] ss:$12 sps:$4 sm:$0xff]  }
 0x271   :  { %6296 = vmatprep.subr.bf16.mxu1 %v9349_v6  ;;  %v9396_v6 = vld [vmem:[%s12358_s4 + $0xb48] ss:$12 sps:$4 sm:$0xff]  }
 0x272   :  { %6709 = vmatmul.mubr.bf16.vlgmr.msra.gmra.mrb[48].mxu0 %v9541_v12  ;;  %v9393_v12 = vld [vmem:[%s12358_s4 + $0xf60] ss:$12 sps:$4 sm:$0xff]  }
 0x273   :  { %8056 = vmatpush3.bf16.msra.mxu0 %v9351_v9  ;;  %6716 = vmatprep.mubr.bf16.mxu0 %v9542_v18  ;;  %v9400_v18 = vld [vmem:[%s12358_s4 + $0xf7c] ss:$12 sps:$4 sm:$0xff]  }
 0x274   :  { %6297 = vmatpush1.bf16.msra.mxu1 %v9347_v8  ;;  %8057 = vmatprep.subr.bf16.mxu0 %v9355_v11 }
 0x275   :  { %6298 = vmatprep.subr.bf16.mxu1 %v9354_v10 }
 0x277   :  { %8058 = vmatpush3.bf16.msra.mxu0 %v9356_v14 }
 0x278   :  { %6299 = vmatpush1.bf16.msra.mxu1 %v9352_v13  ;;  %8059 = vmatprep.subr.bf16.mxu0 %v9362_v17  ;;  %v9397_v13 = vld [vmem:[%s12358_s4 + $0xa88] ss:$12 sps:$4 sm:$0xff]  }
 0x279   :  { %6300 = vmatprep.subr.bf16.mxu1 %v9361_v16 }
 0x27a   :  { %6717 = vmatmul.mubr.bf16.gmra.mrb[52].mxu0 %v9543_v25 }
 0x27b   :  { %8060 = vmatpush3.bf16.msra.mxu0 %v9364_v21  ;;  %6757 = vmatprep.mubr.bf16.mxu0 %v9544_v32  ;;  %v9546_v32 = vld [vmem:[%s12360_s3 + $0xec] ss:$92 sps:$4 sm:$0xff]  }
 0x27c   :  { %6301 = vmatpush1.bf16.msra.mxu1 %v9359_v20  ;;  %8061 = vmatprep.subr.bf16.mxu0 %v9368_v24  ;;  %v9545_v24 = vld [vmem:[%s12360_s3 + $0x30] ss:$92 sps:$4 sm:$0xff]  }
 0x27d   :  { %6302 = vmatprep.subr.bf16.mxu1 %v9367_v22 }
 0x27f   :  { %8062 = vmatpush3.bf16.msra.mxu0 %v9369_v29  ;;  %v9402_v29 = vld [vmem:[%s12358_s4 + $0xaa0] ss:$12 sps:$4 sm:$0xff]  }
 0x280   :  { %6303 = vmatpush1.bf16.msra.mxu1 %v9365_v28  ;;  %8063 = vmatprep.subr.bf16.mxu0 %v9376_v31  ;;  %v9398_v28 = vld [vmem:[%s12358_s4 + $0xf78] ss:$12 sps:$4 sm:$0xff]  }
 0x281   :  { %6325 = vmatprep.subr.bf16.mxu1 %v9375_v30  ;;  %v9405_v30 = vld [vmem:[%s12358_s4 + $0xf94] ss:$12 sps:$4 sm:$0xff]   ;;  %v9406_v31 = vld [vmem:[%s12358_s4 + $0xb78] ss:$12 sps:$4 sm:$0xff]  }
 0x283   :  { %6305 = vmatmul.mubr.bf16.vlgmr.msra.gmra.mrb[0].mxu1 %v11809_v34  ;;  %8064 = vmatpush3.bf16.msra.mxu0 %v9377_v37  ;;  %v9407_v37 = vld [vmem:[%s12358_s4 + $0xab8] ss:$12 sps:$4 sm:$0xff]  }
 0x284   :  { %6326 = vmatpush1.bf16.msra.mxu1 %v9373_v35  ;;  %8065 = vmatprep.subr.bf16.mxu0 %v9381_v41  ;;  %v9403_v35 = vld [vmem:[%s12358_s4 + $0xf90] ss:$12 sps:$4 sm:$0xff]   ;;  %v9547_v41 = vld [vmem:[%s12360_s3 + $0xe8] ss:$92 sps:$4 sm:$0xff]  }
 0x285   :  { %6327 = vmatprep.subr.bf16.mxu1 %v9380_v40  ;;  %v1859_v49 = vpop.f32.mrb[0].mxu0  ;;  %6314 = vmatprep.mubr.bf16.mxu1 %v11831_v42  ;;  %v9411_v40 = vld [vmem:[%s12358_s4 + $0xb90] ss:$12 sps:$4 sm:$0xff]  }
 0x286   :  { %v8213_v50 = vadd.f32 %v1859_v49, %v275_v43  ;;  %v1861_v51 = vpop.f32.mrb[1].mxu0  ;;  %v9417_v49 = vld [vmem:[%s12358_s4 + $0xae8] ss:$12 sps:$4 sm:$0xff]  }
 0x287   :  { %v8214_v53 = vadd.f32 %v1861_v51, %v279_v44  ;;  %v1863_v54 = vpop.f32.mrb[2].mxu0  ;;  %8066 = vmatpush3.bf16.msra.mxu0 %v9382_v46  ;;  %v9416_v46 = vld [vmem:[%s12358_s4 + $0xba8] ss:$12 sps:$4 sm:$0xff]   ;;  %v9421_v51 = vld [vmem:[%s12358_s4 + $0xbc0] ss:$12 sps:$4 sm:$0xff]  }
 0x288   :  { %6328 = vmatpush1.bf16.msra.mxu1 %v9378_v45  ;;  %v1878_v57 = vmax.f32 %v8213_v50, 0.0  ;;  %v8215_v58 = vadd.f32 %v1863_v54, %v275_v43  ;;  %v1865_v59 = vpop.f32.mrb[3].mxu0  ;;  %8067 = vmatprep.subr.bf16.mxu0 %v9386_v48  ;;  %v9415_v45 = vld [vmem:[%s12358_s4 + $0xfc4] ss:$12 sps:$4 sm:$0xff]   ;;  %v9413_v48 = vld [vmem:[%s12358_s4 + $0xfc0] ss:$12 sps:$4 sm:$0xff]  }
 0x289   :  { %6329 = vmatprep.subr.bf16.mxu1 %v9385_v47  ;;  %v1879_v62 = vmax.f32 %v8214_v53, 0.0  ;;  %v8216_v63 = vadd.f32 %v1865_v59, %v279_v44  ;;  %v9548_v47 = vld [vmem:[%s12360_s3 + $0x3c] ss:$92 sps:$4 sm:$0xff]   ;;  %v2674_v53 = vsub.s32 2, %v11789_v26  ;;  %v11991_v54 = vld [vmem:[%s12363_s5] sm:$0x7] }
 0x28a   :  { %1886 = vst [vmem:[%s12362_s6] sm:$0xff] %v1878_v57  ;;  %v1880_v1 = vmax.f32 %v8215_v58, 0.0  ;;  %v9420_v50 = vld [vmem:[%s12358_s4 + $0xfdc] ss:$12 sps:$4 sm:$0xff]   ;;  %v9425_v57 = vld [vmem:[%s12358_s4 + $0xff4] ss:$12 sps:$4 sm:$0xff]  }
 0x28b   :  { %6315 = vmatmul.mubr.bf16.gmra.mrb[4].mxu1 %v11854_v52  ;;  %1887 = vst.msk [vmem:[%s12362_s6 + $0x8] sm:$0xff] %vm1500_vm0, %v1879_v62  ;;  %v1881_v2 = vmax.f32 %v8216_v63, 0.0  ;;  %8068 = vmatpush3.bf16.msra.mxu0 %v9387_v56  ;;  %v9422_v56 = vld [vmem:[%s12358_s4 + $0xb00] ss:$12 sps:$4 sm:$0xff]   ;;  %v9426_v58 = vld [vmem:[%s12358_s4 + $0xbd8] ss:$12 sps:$4 sm:$0xff]  }
 0x28c   :  { %6330 = vmatpush1.bf16.msra.mxu1 %v9383_v55  ;;  %1888 = vst [vmem:[%s12362_s6 + $0x10] sm:$0xff] %v1880_v1  ;;  %8069 = vmatprep.subr.bf16.mxu0 %v9391_v61  ;;  %v9418_v55 = vld [vmem:[%s12358_s4 + $0xfd8] ss:$12 sps:$4 sm:$0xff]   ;;  %v9423_v1 = vld [vmem:[%s12358_s4 + $0xff0] ss:$12 sps:$4 sm:$0xff]  }
 0x28d   :  { %6331 = vmatprep.subr.bf16.mxu1 %v9390_v60  ;;  %1889 = vst.msk [vmem:[%s12362_s6 + $0x18] sm:$0xff] %vm1500_vm0, %v1881_v2  ;;  %v1869_v7 = vpop.f32.mrb[4].mxu0  ;;  %6357 = vmatprep.mubr.bf16.mxu1 %v11871_v0  ;;  %v2675_v60 = vrot.slane %v11991_v54, %v2674_v53  ;;  %v9427_v2 = vld [vmem:[%s12358_s4 + $0xb18] ss:$12 sps:$4 sm:$0xff]   ;;  %v9463_v53 = vld [vmem:[%s12358_s4 + $0xc68] ss:$12 sps:$4 sm:$0xff]  }
 0x28e   :  { %v8217_v8 = vadd.f32 %v1869_v7, %v275_v43  ;;  %v1871_v9 = vpop.f32.mrb[5].mxu0 }
 0x28f   :  { %v8218_v10 = vadd.f32 %v1871_v9, %v279_v44  ;;  %v1873_v11 = vpop.f32.mrb[6].mxu0  ;;  %8070 = vmatpush3.bf16.msra.mxu0 %v9392_v4  ;;  %v9430_v4 = vld [vmem:[%s12358_s4 + $0x100c] ss:$12 sps:$4 sm:$0xff]   ;;  %v9428_v9 = vld [vmem:[%s12358_s4 + $0x1008] ss:$12 sps:$4 sm:$0xff]  }
 0x290   :  { %6332 = vmatpush1.bf16.msra.mxu1 %v9388_v3  ;;  %v1882_v14 = vmax.f32 %v8217_v8, 0.0  ;;  %v8219_v16 = vadd.f32 %v1873_v11, %v275_v43  ;;  %v1875_v17 = vpop.f32.mrb[7].mxu0  ;;  %8083 = vmatprep.subr.bf16.mxu0 %v9396_v6  ;;  %v9408_v43 = vld [vmem:[%s12358_s4 + $0xfa8] ss:$12 sps:$4 sm:$0xff]   ;;  %v9435_v11 = vld [vmem:[%s12358_s4 + $0x1024] ss:$12 sps:$4 sm:$0xff]  }
 0x291   :  { %6333 = vmatprep.subr.bf16.mxu1 %v9395_v5  ;;  %v1883_v20 = vmax.f32 %v8218_v10, 0.0  ;;  %v8220_v21 = vadd.f32 %v1875_v17, %v279_v44  ;;  %v9412_v44 = vld [vmem:[%s12358_s4 + $0xad0] ss:$12 sps:$4 sm:$0xff]   ;;  %v9437_v17 = vld [vmem:[%s12358_s4 + $0xc08] ss:$12 sps:$4 sm:$0xff]  }
 0x292   :  { %1890 = vst [vmem:[%s12362_s6 + $0x20] sm:$0xff] %v1882_v14  ;;  %v1884_v22 = vmax.f32 %v8219_v16, 0.0  ;;  %6758 = vmatmul.mubr.bf16.vlgmr.msra.gmra.mrb[56].mxu0 %v9545_v24  ;;  %v9431_v5 = vld [vmem:[%s12358_s4 + $0xbf0] ss:$12 sps:$4 sm:$0xff]   ;;  %v9433_v16 = vld [vmem:[%s12358_s4 + $0x1020] ss:$12 sps:$4 sm:$0xff]  }
 0x293   :  { %1891 = vst.msk [vmem:[%s12362_s6 + $0x28] sm:$0xff] %vm1500_vm0, %v1883_v20  ;;  %v1885_v25 = vmax.f32 %v8220_v21, 0.0  ;;  %8084 = vmatpush3.bf16.msra.mxu0 %v9397_v13  ;;  %6765 = vmatprep.mubr.bf16.mxu0 %v9546_v32  ;;  %v9432_v10 = vld [vmem:[%s12358_s4 + $0xb30] ss:$12 sps:$4 sm:$0xff]   ;;  %v9441_v21 = vld [vmem:[%s12358_s4 + $0xce0] ss:$12 sps:$4 sm:$0xff]  }
 0x294   :  { %6334 = vmatpush1.bf16.msra.mxu1 %v9393_v12  ;;  %1892 = vst [vmem:[%s12362_s6 + $0x30] sm:$0xff] %v1884_v22  ;;  %8085 = vmatprep.subr.bf16.mxu0 %v9401_v19  ;;  %v9436_v12 = vld [vmem:[%s12358_s4 + $0xcc8] ss:$12 sps:$4 sm:$0xff]  }
 0x295   :  { %6335 = vmatprep.subr.bf16.mxu1 %v9400_v18  ;;  %1893 = vst.msk [vmem:[%s12362_s6 + $0x38] sm:$0xff] %vm1500_vm0, %v1885_v25  ;;  %v9440_v20 = vld [vmem:[%s12358_s4 + $0x103c] ss:$12 sps:$4 sm:$0xff]   ;;  %v9448_v32 = vld [vmem:[%s12358_s4 + $0x1054] ss:$12 sps:$4 sm:$0xff]  }
 0x297   :  { %8086 = vmatpush3.bf16.msra.mxu0 %v9402_v29  ;;  %v9438_v29 = vld [vmem:[%s12358_s4 + $0x1038] ss:$12 sps:$4 sm:$0xff]  }
 0x298   :  { %6336 = vmatpush1.bf16.msra.mxu1 %v9398_v28  ;;  %8087 = vmatprep.subr.bf16.mxu0 %v9406_v31  ;;  %v9549_v28 = vld [vmem:[%s12360_s3 + $0x38] ss:$92 sps:$4 sm:$0xff]  }
 0x299   :  { %6337 = vmatprep.subr.bf16.mxu1 %v9405_v30  ;;  %v9442_v30 = vld [vmem:[%s12358_s4 + $0xc20] ss:$12 sps:$4 sm:$0xff]  }
 0x29a   :  { %6766 = vmatmul.mubr.bf16.gmra.mrb[60].mxu0 %v9547_v41  ;;  %v9453_v41 = vld [vmem:[%s12358_s4 + $0x106c] ss:$12 sps:$4 sm:$0xff]  }
 0x29b   :  { %8088 = vmatpush3.bf16.msra.mxu0 %v9407_v37  ;;  %6806 = vmatprep.mubr.bf16.mxu0 %v9548_v47  ;;  %v9550_v37 = vld [vmem:[%s12360_s3 + $0xf4] ss:$92 sps:$4 sm:$0xff]  }
 0x29c   :  { %6338 = vmatpush1.bf16.msra.mxu1 %v9403_v35  ;;  %8089 = vmatprep.subr.bf16.mxu0 %v9411_v40  ;;  %v9449_v35 = vld [vmem:[%s12358_s4 + $0xcf8] ss:$12 sps:$4 sm:$0xff]  }
 0x29d   :  { %6339 = vmatprep.subr.bf16.mxu1 %v9410_v38  ;;  %v9446_v38 = vld [vmem:[%s12358_s4 + $0x1050] ss:$12 sps:$4 sm:$0xff]   ;;  %v9450_v40 = vld [vmem:[%s12358_s4 + $0xc38] ss:$12 sps:$4 sm:$0xff]  }
 0x29e   :  { %v9461_v47 = vld [vmem:[%s12358_s4 + $0x1084] ss:$12 sps:$4 sm:$0xff]  }
 0x29f   :  { %8090 = vmatpush3.bf16.msra.mxu0 %v9412_v44  ;;  %v9551_v44 = vld [vmem:[%s12360_s3 + $0xf0] ss:$92 sps:$4 sm:$0xff]  }
 0x2a0   :  { %6340 = vmatpush1.bf16.msra.mxu1 %v9408_v43  ;;  %8091 = vmatprep.subr.bf16.mxu0 %v9416_v46  ;;  %v9454_v43 = vld [vmem:[%s12358_s4 + $0xd10] ss:$12 sps:$4 sm:$0xff]  }
 0x2a1   :  { %6341 = vmatprep.subr.bf16.mxu1 %v9415_v45  ;;  %v9451_v45 = vld [vmem:[%s12358_s4 + $0x1068] ss:$12 sps:$4 sm:$0xff]   ;;  %v9455_v46 = vld [vmem:[%s12358_s4 + $0xc50] ss:$12 sps:$4 sm:$0xff]  }
 0x2a3   :  { %8092 = vmatpush3.bf16.msra.mxu0 %v9417_v49  ;;  %v9552_v49 = vld [vmem:[%s12360_s3 + $0x44] ss:$92 sps:$4 sm:$0xff]  }
 0x2a4   :  { %6342 = vmatpush1.bf16.msra.mxu1 %v9413_v48  ;;  %8093 = vmatprep.subr.bf16.mxu0 %v9421_v51  ;;  %v9462_v48 = vld [vmem:[%s12358_s4 + $0xd28] ss:$12 sps:$4 sm:$0xff]   ;;  %v9459_v51 = vld [vmem:[%s12358_s4 + $0x1080] ss:$12 sps:$4 sm:$0xff]  }
 0x2a5   :  { %6343 = vmatprep.subr.bf16.mxu1 %v9420_v50  ;;  %v7903_v59 = vpop.f32.mrb[8].mxu0  ;;  %v12101_v50 = vld [vmem:[%s12360_s3 + $0x50] ss:$92 sps:$4 sm:$0xff]  }
 0x2a6   :  { %v7904_v61 = vpop.f32.mrb[9].mxu0 }
 0x2a7   :  { %v7905_v62 = vadd.f32 %v7904_v61, %v7903_v59  ;;  %v7906_v63 = vpop.f32.mrb[10].mxu0  ;;  %8094 = vmatpush3.bf16.msra.mxu0 %v9422_v56  ;;  %v9467_v56 = vld [vmem:[%s12358_s4 + $0xd40] ss:$12 sps:$4 sm:$0xff]   ;;  %v9475_v61 = vld [vmem:[%s12358_s4 + $0xd58] ss:$12 sps:$4 sm:$0xff]  }
 0x2a8   :  { %6344 = vmatpush1.bf16.msra.mxu1 %v9418_v55  ;;  %v7907_v3 = vpop.f32.mrb[11].mxu0  ;;  %8095 = vmatprep.subr.bf16.mxu0 %v9426_v58  ;;  %v9466_v55 = vld [vmem:[%s12358_s4 + $0x109c] ss:$12 sps:$4 sm:$0xff]   ;;  %v9464_v58 = vld [vmem:[%s12358_s4 + $0x1098] ss:$12 sps:$4 sm:$0xff]  }
 0x2a9   :  { %6345 = vmatprep.subr.bf16.mxu1 %v9425_v57  ;;  %v12018_v6 = vadd.f32 %v7905_v62, %v2675_v60  ;;  %v7908_v7 = vadd.f32 %v7907_v3, %v7906_v63  ;;  %v12118_v57 = vld [vmem:[%s12360_s3 + $0x10c] ss:$92 sps:$4 sm:$0xff]  }
 0x2aa   :  { %v9468_v59 = vld [vmem:[%s12358_s4 + $0xc80] ss:$12 sps:$4 sm:$0xff]  }
 0x2ab   :  { %v12020_v8 = vadd.f32 %v7908_v7, %v2675_v60  ;;  %8096 = vmatpush3.bf16.msra.mxu0 %v9427_v2 }
 0x2ac   :  { %6346 = vmatpush1.bf16.msra.mxu1 %v9423_v1  ;;  %8097 = vmatprep.subr.bf16.mxu0 %v9431_v5  ;;  %v12137_v1 = vld [vmem:[%s12360_s3 + $0x108] ss:$92 sps:$4 sm:$0xff]  }
 0x2ad   :  { %6347 = vmatprep.subr.bf16.mxu1 %v9430_v4  ;;  %v7909_v13 = vpop.f32.mrb[12].mxu0  ;;  %v9472_v4 = vld [vmem:[%s12358_s4 + $0x10b0] ss:$12 sps:$4 sm:$0xff]   ;;  %v9476_v5 = vld [vmem:[%s12358_s4 + $0xc98] ss:$12 sps:$4 sm:$0xff]  }
 0x2ae   :  { %v7910_v14 = vpop.f32.mrb[13].mxu0 }
 0x2af   :  { %8098 = vmatpush3.bf16.msra.mxu0 %v9432_v10  ;;  %v7911_v18 = vadd.f32 %v7910_v14, %v7909_v13  ;;  %v7912_v19 = vpop.f32.mrb[14].mxu0  ;;  %v9480_v10 = vld [vmem:[%s12358_s4 + $0xd70] ss:$12 sps:$4 sm:$0xff]   ;;  %v9477_v14 = vld [vmem:[%s12358_s4 + $0x10c8] ss:$12 sps:$4 sm:$0xff]  }
 0x2b0   :  { %6348 = vmatpush1.bf16.msra.mxu1 %v9428_v9  ;;  %8111 = vmatprep.subr.bf16.mxu0 %v9436_v12  ;;  %v7913_v22 = vpop.f32.mrb[15].mxu0  ;;  %v9479_v9 = vld [vmem:[%s12358_s4 + $0x10cc] ss:$12 sps:$4 sm:$0xff]  }
 0x2b1   :  { %6349 = vmatprep.subr.bf16.mxu1 %v9435_v11  ;;  %v12046_v24 = vadd.f32 %v7911_v18, %v2675_v60  ;;  %v7914_v25 = vadd.f32 %v7913_v22, %v7912_v19  ;;  %v9553_v18 = vmov 0  }
 0x2b2   :  { %6807 = vmatmul.mubr.bf16.vlgmr.msra.gmra.mrb[64].mxu0 %v9549_v28  ;;  %v9486_v28 = vld [vmem:[%s12358_s4 + $0xf08] ss:$12 sps:$4 sm:$0xff]  }
 0x2b3   :  { %8112 = vmatpush3.bf16.msra.mxu0 %v9437_v17  ;;  %v12057_v31 = vadd.f32 %v7914_v25, %v2675_v60  ;;  %6814 = vmatprep.mubr.bf16.mxu0 %v9550_v37  ;;  %v9474_v60 = vld [vmem:[%s12358_s4 + $0x10b4] ss:$12 sps:$4 sm:$0xff]  }
 0x2b4   :  { %6350 = vmatpush1.bf16.msra.mxu1 %v9433_v16  ;;  %8113 = vmatprep.subr.bf16.mxu0 %v9441_v21  ;;  %v9481_v16 = vld [vmem:[%s12358_s4 + $0xcb0] ss:$12 sps:$4 sm:$0xff]   ;;  %v9484_v25 = vld [vmem:[%s12358_s4 + $0xd88] ss:$12 sps:$4 sm:$0xff]  }
 0x2b5   :  { %6351 = vmatprep.subr.bf16.mxu1 %v9440_v20  ;;  %v12173_v20 = vld [vmem:[%s12360_s3 + $0x58] ss:$92 sps:$4 sm:$0xff]  }
 0x2b7   :  { %8114 = vmatpush3.bf16.msra.mxu0 %v9442_v30  ;;  %v9487_v30 = vld [vmem:[%s12358_s4 + $0xe60] ss:$12 sps:$4 sm:$0xff]  }
 0x2b8   :  { %6352 = vmatpush1.bf16.msra.mxu1 %v9438_v29  ;;  %8115 = vmatprep.subr.bf16.mxu0 %v9449_v35 }
 0x2b9   :  { %6353 = vmatprep.subr.bf16.mxu1 %v9448_v32  ;;  %v9489_v32 = vld [vmem:[%s12358_s4 + $0xfe0] ss:$12 sps:$4 sm:$0xff]  }
 0x2ba   :  { %6815 = vmatmul.mubr.bf16.gmra.mrb[68].mxu0 %v9551_v44  ;;  %v9495_v44 = vld [vmem:[%s12358_s4 + $0xf38] ss:$12 sps:$4 sm:$0xff]  }
 0x2bb   :  { %8116 = vmatpush3.bf16.msra.mxu0 %v9450_v40  ;;  %6855 = vmatprep.mubr.bf16.mxu0 %v9552_v49  ;;  %v9488_v40 = vld [vmem:[%s12358_s4 + $0xda0] ss:$12 sps:$4 sm:$0xff]   ;;  %v9501_v49 = vld [vmem:[%s12358_s4 + $0xde8] ss:$12 sps:$4 sm:$0xff]  }
 0x2bc   :  { %6354 = vmatpush1.bf16.msra.mxu1 %v9446_v38  ;;  %8117 = vmatprep.subr.bf16.mxu0 %v9454_v43  ;;  %v9493_v43 = vld [vmem:[%s12358_s4 + $0xdb8] ss:$12 sps:$4 sm:$0xff]  }
 0x2bd   :  { %6355 = vmatprep.subr.bf16.mxu1 %v9453_v41  ;;  %v9492_v41 = vld [vmem:[%s12358_s4 + $0xe78] ss:$12 sps:$4 sm:$0xff]  }
 0x2bf   :  { %8118 = vmatpush3.bf16.msra.mxu0 %v9455_v46  ;;  %v9497_v46 = vld [vmem:[%s12358_s4 + $0xdd0] ss:$12 sps:$4 sm:$0xff]  }
 0x2c0   :  { %6356 = vmatpush1.bf16.msra.mxu1 %v9451_v45  ;;  %8119 = vmatprep.subr.bf16.mxu0 %v9462_v48  ;;  %v9498_v45 = vld [vmem:[%s12358_s4 + $0x1010] ss:$12 sps:$4 sm:$0xff]   ;;  %v9500_v48 = vld [vmem:[%s12358_s4 + $0xea8] ss:$12 sps:$4 sm:$0xff]  }
 0x2c1   :  { %6378 = vmatprep.subr.bf16.mxu1 %v9461_v47  ;;  %v9499_v47 = vld [vmem:[%s12358_s4 + $0xf50] ss:$12 sps:$4 sm:$0xff]  }
 0x2c3   :  { %6358 = vmatmul.mubr.bf16.vlgmr.msra.gmra.mrb[0].mxu1 %v12101_v50  ;;  %8120 = vmatpush3.bf16.msra.mxu0 %v9463_v53  ;;  %v9504_v53 = vld [vmem:[%s12358_s4 + $0xec0] ss:$12 sps:$4 sm:$0xff]  }
 0x2c4   :  { %6379 = vmatpush1.bf16.msra.mxu1 %v9459_v51  ;;  %8121 = vmatprep.subr.bf16.mxu0 %v9467_v56  ;;  %v9503_v51 = vld [vmem:[%s12358_s4 + $0xf68] ss:$12 sps:$4 sm:$0xff]   ;;  %v9508_v56 = vld [vmem:[%s12358_s4 + $0xed8] ss:$12 sps:$4 sm:$0xff]  }
 0x2c5   :  { %6380 = vmatprep.subr.bf16.mxu1 %v9466_v55  ;;  %v7931_v62 = vpop.f32.mrb[16].mxu0  ;;  %6367 = vmatprep.mubr.bf16.mxu1 %v12118_v57  ;;  %v9507_v55 = vld [vmem:[%s12358_s4 + $0xf80] ss:$12 sps:$4 sm:$0xff]  }
 0x2c6   :  { %v7932_v63 = vpop.f32.mrb[17].mxu0 }
 0x2c7   :  { %v7933_v2 = vadd.f32 %v7932_v63, %v7931_v62  ;;  %v7934_v3 = vpop.f32.mrb[18].mxu0  ;;  %8122 = vmatpush3.bf16.msra.mxu0 %v9468_v59  ;;  %v9509_v63 = vld [vmem:[%s12358_s4 + $0xe18] ss:$12 sps:$4 sm:$0xff]  }
 0x2c8   :  { %6381 = vmatpush1.bf16.msra.mxu1 %v9464_v58  ;;  %v7935_v7 = vpop.f32.mrb[19].mxu0  ;;  %8123 = vmatprep.subr.bf16.mxu0 %v9475_v61  ;;  %v9510_v58 = vld [vmem:[%s12358_s4 + $0x1058] ss:$12 sps:$4 sm:$0xff]  }
 0x2c9   :  { %6382 = vmatprep.subr.bf16.mxu1 %v9474_v60  ;;  %v12152_v11 = vadd.f32 %v7933_v2, %v12018_v6  ;;  %v7936_v12 = vadd.f32 %v7935_v7, %v7934_v3  ;;  %v9483_v6 = vld [vmem:[%s12358_s4 + $0xe48] ss:$12 sps:$4 sm:$0xff]   ;;  %v9511_v2 = vld [vmem:[%s12358_s4 + $0xf98] ss:$12 sps:$4 sm:$0xff]  }
 0x2cb   :  { %6368 = vmatmul.mubr.bf16.gmra.mrb[4].mxu1 %v12137_v1  ;;  %v12156_v13 = vadd.f32 %v7936_v12, %v12020_v8  ;;  %8124 = vmatpush3.bf16.msra.mxu0 %v9476_v5  ;;  %v9485_v8 = vld [vmem:[%s12358_s4 + $0xfc8] ss:$12 sps:$4 sm:$0xff]   ;;  %v9514_v5 = vld [vmem:[%s12358_s4 + $0x1070] ss:$12 sps:$4 sm:$0xff]  }
 0x2cc   :  { %6383 = vmatpush1.bf16.msra.mxu1 %v9472_v4  ;;  %8125 = vmatprep.subr.bf16.mxu0 %v9480_v10  ;;  %v9512_v4 = vld [vmem:[%s12358_s4 + $0xef0] ss:$12 sps:$4 sm:$0xff]  }
 0x2cd   :  { %6384 = vmatprep.subr.bf16.mxu1 %v9479_v9  ;;  %v7937_v17 = vpop.f32.mrb[20].mxu0  ;;  %6410 = vmatprep.mubr.bf16.mxu1 %v9553_v18  ;;  %v9513_v12 = vld [vmem:[%s12358_s4 + $0xe30] ss:$12 sps:$4 sm:$0xff]  }
 0x2ce   :  { %v7938_v19 = vpop.f32.mrb[21].mxu0 }
 0x2cf   :  { %v7939_v21 = vadd.f32 %v7938_v19, %v7937_v17  ;;  %v7940_v22 = vpop.f32.mrb[22].mxu0  ;;  %8126 = vmatpush3.bf16.msra.mxu0 %v9481_v16  ;;  %v9516_v16 = vld [vmem:[%s12358_s4 + $0x1088] ss:$12 sps:$4 sm:$0xff]  }
 0x2d0   :  { %6385 = vmatpush1.bf16.msra.mxu1 %v9477_v14  ;;  %v7941_v29 = vpop.f32.mrb[23].mxu0  ;;  %8139 = vmatprep.subr.bf16.mxu0 %v9483_v6  ;;  %v9515_v14 = vld [vmem:[%s12358_s4 + $0xfb0] ss:$12 sps:$4 sm:$0xff]  }
 0x2d1   :  { %8167 = vmatprep.subr.bf16.mxu1 %v9485_v8  ;;  %v12188_v35 = vadd.f32 %v7939_v21, %v12046_v24  ;;  %v7942_v37 = vadd.f32 %v7941_v29, %v7940_v22  ;;  %v9490_v24 = vld [vmem:[%s12358_s4 + $0xf20] ss:$12 sps:$4 sm:$0xff]  }
 0x2d2   :  { %6856 = vmatmul.mubr.bf16.vlgmr.msra.gmra.mrb[72].mxu0 %v11564_v15  ;;  %v9494_v15 = vld [vmem:[%s12358_s4 + $0xff8] ss:$12 sps:$4 sm:$0xff]  }
 0x2d3   :  { %7883 = vmatmul.mubr.msk.bf16.vlgmr.msra.gmra.mrb[0].mxu1 %vm1500_vm0, %v12173_v20  ;;  %v12194_v38 = vadd.f32 %v7942_v37, %v12057_v31  ;;  %8140 = vmatpush3.bf16.msra.mxu0 %v9484_v25  ;;  %v12212_v31 = vld [vmem:[%s12360_s3 + $0x110] ss:$92 sps:$4 sm:$0xff]   ;;  %v9518_v25 = vld [vmem:[%s12358_s4 + $0x10b8] ss:$12 sps:$4 sm:$0xff]  }
 0x2d4   :  { %8168 = vmatpush3.bf16.msra.mxu1 %v9486_v28  ;;  %8141 = vmatprep.subr.bf16.mxu0 %v9487_v30 }
 0x2d5   :  { %8169 = vmatprep.subr.bf16.mxu1 %v9489_v32  ;;  %6420 = vmatprep.mubr.bf16.mxu1 %v9553_v18  ;;  %v9517_v18 = vld [vmem:[%s12358_s4 + $0x10a0] ss:$12 sps:$4 sm:$0xff]  }
 0x2d6   :  { %6863 = vmatprep.mubr.bf16.mxu0 %v11590_v23  ;;  %v9496_v23 = vld [vmem:[%s12358_s4 + $0xe90] ss:$12 sps:$4 sm:$0xff]  }
 0x2d7   :  { %8142 = vmatpush3.bf16.msra.mxu0 %v9488_v40 }
 0x2d8   :  { %8170 = vmatpush3.bf16.msra.mxu1 %v9490_v24  ;;  %8143 = vmatprep.subr.bf16.mxu0 %v9492_v41 }
 0x2d9   :  { %8171 = vmatprep.subr.bf16.mxu1 %v9494_v15 }
 0x2da   :  { %6864 = vmatmul.mubr.bf16.gmra.mrb[76].mxu0 %v11606_v27  ;;  %v9502_v27 = vld [vmem:[%s12358_s4 + $0x1028] ss:$12 sps:$4 sm:$0xff]  }
 0x2db   :  { %7884 = vmatmul.mubr.msk.bf16.gmra.mrb[4].mxu1 %vm1500_vm0, %v12212_v31  ;;  %8144 = vmatpush3.bf16.msra.mxu0 %v9493_v43 }
 0x2dc   :  { %8172 = vmatpush3.bf16.msra.mxu1 %v9495_v44  ;;  %8145 = vmatprep.subr.bf16.mxu0 %v9496_v23 }
 0x2dd   :  { %8173 = vmatprep.subr.bf16.mxu1 %v9498_v45  ;;  %6904 = vmatprep.mubr.bf16.mxu0 %v11626_v33  ;;  %v9506_v33 = vld [vmem:[%s12358_s4 + $0x1040] ss:$12 sps:$4 sm:$0xff]  }
 0x2de   :  { %6953 = vmatprep.mubr.bf16.mxu1 %v11871_v0  ;;  %v9505_v0 = vld [vmem:[%s12358_s4 + $0xe00] ss:$12 sps:$4 sm:$0xff]  }
 0x2df   :  { %8146 = vmatpush3.bf16.msra.mxu0 %v9497_v46 }
 0x2e0   :  { %8174 = vmatpush3.bf16.msra.mxu1 %v9499_v47  ;;  %8147 = vmatprep.subr.bf16.mxu0 %v9500_v48 }
 0x2e1   :  { %8175 = vmatprep.subr.bf16.mxu1 %v9502_v27 }
 0x2e3   :  { %8148 = vmatpush3.bf16.msra.mxu0 %v9501_v49 }
 0x2e4   :  { %8176 = vmatpush3.bf16.msra.mxu1 %v9503_v51  ;;  %8149 = vmatprep.subr.bf16.mxu0 %v9504_v53 }
 0x2e5   :  { %8177 = vmatprep.subr.bf16.mxu1 %v9506_v33  ;;  %v7959_v59 = vpop.f32.mrb[24].mxu0 }
 0x2e6   :  { %v7960_v60 = vpop.f32.mrb[25].mxu0 }
 0x2e7   :  { %v7961_v61 = vadd.f32 %v7960_v60, %v7959_v59  ;;  %v7962_v62 = vpop.f32.mrb[26].mxu0  ;;  %8150 = vmatpush3.bf16.msra.mxu0 %v9505_v0 }
 0x2e8   :  { %8178 = vmatpush3.bf16.msra.mxu1 %v9507_v55  ;;  %v7963_v3 = vpop.f32.mrb[27].mxu0  ;;  %8151 = vmatprep.subr.bf16.mxu0 %v9508_v56 }
 0x2e9   :  { %8179 = vmatprep.subr.bf16.mxu1 %v9510_v58  ;;  %v6564_v7 = vadd.f32 %v7961_v61, %v12152_v11  ;;  %v7964_v9 = vadd.f32 %v7963_v3, %v7962_v62 }
 0x2eb   :  { %v6567_v10 = vadd.f32 %v7964_v9, %v12156_v13  ;;  %8152 = vmatpush3.bf16.msra.mxu0 %v9509_v63 }
 0x2ec   :  { %8180 = vmatpush3.bf16.msra.mxu1 %v9511_v2  ;;  %8153 = vmatprep.subr.bf16.mxu0 %v9512_v4 }
 0x2ed   :  { %8181 = vmatprep.subr.bf16.mxu1 %v9514_v5  ;;  %v7965_v11 = vpop.f32.mrb[28].mxu0 }
 0x2ee   :  { %v7966_v6 = vpop.f32.mrb[29].mxu0 }
 0x2ef   :  { %v7967_v8 = vadd.f32 %v7966_v6, %v7965_v11  ;;  %v7968_v13 = vpop.f32.mrb[30].mxu0  ;;  %8154 = vmatpush3.bf16.msra.mxu0 %v9513_v12 }
 0x2f0   :  { %8182 = vmatpush3.bf16.msra.mxu1 %v9515_v14  ;;  %v7969_v17 = vpop.f32.mrb[31].mxu0  ;;  %8201 = vmatprep.subr.bf16.mxu0 %v9516_v16 }
 0x2f1   :  { %v6572_v19 = vadd.f32 %v7967_v8, %v12188_v35  ;;  %v7970_v21 = vadd.f32 %v7969_v17, %v7968_v13 }
 0x2f2   :  { %6905 = vmatmul.mubr.bf16.vlgmr.msra.gmra.mrb[80].mxu0 %v11809_v34  ;;  %v9519_v34 = vld [vmem:[%s12358_s4 + $0x10d0] ss:$12 sps:$4 sm:$0xff]  }
 0x2f3   :  { %6954 = vmatmul.mubr.bf16.vlgmr.msra.gmra.mrb[8].mxu1 %v12101_v50  ;;  %v6575_v22 = vadd.f32 %v7970_v21, %v12194_v38  ;;  %8202 = vmatpush3.bf16.msra.mxu0 %v9516_v16 }
 0x2f4   :  { %6912 = vmatprep.mubr.bf16.mxu0 %v11831_v42  ;;  %8203 = vmatprep.subr.bf16.mxu0 %v9517_v18 }
 0x2f5   :  { %6961 = vmatprep.mubr.bf16.mxu1 %v12118_v57 }
 0x2f7   :  { %8204 = vmatpush3.bf16.msra.mxu0 %v9517_v18 }
 0x2f8   :  { %8205 = vmatprep.subr.bf16.mxu0 %v9518_v25 }
 0x2fa   :  { %6913 = vmatmul.mubr.bf16.gmra.mrb[84].mxu0 %v11854_v52 }
 0x2fb   :  { %6962 = vmatmul.mubr.bf16.gmra.mrb[12].mxu1 %v12137_v1  ;;  %8206 = vmatpush3.bf16.msra.mxu0 %v9518_v25 }
 0x2fc   :  { %8209 = vmatprep.mubr.msk.bf16.mxu0 %vm1500_vm0, %v12173_v20  ;;  %8207 = vmatprep.subr.bf16.mxu0 %v9519_v34 }
 0x2ff   :  { %8208 = vmatpush3.bf16.msra.mxu0 %v9519_v34 }
 0x302   :  { %8210 = vmatmul.mubr.msk.bf16.vlgmr.msra.gmra.mrb[88].mxu0 %vm1500_vm0, %v12212_v31 }
 0x305   :  { %v7987_v42 = vpop.f32.mrb[32].mxu0 }
 0x306   :  { %v7988_v50 = vpop.f32.mrb[33].mxu0 }
 0x307   :  { %v7989_v57 = vadd.f32 %v7988_v50, %v7987_v42  ;;  %v7990_v28 = vpop.f32.mrb[34].mxu0 }
 0x308   :  { %v7991_v29 = vpop.f32.mrb[35].mxu0 }
 0x309   :  { %v6613_v30 = vadd.f32 %v7989_v57, %v6564_v7  ;;  %v7992_v32 = vadd.f32 %v7991_v29, %v7990_v28 }
 0x30b   :  { %v6616_v35 = vadd.f32 %v7992_v32, %v6567_v10 }
 0x30d   :  { %v7993_v52 = vpop.f32.mrb[36].mxu0 }
 0x30e   :  { %v7994_v37 = vpop.f32.mrb[37].mxu0 }
 0x30f   :  { %v7995_v1 = vadd.f32 %v7994_v37, %v7993_v52  ;;  %v7996_v38 = vpop.f32.mrb[38].mxu0 }
 0x310   :  { %v7997_v40 = vpop.f32.mrb[39].mxu0 }
 0x311   :  { %v6621_v24 = vadd.f32 %v7995_v1, %v6572_v19  ;;  %v7998_v20 = vadd.f32 %v7997_v40, %v7996_v38 }
 0x313   :  { %v6624_v41 = vadd.f32 %v7998_v20, %v6575_v22 }
 0x325   :  { %v8015_v15 = vpop.f32.mrb[40].mxu0 }
 0x326   :  { %v8016_v43 = vpop.f32.mrb[41].mxu0 }
 0x327   :  { %v8017_v44 = vadd.f32 %v8016_v43, %v8015_v15  ;;  %v8018_v31 = vpop.f32.mrb[42].mxu0 }
 0x328   :  { %v8019_v23 = vpop.f32.mrb[43].mxu0 }
 0x329   :  { %v6662_v45 = vadd.f32 %v8017_v44, %v6613_v30  ;;  %v8020_v46 = vadd.f32 %v8019_v23, %v8018_v31  ;;  %v2667_v23 = vrot.slane %v11991_v54, %v274_v36 }
 0x32b   :  { %v6665_v47 = vadd.f32 %v8020_v46, %v6616_v35 }
 0x32d   :  { %v8021_v48 = vpop.f32.mrb[44].mxu0 }
 0x32e   :  { %v8022_v27 = vpop.f32.mrb[45].mxu0 }
 0x32f   :  { %v8023_v49 = vadd.f32 %v8022_v27, %v8021_v48  ;;  %v8024_v51 = vpop.f32.mrb[46].mxu0 }
 0x330   :  { %v8025_v53 = vpop.f32.mrb[47].mxu0 }
 0x331   :  { %v6670_v33 = vadd.f32 %v8023_v49, %v6621_v24  ;;  %v8026_v0 = vadd.f32 %v8025_v53, %v8024_v51 }
 0x333   :  { %v6673_v55 = vadd.f32 %v8026_v0, %v6624_v41 }
 0x345   :  { %v8043_v56 = vpop.f32.mrb[48].mxu0 }
 0x346   :  { %v8044_v58 = vpop.f32.mrb[49].mxu0 }
 0x347   :  { %v8045_v59 = vadd.f32 %v8044_v58, %v8043_v56  ;;  %v8046_v60 = vpop.f32.mrb[50].mxu0 }
 0x348   :  { %v8047_v61 = vpop.f32.mrb[51].mxu0 }
 0x349   :  { %v6711_v62 = vadd.f32 %v8045_v59, %v6662_v45  ;;  %v8048_v63 = vadd.f32 %v8047_v61, %v8046_v60  ;;  %v2671_v45 = vrot.slane %v11991_v54, %v278_v39 }
 0x34b   :  { %v6714_v2 = vadd.f32 %v8048_v63, %v6665_v47 }
 0x34d   :  { %v8049_v3 = vpop.f32.mrb[52].mxu0 }
 0x34e   :  { %v8050_v4 = vpop.f32.mrb[53].mxu0 }
 0x34f   :  { %v8051_v5 = vadd.f32 %v8050_v4, %v8049_v3  ;;  %v8052_v7 = vpop.f32.mrb[54].mxu0 }
 0x350   :  { %v8053_v9 = vpop.f32.mrb[55].mxu0 }
 0x351   :  { %v6719_v10 = vadd.f32 %v8051_v5, %v6670_v33  ;;  %v8054_v12 = vadd.f32 %v8053_v9, %v8052_v7 }
 0x353   :  { %v6722_v14 = vadd.f32 %v8054_v12, %v6673_v55 }
 0x365   :  { %v8071_v16 = vpop.f32.mrb[56].mxu0 }
 0x366   :  { %v8072_v11 = vpop.f32.mrb[57].mxu0 }
 0x367   :  { %v8073_v6 = vadd.f32 %v8072_v11, %v8071_v16  ;;  %v8074_v8 = vpop.f32.mrb[58].mxu0 }
 0x368   :  { %v8075_v13 = vpop.f32.mrb[59].mxu0 }
 0x369   :  { %v6760_v17 = vadd.f32 %v8073_v6, %v6711_v62  ;;  %v8076_v18 = vadd.f32 %v8075_v13, %v8074_v8 }
 0x36b   :  { %v6763_v19 = vadd.f32 %v8076_v18, %v6714_v2 }
 0x36d   :  { %v8077_v21 = vpop.f32.mrb[60].mxu0 }
 0x36e   :  { %v8078_v22 = vpop.f32.mrb[61].mxu0 }
 0x36f   :  { %v8079_v25 = vadd.f32 %v8078_v22, %v8077_v21  ;;  %v8080_v34 = vpop.f32.mrb[62].mxu0 }
 0x370   :  { %v8081_v42 = vpop.f32.mrb[63].mxu0 }
 0x371   :  { %v6768_v50 = vadd.f32 %v8079_v25, %v6719_v10  ;;  %v8082_v57 = vadd.f32 %v8081_v42, %v8080_v34 }
 0x373   :  { %v6771_v28 = vadd.f32 %v8082_v57, %v6722_v14 }
 0x385   :  { %v8099_v29 = vpop.f32.mrb[64].mxu0 }
 0x386   :  { %v8100_v30 = vpop.f32.mrb[65].mxu0 }
 0x387   :  { %v8101_v32 = vadd.f32 %v8100_v30, %v8099_v29  ;;  %v8102_v35 = vpop.f32.mrb[66].mxu0 }
 0x388   :  { %v8103_v52 = vpop.f32.mrb[67].mxu0 }
 0x389   :  { %v6809_v37 = vadd.f32 %v8101_v32, %v6760_v17  ;;  %v8104_v1 = vadd.f32 %v8103_v52, %v8102_v35 }
 0x38b   :  { %v6812_v38 = vadd.f32 %v8104_v1, %v6763_v19 }
 0x38d   :  { %v8105_v40 = vpop.f32.mrb[68].mxu0 }
 0x38e   :  { %v8106_v24 = vpop.f32.mrb[69].mxu0 }
 0x38f   :  { %v8107_v20 = vadd.f32 %v8106_v24, %v8105_v40  ;;  %v8108_v41 = vpop.f32.mrb[70].mxu0 }
 0x390   :  { %v8109_v15 = vpop.f32.mrb[71].mxu0 }
 0x391   :  { %v6817_v43 = vadd.f32 %v8107_v20, %v6768_v50  ;;  %v8110_v44 = vadd.f32 %v8109_v15, %v8108_v41 }
 0x393   :  { %v6820_v31 = vadd.f32 %v8110_v44, %v6771_v28 }
 0x3a5   :  { %v8127_v47 = vpop.f32.mrb[72].mxu0 }
 0x3a6   :  { %v6412_v46 = vpop.f32.mrb[0].mxu1  ;;  %v8128_v49 = vpop.f32.mrb[73].mxu0 }
 0x3a7   :  { %v8221_v48 = vadd.f32 %v6412_v46, %v2667_v23  ;;  %v6414_v27 = vpop.f32.mrb[1].mxu1  ;;  %v8129_v53 = vadd.f32 %v8128_v49, %v8127_v47  ;;  %v8130_v0 = vpop.f32.mrb[74].mxu0 }
 0x3a8   :  { %v8222_v51 = vadd.f32 %v6414_v27, %v2671_v45  ;;  %v6416_v33 = vpop.f32.mrb[2].mxu1  ;;  %v8131_v59 = vpop.f32.mrb[75].mxu0 }
 0x3a9   :  { %v7019_v55 = vmax.f32 %v8221_v48, 0.0  ;;  %v8223_v56 = vadd.f32 %v6416_v33, %v2667_v23  ;;  %v6418_v58 = vpop.f32.mrb[3].mxu1  ;;  %v6858_v61 = vadd.f32 %v8129_v53, %v6809_v37  ;;  %v8132_v62 = vadd.f32 %v8131_v59, %v8130_v0 }
 0x3aa   :  { %v7020_v60 = vmax.f32 %v8222_v51, 0.0  ;;  %v8224_v36 = vadd.f32 %v6418_v58, %v2671_v45 }
 0x3ab   :  { %7031 = vst [vmem:[%s12364_s7] sm:$0xff] %v7019_v55  ;;  %v7022_v26 = vmax.f32 %v8223_v56, 0.0  ;;  %v6861_v54 = vadd.f32 %v8132_v62, %v6812_v38 }
 0x3ac   :  { %7032 = vst [vmem:[%s12364_s7 + $0x8] sm:$0xff] %v7020_v60  ;;  %v7023_v39 = vmax.f32 %v8224_v36, 0.0 }
 0x3ad   :  { %7034 = vst [vmem:[%s12364_s7 + $0x18] sm:$0xff] %v7022_v26  ;;  %v8133_v2 = vpop.f32.mrb[76].mxu0 }
 0x3ae   :  { %7035 = vst [vmem:[%s12364_s7 + $0x20] sm:$0xff] %v7023_v39  ;;  %v6422_v63 = vpop.f32.mrb[4].mxu1  ;;  %v8134_v5 = vpop.f32.mrb[77].mxu0 }
 0x3af   :  { %v8225_v3 = vadd.f32 %v6422_v63, %v2667_v23  ;;  %v6424_v4 = vpop.f32.mrb[5].mxu1  ;;  %v8135_v9 = vadd.f32 %v8134_v5, %v8133_v2  ;;  %v8136_v12 = vpop.f32.mrb[78].mxu0 }
 0x3b0   :  { %v8226_v7 = vadd.f32 %v6424_v4, %v2671_v45  ;;  %v6426_v10 = vpop.f32.mrb[6].mxu1  ;;  %v8137_v6 = vpop.f32.mrb[79].mxu0 }
 0x3b1   :  { %v7025_v14 = vmax.f32 %v8225_v3, 0.0  ;;  %v8227_v16 = vadd.f32 %v6426_v10, %v2667_v23  ;;  %v6428_v11 = vpop.f32.mrb[7].mxu1  ;;  %v6866_v13 = vadd.f32 %v8135_v9, %v6817_v43  ;;  %v8138_v18 = vadd.f32 %v8137_v6, %v8136_v12 }
 0x3b2   :  { %v7026_v8 = vmax.f32 %v8226_v7, 0.0  ;;  %v8228_v17 = vadd.f32 %v6428_v11, %v2671_v45 }
 0x3b3   :  { %7037 = vst [vmem:[%s12364_s7 + $0x30] sm:$0xff] %v7025_v14  ;;  %v7028_v19 = vmax.f32 %v8227_v16, 0.0  ;;  %v6869_v22 = vadd.f32 %v8138_v18, %v6820_v31 }
 0x3b4   :  { %7038 = vst [vmem:[%s12364_s7 + $0x38] sm:$0xff] %v7026_v8  ;;  %v7029_v21 = vmax.f32 %v8228_v17, 0.0 }
 0x3b5   :  { %7040 = vst [vmem:[%s12364_s7 + $0x48] sm:$0xff] %v7028_v19 }
 0x3b6   :  { %7041 = vst [vmem:[%s12364_s7 + $0x50] sm:$0xff] %v7029_v21 }
 0x3c5   :  { %v8155_v25 = vpop.f32.mrb[80].mxu0 }
 0x3c6   :  { %v8183_v34 = vpop.f32.mrb[8].mxu1  ;;  %v8156_v42 = vpop.f32.mrb[81].mxu0 }
 0x3c7   :  { %v8184_v50 = vpop.f32.mrb[9].mxu1  ;;  %v8157_v57 = vadd.f32 %v8156_v42, %v8155_v25  ;;  %v8158_v28 = vpop.f32.mrb[82].mxu0 }
 0x3c8   :  { %v8185_v29 = vadd.f32 %v8184_v50, %v8183_v34  ;;  %v8186_v30 = vpop.f32.mrb[10].mxu1  ;;  %v8159_v32 = vpop.f32.mrb[83].mxu0 }
 0x3c9   :  { %v8187_v35 = vpop.f32.mrb[11].mxu1  ;;  %v6907_v52 = vadd.f32 %v8157_v57, %v6858_v61  ;;  %v8160_v37 = vadd.f32 %v8159_v32, %v8158_v28 }
 0x3ca   :  { %v8188_v1 = vadd.f32 %v8187_v35, %v8186_v30 }
 0x3cb   :  { %v6910_v38 = vadd.f32 %v8160_v37, %v6861_v54  ;;  %v6956_v40 = vadd.f32 %v8185_v29, %v6907_v52 }
 0x3cd   :  { %v8161_v24 = vpop.f32.mrb[84].mxu0  ;;  %v6959_v41 = vadd.f32 %v8188_v1, %v6910_v38 }
 0x3ce   :  { %v8189_v20 = vpop.f32.mrb[12].mxu1  ;;  %v8162_v15 = vpop.f32.mrb[85].mxu0 }
 0x3cf   :  { %v8190_v43 = vpop.f32.mrb[13].mxu1  ;;  %v8163_v44 = vadd.f32 %v8162_v15, %v8161_v24  ;;  %v8164_v31 = vpop.f32.mrb[86].mxu0 }
 0x3d0   :  { %v8191_v23 = vadd.f32 %v8190_v43, %v8189_v20  ;;  %v8192_v45 = vpop.f32.mrb[14].mxu1  ;;  %v8165_v46 = vpop.f32.mrb[87].mxu0 }
 0x3d1   :  { %v8193_v47 = vpop.f32.mrb[15].mxu1  ;;  %v6915_v48 = vadd.f32 %v8163_v44, %v6866_v13  ;;  %v8166_v27 = vadd.f32 %v8165_v46, %v8164_v31 }
 0x3d2   :  { %v8194_v49 = vadd.f32 %v8193_v47, %v8192_v45 }
 0x3d3   :  { %v6918_v51 = vadd.f32 %v8166_v27, %v6869_v22  ;;  %v6964_v53 = vadd.f32 %v8191_v23, %v6915_v48 }
 0x3d5   :  { %v8211_v33 = vpop.f32.mrb[88].mxu0  ;;  %v6967_v0 = vadd.f32 %v8194_v49, %v6918_v51 }
 0x3d6   :  { %v7013_v55 = vadd.f32 %v8211_v33, %v6964_v53  ;;  %v7004_v56 = vpop.f32.mrb[89].mxu0 }
 0x3d7   :  { %v7005_v58 = vadd.f32 %v7004_v56, %v6956_v40  ;;  %v8212_v59 = vpop.f32.mrb[90].mxu0 }
 0x3d8   :  { %v7027_v60 = vmax.f32 %v7013_v55, 0.0  ;;  %v7016_v61 = vadd.f32 %v8212_v59, %v6967_v0  ;;  %v7007_v36 = vpop.f32.mrb[91].mxu0 }
 0x3d9   :  { %v7021_v62 = vmax.f32 %v7005_v58, 0.0  ;;  %v7008_v26 = vadd.f32 %v7007_v36, %v6959_v41 }
 0x3da   :  { %7039 = vst.msk [vmem:[%s12364_s7 + $0x40] sm:$0xff] %vm1500_vm0, %v7027_v60  ;;  %v7030_v39 = vmax.f32 %v7016_v61, 0.0 }
 0x3db   :  { %7033 = vst.msk [vmem:[%s12364_s7 + $0x10] sm:$0xff] %vm1500_vm0, %v7021_v62  ;;  %v7024_v54 = vmax.f32 %v7008_v26, 0.0 }
 0x3dc   :  { %7042 = vst.msk [vmem:[%s12364_s7 + $0x58] sm:$0xff] %vm1500_vm0, %v7030_v39 }
 0x3dd   :  { %7036 = vst.msk [vmem:[%s12364_s7 + $0x28] sm:$0xff] %vm1500_vm0, %v7024_v54 }

</bundles_post_ra>
